<compile_context>
chip_gen: v6e
topology: v6e:2x2x1
jax: 0.10.0
libtpu: 0.0.40
codegen_flags: <defaults>
</compile_context>

<pallas_src>
import jax
import jax.numpy as jnp
from jax import lax
from jax.experimental import pallas as pl
from jax.experimental.pallas import tpu as pltpu


def _round_up(x, m):
    return ((x + m - 1) // m) * m


# --------------------------------------------------------------------------
# Pallas kernels (hot paths)
# --------------------------------------------------------------------------
def conv_mm_bias_relu_kernel(a_ref, w_ref, b_ref, o_ref):
    """One M-tile of relu(patches @ W + b).  bf16 inputs, f32 accumulation."""
    acc = jnp.dot(a_ref[...], w_ref[...], preferred_element_type=jnp.float32)
    acc = acc + b_ref[...]                       # (TM, Coutp) + (1, Coutp)
    o_ref[...] = jnp.maximum(acc, 0.0).astype(o_ref.dtype)


def max9_kernel(t0, t1, t2, t3, t4, t5, t6, t7, t8, o_ref):
    """Elementwise max over the 9 pooling taps (one NHWC image block each)."""
    acc = jnp.maximum(t0[...], t1[...])
    acc = jnp.maximum(acc, t2[...])
    acc = jnp.maximum(acc, t3[...])
    acc = jnp.maximum(acc, t4[...])
    acc = jnp.maximum(acc, t5[...])
    acc = jnp.maximum(acc, t6[...])
    acc = jnp.maximum(acc, t7[...])
    acc = jnp.maximum(acc, t8[...])
    o_ref[...] = acc


# --------------------------------------------------------------------------
# Layer wrappers
# --------------------------------------------------------------------------
def conv2d_relu_pallas(x_nhwc, w_mat, b_row, *, kh, kw, stride, pad, tm_max=512):
    """NHWC conv + bias + ReLU.

    Returns (N, OH, OW, Coutp) with Coutp padded to a multiple of 128; the
    padded channels are exactly zero (zero weights + zero bias + ReLU).
    """
    n, h, w, c = x_nhwc.shape
    kp, coutp = w_mat.shape

    # im2col: K ordering is (kh, kw, Cin), matching the packed weights.
    xp = jnp.pad(x_nhwc, ((0, 0), (pad, pad), (pad, pad), (0, 0)))
    oh = (h + 2 * pad - kh) // stride + 1
    ow = (w + 2 * pad - kw) // stride + 1
    taps = []
    for di in range(kh):
        for dj in range(kw):
            taps.append(xp[:, di:di + stride * (oh - 1) + 1:stride,
                              dj:dj + stride * (ow - 1) + 1:stride, :])
    patches = jnp.stack(taps, axis=3)              # (N, OH, OW, kh*kw, C)
    m = n * oh * ow
    k_true = kh * kw * c
    patches = patches.reshape(m, k_true).astype(jnp.bfloat16)

    tm = min(tm_max, _round_up(m, 16))             # 16: bf16 sublane packing
    mp = _round_up(m, tm)
    patches = jnp.pad(patches, ((0, mp - m), (0, kp - k_true)))

    cost = pl.CostEstimate(
        flops=2 * mp * kp * coutp,
        transcendentals=0,
        bytes_accessed=mp * kp * 2 + kp * coutp * 2 + mp * coutp * 4)

    out = pl.pallas_call(
        conv_mm_bias_relu_kernel,
        out_shape=jax.ShapeDtypeStruct((mp, coutp), jnp.float32),
        grid=(mp // tm,),
        in_specs=[
            pl.BlockSpec((tm, kp), lambda i: (i, 0)),
            pl.BlockSpec((kp, coutp), lambda i: (0, 0)),   # resident weights
            pl.BlockSpec((1, coutp), lambda i: (0, 0)),    # resident bias
        ],
        out_specs=pl.BlockSpec((tm, coutp), lambda i: (i, 0)),
        compiler_params=pltpu.CompilerParams(
            dimension_semantics=("parallel",)),
        cost_estimate=cost,
    )(patches, w_mat, b_row)

    return out[:m].reshape(n, oh, ow, coutp)


def maxpool3x3s2_pallas(x_nhwc):
    """NHWC MaxPool2d(kernel=3, stride=2, ceil_mode=False).

    The 9 window taps are passed as 9 separate strided views (no stacked
    copy); the grid is over the batch so each block is one (OH, OW, C) image
    with C already a lane-dense multiple of 128.
    """
    n, h, w, c = x_nhwc.shape
    oh = (h - 3) // 2 + 1
    ow = (w - 3) // 2 + 1
    taps = [x_nhwc[:, di:di + 2 * (oh - 1) + 1:2,
                      dj:dj + 2 * (ow - 1) + 1:2, :]
            for di in range(3) for dj in range(3)]         # 9 x (N, OH, OW, C)

    blk = pl.BlockSpec((1, oh, ow, c), lambda i: (i, 0, 0, 0))
    cost = pl.CostEstimate(
        flops=9 * n * oh * ow * c,
        transcendentals=0,
        bytes_accessed=10 * n * oh * ow * c * 4)

    return pl.pallas_call(
        max9_kernel,
        out_shape=jax.ShapeDtypeStruct((n, oh, ow, c), x_nhwc.dtype),
        grid=(n,),
        in_specs=[blk] * 9,
        out_specs=blk,
        compiler_params=pltpu.CompilerParams(
            dimension_semantics=("parallel",)),
        cost_estimate=cost,
    )(*taps)


# --------------------------------------------------------------------------
# Model: AlexNet features[:-3]
# --------------------------------------------------------------------------
_CONV_CFG = [
    # (cin, cout, kernel, stride, pad)
    (3, 64, 11, 4, 2),
    (64, 192, 5, 1, 2),
    (192, 384, 3, 1, 1),
    (384, 256, 3, 1, 1),
]


def init_params(key):
    """Random parameters in the PyTorch layout: w (Cout, Cin, kh, kw), b (Cout,)."""
    params = []
    for cin, cout, k, _, _ in _CONV_CFG:
        key, kw_, kb_ = jax.random.split(key, 3)
        fan_in = cin * k * k
        w = jax.random.normal(kw_, (cout, cin, k, k), jnp.float32) / jnp.sqrt(fan_in)
        b = 0.01 * jax.random.normal(kb_, (cout,), jnp.float32)
        params.append((w, b))
    return params


def pack_params(params):
    """One-time weight packing (hoisted out of the jitted forward).

    OIHW -> (K, Cout) with K ordered (kh, kw, Cin), zero-padded so both K and
    Cout are multiples of 128, cast to bf16.  Bias -> (1, Coutp) f32.
    """
    packed = []
    for (w, b), (cin, cout, k, _, _) in zip(params, _CONV_CFG):
        k_true = k * k * cin
        kp = _round_up(k_true, 128)
        coutp = _round_up(cout, 128)
        w_mat = w.transpose(2, 3, 1, 0).reshape(k_true, cout)
        w_mat = jnp.pad(w_mat, ((0, kp - k_true), (0, coutp - cout)))
        b_row = jnp.pad(b, (0, coutp - cout)).reshape(1, coutp).astype(jnp.float32)
        packed.append((w_mat.astype(jnp.bfloat16), b_row))
    return packed


@jax.jit
def alexnet_conv_forward(x_nchw, packed_params):
    (w1, b1), (w2, b2), (w3, b3), (w4, b4) = packed_params
    x = x_nchw.transpose(0, 2, 3, 1)                                # NCHW -> NHWC (once)

    x = conv2d_relu_pallas(x, w1, b1, kh=11, kw=11, stride=4, pad=2)  # C = 128 (64 real)
    x = maxpool3x3s2_pallas(x)[..., :64]                              # drop pad channels

    x = conv2d_relu_pallas(x, w2, b2, kh=5, kw=5, stride=1, pad=2)    # C = 256 (192 real)
    x = maxpool3x3s2_pallas(x)[..., :192]

    x = conv2d_relu_pallas(x, w3, b3, kh=3, kw=3, stride=1, pad=1)    # C = 384
    x = conv2d_relu_pallas(x, w4, b4, kh=3, kw=3, stride=1, pad=1)    # C = 256

    return x.transpose(0, 3, 1, 2)                                    # NHWC -> NCHW (once)


# Pure-JAX reference (for sanity check only).
def _reference_forward(x, params):
    def conv(x, w, b, stride, pad):
        y = lax.conv_general_dilated(
            x, w, (stride, stride), [(pad, pad), (pad, pad)],
            dimension_numbers=("NCHW", "OIHW", "NCHW"))
        return jax.nn.relu(y + b[None, :, None, None])

    def pool(x):
        return lax.reduce_window(x, -jnp.inf, lax.max,
                                 (1, 1, 3, 3), (1, 1, 2, 2), "VALID")

    (w1, b1), (w2, b2), (w3, b3), (w4, b4) = params
    x = pool(conv(x, w1, b1, 4, 2))
    x = pool(conv(x, w2, b2, 1, 2))
    x = conv(x, w3, b3, 1, 1)
    x = conv(x, w4, b4, 1, 1)
    return x


if __name__ == "__main__":
    key = jax.random.PRNGKey(0)
    k_in, k_p = jax.random.split(key)
    # Small input consistent with AlexNet's 3-channel NCHW convention.
    x = jax.random.normal(k_in, (2, 3, 64, 64), jnp.float32)
    params = init_params(k_p)
    packed = pack_params(params)          # one-time weight packing (not per call)

    out = jax.block_until_ready(alexnet_conv_forward(x, packed))
    assert out.shape == (2, 256, 3, 3), out.shape

    ref = jax.block_until_ready(_reference_forward(x, params))
    ref_scale = max(1.0, float(jnp.max(jnp.abs(ref))))
    err = float(jnp.max(jnp.abs(out - ref)))
    # bf16 inputs with f32 accumulation: allow ~a few % relative error.
    assert err / ref_scale < 5e-2, f"max abs error {err} (ref scale {ref_scale})"

    print("KERNEL_OK")
</pallas_src>

<mosaic_0001>
module attributes {stable_mosaic.version = 11 : i64} {
  func.func @conv_mm_bias_relu_kernel(%arg0: i32, %arg1: memref<464x384xbf16, #tpu.memory_space<vmem>>, %arg2: memref<384x128xbf16, #tpu.memory_space<vmem>>, %arg3: memref<1x128xf32, #tpu.memory_space<vmem>>, %arg4: memref<464x128xf32, #tpu.memory_space<vmem>>) attributes {dimension_semantics = [#tpu.dimension_semantics<parallel>], iteration_bounds = array<i64: 1>, scalar_prefetch = 0 : i64, scratch_operands = 0 : i64, tpu.core_type = #tpu.core_type<tc>, window_params = [{transform_indices = @transform_0, window_bounds = array<i64: 464, 384>}, {pipeline_mode = #tpu.pipeline_mode<synchronous>, transform_indices = @transform_1, window_bounds = array<i64: 384, 128>}, {pipeline_mode = #tpu.pipeline_mode<synchronous>, transform_indices = @transform_2, window_bounds = array<i64: 1, 128>}, {transform_indices = @transform_3, window_bounds = array<i64: 464, 128>}]} {
    %c0 = arith.constant 0 : index
    %c0_0 = arith.constant 0 : index
    %0 = vector.load %arg1[%c0, %c0_0] : memref<464x384xbf16, #tpu.memory_space<vmem>>, vector<464x384xbf16>
    %c0_1 = arith.constant 0 : index
    %c0_2 = arith.constant 0 : index
    %1 = vector.load %arg2[%c0_1, %c0_2] : memref<384x128xbf16, #tpu.memory_space<vmem>>, vector<384x128xbf16>
    %cst = arith.constant dense<0.000000e+00> : vector<464x128xf32>
    %2 = tpu.matmul %0, %1, %cst {dimension_numbers = #tpu.dot_dimension_numbers<[1], [0], [0], [1], [0, 0, 1, 1], [], []>} : vector<464x384xbf16>, vector<384x128xbf16>, vector<464x128xf32> -> vector<464x128xf32>
    %c0_3 = arith.constant 0 : index
    %c0_4 = arith.constant 0 : index
    %3 = vector.load %arg3[%c0_3, %c0_4] : memref<1x128xf32, #tpu.memory_space<vmem>>, vector<1x128xf32>
    %4 = vector.broadcast %3 : vector<1x128xf32> to vector<464x128xf32>
    %5 = arith.addf %2, %4 : vector<464x128xf32>
    %cst_5 = arith.constant 0.000000e+00 : f32
    %6 = vector.broadcast %cst_5 : f32 to vector<464x128xf32>
    %7 = arith.maximumf %5, %6 : vector<464x128xf32>
    %c0_6 = arith.constant 0 : index
    %c0_7 = arith.constant 0 : index
    %8 = vector.load %arg4[%c0_6, %c0_7] : memref<464x128xf32, #tpu.memory_space<vmem>>, vector<464x128xf32>
    tpu.vector_store %arg4[%c0_6, %c0_7], %7 {strides = array<i32>} : memref<464x128xf32, #tpu.memory_space<vmem>>, vector<464x128xf32>,
    return
  }
  func.func @transform_0(%arg0: i32) -> (i32, i32) {
    %c0_i32 = arith.constant 0 : i32
    %c0_i32_0 = arith.constant 0 : i32
    return %arg0, %c0_i32 : i32, i32
  }
  func.func @transform_1(%arg0: i32) -> (i32, i32) {
    %c0_i32 = arith.constant 0 : i32
    %c0_i32_0 = arith.constant 0 : i32
    %c0_i32_1 = arith.constant 0 : i32
    return %c0_i32, %c0_i32_0 : i32, i32
  }
  func.func @transform_2(%arg0: i32) -> (i32, i32) {
    %c0_i32 = arith.constant 0 : i32
    %c0_i32_0 = arith.constant 0 : i32
    %c0_i32_1 = arith.constant 0 : i32
    return %c0_i32, %c0_i32_0 : i32, i32
  }
  func.func @transform_3(%arg0: i32) -> (i32, i32) {
    %c0_i32 = arith.constant 0 : i32
    %c0_i32_0 = arith.constant 0 : i32
    return %arg0, %c0_i32 : i32, i32
  }
}

module attributes {stable_mosaic.version = 11 : i64} {
  func.func @max9_kernel(%arg0: i32, %arg1: memref<1x7x7x128xf32, #tpu.memory_space<vmem>>, %arg2: memref<1x7x7x128xf32, #tpu.memory_space<vmem>>, %arg3: memref<1x7x7x128xf32, #tpu.memory_space<vmem>>, %arg4: memref<1x7x7x128xf32, #tpu.memory_space<vmem>>, %arg5: memref<1x7x7x128xf32, #tpu.memory_space<vmem>>, %arg6: memref<1x7x7x128xf32, #tpu.memory_space<vmem>>, %arg7: memref<1x7x7x128xf32, #tpu.memory_space<vmem>>, %arg8: memref<1x7x7x128xf32, #tpu.memory_space<vmem>>, %arg9: memref<1x7x7x128xf32, #tpu.memory_space<vmem>>, %arg10: memref<1x7x7x128xf32, #tpu.memory_space<vmem>>) attributes {dimension_semantics = [#tpu.dimension_semantics<parallel>], iteration_bounds = array<i64: 2>, scalar_prefetch = 0 : i64, scratch_operands = 0 : i64, tpu.core_type = #tpu.core_type<tc>, window_params = [{transform_indices = @transform_0, window_bounds = array<i64: 1, 7, 7, 128>}, {transform_indices = @transform_1, window_bounds = array<i64: 1, 7, 7, 128>}, {transform_indices = @transform_2, window_bounds = array<i64: 1, 7, 7, 128>}, {transform_indices = @transform_3, window_bounds = array<i64: 1, 7, 7, 128>}, {transform_indices = @transform_4, window_bounds = array<i64: 1, 7, 7, 128>}, {transform_indices = @transform_5, window_bounds = array<i64: 1, 7, 7, 128>}, {transform_indices = @transform_6, window_bounds = array<i64: 1, 7, 7, 128>}, {transform_indices = @transform_7, window_bounds = array<i64: 1, 7, 7, 128>}, {transform_indices = @transform_8, window_bounds = array<i64: 1, 7, 7, 128>}, {transform_indices = @transform_9, window_bounds = array<i64: 1, 7, 7, 128>}]} {
    %c0 = arith.constant 0 : index
    %c0_0 = arith.constant 0 : index
    %c0_1 = arith.constant 0 : index
    %c0_2 = arith.constant 0 : index
    %0 = vector.load %arg1[%c0, %c0_0, %c0_1, %c0_2] : memref<1x7x7x128xf32, #tpu.memory_space<vmem>>, vector<1x7x7x128xf32>
    %c0_3 = arith.constant 0 : index
    %c0_4 = arith.constant 0 : index
    %c0_5 = arith.constant 0 : index
    %c0_6 = arith.constant 0 : index
    %1 = vector.load %arg2[%c0_3, %c0_4, %c0_5, %c0_6] : memref<1x7x7x128xf32, #tpu.memory_space<vmem>>, vector<1x7x7x128xf32>
    %2 = arith.maximumf %0, %1 : vector<1x7x7x128xf32>
    %c0_7 = arith.constant 0 : index
    %c0_8 = arith.constant 0 : index
    %c0_9 = arith.constant 0 : index
    %c0_10 = arith.constant 0 : index
    %3 = vector.load %arg3[%c0_7, %c0_8, %c0_9, %c0_10] : memref<1x7x7x128xf32, #tpu.memory_space<vmem>>, vector<1x7x7x128xf32>
    %4 = arith.maximumf %2, %3 : vector<1x7x7x128xf32>
    %c0_11 = arith.constant 0 : index
    %c0_12 = arith.constant 0 : index
    %c0_13 = arith.constant 0 : index
    %c0_14 = arith.constant 0 : index
    %5 = vector.load %arg4[%c0_11, %c0_12, %c0_13, %c0_14] : memref<1x7x7x128xf32, #tpu.memory_space<vmem>>, vector<1x7x7x128xf32>
    %6 = arith.maximumf %4, %5 : vector<1x7x7x128xf32>
    %c0_15 = arith.constant 0 : index
    %c0_16 = arith.constant 0 : index
    %c0_17 = arith.constant 0 : index
    %c0_18 = arith.constant 0 : index
    %7 = vector.load %arg5[%c0_15, %c0_16, %c0_17, %c0_18] : memref<1x7x7x128xf32, #tpu.memory_space<vmem>>, vector<1x7x7x128xf32>
    %8 = arith.maximumf %6, %7 : vector<1x7x7x128xf32>
    %c0_19 = arith.constant 0 : index
    %c0_20 = arith.constant 0 : index
    %c0_21 = arith.constant 0 : index
    %c0_22 = arith.constant 0 : index
    %9 = vector.load %arg6[%c0_19, %c0_20, %c0_21, %c0_22] : memref<1x7x7x128xf32, #tpu.memory_space<vmem>>, vector<1x7x7x128xf32>
    %10 = arith.maximumf %8, %9 : vector<1x7x7x128xf32>
    %c0_23 = arith.constant 0 : index
    %c0_24 = arith.constant 0 : index
    %c0_25 = arith.constant 0 : index
    %c0_26 = arith.constant 0 : index
    %11 = vector.load %arg7[%c0_23, %c0_24, %c0_25, %c0_26] : memref<1x7x7x128xf32, #tpu.memory_space<vmem>>, vector<1x7x7x128xf32>
    %12 = arith.maximumf %10, %11 : vector<1x7x7x128xf32>
    %c0_27 = arith.constant 0 : index
    %c0_28 = arith.constant 0 : index
    %c0_29 = arith.constant 0 : index
    %c0_30 = arith.constant 0 : index
    %13 = vector.load %arg8[%c0_27, %c0_28, %c0_29, %c0_30] : memref<1x7x7x128xf32, #tpu.memory_space<vmem>>, vector<1x7x7x128xf32>
    %14 = arith.maximumf %12, %13 : vector<1x7x7x128xf32>
    %c0_31 = arith.constant 0 : index
    %c0_32 = arith.constant 0 : index
    %c0_33 = arith.constant 0 : index
    %c0_34 = arith.constant 0 : index
    %15 = vector.load %arg9[%c0_31, %c0_32, %c0_33, %c0_34] : memref<1x7x7x128xf32, #tpu.memory_space<vmem>>, vector<1x7x7x128xf32>
    %16 = arith.maximumf %14, %15 : vector<1x7x7x128xf32>
    %c0_35 = arith.constant 0 : index
    %c0_36 = arith.constant 0 : index
    %c0_37 = arith.constant 0 : index
    %c0_38 = arith.constant 0 : index
    %17 = vector.load %arg10[%c0_35, %c0_36, %c0_37, %c0_38] : memref<1x7x7x128xf32, #tpu.memory_space<vmem>>, vector<1x7x7x128xf32>
    tpu.vector_store %arg10[%c0_35, %c0_36, %c0_37, %c0_38], %16 {strides = array<i32>} : memref<1x7x7x128xf32, #tpu.memory_space<vmem>>, vector<1x7x7x128xf32>,
    return
  }
  func.func @transform_0(%arg0: i32) -> (i32, i32, i32, i32) {
    %c0_i32 = arith.constant 0 : i32
    %c0_i32_0 = arith.constant 0 : i32
    %c0_i32_1 = arith.constant 0 : i32
    %c0_i32_2 = arith.constant 0 : i32
    return %arg0, %c0_i32, %c0_i32_0, %c0_i32_1 : i32, i32, i32, i32
  }
  func.func @transform_1(%arg0: i32) -> (i32, i32, i32, i32) {
    %c0_i32 = arith.constant 0 : i32
    %c0_i32_0 = arith.constant 0 : i32
    %c0_i32_1 = arith.constant 0 : i32
    %c0_i32_2 = arith.constant 0 : i32
    return %arg0, %c0_i32, %c0_i32_0, %c0_i32_1 : i32, i32, i32, i32
  }
  func.func @transform_2(%arg0: i32) -> (i32, i32, i32, i32) {
    %c0_i32 = arith.constant 0 : i32
    %c0_i32_0 = arith.constant 0 : i32
    %c0_i32_1 = arith.constant 0 : i32
    %c0_i32_2 = arith.constant 0 : i32
    return %arg0, %c0_i32, %c0_i32_0, %c0_i32_1 : i32, i32, i32, i32
  }
  func.func @transform_3(%arg0: i32) -> (i32, i32, i32, i32) {
    %c0_i32 = arith.constant 0 : i32
    %c0_i32_0 = arith.constant 0 : i32
    %c0_i32_1 = arith.constant 0 : i32
    %c0_i32_2 = arith.constant 0 : i32
    return %arg0, %c0_i32, %c0_i32_0, %c0_i32_1 : i32, i32, i32, i32
  }
  func.func @transform_4(%arg0: i32) -> (i32, i32, i32, i32) {
    %c0_i32 = arith.constant 0 : i32
    %c0_i32_0 = arith.constant 0 : i32
    %c0_i32_1 = arith.constant 0 : i32
    %c0_i32_2 = arith.constant 0 : i32
    return %arg0, %c0_i32, %c0_i32_0, %c0_i32_1 : i32, i32, i32, i32
  }
  func.func @transform_5(%arg0: i32) -> (i32, i32, i32, i32) {
    %c0_i32 = arith.constant 0 : i32
    %c0_i32_0 = arith.constant 0 : i32
    %c0_i32_1 = arith.constant 0 : i32
    %c0_i32_2 = arith.constant 0 : i32
    return %arg0, %c0_i32, %c0_i32_0, %c0_i32_1 : i32, i32, i32, i32
  }
  func.func @transform_6(%arg0: i32) -> (i32, i32, i32, i32) {
    %c0_i32 = arith.constant 0 : i32
    %c0_i32_0 = arith.constant 0 : i32
    %c0_i32_1 = arith.constant 0 : i32
    %c0_i32_2 = arith.constant 0 : i32
    return %arg0, %c0_i32, %c0_i32_0, %c0_i32_1 : i32, i32, i32, i32
  }
  func.func @transform_7(%arg0: i32) -> (i32, i32, i32, i32) {
    %c0_i32 = arith.constant 0 : i32
    %c0_i32_0 = arith.constant 0 : i32
    %c0_i32_1 = arith.constant 0 : i32
    %c0_i32_2 = arith.constant 0 : i32
    return %arg0, %c0_i32, %c0_i32_0, %c0_i32_1 : i32, i32, i32, i32
  }
  func.func @transform_8(%arg0: i32) -> (i32, i32, i32, i32) {
    %c0_i32 = arith.constant 0 : i32
    %c0_i32_0 = arith.constant 0 : i32
    %c0_i32_1 = arith.constant 0 : i32
    %c0_i32_2 = arith.constant 0 : i32
    return %arg0, %c0_i32, %c0_i32_0, %c0_i32_1 : i32, i32, i32, i32
  }
  func.func @transform_9(%arg0: i32) -> (i32, i32, i32, i32) {
    %c0_i32 = arith.constant 0 : i32
    %c0_i32_0 = arith.constant 0 : i32
    %c0_i32_1 = arith.constant 0 : i32
    %c0_i32_2 = arith.constant 0 : i32
    return %arg0, %c0_i32, %c0_i32_0, %c0_i32_1 : i32, i32, i32, i32
  }
}

module attributes {stable_mosaic.version = 11 : i64} {
  func.func @conv_mm_bias_relu_kernel(%arg0: i32, %arg1: memref<112x1664xbf16, #tpu.memory_space<vmem>>, %arg2: memref<1664x256xbf16, #tpu.memory_space<vmem>>, %arg3: memref<1x256xf32, #tpu.memory_space<vmem>>, %arg4: memref<112x256xf32, #tpu.memory_space<vmem>>) attributes {dimension_semantics = [#tpu.dimension_semantics<parallel>], iteration_bounds = array<i64: 1>, scalar_prefetch = 0 : i64, scratch_operands = 0 : i64, tpu.core_type = #tpu.core_type<tc>, window_params = [{transform_indices = @transform_0, window_bounds = array<i64: 112, 1664>}, {pipeline_mode = #tpu.pipeline_mode<synchronous>, transform_indices = @transform_1, window_bounds = array<i64: 1664, 256>}, {pipeline_mode = #tpu.pipeline_mode<synchronous>, transform_indices = @transform_2, window_bounds = array<i64: 1, 256>}, {transform_indices = @transform_3, window_bounds = array<i64: 112, 256>}]} {
    %c0 = arith.constant 0 : index
    %c0_0 = arith.constant 0 : index
    %0 = vector.load %arg1[%c0, %c0_0] : memref<112x1664xbf16, #tpu.memory_space<vmem>>, vector<112x1664xbf16>
    %c0_1 = arith.constant 0 : index
    %c0_2 = arith.constant 0 : index
    %1 = vector.load %arg2[%c0_1, %c0_2] : memref<1664x256xbf16, #tpu.memory_space<vmem>>, vector<1664x256xbf16>
    %cst = arith.constant dense<0.000000e+00> : vector<112x256xf32>
    %2 = tpu.matmul %0, %1, %cst {dimension_numbers = #tpu.dot_dimension_numbers<[1], [0], [0], [1], [0, 0, 1, 1], [], []>} : vector<112x1664xbf16>, vector<1664x256xbf16>, vector<112x256xf32> -> vector<112x256xf32>
    %c0_3 = arith.constant 0 : index
    %c0_4 = arith.constant 0 : index
    %3 = vector.load %arg3[%c0_3, %c0_4] : memref<1x256xf32, #tpu.memory_space<vmem>>, vector<1x256xf32>
    %4 = vector.broadcast %3 : vector<1x256xf32> to vector<112x256xf32>
    %5 = arith.addf %2, %4 : vector<112x256xf32>
    %cst_5 = arith.constant 0.000000e+00 : f32
    %6 = vector.broadcast %cst_5 : f32 to vector<112x256xf32>
    %7 = arith.maximumf %5, %6 : vector<112x256xf32>
    %c0_6 = arith.constant 0 : index
    %c0_7 = arith.constant 0 : index
    %8 = vector.load %arg4[%c0_6, %c0_7] : memref<112x256xf32, #tpu.memory_space<vmem>>, vector<112x256xf32>
    tpu.vector_store %arg4[%c0_6, %c0_7], %7 {strides = array<i32>} : memref<112x256xf32, #tpu.memory_space<vmem>>, vector<112x256xf32>,
    return
  }
  func.func @transform_0(%arg0: i32) -> (i32, i32) {
    %c0_i32 = arith.constant 0 : i32
    %c0_i32_0 = arith.constant 0 : i32
    return %arg0, %c0_i32 : i32, i32
  }
  func.func @transform_1(%arg0: i32) -> (i32, i32) {
    %c0_i32 = arith.constant 0 : i32
    %c0_i32_0 = arith.constant 0 : i32
    %c0_i32_1 = arith.constant 0 : i32
    return %c0_i32, %c0_i32_0 : i32, i32
  }
  func.func @transform_2(%arg0: i32) -> (i32, i32) {
    %c0_i32 = arith.constant 0 : i32
    %c0_i32_0 = arith.constant 0 : i32
    %c0_i32_1 = arith.constant 0 : i32
    return %c0_i32, %c0_i32_0 : i32, i32
  }
  func.func @transform_3(%arg0: i32) -> (i32, i32) {
    %c0_i32 = arith.constant 0 : i32
    %c0_i32_0 = arith.constant 0 : i32
    return %arg0, %c0_i32 : i32, i32
  }
}

module attributes {stable_mosaic.version = 11 : i64} {
  func.func @max9_kernel(%arg0: i32, %arg1: memref<1x3x3x256xf32, #tpu.memory_space<vmem>>, %arg2: memref<1x3x3x256xf32, #tpu.memory_space<vmem>>, %arg3: memref<1x3x3x256xf32, #tpu.memory_space<vmem>>, %arg4: memref<1x3x3x256xf32, #tpu.memory_space<vmem>>, %arg5: memref<1x3x3x256xf32, #tpu.memory_space<vmem>>, %arg6: memref<1x3x3x256xf32, #tpu.memory_space<vmem>>, %arg7: memref<1x3x3x256xf32, #tpu.memory_space<vmem>>, %arg8: memref<1x3x3x256xf32, #tpu.memory_space<vmem>>, %arg9: memref<1x3x3x256xf32, #tpu.memory_space<vmem>>, %arg10: memref<1x3x3x256xf32, #tpu.memory_space<vmem>>) attributes {dimension_semantics = [#tpu.dimension_semantics<parallel>], iteration_bounds = array<i64: 2>, scalar_prefetch = 0 : i64, scratch_operands = 0 : i64, tpu.core_type = #tpu.core_type<tc>, window_params = [{transform_indices = @transform_0, window_bounds = array<i64: 1, 3, 3, 256>}, {transform_indices = @transform_1, window_bounds = array<i64: 1, 3, 3, 256>}, {transform_indices = @transform_2, window_bounds = array<i64: 1, 3, 3, 256>}, {transform_indices = @transform_3, window_bounds = array<i64: 1, 3, 3, 256>}, {transform_indices = @transform_4, window_bounds = array<i64: 1, 3, 3, 256>}, {transform_indices = @transform_5, window_bounds = array<i64: 1, 3, 3, 256>}, {transform_indices = @transform_6, window_bounds = array<i64: 1, 3, 3, 256>}, {transform_indices = @transform_7, window_bounds = array<i64: 1, 3, 3, 256>}, {transform_indices = @transform_8, window_bounds = array<i64: 1, 3, 3, 256>}, {transform_indices = @transform_9, window_bounds = array<i64: 1, 3, 3, 256>}]} {
    %c0 = arith.constant 0 : index
    %c0_0 = arith.constant 0 : index
    %c0_1 = arith.constant 0 : index
    %c0_2 = arith.constant 0 : index
    %0 = vector.load %arg1[%c0, %c0_0, %c0_1, %c0_2] : memref<1x3x3x256xf32, #tpu.memory_space<vmem>>, vector<1x3x3x256xf32>
    %c0_3 = arith.constant 0 : index
    %c0_4 = arith.constant 0 : index
    %c0_5 = arith.constant 0 : index
    %c0_6 = arith.constant 0 : index
    %1 = vector.load %arg2[%c0_3, %c0_4, %c0_5, %c0_6] : memref<1x3x3x256xf32, #tpu.memory_space<vmem>>, vector<1x3x3x256xf32>
    %2 = arith.maximumf %0, %1 : vector<1x3x3x256xf32>
    %c0_7 = arith.constant 0 : index
    %c0_8 = arith.constant 0 : index
    %c0_9 = arith.constant 0 : index
    %c0_10 = arith.constant 0 : index
    %3 = vector.load %arg3[%c0_7, %c0_8, %c0_9, %c0_10] : memref<1x3x3x256xf32, #tpu.memory_space<vmem>>, vector<1x3x3x256xf32>
    %4 = arith.maximumf %2, %3 : vector<1x3x3x256xf32>
    %c0_11 = arith.constant 0 : index
    %c0_12 = arith.constant 0 : index
    %c0_13 = arith.constant 0 : index
    %c0_14 = arith.constant 0 : index
    %5 = vector.load %arg4[%c0_11, %c0_12, %c0_13, %c0_14] : memref<1x3x3x256xf32, #tpu.memory_space<vmem>>, vector<1x3x3x256xf32>
    %6 = arith.maximumf %4, %5 : vector<1x3x3x256xf32>
    %c0_15 = arith.constant 0 : index
    %c0_16 = arith.constant 0 : index
    %c0_17 = arith.constant 0 : index
    %c0_18 = arith.constant 0 : index
    %7 = vector.load %arg5[%c0_15, %c0_16, %c0_17, %c0_18] : memref<1x3x3x256xf32, #tpu.memory_space<vmem>>, vector<1x3x3x256xf32>
    %8 = arith.maximumf %6, %7 : vector<1x3x3x256xf32>
    %c0_19 = arith.constant 0 : index
    %c0_20 = arith.constant 0 : index
    %c0_21 = arith.constant 0 : index
    %c0_22 = arith.constant 0 : index
    %9 = vector.load %arg6[%c0_19, %c0_20, %c0_21, %c0_22] : memref<1x3x3x256xf32, #tpu.memory_space<vmem>>, vector<1x3x3x256xf32>
    %10 = arith.maximumf %8, %9 : vector<1x3x3x256xf32>
    %c0_23 = arith.constant 0 : index
    %c0_24 = arith.constant 0 : index
    %c0_25 = arith.constant 0 : index
    %c0_26 = arith.constant 0 : index
    %11 = vector.load %arg7[%c0_23, %c0_24, %c0_25, %c0_26] : memref<1x3x3x256xf32, #tpu.memory_space<vmem>>, vector<1x3x3x256xf32>
    %12 = arith.maximumf %10, %11 : vector<1x3x3x256xf32>
    %c0_27 = arith.constant 0 : index
    %c0_28 = arith.constant 0 : index
    %c0_29 = arith.constant 0 : index
    %c0_30 = arith.constant 0 : index
    %13 = vector.load %arg8[%c0_27, %c0_28, %c0_29, %c0_30] : memref<1x3x3x256xf32, #tpu.memory_space<vmem>>, vector<1x3x3x256xf32>
    %14 = arith.maximumf %12, %13 : vector<1x3x3x256xf32>
    %c0_31 = arith.constant 0 : index
    %c0_32 = arith.constant 0 : index
    %c0_33 = arith.constant 0 : index
    %c0_34 = arith.constant 0 : index
    %15 = vector.load %arg9[%c0_31, %c0_32, %c0_33, %c0_34] : memref<1x3x3x256xf32, #tpu.memory_space<vmem>>, vector<1x3x3x256xf32>
    %16 = arith.maximumf %14, %15 : vector<1x3x3x256xf32>
    %c0_35 = arith.constant 0 : index
    %c0_36 = arith.constant 0 : index
    %c0_37 = arith.constant 0 : index
    %c0_38 = arith.constant 0 : index
    %17 = vector.load %arg10[%c0_35, %c0_36, %c0_37, %c0_38] : memref<1x3x3x256xf32, #tpu.memory_space<vmem>>, vector<1x3x3x256xf32>
    tpu.vector_store %arg10[%c0_35, %c0_36, %c0_37, %c0_38], %16 {strides = array<i32>} : memref<1x3x3x256xf32, #tpu.memory_space<vmem>>, vector<1x3x3x256xf32>,
    return
  }
  func.func @transform_0(%arg0: i32) -> (i32, i32, i32, i32) {
    %c0_i32 = arith.constant 0 : i32
    %c0_i32_0 = arith.constant 0 : i32
    %c0_i32_1 = arith.constant 0 : i32
    %c0_i32_2 = arith.constant 0 : i32
    return %arg0, %c0_i32, %c0_i32_0, %c0_i32_1 : i32, i32, i32, i32
  }
  func.func @transform_1(%arg0: i32) -> (i32, i32, i32, i32) {
    %c0_i32 = arith.constant 0 : i32
    %c0_i32_0 = arith.constant 0 : i32
    %c0_i32_1 = arith.constant 0 : i32
    %c0_i32_2 = arith.constant 0 : i32
    return %arg0, %c0_i32, %c0_i32_0, %c0_i32_1 : i32, i32, i32, i32
  }
  func.func @transform_2(%arg0: i32) -> (i32, i32, i32, i32) {
    %c0_i32 = arith.constant 0 : i32
    %c0_i32_0 = arith.constant 0 : i32
    %c0_i32_1 = arith.constant 0 : i32
    %c0_i32_2 = arith.constant 0 : i32
    return %arg0, %c0_i32, %c0_i32_0, %c0_i32_1 : i32, i32, i32, i32
  }
  func.func @transform_3(%arg0: i32) -> (i32, i32, i32, i32) {
    %c0_i32 = arith.constant 0 : i32
    %c0_i32_0 = arith.constant 0 : i32
    %c0_i32_1 = arith.constant 0 : i32
    %c0_i32_2 = arith.constant 0 : i32
    return %arg0, %c0_i32, %c0_i32_0, %c0_i32_1 : i32, i32, i32, i32
  }
  func.func @transform_4(%arg0: i32) -> (i32, i32, i32, i32) {
    %c0_i32 = arith.constant 0 : i32
    %c0_i32_0 = arith.constant 0 : i32
    %c0_i32_1 = arith.constant 0 : i32
    %c0_i32_2 = arith.constant 0 : i32
    return %arg0, %c0_i32, %c0_i32_0, %c0_i32_1 : i32, i32, i32, i32
  }
  func.func @transform_5(%arg0: i32) -> (i32, i32, i32, i32) {
    %c0_i32 = arith.constant 0 : i32
    %c0_i32_0 = arith.constant 0 : i32
    %c0_i32_1 = arith.constant 0 : i32
    %c0_i32_2 = arith.constant 0 : i32
    return %arg0, %c0_i32, %c0_i32_0, %c0_i32_1 : i32, i32, i32, i32
  }
  func.func @transform_6(%arg0: i32) -> (i32, i32, i32, i32) {
    %c0_i32 = arith.constant 0 : i32
    %c0_i32_0 = arith.constant 0 : i32
    %c0_i32_1 = arith.constant 0 : i32
    %c0_i32_2 = arith.constant 0 : i32
    return %arg0, %c0_i32, %c0_i32_0, %c0_i32_1 : i32, i32, i32, i32
  }
  func.func @transform_7(%arg0: i32) -> (i32, i32, i32, i32) {
    %c0_i32 = arith.constant 0 : i32
    %c0_i32_0 = arith.constant 0 : i32
    %c0_i32_1 = arith.constant 0 : i32
    %c0_i32_2 = arith.constant 0 : i32
    return %arg0, %c0_i32, %c0_i32_0, %c0_i32_1 : i32, i32, i32, i32
  }
  func.func @transform_8(%arg0: i32) -> (i32, i32, i32, i32) {
    %c0_i32 = arith.constant 0 : i32
    %c0_i32_0 = arith.constant 0 : i32
    %c0_i32_1 = arith.constant 0 : i32
    %c0_i32_2 = arith.constant 0 : i32
    return %arg0, %c0_i32, %c0_i32_0, %c0_i32_1 : i32, i32, i32, i32
  }
  func.func @transform_9(%arg0: i32) -> (i32, i32, i32, i32) {
    %c0_i32 = arith.constant 0 : i32
    %c0_i32_0 = arith.constant 0 : i32
    %c0_i32_1 = arith.constant 0 : i32
    %c0_i32_2 = arith.constant 0 : i32
    return %arg0, %c0_i32, %c0_i32_0, %c0_i32_1 : i32, i32, i32, i32
  }
}

module attributes {stable_mosaic.version = 11 : i64} {
  func.func @conv_mm_bias_relu_kernel(%arg0: i32, %arg1: memref<32x1792xbf16, #tpu.memory_space<vmem>>, %arg2: memref<1792x384xbf16, #tpu.memory_space<vmem>>, %arg3: memref<1x384xf32, #tpu.memory_space<vmem>>, %arg4: memref<32x384xf32, #tpu.memory_space<vmem>>) attributes {dimension_semantics = [#tpu.dimension_semantics<parallel>], iteration_bounds = array<i64: 1>, scalar_prefetch = 0 : i64, scratch_operands = 0 : i64, tpu.core_type = #tpu.core_type<tc>, window_params = [{transform_indices = @transform_0, window_bounds = array<i64: 32, 1792>}, {pipeline_mode = #tpu.pipeline_mode<synchronous>, transform_indices = @transform_1, window_bounds = array<i64: 1792, 384>}, {pipeline_mode = #tpu.pipeline_mode<synchronous>, transform_indices = @transform_2, window_bounds = array<i64: 1, 384>}, {transform_indices = @transform_3, window_bounds = array<i64: 32, 384>}]} {
    %c0 = arith.constant 0 : index
    %c0_0 = arith.constant 0 : index
    %0 = vector.load %arg1[%c0, %c0_0] : memref<32x1792xbf16, #tpu.memory_space<vmem>>, vector<32x1792xbf16>
    %c0_1 = arith.constant 0 : index
    %c0_2 = arith.constant 0 : index
    %1 = vector.load %arg2[%c0_1, %c0_2] : memref<1792x384xbf16, #tpu.memory_space<vmem>>, vector<1792x384xbf16>
    %cst = arith.constant dense<0.000000e+00> : vector<32x384xf32>
    %2 = tpu.matmul %0, %1, %cst {dimension_numbers = #tpu.dot_dimension_numbers<[1], [0], [0], [1], [0, 0, 1, 1], [], []>} : vector<32x1792xbf16>, vector<1792x384xbf16>, vector<32x384xf32> -> vector<32x384xf32>
    %c0_3 = arith.constant 0 : index
    %c0_4 = arith.constant 0 : index
    %3 = vector.load %arg3[%c0_3, %c0_4] : memref<1x384xf32, #tpu.memory_space<vmem>>, vector<1x384xf32>
    %4 = vector.broadcast %3 : vector<1x384xf32> to vector<32x384xf32>
    %5 = arith.addf %2, %4 : vector<32x384xf32>
    %cst_5 = arith.constant 0.000000e+00 : f32
    %6 = vector.broadcast %cst_5 : f32 to vector<32x384xf32>
    %7 = arith.maximumf %5, %6 : vector<32x384xf32>
    %c0_6 = arith.constant 0 : index
    %c0_7 = arith.constant 0 : index
    %8 = vector.load %arg4[%c0_6, %c0_7] : memref<32x384xf32, #tpu.memory_space<vmem>>, vector<32x384xf32>
    tpu.vector_store %arg4[%c0_6, %c0_7], %7 {strides = array<i32>} : memref<32x384xf32, #tpu.memory_space<vmem>>, vector<32x384xf32>,
    return
  }
  func.func @transform_0(%arg0: i32) -> (i32, i32) {
    %c0_i32 = arith.constant 0 : i32
    %c0_i32_0 = arith.constant 0 : i32
    return %arg0, %c0_i32 : i32, i32
  }
  func.func @transform_1(%arg0: i32) -> (i32, i32) {
    %c0_i32 = arith.constant 0 : i32
    %c0_i32_0 = arith.constant 0 : i32
    %c0_i32_1 = arith.constant 0 : i32
    return %c0_i32, %c0_i32_0 : i32, i32
  }
  func.func @transform_2(%arg0: i32) -> (i32, i32) {
    %c0_i32 = arith.constant 0 : i32
    %c0_i32_0 = arith.constant 0 : i32
    %c0_i32_1 = arith.constant 0 : i32
    return %c0_i32, %c0_i32_0 : i32, i32
  }
  func.func @transform_3(%arg0: i32) -> (i32, i32) {
    %c0_i32 = arith.constant 0 : i32
    %c0_i32_0 = arith.constant 0 : i32
    return %arg0, %c0_i32 : i32, i32
  }
}

module attributes {stable_mosaic.version = 11 : i64} {
  func.func @conv_mm_bias_relu_kernel(%arg0: i32, %arg1: memref<32x3456xbf16, #tpu.memory_space<vmem>>, %arg2: memref<3456x256xbf16, #tpu.memory_space<vmem>>, %arg3: memref<1x256xf32, #tpu.memory_space<vmem>>, %arg4: memref<32x256xf32, #tpu.memory_space<vmem>>) attributes {dimension_semantics = [#tpu.dimension_semantics<parallel>], iteration_bounds = array<i64: 1>, scalar_prefetch = 0 : i64, scratch_operands = 0 : i64, tpu.core_type = #tpu.core_type<tc>, window_params = [{transform_indices = @transform_0, window_bounds = array<i64: 32, 3456>}, {pipeline_mode = #tpu.pipeline_mode<synchronous>, transform_indices = @transform_1, window_bounds = array<i64: 3456, 256>}, {pipeline_mode = #tpu.pipeline_mode<synchronous>, transform_indices = @transform_2, window_bounds = array<i64: 1, 256>}, {transform_indices = @transform_3, window_bounds = array<i64: 32, 256>}]} {
    %c0 = arith.constant 0 : index
    %c0_0 = arith.constant 0 : index
    %0 = vector.load %arg1[%c0, %c0_0] : memref<32x3456xbf16, #tpu.memory_space<vmem>>, vector<32x3456xbf16>
    %c0_1 = arith.constant 0 : index
    %c0_2 = arith.constant 0 : index
    %1 = vector.load %arg2[%c0_1, %c0_2] : memref<3456x256xbf16, #tpu.memory_space<vmem>>, vector<3456x256xbf16>
    %cst = arith.constant dense<0.000000e+00> : vector<32x256xf32>
    %2 = tpu.matmul %0, %1, %cst {dimension_numbers = #tpu.dot_dimension_numbers<[1], [0], [0], [1], [0, 0, 1, 1], [], []>} : vector<32x3456xbf16>, vector<3456x256xbf16>, vector<32x256xf32> -> vector<32x256xf32>
    %c0_3 = arith.constant 0 : index
    %c0_4 = arith.constant 0 : index
    %3 = vector.load %arg3[%c0_3, %c0_4] : memref<1x256xf32, #tpu.memory_space<vmem>>, vector<1x256xf32>
    %4 = vector.broadcast %3 : vector<1x256xf32> to vector<32x256xf32>
    %5 = arith.addf %2, %4 : vector<32x256xf32>
    %cst_5 = arith.constant 0.000000e+00 : f32
    %6 = vector.broadcast %cst_5 : f32 to vector<32x256xf32>
    %7 = arith.maximumf %5, %6 : vector<32x256xf32>
    %c0_6 = arith.constant 0 : index
    %c0_7 = arith.constant 0 : index
    %8 = vector.load %arg4[%c0_6, %c0_7] : memref<32x256xf32, #tpu.memory_space<vmem>>, vector<32x256xf32>
    tpu.vector_store %arg4[%c0_6, %c0_7], %7 {strides = array<i32>} : memref<32x256xf32, #tpu.memory_space<vmem>>, vector<32x256xf32>,
    return
  }
  func.func @transform_0(%arg0: i32) -> (i32, i32) {
    %c0_i32 = arith.constant 0 : i32
    %c0_i32_0 = arith.constant 0 : i32
    return %arg0, %c0_i32 : i32, i32
  }
  func.func @transform_1(%arg0: i32) -> (i32, i32) {
    %c0_i32 = arith.constant 0 : i32
    %c0_i32_0 = arith.constant 0 : i32
    %c0_i32_1 = arith.constant 0 : i32
    return %c0_i32, %c0_i32_0 : i32, i32
  }
  func.func @transform_2(%arg0: i32) -> (i32, i32) {
    %c0_i32 = arith.constant 0 : i32
    %c0_i32_0 = arith.constant 0 : i32
    %c0_i32_1 = arith.constant 0 : i32
    return %c0_i32, %c0_i32_0 : i32, i32
  }
  func.func @transform_3(%arg0: i32) -> (i32, i32) {
    %c0_i32 = arith.constant 0 : i32
    %c0_i32_0 = arith.constant 0 : i32
    return %arg0, %c0_i32 : i32, i32
  }
}

</mosaic_0001>

<bundles_post_ra>
// kernel: alexnet_conv_forward.6
= control target key start
LH: loop header
LB: loop body
LE: loop exit
PB: predicated region body
PF: predicated region fallthrough
CT: control target
= control target key end

     0   :  { %v1868_v0 = vmov 0   ;;  %v1869_v2 = vmov 0.0   ;;  %vm1870_vm0 = vmmov 0   ;;  %s2561_s1 = inlined_call_operand.vmem [shape: bf16[384,128], index: 1, kind: input, shape index: {}]   ;;  %s2562_s0 = inlined_call_operand.vmem [shape: bf16[464,384], index: 0, kind: input, shape index: {}]   ;;  %s2563_s2 = inlined_call_operand.vmem [shape: f32[1,128], index: 2, kind: input, shape index: {}]   ;;  %s2564_s3 = inlined_call_operand.vmem [shape: f32[464,128], index: 3, kind: output, shape index: {}]  }
   0x1   :  { %794 = vmatprep.subr.bf16.mxu0 %v1868_v0  ;;  %v1728_v1 = vld [vmem:[%s2561_s1 + $0x38] sm:$0xff]   ;;  %1593 = vmatprep.subr.bf16.mxu1 %v1869_v2  ;;  %v1729_v3 = vld [vmem:[%s2561_s1 + $0x30] sm:$0xff]   ;;  %v1730_v4 = vld [vmem:[%s2561_s1 + $0x28] sm:$0xff]  }
   0x2   :  { %1609 = vmatprep.mubr.msk.bf16.mxu1 %vm1870_vm0, %v1869_v2  ;;  %795 = vmatpush1.bf16.msra.mxu0 %v1728_v1  ;;  %v1736_v5 = vld [vmem:[%s2561_s1 + $0xb8] sm:$0xff]   ;;  %v1731_v6 = vld [vmem:[%s2561_s1 + $0x20] sm:$0xff]   ;;  %v1738_v7 = vld [vmem:[%s2561_s1 + $0xb0] sm:$0xff]  }
   0x3   :  { %796 = vmatprep.subr.bf16.mxu0 %v1868_v0  ;;  %1594 = vmatpush3.bf16.msra.mxu1 %v1736_v5  ;;  %v1732_v8 = vld [vmem:[%s2561_s1 + $0x18] sm:$0xff]   ;;  %v1740_v9 = vld [vmem:[%s2561_s1 + $0xa8] sm:$0xff]   ;;  %v1733_v10 = vld [vmem:[%s2561_s1 + $0x10] sm:$0xff]  }
   0x4   :  { %1595 = vmatprep.subr.bf16.mxu1 %v1869_v2  ;;  %v1742_v11 = vld [vmem:[%s2561_s1 + $0xa0] sm:$0xff]   ;;  %v1734_v12 = vld [vmem:[%s2561_s1 + $0x8] sm:$0xff]   ;;  %v1744_v13 = vld [vmem:[%s2561_s1 + $0x98] sm:$0xff]  }
   0x5   :  { %v1735_v14 = vld [vmem:[%s2561_s1] sm:$0xff]   ;;  %v1746_v15 = vld [vmem:[%s2561_s1 + $0x90] sm:$0xff]   ;;  %v1737_v17 = vld [vmem:[%s2561_s1 + $0x78] sm:$0xff]  }
   0x6   :  { %797 = vmatpush1.bf16.msra.mxu0 %v1729_v3  ;;  %v1755_v16 = vld [vmem:[%s2562_s0 + $0x4] ss:$12 sps:$4 sm:$0xff]   ;;  %v1748_v18 = vld [vmem:[%s2561_s1 + $0x88] sm:$0xff]   ;;  %v1745_v25 = vld [vmem:[%s2561_s1 + $0x58] sm:$0xff]  }
   0x7   :  { %798 = vmatprep.subr.bf16.mxu0 %v1868_v0  ;;  %1596 = vmatpush3.bf16.msra.mxu1 %v1738_v7  ;;  %v1739_v19 = vld [vmem:[%s2561_s1 + $0x70] sm:$0xff]   ;;  %v1750_v20 = vld [vmem:[%s2561_s1 + $0x80] sm:$0xff]   ;;  %v1741_v22 = vld [vmem:[%s2561_s1 + $0x68] sm:$0xff]  }
   0x8   :  { %1597 = vmatprep.subr.bf16.mxu1 %v1869_v2  ;;  %826 = vmatprep.mubr.bf16.mxu0 %v1755_v16  ;;  %v1751_v21 = vld [vmem:[%s2562_s0 + $0x8] ss:$12 sps:$4 sm:$0xff]   ;;  %v1743_v23 = vld [vmem:[%s2561_s1 + $0x60] sm:$0xff]   ;;  %v1764_v31 = vld [vmem:[%s2562_s0 + $0x50] ss:$12 sps:$4 sm:$0xff]  }
   0x9   :  { %v1756_v24 = vld [vmem:[%s2562_s0 + $0x20] ss:$12 sps:$4 sm:$0xff]   ;;  %v1747_v26 = vld [vmem:[%s2561_s1 + $0x50] sm:$0xff]   ;;  %v1760_v27 = vld [vmem:[%s2562_s0 + $0x38] ss:$12 sps:$4 sm:$0xff]  }
   0xa   :  { %799 = vmatpush1.bf16.msra.mxu0 %v1730_v4  ;;  %v1749_v28 = vld [vmem:[%s2561_s1 + $0x48] sm:$0xff]   ;;  %v1752_v29 = vld [vmem:[%s2561_s1 + $0x40] sm:$0xff]   ;;  %v1763_v36 = vld [vmem:[%s2562_s0 + $0x30] ss:$12 sps:$4 sm:$0xff]  }
   0xb   :  { %800 = vmatprep.subr.bf16.mxu0 %v1868_v0  ;;  %1598 = vmatpush3.bf16.msra.mxu1 %v1740_v9  ;;  %v1753_v30 = vld [vmem:[%s2562_s0] ss:$12 sps:$4 sm:$0xff]   ;;  %v1757_v32 = vld [vmem:[%s2562_s0 + $0x1c] ss:$12 sps:$4 sm:$0xff]   ;;  %v1759_v33 = vld [vmem:[%s2562_s0 + $0x18] ss:$12 sps:$4 sm:$0xff]  }
   0xc   :  { %1599 = vmatprep.subr.bf16.mxu1 %v1869_v2  ;;  %v1768_v34 = vld [vmem:[%s2562_s0 + $0x68] ss:$12 sps:$4 sm:$0xff]   ;;  %v1772_v37 = vld [vmem:[%s2562_s0 + $0x80] ss:$12 sps:$4 sm:$0xff]   ;;  %v1776_v40 = vld [vmem:[%s2562_s0 + $0x98] ss:$12 sps:$4 sm:$0xff]  }
   0xd   :  { %v1761_v35 = vld [vmem:[%s2562_s0 + $0x34] ss:$12 sps:$4 sm:$0xff]   ;;  %v1765_v38 = vld [vmem:[%s2562_s0 + $0x4c] ss:$12 sps:$4 sm:$0xff]   ;;  %v1769_v41 = vld [vmem:[%s2562_s0 + $0x64] ss:$12 sps:$4 sm:$0xff]  }
   0xe   :  { %801 = vmatpush1.bf16.msra.mxu0 %v1731_v6  ;;  %v1767_v39 = vld [vmem:[%s2562_s0 + $0x48] ss:$12 sps:$4 sm:$0xff]   ;;  %v1771_v42 = vld [vmem:[%s2562_s0 + $0x60] ss:$12 sps:$4 sm:$0xff]   ;;  %v1780_v43 = vld [vmem:[%s2562_s0 + $0xb0] ss:$12 sps:$4 sm:$0xff]  }
   0xf   :  { %802 = vmatprep.subr.bf16.mxu0 %v1868_v0  ;;  %1600 = vmatpush3.bf16.msra.mxu1 %v1742_v11  ;;  %v1773_v44 = vld [vmem:[%s2562_s0 + $0x7c] ss:$12 sps:$4 sm:$0xff]   ;;  %v1775_v45 = vld [vmem:[%s2562_s0 + $0x78] ss:$12 sps:$4 sm:$0xff]   ;;  %v1777_v47 = vld [vmem:[%s2562_s0 + $0x94] ss:$12 sps:$4 sm:$0xff]  }
  0x10   :  { %1601 = vmatprep.subr.bf16.mxu1 %v1869_v2  ;;  %v1784_v46 = vld [vmem:[%s2562_s0 + $0xc8] ss:$12 sps:$4 sm:$0xff]   ;;  %v1779_v48 = vld [vmem:[%s2562_s0 + $0x90] ss:$12 sps:$4 sm:$0xff]   ;;  %v1788_v49 = vld [vmem:[%s2562_s0 + $0xe0] ss:$12 sps:$4 sm:$0xff]  }
  0x11   :  { %v1781_v50 = vld [vmem:[%s2562_s0 + $0xac] ss:$12 sps:$4 sm:$0xff]   ;;  %v1783_v51 = vld [vmem:[%s2562_s0 + $0xa8] ss:$12 sps:$4 sm:$0xff]   ;;  %v1785_v53 = vld [vmem:[%s2562_s0 + $0xc4] ss:$12 sps:$4 sm:$0xff]  }
  0x12   :  { %803 = vmatpush1.bf16.msra.mxu0 %v1732_v8  ;;  %v1792_v52 = vld [vmem:[%s2562_s0 + $0xf8] ss:$12 sps:$4 sm:$0xff]   ;;  %v1787_v54 = vld [vmem:[%s2562_s0 + $0xc0] ss:$12 sps:$4 sm:$0xff]   ;;  %v1796_v55 = vld [vmem:[%s2562_s0 + $0x110] ss:$12 sps:$4 sm:$0xff]  }
  0x13   :  { %804 = vmatprep.subr.bf16.mxu0 %v1868_v0  ;;  %1602 = vmatpush3.bf16.msra.mxu1 %v1744_v13  ;;  %v1789_v56 = vld [vmem:[%s2562_s0 + $0xdc] ss:$12 sps:$4 sm:$0xff]   ;;  %v1791_v57 = vld [vmem:[%s2562_s0 + $0xd8] ss:$12 sps:$4 sm:$0xff]   ;;  %v1793_v59 = vld [vmem:[%s2562_s0 + $0xf4] ss:$12 sps:$4 sm:$0xff]  }
  0x14   :  { %1603 = vmatprep.subr.bf16.mxu1 %v1869_v2  ;;  %v1800_v58 = vld [vmem:[%s2562_s0 + $0x128] ss:$12 sps:$4 sm:$0xff]   ;;  %v1795_v60 = vld [vmem:[%s2562_s0 + $0xf0] ss:$12 sps:$4 sm:$0xff]   ;;  %v1804_v61 = vld [vmem:[%s2562_s0 + $0x140] ss:$12 sps:$4 sm:$0xff]  }
  0x15   :  { %v1797_v62 = vld [vmem:[%s2562_s0 + $0x10c] ss:$12 sps:$4 sm:$0xff]   ;;  %v1799_v63 = vld [vmem:[%s2562_s0 + $0x108] ss:$12 sps:$4 sm:$0xff]   ;;  %v1801_v1 = vld [vmem:[%s2562_s0 + $0x124] ss:$12 sps:$4 sm:$0xff]  }
  0x16   :  { %805 = vmatpush1.bf16.msra.mxu0 %v1733_v10  ;;  %v1803_v3 = vld [vmem:[%s2562_s0 + $0x120] ss:$12 sps:$4 sm:$0xff]   ;;  %v1812_v4 = vld [vmem:[%s2562_s0 + $0x170] ss:$12 sps:$4 sm:$0xff]   ;;  %v1807_v6 = vld [vmem:[%s2562_s0 + $0x138] ss:$12 sps:$4 sm:$0xff]  }
  0x17   :  { %806 = vmatprep.subr.bf16.mxu0 %v1868_v0  ;;  %1604 = vmatpush3.bf16.msra.mxu1 %v1746_v15  ;;  %v1805_v5 = vld [vmem:[%s2562_s0 + $0x13c] ss:$12 sps:$4 sm:$0xff]   ;;  %v1809_v8 = vld [vmem:[%s2562_s0 + $0x154] ss:$12 sps:$4 sm:$0xff]   ;;  %v1813_v11 = vld [vmem:[%s2562_s0 + $0x16c] ss:$12 sps:$4 sm:$0xff]  }
  0x18   :  { %1605 = vmatprep.subr.bf16.mxu1 %v1869_v2  ;;  %v1816_v7 = vld [vmem:[%s2562_s0 + $0x188] ss:$12 sps:$4 sm:$0xff]   ;;  %v1811_v9 = vld [vmem:[%s2562_s0 + $0x150] ss:$12 sps:$4 sm:$0xff]   ;;  %v1820_v10 = vld [vmem:[%s2562_s0 + $0x1a0] ss:$12 sps:$4 sm:$0xff]  }
  0x19   :  { %v1824_v13 = vld [vmem:[%s2562_s0 + $0x1b8] ss:$12 sps:$4 sm:$0xff]   ;;  %v1819_v15 = vld [vmem:[%s2562_s0 + $0x180] ss:$12 sps:$4 sm:$0xff]   ;;  %v1828_v16 = vld [vmem:[%s2562_s0 + $0x1d0] ss:$12 sps:$4 sm:$0xff]  }
  0x1a   :  { %807 = vmatpush1.bf16.msra.mxu0 %v1734_v12  ;;  %v1815_v12 = vld [vmem:[%s2562_s0 + $0x168] ss:$12 sps:$4 sm:$0xff]  }
  0x1b   :  { %808 = vmatprep.subr.bf16.mxu0 %v1868_v0  ;;  %1606 = vmatpush3.bf16.msra.mxu1 %v1748_v18  ;;  %v1823_v18 = vld [vmem:[%s2562_s0 + $0x198] ss:$12 sps:$4 sm:$0xff]  }
  0x1c   :  { %1607 = vmatprep.subr.bf16.mxu1 %v1869_v2 }
  0x1e   :  { %809 = vmatpush1.bf16.msra.mxu0 %v1735_v14  ;;  %v1817_v14 = vld [vmem:[%s2562_s0 + $0x184] ss:$12 sps:$4 sm:$0xff]  }
  0x1f   :  { %810 = vmatprep.subr.bf16.mxu0 %v1868_v0  ;;  %1608 = vmatpush3.bf16.msra.mxu1 %v1750_v20  ;;  %v1825_v20 = vld [vmem:[%s2562_s0 + $0x1b4] ss:$12 sps:$4 sm:$0xff]  }
  0x22   :  { %811 = vmatpush2.bf16.msra.mxu0 %v1737_v17  ;;  %1610 = vmatmul.mubr.bf16.vlgmr.msra.gmra.mxu1 %v1751_v21  ;;  %v1821_v17 = vld [vmem:[%s2562_s0 + $0x19c] ss:$12 sps:$4 sm:$0xff]  }
  0x23   :  { %812 = vmatprep.subr.bf16.mxu0 %v1868_v0  ;;  %1613 = vmatprep.mubr.msk.bf16.mxu1 %vm1870_vm0, %v1869_v2  ;;  %v1827_v21 = vld [vmem:[%s2562_s0 + $0x1b0] ss:$12 sps:$4 sm:$0xff]  }
  0x26   :  { %813 = vmatpush2.bf16.msra.mxu0 %v1739_v19  ;;  %v1832_v19 = vld [vmem:[%s2562_s0 + $0x1e8] ss:$12 sps:$4 sm:$0xff]  }
  0x27   :  { %814 = vmatprep.subr.bf16.mxu0 %v1868_v0 }
  0x2a   :  { %815 = vmatpush2.bf16.msra.mxu0 %v1741_v22  ;;  %1614 = vmatmul.mubr.bf16.gmra.mxu1 %v1756_v24  ;;  %v1836_v22 = vld [vmem:[%s2562_s0 + $0x200] ss:$12 sps:$4 sm:$0xff]   ;;  %v1831_v24 = vld [vmem:[%s2562_s0 + $0x1c8] ss:$12 sps:$4 sm:$0xff]  }
  0x2b   :  { %816 = vmatprep.subr.bf16.mxu0 %v1868_v0  ;;  %1617 = vmatprep.mubr.msk.bf16.mxu1 %vm1870_vm0, %v1869_v2 }
  0x2e   :  { %817 = vmatpush2.bf16.msra.mxu0 %v1743_v23  ;;  %v1829_v23 = vld [vmem:[%s2562_s0 + $0x1cc] ss:$12 sps:$4 sm:$0xff]  }
  0x2f   :  { %818 = vmatprep.subr.bf16.mxu0 %v1868_v0 }
  0x32   :  { %819 = vmatpush2.bf16.msra.mxu0 %v1745_v25  ;;  %1618 = vmatmul.mubr.bf16.gmra.mxu1 %v1760_v27  ;;  %v1840_v25 = vld [vmem:[%s2562_s0 + $0x218] ss:$12 sps:$4 sm:$0xff]   ;;  %v1835_v27 = vld [vmem:[%s2562_s0 + $0x1e0] ss:$12 sps:$4 sm:$0xff]  }
  0x33   :  { %820 = vmatprep.subr.bf16.mxu0 %v1868_v0  ;;  %1621 = vmatprep.mubr.msk.bf16.mxu1 %vm1870_vm0, %v1869_v2 }
  0x36   :  { %821 = vmatpush2.bf16.msra.mxu0 %v1747_v26  ;;  %v1833_v26 = vld [vmem:[%s2562_s0 + $0x1e4] ss:$12 sps:$4 sm:$0xff]  }
  0x37   :  { %822 = vmatprep.subr.bf16.mxu0 %v1868_v0 }
  0x3a   :  { %823 = vmatpush2.bf16.msra.mxu0 %v1749_v28  ;;  %1622 = vmatmul.mubr.bf16.gmra.mxu1 %v1764_v31  ;;  %v1844_v28 = vld [vmem:[%s2562_s0 + $0x230] ss:$12 sps:$4 sm:$0xff]   ;;  %v1848_v31 = vld [vmem:[%s2562_s0 + $0x248] ss:$12 sps:$4 sm:$0xff]  }
  0x3b   :  { %824 = vmatprep.subr.bf16.mxu0 %v1868_v0  ;;  %1625 = vmatprep.mubr.msk.bf16.mxu1 %vm1870_vm0, %v1869_v2  ;;  %v1808_v0 = vld [vmem:[%s2562_s0 + $0x158] ss:$12 sps:$4 sm:$0xff]  }
  0x3e   :  { %825 = vmatpush2.bf16.msra.mxu0 %v1752_v29  ;;  %v1837_v29 = vld [vmem:[%s2562_s0 + $0x1fc] ss:$12 sps:$4 sm:$0xff]  }
  0x41   :  { %827 = vmatmul.mubr.bf16.vlgmr.msra.gmra.mxu0 %v1753_v30  ;;  %v1839_v30 = vld [vmem:[%s2562_s0 + $0x1f8] ss:$12 sps:$4 sm:$0xff]  }
  0x42   :  { %834 = vmatprep.mubr.bf16.mxu0 %v1757_v32  ;;  %1626 = vmatmul.mubr.bf16.gmra.mxu1 %v1768_v34  ;;  %v1841_v32 = vld [vmem:[%s2562_s0 + $0x214] ss:$12 sps:$4 sm:$0xff]  }
  0x43   :  { %1629 = vmatprep.mubr.msk.bf16.mxu1 %vm1870_vm0, %v1869_v2 }
  0x49   :  { %835 = vmatmul.mubr.bf16.gmra.mxu0 %v1759_v33 }
  0x4a   :  { %842 = vmatprep.mubr.bf16.mxu0 %v1761_v35  ;;  %1630 = vmatmul.mubr.bf16.gmra.mxu1 %v1772_v37  ;;  %v1843_v35 = vld [vmem:[%s2562_s0 + $0x210] ss:$12 sps:$4 sm:$0xff]   ;;  %v1852_v37 = vld [vmem:[%s2562_s0 + $0x260] ss:$12 sps:$4 sm:$0xff]  }
  0x4b   :  { %1633 = vmatprep.mubr.msk.bf16.mxu1 %vm1870_vm0, %v1869_v2 }
  0x51   :  { %843 = vmatmul.mubr.bf16.gmra.mxu0 %v1763_v36 }
  0x52   :  { %850 = vmatprep.mubr.bf16.mxu0 %v1765_v38  ;;  %1634 = vmatmul.mubr.bf16.gmra.mxu1 %v1776_v40  ;;  %v1845_v38 = vld [vmem:[%s2562_s0 + $0x22c] ss:$12 sps:$4 sm:$0xff]  }
  0x53   :  { %1637 = vmatprep.mubr.msk.bf16.mxu1 %vm1870_vm0, %v1869_v2 }
  0x59   :  { %851 = vmatmul.mubr.bf16.gmra.mxu0 %v1767_v39 }
  0x5a   :  { %858 = vmatprep.mubr.bf16.mxu0 %v1769_v41  ;;  %1638 = vmatmul.mubr.bf16.gmra.mxu1 %v1780_v43 }
  0x5b   :  { %1641 = vmatprep.mubr.msk.bf16.mxu1 %vm1870_vm0, %v1869_v2 }
  0x61   :  { %859 = vmatmul.mubr.bf16.gmra.mxu0 %v1771_v42  ;;  %v1847_v42 = vld [vmem:[%s2562_s0 + $0x228] ss:$12 sps:$4 sm:$0xff]  }
  0x62   :  { %866 = vmatprep.mubr.bf16.mxu0 %v1773_v44  ;;  %1642 = vmatmul.mubr.bf16.gmra.mxu1 %v1784_v46  ;;  %v1856_v44 = vld [vmem:[%s2562_s0 + $0x278] ss:$12 sps:$4 sm:$0xff]  }
  0x63   :  { %1645 = vmatprep.mubr.msk.bf16.mxu1 %vm1870_vm0, %v1869_v2 }
  0x69   :  { %867 = vmatmul.mubr.bf16.gmra.mxu0 %v1775_v45  ;;  %v1849_v45 = vld [vmem:[%s2562_s0 + $0x244] ss:$12 sps:$4 sm:$0xff]  }
  0x6a   :  { %874 = vmatprep.mubr.bf16.mxu0 %v1777_v47  ;;  %1646 = vmatmul.mubr.bf16.gmra.mxu1 %v1788_v49  ;;  %v1851_v49 = vld [vmem:[%s2562_s0 + $0x240] ss:$12 sps:$4 sm:$0xff]  }
  0x6b   :  { %1649 = vmatprep.mubr.msk.bf16.mxu1 %vm1870_vm0, %v1869_v2 }
  0x71   :  { %875 = vmatmul.mubr.bf16.gmra.mxu0 %v1779_v48 }
  0x72   :  { %882 = vmatprep.mubr.bf16.mxu0 %v1781_v50  ;;  %1650 = vmatmul.mubr.bf16.gmra.mxu1 %v1792_v52  ;;  %v1853_v52 = vld [vmem:[%s2562_s0 + $0x25c] ss:$12 sps:$4 sm:$0xff]  }
  0x73   :  { %1653 = vmatprep.mubr.msk.bf16.mxu1 %vm1870_vm0, %v1869_v2 }
  0x79   :  { %883 = vmatmul.mubr.bf16.gmra.mxu0 %v1783_v51  ;;  %v1860_v51 = vld [vmem:[%s2562_s0 + $0x290] ss:$12 sps:$4 sm:$0xff]  }
  0x7a   :  { %890 = vmatprep.mubr.bf16.mxu0 %v1785_v53  ;;  %1654 = vmatmul.mubr.bf16.gmra.mxu1 %v1796_v55  ;;  %v2287_v53 = vld [vmem:[%s2563_s2] ss:$0 sm:$0xff] }
  0x7b   :  { %1657 = vmatprep.mubr.msk.bf16.mxu1 %vm1870_vm0, %v1869_v2 }
  0x81   :  { %891 = vmatmul.mubr.bf16.gmra.mxu0 %v1787_v54 }
  0x82   :  { %898 = vmatprep.mubr.bf16.mxu0 %v1789_v56  ;;  %1658 = vmatmul.mubr.bf16.gmra.mxu1 %v1800_v58 }
  0x83   :  { %1661 = vmatprep.mubr.msk.bf16.mxu1 %vm1870_vm0, %v1869_v2 }
  0x89   :  { %899 = vmatmul.mubr.bf16.gmra.mxu0 %v1791_v57 }
  0x8a   :  { %906 = vmatprep.mubr.bf16.mxu0 %v1793_v59  ;;  %1662 = vmatmul.mubr.bf16.gmra.mxu1 %v1804_v61 }
  0x8b   :  { %1665 = vmatprep.mubr.msk.bf16.mxu1 %vm1870_vm0, %v1869_v2 }
  0x91   :  { %907 = vmatmul.mubr.bf16.gmra.mxu0 %v1795_v60 }
  0x92   :  { %914 = vmatprep.mubr.bf16.mxu0 %v1797_v62  ;;  %1666 = vmatmul.mubr.bf16.gmra.mxu1 %v1808_v0  ;;  %v1855_v62 = vld [vmem:[%s2562_s0 + $0x258] ss:$12 sps:$4 sm:$0xff]   ;;  %v1864_v0 = vld [vmem:[%s2562_s0 + $0x2a8] ss:$12 sps:$4 sm:$0xff]  }
  0x93   :  { %1669 = vmatprep.mubr.msk.bf16.mxu1 %vm1870_vm0, %v1869_v2 }
  0x99   :  { %915 = vmatmul.mubr.bf16.gmra.mxu0 %v1799_v63 }
  0x9a   :  { %922 = vmatprep.mubr.bf16.mxu0 %v1801_v1  ;;  %1670 = vmatmul.mubr.bf16.gmra.mxu1 %v1812_v4 }
  0x9b   :  { %1673 = vmatprep.mubr.msk.bf16.mxu1 %vm1870_vm0, %v1869_v2 }
  0xa1   :  { %923 = vmatmul.mubr.bf16.gmra.mxu0 %v1803_v3 }
  0xa2   :  { %930 = vmatprep.mubr.bf16.mxu0 %v1805_v5  ;;  %1674 = vmatmul.mubr.bf16.gmra.mxu1 %v1816_v7 }
  0xa3   :  { %1677 = vmatprep.mubr.msk.bf16.mxu1 %vm1870_vm0, %v1869_v2 }
  0xa9   :  { %931 = vmatmul.mubr.bf16.gmra.mxu0 %v1807_v6 }
  0xaa   :  { %938 = vmatprep.mubr.bf16.mxu0 %v1809_v8  ;;  %1678 = vmatmul.mubr.bf16.gmra.mxu1 %v1820_v10 }
  0xab   :  { %1681 = vmatprep.mubr.msk.bf16.mxu1 %vm1870_vm0, %v1869_v2 }
  0xb1   :  { %939 = vmatmul.mubr.bf16.gmra.mxu0 %v1811_v9 }
  0xb2   :  { %946 = vmatprep.mubr.bf16.mxu0 %v1813_v11  ;;  %1682 = vmatmul.mubr.bf16.gmra.mxu1 %v1824_v13 }
  0xb3   :  { %1685 = vmatprep.mubr.msk.bf16.mxu1 %vm1870_vm0, %v1869_v2 }
  0xb9   :  { %947 = vmatmul.mubr.bf16.gmra.mxu0 %v1815_v12 }
  0xba   :  { %954 = vmatprep.mubr.bf16.mxu0 %v1817_v14  ;;  %1686 = vmatmul.mubr.bf16.gmra.mxu1 %v1828_v16 }
  0xbb   :  { %1689 = vmatprep.mubr.msk.bf16.mxu1 %vm1870_vm0, %v1869_v2 }
  0xc1   :  { %955 = vmatmul.mubr.bf16.gmra.mxu0 %v1819_v15  ;;  %v1859_v15 = vld [vmem:[%s2562_s0 + $0x270] ss:$12 sps:$4 sm:$0xff]  }
  0xc2   :  { %962 = vmatprep.mubr.bf16.mxu0 %v1821_v17  ;;  %1690 = vmatmul.mubr.bf16.gmra.mxu1 %v1832_v19  ;;  %v1861_v19 = vld [vmem:[%s2562_s0 + $0x28c] ss:$12 sps:$4 sm:$0xff]  }
  0xc3   :  { %1693 = vmatprep.mubr.msk.bf16.mxu1 %vm1870_vm0, %v1869_v2 }
  0xc9   :  { %963 = vmatmul.mubr.bf16.gmra.mxu0 %v1823_v18 }
  0xca   :  { %970 = vmatprep.mubr.bf16.mxu0 %v1825_v20  ;;  %1694 = vmatmul.mubr.bf16.gmra.mxu1 %v1836_v22 }
  0xcb   :  { %1697 = vmatprep.mubr.msk.bf16.mxu1 %vm1870_vm0, %v1869_v2 }
  0xd1   :  { %971 = vmatmul.mubr.bf16.gmra.mxu0 %v1827_v21 }
  0xd2   :  { %978 = vmatprep.mubr.bf16.mxu0 %v1829_v23  ;;  %1698 = vmatmul.mubr.bf16.gmra.mxu1 %v1840_v25 }
  0xd3   :  { %1701 = vmatprep.mubr.msk.bf16.mxu1 %vm1870_vm0, %v1869_v2 }
  0xd9   :  { %979 = vmatmul.mubr.bf16.gmra.mxu0 %v1831_v24 }
  0xda   :  { %986 = vmatprep.mubr.bf16.mxu0 %v1833_v26  ;;  %1702 = vmatmul.mubr.bf16.gmra.mxu1 %v1844_v28 }
  0xdb   :  { %1705 = vmatprep.mubr.msk.bf16.mxu1 %vm1870_vm0, %v1869_v2 }
  0xe1   :  { %987 = vmatmul.mubr.bf16.gmra.mxu0 %v1835_v27 }
  0xe2   :  { %994 = vmatprep.mubr.bf16.mxu0 %v1837_v29  ;;  %v1093_v33 = vpop.f32.mrf.mxu1  ;;  %1706 = vmatmul.mubr.bf16.gmra.mxu1 %v1848_v31  ;;  %v1863_v31 = vld [vmem:[%s2562_s0 + $0x288] ss:$12 sps:$4 sm:$0xff]  }
  0xe3   :  { %1709 = vmatprep.mubr.msk.bf16.mxu1 %vm1870_vm0, %v1869_v2 }
  0xe4   :  { %v1611_v34 = vpop.f32.mrf.mxu1 }
  0xe6   :  { %v1096_v36 = vpop.f32.mrf.mxu1 }
  0xe8   :  { %v1612_v39 = vpop.f32.mrf.mxu1 }
  0xe9   :  { %995 = vmatmul.mubr.bf16.gmra.mxu0 %v1839_v30 }
  0xea   :  { %1002 = vmatprep.mubr.bf16.mxu0 %v1841_v32  ;;  %v1101_v40 = vpop.f32.mrf.mxu1  ;;  %1710 = vmatmul.mubr.bf16.gmra.mxu1 %v1852_v37 }
  0xeb   :  { %1713 = vmatprep.mubr.msk.bf16.mxu1 %vm1870_vm0, %v1869_v2 }
  0xec   :  { %v1615_v41 = vpop.f32.mrf.mxu1 }
  0xee   :  { %v1104_v43 = vpop.f32.mrf.mxu1 }
  0xf0   :  { %v1616_v46 = vpop.f32.mrf.mxu1 }
  0xf1   :  { %1003 = vmatmul.mubr.bf16.gmra.mxu0 %v1843_v35  ;;  %v1867_v35 = vld [vmem:[%s2562_s0 + $0x2a4] ss:$12 sps:$4 sm:$0xff]  }
  0xf2   :  { %1010 = vmatprep.mubr.bf16.mxu0 %v1845_v38  ;;  %v2269_v47 = vpop.f32.mrf.mxu1  ;;  %1714 = vmatmul.mubr.bf16.gmra.mxu1 %v1856_v44 }
  0xf3   :  { %1717 = vmatprep.mubr.msk.bf16.mxu1 %vm1870_vm0, %v1869_v2 }
  0xf4   :  { %v1619_v48 = vpop.f32.mrf.mxu1 }
  0xf6   :  { %v2276_v50 = vpop.f32.mrf.mxu1 }
  0xf8   :  { %v1620_v54 = vpop.f32.mrf.mxu1 }
  0xf9   :  { %1011 = vmatmul.mubr.bf16.gmra.mxu0 %v1847_v42 }
  0xfa   :  { %1018 = vmatprep.mubr.bf16.mxu0 %v1849_v45  ;;  %v2289_v56 = vpop.f32.mrf.mxu1  ;;  %1718 = vmatmul.mubr.bf16.gmra.mxu1 %v1860_v51 }
  0xfb   :  { %1721 = vmatprep.mubr.msk.bf16.mxu1 %vm1870_vm0, %v1869_v2  ;;  %v1857_v2 = vld [vmem:[%s2562_s0 + $0x274] ss:$12 sps:$4 sm:$0xff]  }
  0xfc   :  { %v1623_v59 = vpop.f32.mrf.mxu1 }
  0xfe   :  { %v2297_v63 = vpop.f32.mrf.mxu1 }
 0x100   :  { %v1624_v5 = vpop.f32.mrf.mxu1 }
 0x101   :  { %v828_v55 = vpop.f32.mrf.mxu0  ;;  %1019 = vmatmul.mubr.bf16.gmra.mxu0 %v1851_v49 }
 0x102   :  { %v829_v57 = vadd.f32 %v2287_v53, %v828_v55  ;;  %1026 = vmatprep.mubr.bf16.mxu0 %v1853_v52  ;;  %v2309_v8 = vpop.f32.mrf.mxu1  ;;  %1722 = vmatmul.mubr.bf16.gmra.mxu1 %v1864_v0 }
 0x103   :  { %v830_v58 = vpop.f32.mrf.mxu0 }
 0x104   :  { %v1094_v60 = vadd.f32 %v1093_v33, %v829_v57  ;;  %v1627_v12 = vpop.f32.mrf.mxu1 }
 0x105   :  { %v831_v61 = vpop.f32.mrf.mxu0 }
 0x106   :  { %v1324_v1 = vmax.f32 %v1094_v60, 0.0  ;;  %v832_v3 = vadd.f32 %v2287_v53, %v831_v61  ;;  %v2318_v16 = vpop.f32.mrf.mxu1 }
 0x107   :  { %v833_v4 = vpop.f32.mrf.mxu0 }
 0x108   :  { %1382 = vst [vmem:[%s2564_s3] sm:$0xff] %v1324_v1  ;;  %v1097_v6 = vadd.f32 %v1096_v36, %v832_v3  ;;  %v1628_v21 = vpop.f32.mrf.mxu1 }
 0x109   :  { %v836_v7 = vpop.f32.mrf.mxu0  ;;  %1027 = vmatmul.mubr.bf16.gmra.mxu0 %v1855_v62 }
 0x10a   :  { %v1325_v9 = vmax.f32 %v1097_v6, 0.0  ;;  %v837_v10 = vadd.f32 %v2287_v53, %v836_v7  ;;  %1034 = vmatprep.mubr.bf16.mxu0 %v1857_v2  ;;  %v1133_v24 = vpop.f32.mrf.mxu1 }
 0x10b   :  { %v838_v11 = vpop.f32.mrf.mxu0 }
 0x10c   :  { %1383 = vst [vmem:[%s2564_s3 + $0x8] sm:$0xff] %v1325_v9  ;;  %v1102_v13 = vadd.f32 %v1101_v40, %v837_v10  ;;  %v1631_v28 = vpop.f32.mrf.mxu1 }
 0x10d   :  { %v839_v14 = vpop.f32.mrf.mxu0 }
 0x10e   :  { %v1326_v17 = vmax.f32 %v1102_v13, 0.0  ;;  %v840_v18 = vadd.f32 %v2287_v53, %v839_v14  ;;  %v1136_v32 = vpop.f32.mrf.mxu1 }
 0x10f   :  { %v841_v20 = vpop.f32.mrf.mxu0 }
 0x110   :  { %1384 = vst [vmem:[%s2564_s3 + $0x10] sm:$0xff] %v1326_v17  ;;  %v1105_v22 = vadd.f32 %v1104_v43, %v840_v18  ;;  %v1632_v37 = vpop.f32.mrf.mxu1 }
 0x111   :  { %v844_v23 = vpop.f32.mrf.mxu0  ;;  %1035 = vmatmul.mubr.bf16.gmra.mxu0 %v1859_v15 }
 0x112   :  { %v1327_v25 = vmax.f32 %v1105_v22, 0.0  ;;  %v845_v26 = vadd.f32 %v2287_v53, %v844_v23  ;;  %1042 = vmatprep.mubr.bf16.mxu0 %v1861_v19  ;;  %v1141_v40 = vpop.f32.mrf.mxu1 }
 0x113   :  { %v846_v27 = vpop.f32.mrf.mxu0 }
 0x114   :  { %1385 = vst [vmem:[%s2564_s3 + $0x18] sm:$0xff] %v1327_v25  ;;  %v1110_v29 = vadd.f32 %v2269_v47, %v845_v26  ;;  %v1635_v44 = vpop.f32.mrf.mxu1  ;;  %v1865_v47 = vld [vmem:[%s2562_s0 + $0x2a0] ss:$12 sps:$4 sm:$0xff]  }
 0x115   :  { %v847_v30 = vpop.f32.mrf.mxu0 }
 0x116   :  { %v1328_v33 = vmax.f32 %v1110_v29, 0.0  ;;  %v848_v34 = vadd.f32 %v2287_v53, %v847_v30  ;;  %v1144_v48 = vpop.f32.mrf.mxu1 }
 0x117   :  { %v849_v36 = vpop.f32.mrf.mxu0 }
 0x118   :  { %1386 = vst [vmem:[%s2564_s3 + $0x20] sm:$0xff] %v1328_v33  ;;  %v1113_v38 = vadd.f32 %v2276_v50, %v848_v34  ;;  %v1636_v52 = vpop.f32.mrf.mxu1 }
 0x119   :  { %v852_v39 = vpop.f32.mrf.mxu0  ;;  %1043 = vmatmul.mubr.bf16.gmra.mxu0 %v1863_v31 }
 0x11a   :  { %v1329_v41 = vmax.f32 %v1113_v38, 0.0  ;;  %v853_v42 = vadd.f32 %v2287_v53, %v852_v39  ;;  %1050 = vmatprep.mubr.bf16.mxu0 %v1867_v35 }
 0x11b   :  { %v854_v43 = vpop.f32.mrf.mxu0 }
 0x11c   :  { %1387 = vst [vmem:[%s2564_s3 + $0x28] sm:$0xff] %v1329_v41  ;;  %v1118_v45 = vadd.f32 %v2289_v56, %v853_v42  ;;  %v1149_v56 = vpop.f32.mrf.mxu1 }
 0x11d   :  { %v855_v46 = vpop.f32.mrf.mxu0 }
 0x11e   :  { %v1330_v49 = vmax.f32 %v1118_v45, 0.0  ;;  %v856_v50 = vadd.f32 %v2287_v53, %v855_v46  ;;  %v1639_v60 = vpop.f32.mrf.mxu1 }
 0x11f   :  { %v857_v51 = vpop.f32.mrf.mxu0 }
 0x120   :  { %1388 = vst [vmem:[%s2564_s3 + $0x30] sm:$0xff] %v1330_v49  ;;  %v1121_v54 = vadd.f32 %v2297_v63, %v856_v50  ;;  %v1152_v0 = vpop.f32.mrf.mxu1 }
 0x121   :  { %v860_v55 = vpop.f32.mrf.mxu0  ;;  %1051 = vmatmul.mubr.bf16.gmra.mxu0 %v1865_v47 }
 0x122   :  { %v1331_v57 = vmax.f32 %v1121_v54, 0.0  ;;  %v861_v58 = vadd.f32 %v2287_v53, %v860_v55  ;;  %v1640_v2 = vpop.f32.mrf.mxu1 }
 0x123   :  { %v862_v59 = vpop.f32.mrf.mxu0 }
 0x124   :  { %1389 = vst [vmem:[%s2564_s3 + $0x38] sm:$0xff] %v1331_v57  ;;  %v1126_v61 = vadd.f32 %v2309_v8, %v861_v58  ;;  %v1157_v6 = vpop.f32.mrf.mxu1 }
 0x125   :  { %v863_v62 = vpop.f32.mrf.mxu0 }
 0x126   :  { %v1332_v1 = vmax.f32 %v1126_v61, 0.0  ;;  %v864_v3 = vadd.f32 %v2287_v53, %v863_v62  ;;  %v1643_v8 = vpop.f32.mrf.mxu1 }
 0x127   :  { %v865_v63 = vpop.f32.mrf.mxu0 }
 0x128   :  { %1390 = vst [vmem:[%s2564_s3 + $0x40] sm:$0xff] %v1332_v1  ;;  %v1129_v4 = vadd.f32 %v2318_v16, %v864_v3  ;;  %v1160_v13 = vpop.f32.mrf.mxu1 }
 0x129   :  { %v868_v5 = vpop.f32.mrf.mxu0 }
 0x12a   :  { %v1333_v7 = vmax.f32 %v1129_v4, 0.0  ;;  %v869_v9 = vadd.f32 %v2287_v53, %v868_v5  ;;  %v1644_v18 = vpop.f32.mrf.mxu1 }
 0x12b   :  { %v870_v10 = vpop.f32.mrf.mxu0 }
 0x12c   :  { %1391 = vst [vmem:[%s2564_s3 + $0x48] sm:$0xff] %v1333_v7  ;;  %v1134_v11 = vadd.f32 %v1133_v24, %v869_v9  ;;  %v1165_v20 = vpop.f32.mrf.mxu1 }
 0x12d   :  { %v871_v12 = vpop.f32.mrf.mxu0 }
 0x12e   :  { %v1334_v14 = vmax.f32 %v1134_v11, 0.0  ;;  %v872_v15 = vadd.f32 %v2287_v53, %v871_v12  ;;  %v1647_v25 = vpop.f32.mrf.mxu1 }
 0x12f   :  { %v873_v17 = vpop.f32.mrf.mxu0 }
 0x130   :  { %1392 = vst [vmem:[%s2564_s3 + $0x50] sm:$0xff] %v1334_v14  ;;  %v1137_v16 = vadd.f32 %v1136_v32, %v872_v15  ;;  %v1168_v27 = vpop.f32.mrf.mxu1 }
 0x131   :  { %v876_v19 = vpop.f32.mrf.mxu0 }
 0x132   :  { %v1335_v21 = vmax.f32 %v1137_v16, 0.0  ;;  %v877_v22 = vadd.f32 %v2287_v53, %v876_v19  ;;  %v1648_v31 = vpop.f32.mrf.mxu1 }
 0x133   :  { %v878_v23 = vpop.f32.mrf.mxu0 }
 0x134   :  { %1393 = vst [vmem:[%s2564_s3 + $0x58] sm:$0xff] %v1335_v21  ;;  %v1142_v24 = vadd.f32 %v1141_v40, %v877_v22  ;;  %v1173_v34 = vpop.f32.mrf.mxu1 }
 0x135   :  { %v879_v26 = vpop.f32.mrf.mxu0 }
 0x136   :  { %v1336_v28 = vmax.f32 %v1142_v24, 0.0  ;;  %v880_v29 = vadd.f32 %v2287_v53, %v879_v26  ;;  %v1651_v38 = vpop.f32.mrf.mxu1 }
 0x137   :  { %v881_v30 = vpop.f32.mrf.mxu0 }
 0x138   :  { %1394 = vst [vmem:[%s2564_s3 + $0x60] sm:$0xff] %v1336_v28  ;;  %v1145_v32 = vadd.f32 %v1144_v48, %v880_v29  ;;  %v1176_v41 = vpop.f32.mrf.mxu1 }
 0x139   :  { %v884_v33 = vpop.f32.mrf.mxu0 }
 0x13a   :  { %v1337_v35 = vmax.f32 %v1145_v32, 0.0  ;;  %v885_v36 = vadd.f32 %v2287_v53, %v884_v33  ;;  %v1652_v45 = vpop.f32.mrf.mxu1 }
 0x13b   :  { %v886_v37 = vpop.f32.mrf.mxu0 }
 0x13c   :  { %1395 = vst [vmem:[%s2564_s3 + $0x68] sm:$0xff] %v1337_v35  ;;  %v1150_v39 = vadd.f32 %v1149_v56, %v885_v36  ;;  %v1181_v48 = vpop.f32.mrf.mxu1 }
 0x13d   :  { %v887_v40 = vpop.f32.mrf.mxu0 }
 0x13e   :  { %v1338_v42 = vmax.f32 %v1150_v39, 0.0  ;;  %v888_v43 = vadd.f32 %v2287_v53, %v887_v40  ;;  %v1655_v52 = vpop.f32.mrf.mxu1 }
 0x13f   :  { %v889_v44 = vpop.f32.mrf.mxu0 }
 0x140   :  { %1396 = vst [vmem:[%s2564_s3 + $0x70] sm:$0xff] %v1338_v42  ;;  %v1153_v46 = vadd.f32 %v1152_v0, %v888_v43  ;;  %v1184_v56 = vpop.f32.mrf.mxu1 }
 0x141   :  { %v892_v47 = vpop.f32.mrf.mxu0 }
 0x142   :  { %v1339_v49 = vmax.f32 %v1153_v46, 0.0  ;;  %v893_v50 = vadd.f32 %v2287_v53, %v892_v47  ;;  %v1656_v60 = vpop.f32.mrf.mxu1 }
 0x143   :  { %v894_v51 = vpop.f32.mrf.mxu0 }
 0x144   :  { %1397 = vst [vmem:[%s2564_s3 + $0x78] sm:$0xff] %v1339_v49  ;;  %v1158_v54 = vadd.f32 %v1157_v6, %v893_v50  ;;  %v1189_v0 = vpop.f32.mrf.mxu1 }
 0x145   :  { %v895_v55 = vpop.f32.mrf.mxu0 }
 0x146   :  { %v1340_v57 = vmax.f32 %v1158_v54, 0.0  ;;  %v896_v58 = vadd.f32 %v2287_v53, %v895_v55  ;;  %v1659_v2 = vpop.f32.mrf.mxu1 }
 0x147   :  { %v897_v59 = vpop.f32.mrf.mxu0 }
 0x148   :  { %1398 = vst [vmem:[%s2564_s3 + $0x80] sm:$0xff] %v1340_v57  ;;  %v1161_v61 = vadd.f32 %v1160_v13, %v896_v58  ;;  %v1192_v6 = vpop.f32.mrf.mxu1 }
 0x149   :  { %v900_v62 = vpop.f32.mrf.mxu0 }
 0x14a   :  { %v1341_v1 = vmax.f32 %v1161_v61, 0.0  ;;  %v901_v3 = vadd.f32 %v2287_v53, %v900_v62  ;;  %v1660_v8 = vpop.f32.mrf.mxu1 }
 0x14b   :  { %v902_v63 = vpop.f32.mrf.mxu0 }
 0x14c   :  { %1399 = vst [vmem:[%s2564_s3 + $0x88] sm:$0xff] %v1341_v1  ;;  %v1166_v4 = vadd.f32 %v1165_v20, %v901_v3  ;;  %v1197_v13 = vpop.f32.mrf.mxu1 }
 0x14d   :  { %v903_v5 = vpop.f32.mrf.mxu0 }
 0x14e   :  { %v1342_v7 = vmax.f32 %v1166_v4, 0.0  ;;  %v904_v9 = vadd.f32 %v2287_v53, %v903_v5  ;;  %v1663_v18 = vpop.f32.mrf.mxu1 }
 0x14f   :  { %v905_v10 = vpop.f32.mrf.mxu0 }
 0x150   :  { %1400 = vst [vmem:[%s2564_s3 + $0x90] sm:$0xff] %v1342_v7  ;;  %v1169_v11 = vadd.f32 %v1168_v27, %v904_v9  ;;  %v1200_v20 = vpop.f32.mrf.mxu1 }
 0x151   :  { %v908_v12 = vpop.f32.mrf.mxu0 }
 0x152   :  { %v1343_v14 = vmax.f32 %v1169_v11, 0.0  ;;  %v909_v15 = vadd.f32 %v2287_v53, %v908_v12  ;;  %v1664_v25 = vpop.f32.mrf.mxu1 }
 0x153   :  { %v910_v17 = vpop.f32.mrf.mxu0 }
 0x154   :  { %1401 = vst [vmem:[%s2564_s3 + $0x98] sm:$0xff] %v1343_v14  ;;  %v1174_v16 = vadd.f32 %v1173_v34, %v909_v15  ;;  %v1205_v27 = vpop.f32.mrf.mxu1 }
 0x155   :  { %v911_v19 = vpop.f32.mrf.mxu0 }
 0x156   :  { %v1344_v21 = vmax.f32 %v1174_v16, 0.0  ;;  %v912_v22 = vadd.f32 %v2287_v53, %v911_v19  ;;  %v1667_v31 = vpop.f32.mrf.mxu1 }
 0x157   :  { %v913_v23 = vpop.f32.mrf.mxu0 }
 0x158   :  { %1402 = vst [vmem:[%s2564_s3 + $0xa0] sm:$0xff] %v1344_v21  ;;  %v1177_v24 = vadd.f32 %v1176_v41, %v912_v22  ;;  %v1208_v34 = vpop.f32.mrf.mxu1 }
 0x159   :  { %v916_v26 = vpop.f32.mrf.mxu0 }
 0x15a   :  { %v1345_v28 = vmax.f32 %v1177_v24, 0.0  ;;  %v917_v29 = vadd.f32 %v2287_v53, %v916_v26  ;;  %v1668_v38 = vpop.f32.mrf.mxu1 }
 0x15b   :  { %v918_v30 = vpop.f32.mrf.mxu0 }
 0x15c   :  { %1403 = vst [vmem:[%s2564_s3 + $0xa8] sm:$0xff] %v1345_v28  ;;  %v1182_v32 = vadd.f32 %v1181_v48, %v917_v29  ;;  %v1213_v41 = vpop.f32.mrf.mxu1 }
 0x15d   :  { %v919_v33 = vpop.f32.mrf.mxu0 }
 0x15e   :  { %v1346_v35 = vmax.f32 %v1182_v32, 0.0  ;;  %v920_v36 = vadd.f32 %v2287_v53, %v919_v33  ;;  %v1671_v45 = vpop.f32.mrf.mxu1 }
 0x15f   :  { %v921_v37 = vpop.f32.mrf.mxu0 }
 0x160   :  { %1404 = vst [vmem:[%s2564_s3 + $0xb0] sm:$0xff] %v1346_v35  ;;  %v1185_v39 = vadd.f32 %v1184_v56, %v920_v36  ;;  %v1216_v48 = vpop.f32.mrf.mxu1 }
 0x161   :  { %v924_v40 = vpop.f32.mrf.mxu0 }
 0x162   :  { %v1347_v42 = vmax.f32 %v1185_v39, 0.0  ;;  %v925_v43 = vadd.f32 %v2287_v53, %v924_v40  ;;  %v1672_v52 = vpop.f32.mrf.mxu1 }
 0x163   :  { %v926_v44 = vpop.f32.mrf.mxu0 }
 0x164   :  { %1405 = vst [vmem:[%s2564_s3 + $0xb8] sm:$0xff] %v1347_v42  ;;  %v1190_v46 = vadd.f32 %v1189_v0, %v925_v43  ;;  %v1221_v56 = vpop.f32.mrf.mxu1 }
 0x165   :  { %v927_v47 = vpop.f32.mrf.mxu0 }
 0x166   :  { %v1348_v49 = vmax.f32 %v1190_v46, 0.0  ;;  %v928_v50 = vadd.f32 %v2287_v53, %v927_v47  ;;  %v1675_v60 = vpop.f32.mrf.mxu1 }
 0x167   :  { %v929_v51 = vpop.f32.mrf.mxu0 }
 0x168   :  { %1406 = vst [vmem:[%s2564_s3 + $0xc0] sm:$0xff] %v1348_v49  ;;  %v1193_v54 = vadd.f32 %v1192_v6, %v928_v50  ;;  %v1224_v0 = vpop.f32.mrf.mxu1 }
 0x169   :  { %v932_v55 = vpop.f32.mrf.mxu0 }
 0x16a   :  { %v1349_v57 = vmax.f32 %v1193_v54, 0.0  ;;  %v933_v58 = vadd.f32 %v2287_v53, %v932_v55  ;;  %v1676_v2 = vpop.f32.mrf.mxu1 }
 0x16b   :  { %v934_v59 = vpop.f32.mrf.mxu0 }
 0x16c   :  { %1407 = vst [vmem:[%s2564_s3 + $0xc8] sm:$0xff] %v1349_v57  ;;  %v1198_v61 = vadd.f32 %v1197_v13, %v933_v58  ;;  %v1229_v6 = vpop.f32.mrf.mxu1 }
 0x16d   :  { %v935_v62 = vpop.f32.mrf.mxu0 }
 0x16e   :  { %v1350_v1 = vmax.f32 %v1198_v61, 0.0  ;;  %v936_v3 = vadd.f32 %v2287_v53, %v935_v62  ;;  %v1679_v8 = vpop.f32.mrf.mxu1 }
 0x16f   :  { %v937_v63 = vpop.f32.mrf.mxu0 }
 0x170   :  { %1408 = vst [vmem:[%s2564_s3 + $0xd0] sm:$0xff] %v1350_v1  ;;  %v1201_v4 = vadd.f32 %v1200_v20, %v936_v3  ;;  %v1232_v13 = vpop.f32.mrf.mxu1 }
 0x171   :  { %v940_v5 = vpop.f32.mrf.mxu0 }
 0x172   :  { %v1351_v7 = vmax.f32 %v1201_v4, 0.0  ;;  %v941_v9 = vadd.f32 %v2287_v53, %v940_v5  ;;  %v1680_v18 = vpop.f32.mrf.mxu1 }
 0x173   :  { %v942_v10 = vpop.f32.mrf.mxu0 }
 0x174   :  { %1409 = vst [vmem:[%s2564_s3 + $0xd8] sm:$0xff] %v1351_v7  ;;  %v1206_v11 = vadd.f32 %v1205_v27, %v941_v9  ;;  %v1237_v20 = vpop.f32.mrf.mxu1 }
 0x175   :  { %v943_v12 = vpop.f32.mrf.mxu0 }
 0x176   :  { %v1352_v14 = vmax.f32 %v1206_v11, 0.0  ;;  %v944_v15 = vadd.f32 %v2287_v53, %v943_v12  ;;  %v1683_v25 = vpop.f32.mrf.mxu1 }
 0x177   :  { %v945_v17 = vpop.f32.mrf.mxu0 }
 0x178   :  { %1410 = vst [vmem:[%s2564_s3 + $0xe0] sm:$0xff] %v1352_v14  ;;  %v1209_v16 = vadd.f32 %v1208_v34, %v944_v15  ;;  %v1240_v27 = vpop.f32.mrf.mxu1 }
 0x179   :  { %v948_v19 = vpop.f32.mrf.mxu0 }
 0x17a   :  { %v1353_v21 = vmax.f32 %v1209_v16, 0.0  ;;  %v949_v22 = vadd.f32 %v2287_v53, %v948_v19  ;;  %v1684_v31 = vpop.f32.mrf.mxu1 }
 0x17b   :  { %v950_v23 = vpop.f32.mrf.mxu0 }
 0x17c   :  { %1411 = vst [vmem:[%s2564_s3 + $0xe8] sm:$0xff] %v1353_v21  ;;  %v1214_v24 = vadd.f32 %v1213_v41, %v949_v22  ;;  %v1245_v34 = vpop.f32.mrf.mxu1 }
 0x17d   :  { %v951_v26 = vpop.f32.mrf.mxu0 }
 0x17e   :  { %v1354_v28 = vmax.f32 %v1214_v24, 0.0  ;;  %v952_v29 = vadd.f32 %v2287_v53, %v951_v26  ;;  %v1687_v38 = vpop.f32.mrf.mxu1 }
 0x17f   :  { %v953_v30 = vpop.f32.mrf.mxu0 }
 0x180   :  { %1412 = vst [vmem:[%s2564_s3 + $0xf0] sm:$0xff] %v1354_v28  ;;  %v1217_v32 = vadd.f32 %v1216_v48, %v952_v29  ;;  %v1248_v41 = vpop.f32.mrf.mxu1 }
 0x181   :  { %v956_v33 = vpop.f32.mrf.mxu0 }
 0x182   :  { %v1355_v35 = vmax.f32 %v1217_v32, 0.0  ;;  %v957_v36 = vadd.f32 %v2287_v53, %v956_v33  ;;  %v1688_v45 = vpop.f32.mrf.mxu1 }
 0x183   :  { %v958_v37 = vpop.f32.mrf.mxu0 }
 0x184   :  { %1413 = vst [vmem:[%s2564_s3 + $0xf8] sm:$0xff] %v1355_v35  ;;  %v1222_v39 = vadd.f32 %v1221_v56, %v957_v36  ;;  %v1253_v48 = vpop.f32.mrf.mxu1 }
 0x185   :  { %v959_v40 = vpop.f32.mrf.mxu0 }
 0x186   :  { %v1356_v42 = vmax.f32 %v1222_v39, 0.0  ;;  %v960_v43 = vadd.f32 %v2287_v53, %v959_v40  ;;  %v1691_v52 = vpop.f32.mrf.mxu1 }
 0x187   :  { %v961_v44 = vpop.f32.mrf.mxu0 }
 0x188   :  { %1414 = vst [vmem:[%s2564_s3 + $0x100] sm:$0xff] %v1356_v42  ;;  %v1225_v46 = vadd.f32 %v1224_v0, %v960_v43  ;;  %v1256_v56 = vpop.f32.mrf.mxu1 }
 0x189   :  { %v964_v47 = vpop.f32.mrf.mxu0 }
 0x18a   :  { %v1357_v49 = vmax.f32 %v1225_v46, 0.0  ;;  %v965_v50 = vadd.f32 %v2287_v53, %v964_v47  ;;  %v1692_v60 = vpop.f32.mrf.mxu1 }
 0x18b   :  { %v966_v51 = vpop.f32.mrf.mxu0 }
 0x18c   :  { %1415 = vst [vmem:[%s2564_s3 + $0x108] sm:$0xff] %v1357_v49  ;;  %v1230_v54 = vadd.f32 %v1229_v6, %v965_v50  ;;  %v1261_v0 = vpop.f32.mrf.mxu1 }
 0x18d   :  { %v967_v55 = vpop.f32.mrf.mxu0 }
 0x18e   :  { %v1358_v57 = vmax.f32 %v1230_v54, 0.0  ;;  %v968_v58 = vadd.f32 %v2287_v53, %v967_v55  ;;  %v1695_v2 = vpop.f32.mrf.mxu1 }
 0x18f   :  { %v969_v59 = vpop.f32.mrf.mxu0 }
 0x190   :  { %1416 = vst [vmem:[%s2564_s3 + $0x110] sm:$0xff] %v1358_v57  ;;  %v1233_v61 = vadd.f32 %v1232_v13, %v968_v58  ;;  %v1264_v6 = vpop.f32.mrf.mxu1 }
 0x191   :  { %v972_v62 = vpop.f32.mrf.mxu0 }
 0x192   :  { %v1359_v1 = vmax.f32 %v1233_v61, 0.0  ;;  %v973_v3 = vadd.f32 %v2287_v53, %v972_v62  ;;  %v1696_v8 = vpop.f32.mrf.mxu1 }
 0x193   :  { %v974_v63 = vpop.f32.mrf.mxu0 }
 0x194   :  { %1417 = vst [vmem:[%s2564_s3 + $0x118] sm:$0xff] %v1359_v1  ;;  %v1238_v4 = vadd.f32 %v1237_v20, %v973_v3  ;;  %v1269_v13 = vpop.f32.mrf.mxu1 }
 0x195   :  { %v975_v5 = vpop.f32.mrf.mxu0 }
 0x196   :  { %v1360_v7 = vmax.f32 %v1238_v4, 0.0  ;;  %v976_v9 = vadd.f32 %v2287_v53, %v975_v5  ;;  %v1699_v18 = vpop.f32.mrf.mxu1 }
 0x197   :  { %v977_v10 = vpop.f32.mrf.mxu0 }
 0x198   :  { %1418 = vst [vmem:[%s2564_s3 + $0x120] sm:$0xff] %v1360_v7  ;;  %v1241_v11 = vadd.f32 %v1240_v27, %v976_v9  ;;  %v1272_v20 = vpop.f32.mrf.mxu1 }
 0x199   :  { %v980_v12 = vpop.f32.mrf.mxu0 }
 0x19a   :  { %v1361_v14 = vmax.f32 %v1241_v11, 0.0  ;;  %v981_v15 = vadd.f32 %v2287_v53, %v980_v12  ;;  %v1700_v25 = vpop.f32.mrf.mxu1 }
 0x19b   :  { %v982_v17 = vpop.f32.mrf.mxu0 }
 0x19c   :  { %1419 = vst [vmem:[%s2564_s3 + $0x128] sm:$0xff] %v1361_v14  ;;  %v1246_v16 = vadd.f32 %v1245_v34, %v981_v15  ;;  %v1277_v27 = vpop.f32.mrf.mxu1 }
 0x19d   :  { %v983_v19 = vpop.f32.mrf.mxu0 }
 0x19e   :  { %v1362_v21 = vmax.f32 %v1246_v16, 0.0  ;;  %v984_v22 = vadd.f32 %v2287_v53, %v983_v19  ;;  %v1703_v31 = vpop.f32.mrf.mxu1 }
 0x19f   :  { %v985_v23 = vpop.f32.mrf.mxu0 }
 0x1a0   :  { %1420 = vst [vmem:[%s2564_s3 + $0x130] sm:$0xff] %v1362_v21  ;;  %v1249_v24 = vadd.f32 %v1248_v41, %v984_v22  ;;  %v1280_v34 = vpop.f32.mrf.mxu1 }
 0x1a1   :  { %v988_v26 = vpop.f32.mrf.mxu0 }
 0x1a2   :  { %v1363_v28 = vmax.f32 %v1249_v24, 0.0  ;;  %v989_v29 = vadd.f32 %v2287_v53, %v988_v26  ;;  %v1704_v38 = vpop.f32.mrf.mxu1 }
 0x1a3   :  { %v990_v30 = vpop.f32.mrf.mxu0 }
 0x1a4   :  { %1421 = vst [vmem:[%s2564_s3 + $0x138] sm:$0xff] %v1363_v28  ;;  %v1254_v32 = vadd.f32 %v1253_v48, %v989_v29  ;;  %v1285_v41 = vpop.f32.mrf.mxu1 }
 0x1a5   :  { %v991_v33 = vpop.f32.mrf.mxu0 }
 0x1a6   :  { %v1364_v35 = vmax.f32 %v1254_v32, 0.0  ;;  %v992_v36 = vadd.f32 %v2287_v53, %v991_v33  ;;  %v1707_v45 = vpop.f32.mrf.mxu1 }
 0x1a7   :  { %v993_v37 = vpop.f32.mrf.mxu0 }
 0x1a8   :  { %1422 = vst [vmem:[%s2564_s3 + $0x140] sm:$0xff] %v1364_v35  ;;  %v1257_v39 = vadd.f32 %v1256_v56, %v992_v36  ;;  %v1288_v48 = vpop.f32.mrf.mxu1 }
 0x1a9   :  { %v996_v40 = vpop.f32.mrf.mxu0 }
 0x1aa   :  { %v1365_v42 = vmax.f32 %v1257_v39, 0.0  ;;  %v997_v43 = vadd.f32 %v2287_v53, %v996_v40  ;;  %v1708_v52 = vpop.f32.mrf.mxu1 }
 0x1ab   :  { %v998_v44 = vpop.f32.mrf.mxu0 }
 0x1ac   :  { %1423 = vst [vmem:[%s2564_s3 + $0x148] sm:$0xff] %v1365_v42  ;;  %v1262_v46 = vadd.f32 %v1261_v0, %v997_v43  ;;  %v1293_v56 = vpop.f32.mrf.mxu1 }
 0x1ad   :  { %v999_v47 = vpop.f32.mrf.mxu0 }
 0x1ae   :  { %v1366_v49 = vmax.f32 %v1262_v46, 0.0  ;;  %v1000_v50 = vadd.f32 %v2287_v53, %v999_v47  ;;  %v1711_v60 = vpop.f32.mrf.mxu1 }
 0x1af   :  { %v1001_v51 = vpop.f32.mrf.mxu0 }
 0x1b0   :  { %1424 = vst [vmem:[%s2564_s3 + $0x150] sm:$0xff] %v1366_v49  ;;  %v1265_v54 = vadd.f32 %v1264_v6, %v1000_v50  ;;  %v1296_v0 = vpop.f32.mrf.mxu1 }
 0x1b1   :  { %v1004_v55 = vpop.f32.mrf.mxu0 }
 0x1b2   :  { %v1367_v57 = vmax.f32 %v1265_v54, 0.0  ;;  %v1005_v58 = vadd.f32 %v2287_v53, %v1004_v55  ;;  %v1712_v2 = vpop.f32.mrf.mxu1 }
 0x1b3   :  { %v1006_v59 = vpop.f32.mrf.mxu0 }
 0x1b4   :  { %1425 = vst [vmem:[%s2564_s3 + $0x158] sm:$0xff] %v1367_v57  ;;  %v1270_v61 = vadd.f32 %v1269_v13, %v1005_v58  ;;  %v1301_v6 = vpop.f32.mrf.mxu1 }
 0x1b5   :  { %v1007_v62 = vpop.f32.mrf.mxu0 }
 0x1b6   :  { %v1368_v1 = vmax.f32 %v1270_v61, 0.0  ;;  %v1008_v3 = vadd.f32 %v2287_v53, %v1007_v62  ;;  %v1715_v8 = vpop.f32.mrf.mxu1 }
 0x1b7   :  { %v1009_v63 = vpop.f32.mrf.mxu0 }
 0x1b8   :  { %1426 = vst [vmem:[%s2564_s3 + $0x160] sm:$0xff] %v1368_v1  ;;  %v1273_v4 = vadd.f32 %v1272_v20, %v1008_v3  ;;  %v1304_v13 = vpop.f32.mrf.mxu1 }
 0x1b9   :  { %v1012_v5 = vpop.f32.mrf.mxu0 }
 0x1ba   :  { %v1369_v7 = vmax.f32 %v1273_v4, 0.0  ;;  %v1013_v9 = vadd.f32 %v2287_v53, %v1012_v5  ;;  %v1716_v18 = vpop.f32.mrf.mxu1 }
 0x1bb   :  { %v1014_v10 = vpop.f32.mrf.mxu0 }
 0x1bc   :  { %1427 = vst [vmem:[%s2564_s3 + $0x168] sm:$0xff] %v1369_v7  ;;  %v1278_v11 = vadd.f32 %v1277_v27, %v1013_v9  ;;  %v1309_v20 = vpop.f32.mrf.mxu1 }
 0x1bd   :  { %v1015_v12 = vpop.f32.mrf.mxu0 }
 0x1be   :  { %v1370_v14 = vmax.f32 %v1278_v11, 0.0  ;;  %v1016_v15 = vadd.f32 %v2287_v53, %v1015_v12  ;;  %v1719_v25 = vpop.f32.mrf.mxu1 }
 0x1bf   :  { %v1017_v17 = vpop.f32.mrf.mxu0 }
 0x1c0   :  { %1428 = vst [vmem:[%s2564_s3 + $0x170] sm:$0xff] %v1370_v14  ;;  %v1281_v16 = vadd.f32 %v1280_v34, %v1016_v15  ;;  %v1312_v27 = vpop.f32.mrf.mxu1 }
 0x1c1   :  { %v1020_v19 = vpop.f32.mrf.mxu0 }
 0x1c2   :  { %v1371_v21 = vmax.f32 %v1281_v16, 0.0  ;;  %v1021_v22 = vadd.f32 %v2287_v53, %v1020_v19  ;;  %v1720_v31 = vpop.f32.mrf.mxu1 }
 0x1c3   :  { %v1022_v23 = vpop.f32.mrf.mxu0 }
 0x1c4   :  { %1429 = vst [vmem:[%s2564_s3 + $0x178] sm:$0xff] %v1371_v21  ;;  %v1286_v24 = vadd.f32 %v1285_v41, %v1021_v22  ;;  %v1317_v34 = vpop.f32.mrf.mxu1 }
 0x1c5   :  { %v1023_v26 = vpop.f32.mrf.mxu0 }
 0x1c6   :  { %v1372_v28 = vmax.f32 %v1286_v24, 0.0  ;;  %v1024_v29 = vadd.f32 %v2287_v53, %v1023_v26  ;;  %v1723_v38 = vpop.f32.mrf.mxu1 }
 0x1c7   :  { %v1025_v30 = vpop.f32.mrf.mxu0 }
 0x1c8   :  { %1430 = vst [vmem:[%s2564_s3 + $0x180] sm:$0xff] %v1372_v28  ;;  %v1289_v32 = vadd.f32 %v1288_v48, %v1024_v29  ;;  %v1320_v41 = vpop.f32.mrf.mxu1 }
 0x1c9   :  { %v1028_v33 = vpop.f32.mrf.mxu0 }
 0x1ca   :  { %v1373_v35 = vmax.f32 %v1289_v32, 0.0  ;;  %v1029_v36 = vadd.f32 %v2287_v53, %v1028_v33  ;;  %v1724_v45 = vpop.f32.mrf.mxu1 }
 0x1cb   :  { %v1030_v37 = vpop.f32.mrf.mxu0 }
 0x1cc   :  { %1431 = vst [vmem:[%s2564_s3 + $0x188] sm:$0xff] %v1373_v35  ;;  %v1294_v39 = vadd.f32 %v1293_v56, %v1029_v36 }
 0x1cd   :  { %v1031_v40 = vpop.f32.mrf.mxu0 }
 0x1ce   :  { %v1374_v42 = vmax.f32 %v1294_v39, 0.0  ;;  %v1032_v43 = vadd.f32 %v2287_v53, %v1031_v40 }
 0x1cf   :  { %v1033_v44 = vpop.f32.mrf.mxu0 }
 0x1d0   :  { %1432 = vst [vmem:[%s2564_s3 + $0x190] sm:$0xff] %v1374_v42  ;;  %v1297_v46 = vadd.f32 %v1296_v0, %v1032_v43 }
 0x1d1   :  { %v1036_v47 = vpop.f32.mrf.mxu0 }
 0x1d2   :  { %v1375_v48 = vmax.f32 %v1297_v46, 0.0  ;;  %v1037_v49 = vadd.f32 %v2287_v53, %v1036_v47 }
 0x1d3   :  { %v1038_v50 = vpop.f32.mrf.mxu0 }
 0x1d4   :  { %1433 = vst [vmem:[%s2564_s3 + $0x198] sm:$0xff] %v1375_v48  ;;  %v1302_v51 = vadd.f32 %v1301_v6, %v1037_v49 }
 0x1d5   :  { %v1039_v52 = vpop.f32.mrf.mxu0 }
 0x1d6   :  { %v1376_v54 = vmax.f32 %v1302_v51, 0.0  ;;  %v1040_v55 = vadd.f32 %v2287_v53, %v1039_v52 }
 0x1d7   :  { %v1041_v56 = vpop.f32.mrf.mxu0 }
 0x1d8   :  { %1434 = vst [vmem:[%s2564_s3 + $0x1a0] sm:$0xff] %v1376_v54  ;;  %v1305_v57 = vadd.f32 %v1304_v13, %v1040_v55 }
 0x1d9   :  { %v1044_v58 = vpop.f32.mrf.mxu0 }
 0x1da   :  { %v1377_v59 = vmax.f32 %v1305_v57, 0.0  ;;  %v1045_v60 = vadd.f32 %v2287_v53, %v1044_v58 }
 0x1db   :  { %v1046_v61 = vpop.f32.mrf.mxu0 }
 0x1dc   :  { %1435 = vst [vmem:[%s2564_s3 + $0x1a8] sm:$0xff] %v1377_v59  ;;  %v1310_v62 = vadd.f32 %v1309_v20, %v1045_v60 }
 0x1dd   :  { %v1047_v0 = vpop.f32.mrf.mxu0 }
 0x1de   :  { %v1378_v1 = vmax.f32 %v1310_v62, 0.0  ;;  %v1048_v3 = vadd.f32 %v2287_v53, %v1047_v0 }
 0x1df   :  { %v1049_v63 = vpop.f32.mrf.mxu0 }
 0x1e0   :  { %1436 = vst [vmem:[%s2564_s3 + $0x1b0] sm:$0xff] %v1378_v1  ;;  %v1313_v2 = vadd.f32 %v1312_v27, %v1048_v3 }
 0x1e1   :  { %v1052_v4 = vpop.f32.mrf.mxu0 }
 0x1e2   :  { %v1379_v5 = vmax.f32 %v1313_v2, 0.0  ;;  %v1053_v6 = vadd.f32 %v2287_v53, %v1052_v4 }
 0x1e3   :  { %v1054_v7 = vpop.f32.mrf.mxu0 }
 0x1e4   :  { %1437 = vst [vmem:[%s2564_s3 + $0x1b8] sm:$0xff] %v1379_v5  ;;  %v1318_v9 = vadd.f32 %v1317_v34, %v1053_v6 }
 0x1e5   :  { %v1055_v10 = vpop.f32.mrf.mxu0 }
 0x1e6   :  { %v1380_v8 = vmax.f32 %v1318_v9, 0.0  ;;  %v1056_v11 = vadd.f32 %v2287_v53, %v1055_v10 }
 0x1e7   :  { %v1057_v12 = vpop.f32.mrf.mxu0 }
 0x1e8   :  { %1438 = vst [vmem:[%s2564_s3 + $0x1c0] sm:$0xff] %v1380_v8  ;;  %v1321_v13 = vadd.f32 %v1320_v41, %v1056_v11 }
 0x1ea   :  { %v1381_v14 = vmax.f32 %v1321_v13, 0.0 }
 0x1ec   :  { %1439 = vst [vmem:[%s2564_s3 + $0x1c8] sm:$0xff] %v1381_v14 }

// kernel: alexnet_conv_forward.7
= control target key start
LH: loop header
LB: loop body
LE: loop exit
PB: predicated region body
PF: predicated region fallthrough
CT: control target
= control target key end

     0   :  { %s854_s30 = smov 0   ;;  %s997_s0 = inlined_call_operand.vmem [shape: f32[2,7,7,128], index: 0, kind: input, shape index: {}]   ;;  %s998_s1 = inlined_call_operand.vmem [shape: f32[2,7,7,128], index: 1, kind: input, shape index: {}]   ;;  %s999_s2 = inlined_call_operand.vmem [shape: f32[2,7,7,128], index: 2, kind: input, shape index: {}]   ;;  %s1000_s3 = inlined_call_operand.vmem [shape: f32[2,7,7,128], index: 3, kind: input, shape index: {}]   ;;  %s1001_s4 = inlined_call_operand.vmem [shape: f32[2,7,7,128], index: 4, kind: input, shape index: {}]   ;;  %s1002_s5 = inlined_call_operand.vmem [shape: f32[2,7,7,128], index: 5, kind: input, shape index: {}]   ;;  %s1003_s6 = inlined_call_operand.vmem [shape: f32[2,7,7,128], index: 6, kind: input, shape index: {}]   ;;  %s1004_s7 = inlined_call_operand.vmem [shape: f32[2,7,7,128], index: 7, kind: input, shape index: {}]   ;;  %s1005_s8 = inlined_call_operand.vmem [shape: f32[2,7,7,128], index: 8, kind: input, shape index: {}]   ;;  %s1006_s9 = inlined_call_operand.vmem [shape: f32[2,7,7,128], index: 9, kind: output, shape index: {}]  }
   0x1 LB: > { %s770_s10 = sadd.s32 4294967295, %s802_s30   ;;  %p774_p0 = scmp.ge.s32.totalorder %s802_s30, 1  ;;  %s802_s30 = sphi %s854_s30, %s19_s30  }
   0x2   : > { %p367_p1 = scmp.lt.s32.totalorder %s802_s30, 3 }
   0x4   : > { %p368_p2 = pnand %p774_p0, %p367_p1 }
   0x5   : > { %p443_p3 = scmp.lt.s32.totalorder (!%p368_p2), %s770_s10, 1 }
   0x6   : > { %371 = sbr.rel (%p368_p2) target bundleno = 48 (0x30), region = 56 }
   0xb   : > { %s1008_s10 = smov (!%p443_p3, %s770_s10), 1 }
   0xc   : > { %s862_s11 = smul.u32 56, %s1008_s10 }
   0xe   : > { %s868_s14 = scalar_lea.vmem %s997_s0, %s862_s11  ;;  %s874_s17 = scalar_lea.vmem %s998_s1, %s862_s11 }
   0xf   : > { %s880_s20 = scalar_lea.vmem %s999_s2, %s862_s11  ;;  %s886_s23 = scalar_lea.vmem %s1000_s3, %s862_s11  ;;  %v493_v0 = vld [vmem:[%s868_s14] sm:$0x7f]  ;;  %v494_v2 = vld [vmem:[%s868_s14 + $0x8] sm:$0x7f]  ;;  %v495_v17 = vld [vmem:[%s868_s14 + $0x10] sm:$0x7f] }
  0x10   : > { %v500_v1 = vld [vmem:[%s874_s17] sm:$0x7f]  ;;  %s895_s26 = scalar_lea.vmem %s1001_s4, %s862_s11  ;;  %v501_v5 = vld [vmem:[%s874_s17 + $0x8] sm:$0x7f]  ;;  %s903_s29 = scalar_lea.vmem %s1002_s5, %s862_s11  ;;  %v502_v18 = vld [vmem:[%s874_s17 + $0x10] sm:$0x7f] }
  0x11   : > { %v507_v3 = vmax.f32 %v493_v0, %v500_v1  ;;  %v514_v4 = vld [vmem:[%s880_s20] sm:$0x7f]  ;;  %v508_v7 = vmax.f32 %v494_v2, %v501_v5  ;;  %v515_v8 = vld [vmem:[%s880_s20 + $0x8] sm:$0x7f]  ;;  %s913_s13 = scalar_lea.vmem %s1003_s6, %s862_s11  ;;  %v516_v19 = vld [vmem:[%s880_s20 + $0x10] sm:$0x7f]  ;;  %s924_s18 = scalar_lea.vmem %s1004_s7, %s862_s11  ;;  %v509_v22 = vmax.f32 %v495_v17, %v502_v18 }
  0x12   : > { %v528_v6 = vld [vmem:[%s886_s23] sm:$0x7f]  ;;  %v529_v10 = vld [vmem:[%s886_s23 + $0x8] sm:$0x7f]  ;;  %s930_s22 = scalar_lea.vmem %s1005_s8, %s862_s11  ;;  %v530_v26 = vld [vmem:[%s886_s23 + $0x10] sm:$0x7f]  ;;  %s954_s27 = scalar_lea.vmem %s1006_s9, %s862_s11 }
  0x13   : > { %v521_v9 = vmax.f32 %v507_v3, %v514_v4  ;;  %v542_v11 = vld [vmem:[%s895_s26] sm:$0x7f]  ;;  %v522_v12 = vmax.f32 %v508_v7, %v515_v8  ;;  %v543_v15 = vld [vmem:[%s895_s26 + $0x8] sm:$0x7f]  ;;  %v523_v28 = vmax.f32 %v509_v22, %v516_v19  ;;  %v496_v29 = vld [vmem:[%s868_s14 + $0x18] sm:$0x7f] }
  0x14   : > { %v556_v14 = vld [vmem:[%s903_s29] sm:$0x7f]  ;;  %v557_v21 = vld [vmem:[%s903_s29 + $0x8] sm:$0x7f]  ;;  %v503_v30 = vld [vmem:[%s874_s17 + $0x18] sm:$0x7f] }
  0x15   : > { %v535_v13 = vmax.f32 %v521_v9, %v528_v6  ;;  %v536_v16 = vmax.f32 %v522_v12, %v529_v10  ;;  %v570_v23 = vld [vmem:[%s913_s13] sm:$0x7f]  ;;  %v571_v25 = vld [vmem:[%s913_s13 + $0x8] sm:$0x7f]  ;;  %v517_v31 = vld [vmem:[%s880_s20 + $0x18] sm:$0x7f]  ;;  %v510_v36 = vmax.f32 %v496_v29, %v503_v30  ;;  %v537_v39 = vmax.f32 %v523_v28, %v530_v26 }
  0x16   : > { %v584_v32 = vld [vmem:[%s924_s18] sm:$0x7f]  ;;  %v544_v35 = vld [vmem:[%s895_s26 + $0x10] sm:$0x7f]  ;;  %v585_v38 = vld [vmem:[%s924_s18 + $0x8] sm:$0x7f] }
  0x17   : > { %v549_v20 = vmax.f32 %v535_v13, %v542_v11  ;;  %v550_v24 = vmax.f32 %v536_v16, %v543_v15  ;;  %v598_v33 = vld [vmem:[%s930_s22] sm:$0x7f]  ;;  %v558_v40 = vld [vmem:[%s903_s29 + $0x10] sm:$0x7f]  ;;  %v531_v41 = vld [vmem:[%s886_s23 + $0x18] sm:$0x7f]  ;;  %v524_v43 = vmax.f32 %v510_v36, %v517_v31  ;;  %v551_v49 = vmax.f32 %v537_v39, %v544_v35 }
  0x18   : > { %v497_v44 = vld [vmem:[%s868_s14 + $0x20] sm:$0x7f]  ;;  %v599_v48 = vld [vmem:[%s930_s22 + $0x8] sm:$0x7f]  ;;  %v545_v50 = vld [vmem:[%s895_s26 + $0x18] sm:$0x7f] }
  0x19   : > { %v563_v27 = vmax.f32 %v549_v20, %v556_v14  ;;  %v564_v34 = vmax.f32 %v550_v24, %v557_v21  ;;  %v504_v45 = vld [vmem:[%s874_s17 + $0x20] sm:$0x7f]  ;;  %v572_v53 = vld [vmem:[%s913_s13 + $0x10] sm:$0x7f]  ;;  %v538_v54 = vmax.f32 %v524_v43, %v531_v41  ;;  %v559_v55 = vld [vmem:[%s903_s29 + $0x18] sm:$0x7f]  ;;  %v565_v58 = vmax.f32 %v551_v49, %v558_v40 }
  0x1a   : > { %v518_v46 = vld [vmem:[%s880_s20 + $0x20] sm:$0x7f]  ;;  %v511_v51 = vmax.f32 %v497_v44, %v504_v45  ;;  %v498_v60 = vld [vmem:[%s868_s14 + $0x28] sm:$0x7f]  ;;  %v586_v0 = vld [vmem:[%s924_s18 + $0x10] sm:$0x7f] }
  0x1b   : > { %v577_v37 = vmax.f32 %v563_v27, %v570_v23  ;;  %v578_v42 = vmax.f32 %v564_v34, %v571_v25  ;;  %v532_v56 = vld [vmem:[%s886_s23 + $0x20] sm:$0x7f]  ;;  %v505_v61 = vld [vmem:[%s874_s17 + $0x28] sm:$0x7f]  ;;  %v600_v1 = vld [vmem:[%s930_s22 + $0x10] sm:$0x7f]  ;;  %v552_v2 = vmax.f32 %v538_v54, %v545_v50  ;;  %v579_v5 = vmax.f32 %v565_v58, %v572_v53 }
  0x1c   : > { %v525_v59 = vmax.f32 %v511_v51, %v518_v46  ;;  %v519_v62 = vld [vmem:[%s880_s20 + $0x28] sm:$0x7f]  ;;  %v546_v3 = vld [vmem:[%s895_s26 + $0x20] sm:$0x7f]  ;;  %v512_v4 = vmax.f32 %v498_v60, %v505_v61  ;;  %v573_v6 = vld [vmem:[%s913_s13 + $0x18] sm:$0x7f] }
  0x1d   : > { %v591_v47 = vmax.f32 %v577_v37, %v584_v32  ;;  %v592_v52 = vmax.f32 %v578_v42, %v585_v38  ;;  %v560_v8 = vld [vmem:[%s903_s29 + $0x20] sm:$0x7f]  ;;  %v533_v9 = vld [vmem:[%s886_s23 + $0x28] sm:$0x7f]  ;;  %v566_v10 = vmax.f32 %v552_v2, %v559_v55  ;;  %v499_v12 = vld [vmem:[%s868_s14 + $0x30] sm:$0x7f]  ;;  %v593_v15 = vmax.f32 %v579_v5, %v586_v0 }
  0x1e   : > { %v539_v7 = vmax.f32 %v525_v59, %v532_v56  ;;  %v526_v11 = vmax.f32 %v512_v4, %v519_v62  ;;  %v506_v13 = vld [vmem:[%s874_s17 + $0x30] sm:$0x7f]  ;;  %v587_v16 = vld [vmem:[%s924_s18 + $0x18] sm:$0x7f]  ;;  %v547_v18 = vld [vmem:[%s895_s26 + $0x28] sm:$0x7f] }
  0x1f   : > { %v605_v57 = vmax.f32 %v591_v47, %v598_v33  ;;  %v606_v63 = vmax.f32 %v592_v52, %v599_v48  ;;  %v520_v14 = vld [vmem:[%s880_s20 + $0x30] sm:$0x7f]  ;;  %v513_v19 = vmax.f32 %v499_v12, %v506_v13  ;;  %v580_v20 = vmax.f32 %v566_v10, %v573_v6  ;;  %v574_v21 = vld [vmem:[%s913_s13 + $0x20] sm:$0x7f]  ;;  %v601_v25 = vld [vmem:[%s930_s22 + $0x18] sm:$0x7f] }
  0x20   : > { %v553_v17 = vmax.f32 %v539_v7, %v546_v3  ;;  %v540_v22 = vmax.f32 %v526_v11, %v533_v9  ;;  %v534_v23 = vld [vmem:[%s886_s23 + $0x30] sm:$0x7f]  ;;  %v607_v24 = vmax.f32 %v593_v15, %v600_v1  ;;  %v561_v27 = vld [vmem:[%s903_s29 + $0x28] sm:$0x7f]  ;;  %v588_v30 = vld [vmem:[%s924_s18 + $0x20] sm:$0x7f] }
  0x21   : > { %612 = vst [vmem:[%s954_s27] sm:$0x7f] %v605_v57  ;;  %613 = vst [vmem:[%s954_s27 + $0x8] sm:$0x7f] %v606_v63  ;;  %v527_v28 = vmax.f32 %v513_v19, %v520_v14  ;;  %v594_v29 = vmax.f32 %v580_v20, %v587_v16  ;;  %v548_v32 = vld [vmem:[%s895_s26 + $0x30] sm:$0x7f] }
  0x22   : > { %v567_v26 = vmax.f32 %v553_v17, %v560_v8  ;;  %v554_v31 = vmax.f32 %v540_v22, %v547_v18  ;;  %614 = vst [vmem:[%s954_s27 + $0x10] sm:$0x7f] %v607_v24  ;;  %v575_v34 = vld [vmem:[%s913_s13 + $0x28] sm:$0x7f]  ;;  %v602_v37 = vld [vmem:[%s930_s22 + $0x20] sm:$0x7f] }
  0x23   : > { %v541_v35 = vmax.f32 %v527_v28, %v534_v23  ;;  %v608_v36 = vmax.f32 %v594_v29, %v601_v25  ;;  %v562_v39 = vld [vmem:[%s903_s29 + $0x30] sm:$0x7f]  ;;  %v589_v41 = vld [vmem:[%s924_s18 + $0x28] sm:$0x7f] }
  0x24   : > { %v581_v33 = vmax.f32 %v567_v26, %v574_v21  ;;  %v568_v38 = vmax.f32 %v554_v31, %v561_v27  ;;  %v576_v44 = vld [vmem:[%s913_s13 + $0x30] sm:$0x7f]  ;;  %v603_v46 = vld [vmem:[%s930_s22 + $0x28] sm:$0x7f] }
  0x25   : > { %v555_v42 = vmax.f32 %v541_v35, %v548_v32  ;;  %615 = vst [vmem:[%s954_s27 + $0x18] sm:$0x7f] %v608_v36  ;;  %v590_v49 = vld [vmem:[%s924_s18 + $0x30] sm:$0x7f] }
  0x26   : > { %v595_v40 = vmax.f32 %v581_v33, %v588_v30  ;;  %v582_v43 = vmax.f32 %v568_v38, %v575_v34  ;;  %v604_v52 = vld [vmem:[%s930_s22 + $0x30] sm:$0x7f] }
  0x27   : > { %v569_v47 = vmax.f32 %v555_v42, %v562_v39 }
  0x28   : > { %v609_v45 = vmax.f32 %v595_v40, %v602_v37  ;;  %v596_v48 = vmax.f32 %v582_v43, %v589_v41 }
  0x29   : > { %v583_v50 = vmax.f32 %v569_v47, %v576_v44 }
  0x2a   : > { %616 = vst [vmem:[%s954_s27 + $0x20] sm:$0x7f] %v609_v45  ;;  %v610_v51 = vmax.f32 %v596_v48, %v603_v46 }
  0x2b   : > { %v597_v53 = vmax.f32 %v583_v50, %v590_v49 }
  0x2c   : > { %617 = vst [vmem:[%s954_s27 + $0x28] sm:$0x7f] %v610_v51 }
  0x2d   : > { %v611_v54 = vmax.f32 %v597_v53, %v604_v52 }
  0x2f   : > { %618 = vst [vmem:[%s954_s27 + $0x30] sm:$0x7f] %v611_v54 }
  0x30 PF: > { %s19_s30 = sadd.s32 1, %s802_s30  }
  0x31   : > { %p16_p4 = scmp.ge.s32.totalorder %s19_s30, 4  }
  0x33   :  { %18 = sbr.rel (!%p16_p4) target bundleno = 1 (0x1), region = 110 }

// kernel: alexnet_conv_forward.8
= control target key start
LH: loop header
LB: loop body
LE: loop exit
PB: predicated region body
PF: predicated region fallthrough
CT: control target
= control target key end

     0   :  { %s4699_s1 = inlined_call_operand.vmem [shape: bf16[1664,256], index: 1, kind: input, shape index: {}]   ;;  %s4700_s0 = inlined_call_operand.vmem [shape: bf16[112,1664], index: 0, kind: input, shape index: {}]   ;;  %s4701_s2 = inlined_call_operand.vmem [shape: f32[1,256], index: 2, kind: input, shape index: {}]   ;;  %s4702_s3 = inlined_call_operand.vmem [shape: f32[112,256], index: 3, kind: output, shape index: {}]  }
   0x1   :  { %v2932_v0 = vld [vmem:[%s4699_s1 + $0x74] ss:$8 sps:$4 sm:$0xff]   ;;  %v2936_v2 = vld [vmem:[%s4699_s1 + $0x70] ss:$8 sps:$4 sm:$0xff]   ;;  %v2938_v4 = vld [vmem:[%s4699_s1 + $0x64] ss:$8 sps:$4 sm:$0xff]  }
   0x2   :  { %v2934_v1 = vld [vmem:[%s4699_s1 + $0x174] ss:$8 sps:$4 sm:$0xff]   ;;  %1835 = vmatprep.subr.bf16.mxu0 %v2932_v0  ;;  %v2937_v3 = vld [vmem:[%s4699_s1 + $0x170] ss:$8 sps:$4 sm:$0xff]   ;;  %v2940_v5 = vld [vmem:[%s4699_s1 + $0x164] ss:$8 sps:$4 sm:$0xff]  }
   0x3   :  { %1938 = vmatprep.subr.bf16.mxu1 %v2934_v1  ;;  %1836 = vmatpush1.bf16.msra.mxu0 %v2936_v2  ;;  %v2942_v6 = vld [vmem:[%s4699_s1 + $0x60] ss:$8 sps:$4 sm:$0xff]   ;;  %v2944_v8 = vld [vmem:[%s4699_s1 + $0x54] ss:$8 sps:$4 sm:$0xff]   ;;  %v2948_v10 = vld [vmem:[%s4699_s1 + $0x50] ss:$8 sps:$4 sm:$0xff]  }
   0x4   :  { %1939 = vmatpush1.bf16.msra.mxu1 %v2937_v3  ;;  %1837 = vmatprep.subr.bf16.mxu0 %v2938_v4  ;;  %v2943_v7 = vld [vmem:[%s4699_s1 + $0x160] ss:$8 sps:$4 sm:$0xff]   ;;  %v2946_v9 = vld [vmem:[%s4699_s1 + $0x154] ss:$8 sps:$4 sm:$0xff]   ;;  %v2949_v11 = vld [vmem:[%s4699_s1 + $0x150] ss:$8 sps:$4 sm:$0xff]  }
   0x5   :  { %1940 = vmatprep.subr.bf16.mxu1 %v2940_v5  ;;  %v2950_v12 = vld [vmem:[%s4699_s1 + $0x44] ss:$8 sps:$4 sm:$0xff]   ;;  %v2954_v14 = vld [vmem:[%s4699_s1 + $0x40] ss:$8 sps:$4 sm:$0xff]   ;;  %v2956_v16 = vld [vmem:[%s4699_s1 + $0x34] ss:$8 sps:$4 sm:$0xff]  }
   0x6   :  { %v2952_v13 = vld [vmem:[%s4699_s1 + $0x144] ss:$8 sps:$4 sm:$0xff]   ;;  %v2955_v15 = vld [vmem:[%s4699_s1 + $0x140] ss:$8 sps:$4 sm:$0xff]   ;;  %v2958_v17 = vld [vmem:[%s4699_s1 + $0x134] ss:$8 sps:$4 sm:$0xff]  }
   0x7   :  { %1838 = vmatpush1.bf16.msra.mxu0 %v2942_v6  ;;  %v2960_v18 = vld [vmem:[%s4699_s1 + $0x30] ss:$8 sps:$4 sm:$0xff]   ;;  %v2962_v20 = vld [vmem:[%s4699_s1 + $0x24] ss:$8 sps:$4 sm:$0xff]   ;;  %v2966_v22 = vld [vmem:[%s4699_s1 + $0x20] ss:$8 sps:$4 sm:$0xff]  }
   0x8   :  { %1941 = vmatpush1.bf16.msra.mxu1 %v2943_v7  ;;  %1839 = vmatprep.subr.bf16.mxu0 %v2944_v8  ;;  %v2961_v19 = vld [vmem:[%s4699_s1 + $0x130] ss:$8 sps:$4 sm:$0xff]   ;;  %v2964_v21 = vld [vmem:[%s4699_s1 + $0x124] ss:$8 sps:$4 sm:$0xff]   ;;  %v2967_v23 = vld [vmem:[%s4699_s1 + $0x120] ss:$8 sps:$4 sm:$0xff]  }
   0x9   :  { %1942 = vmatprep.subr.bf16.mxu1 %v2946_v9  ;;  %v2968_v24 = vld [vmem:[%s4699_s1 + $0x14] ss:$8 sps:$4 sm:$0xff]   ;;  %v2972_v26 = vld [vmem:[%s4699_s1 + $0x10] ss:$8 sps:$4 sm:$0xff]   ;;  %v2974_v28 = vld [vmem:[%s4699_s1 + $0x4] ss:$8 sps:$4 sm:$0xff]  }
   0xa   :  { %v2970_v25 = vld [vmem:[%s4699_s1 + $0x114] ss:$8 sps:$4 sm:$0xff]   ;;  %v2973_v27 = vld [vmem:[%s4699_s1 + $0x110] ss:$8 sps:$4 sm:$0xff]   ;;  %v2976_v29 = vld [vmem:[%s4699_s1 + $0x104] ss:$8 sps:$4 sm:$0xff]  }
   0xb   :  { %1840 = vmatpush1.bf16.msra.mxu0 %v2948_v10  ;;  %v2978_v30 = vld [vmem:[%s4699_s1] ss:$8 sps:$4 sm:$0xff]   ;;  %v2980_v32 = vld [vmem:[%s4699_s1 + $0xf4] ss:$8 sps:$4 sm:$0xff]   ;;  %v2984_v34 = vld [vmem:[%s4699_s1 + $0xf0] ss:$8 sps:$4 sm:$0xff]  }
   0xc   :  { %1943 = vmatpush1.bf16.msra.mxu1 %v2949_v11  ;;  %1841 = vmatprep.subr.bf16.mxu0 %v2950_v12  ;;  %v2979_v31 = vld [vmem:[%s4699_s1 + $0x100] ss:$8 sps:$4 sm:$0xff]   ;;  %v2982_v33 = vld [vmem:[%s4699_s1 + $0x1f4] ss:$8 sps:$4 sm:$0xff]   ;;  %v2985_v35 = vld [vmem:[%s4699_s1 + $0x1f0] ss:$8 sps:$4 sm:$0xff]  }
   0xd   :  { %1944 = vmatprep.subr.bf16.mxu1 %v2952_v13  ;;  %v2986_v36 = vld [vmem:[%s4699_s1 + $0xe4] ss:$8 sps:$4 sm:$0xff]   ;;  %v2990_v38 = vld [vmem:[%s4699_s1 + $0xe0] ss:$8 sps:$4 sm:$0xff]   ;;  %v2992_v40 = vld [vmem:[%s4699_s1 + $0xd4] ss:$8 sps:$4 sm:$0xff]  }
   0xe   :  { %v2988_v37 = vld [vmem:[%s4699_s1 + $0x1e4] ss:$8 sps:$4 sm:$0xff]   ;;  %v2991_v39 = vld [vmem:[%s4699_s1 + $0x1e0] ss:$8 sps:$4 sm:$0xff]   ;;  %v2994_v41 = vld [vmem:[%s4699_s1 + $0x1d4] ss:$8 sps:$4 sm:$0xff]  }
   0xf   :  { %1842 = vmatpush1.bf16.msra.mxu0 %v2954_v14  ;;  %v2996_v42 = vld [vmem:[%s4699_s1 + $0xd0] ss:$8 sps:$4 sm:$0xff]   ;;  %v2998_v44 = vld [vmem:[%s4699_s1 + $0xc4] ss:$8 sps:$4 sm:$0xff]   ;;  %v3002_v46 = vld [vmem:[%s4699_s1 + $0xc0] ss:$8 sps:$4 sm:$0xff]  }
  0x10   :  { %1945 = vmatpush1.bf16.msra.mxu1 %v2955_v15  ;;  %1843 = vmatprep.subr.bf16.mxu0 %v2956_v16  ;;  %v2997_v43 = vld [vmem:[%s4699_s1 + $0x1d0] ss:$8 sps:$4 sm:$0xff]   ;;  %v3000_v45 = vld [vmem:[%s4699_s1 + $0x1c4] ss:$8 sps:$4 sm:$0xff]   ;;  %v3003_v47 = vld [vmem:[%s4699_s1 + $0x1c0] ss:$8 sps:$4 sm:$0xff]  }
  0x11   :  { %1946 = vmatprep.subr.bf16.mxu1 %v2958_v17  ;;  %v3004_v48 = vld [vmem:[%s4699_s1 + $0xb4] ss:$8 sps:$4 sm:$0xff]   ;;  %v3030_v49 = vld [vmem:[%s4700_s0 + $0x4] ss:$52 sps:$4 sm:$0xff]   ;;  %v3033_v51 = vld [vmem:[%s4700_s0 + $0xc] ss:$52 sps:$4 sm:$0xff]  }
  0x12   :  { %v3006_v50 = vld [vmem:[%s4699_s1 + $0x1b4] ss:$8 sps:$4 sm:$0xff]   ;;  %1867 = vmatprep.mubr.bf16.mxu0 %v3030_v49  ;;  %v3008_v52 = vld [vmem:[%s4699_s1 + $0xb0] ss:$8 sps:$4 sm:$0xff]   ;;  %1970 = vmatprep.mubr.bf16.mxu1 %v3033_v51  ;;  %v3010_v54 = vld [vmem:[%s4699_s1 + $0xa4] ss:$8 sps:$4 sm:$0xff]  }
  0x13   :  { %1844 = vmatpush1.bf16.msra.mxu0 %v2960_v18  ;;  %v3009_v53 = vld [vmem:[%s4699_s1 + $0x1b0] ss:$8 sps:$4 sm:$0xff]   ;;  %v3012_v55 = vld [vmem:[%s4699_s1 + $0x1a4] ss:$8 sps:$4 sm:$0xff]   ;;  %v3014_v56 = vld [vmem:[%s4699_s1 + $0xa0] ss:$8 sps:$4 sm:$0xff]  }
  0x14   :  { %1947 = vmatpush1.bf16.msra.mxu1 %v2961_v19  ;;  %1845 = vmatprep.subr.bf16.mxu0 %v2962_v20  ;;  %v3015_v57 = vld [vmem:[%s4699_s1 + $0x1a0] ss:$8 sps:$4 sm:$0xff]   ;;  %v3016_v58 = vld [vmem:[%s4699_s1 + $0x94] ss:$8 sps:$4 sm:$0xff]   ;;  %v3020_v60 = vld [vmem:[%s4699_s1 + $0x90] ss:$8 sps:$4 sm:$0xff]  }
  0x15   :  { %1948 = vmatprep.subr.bf16.mxu1 %v2964_v21  ;;  %v3018_v59 = vld [vmem:[%s4699_s1 + $0x194] ss:$8 sps:$4 sm:$0xff]   ;;  %v3021_v61 = vld [vmem:[%s4699_s1 + $0x190] ss:$8 sps:$4 sm:$0xff]   ;;  %v3022_v62 = vld [vmem:[%s4699_s1 + $0x84] ss:$8 sps:$4 sm:$0xff]  }
  0x16   :  { %v3024_v63 = vld [vmem:[%s4699_s1 + $0x184] ss:$8 sps:$4 sm:$0xff]   ;;  %v3026_v0 = vld [vmem:[%s4699_s1 + $0x80] ss:$8 sps:$4 sm:$0xff]   ;;  %v3036_v2 = vld [vmem:[%s4699_s1 + $0x274] ss:$8 sps:$4 sm:$0xff]  }
  0x17   :  { %1846 = vmatpush1.bf16.msra.mxu0 %v2966_v22  ;;  %v3027_v1 = vld [vmem:[%s4699_s1 + $0x180] ss:$8 sps:$4 sm:$0xff]   ;;  %v3039_v3 = vld [vmem:[%s4699_s1 + $0x374] ss:$8 sps:$4 sm:$0xff]   ;;  %v3034_v6 = vld [vmem:[%s4699_s1 + $0x270] ss:$8 sps:$4 sm:$0xff]  }
  0x18   :  { %1949 = vmatpush1.bf16.msra.mxu1 %v2967_v23  ;;  %1847 = vmatprep.subr.bf16.mxu0 %v2968_v24  ;;  %v3028_v4 = vld [vmem:[%s4700_s0] ss:$52 sps:$4 sm:$0xff]   ;;  %v3031_v5 = vld [vmem:[%s4700_s0 + $0x8] ss:$52 sps:$4 sm:$0xff]   ;;  %v3037_v7 = vld [vmem:[%s4699_s1 + $0x370] ss:$8 sps:$4 sm:$0xff]  }
  0x19   :  { %1950 = vmatprep.subr.bf16.mxu1 %v2970_v25  ;;  %v3042_v8 = vld [vmem:[%s4699_s1 + $0x264] ss:$8 sps:$4 sm:$0xff]   ;;  %v3055_v11 = vld [vmem:[%s4700_s0 + $0x74] ss:$52 sps:$4 sm:$0xff]   ;;  %v3046_v16 = vld [vmem:[%s4699_s1 + $0x250] ss:$8 sps:$4 sm:$0xff]  }
  0x1a   :  { %v3045_v9 = vld [vmem:[%s4699_s1 + $0x364] ss:$8 sps:$4 sm:$0xff]   ;;  %v3040_v12 = vld [vmem:[%s4699_s1 + $0x260] ss:$8 sps:$4 sm:$0xff]   ;;  %v3048_v14 = vld [vmem:[%s4699_s1 + $0x254] ss:$8 sps:$4 sm:$0xff]  }
  0x1b   :  { %1848 = vmatpush1.bf16.msra.mxu0 %v2972_v26  ;;  %v3052_v10 = vld [vmem:[%s4700_s0 + $0x6c] ss:$52 sps:$4 sm:$0xff]   ;;  %v3051_v15 = vld [vmem:[%s4699_s1 + $0x354] ss:$8 sps:$4 sm:$0xff]   ;;  %v3063_v18 = vld [vmem:[%s4700_s0 + $0x70] ss:$52 sps:$4 sm:$0xff]  }
  0x1c   :  { %1951 = vmatpush1.bf16.msra.mxu1 %v2973_v27  ;;  %1849 = vmatprep.subr.bf16.mxu0 %v2974_v28  ;;  %v3043_v13 = vld [vmem:[%s4699_s1 + $0x360] ss:$8 sps:$4 sm:$0xff]   ;;  %v3049_v19 = vld [vmem:[%s4699_s1 + $0x350] ss:$8 sps:$4 sm:$0xff]   ;;  %v3059_v20 = vld [vmem:[%s4699_s1 + $0x244] ss:$8 sps:$4 sm:$0xff]  }
  0x1d   :  { %1952 = vmatprep.subr.bf16.mxu1 %v2976_v29  ;;  %v3054_v17 = vld [vmem:[%s4700_s0 + $0x68] ss:$52 sps:$4 sm:$0xff]   ;;  %v3062_v21 = vld [vmem:[%s4699_s1 + $0x344] ss:$8 sps:$4 sm:$0xff]   ;;  %v3064_v28 = vld [vmem:[%s4699_s1 + $0x230] ss:$8 sps:$4 sm:$0xff]  }
  0x1e   :  { %v3070_v22 = vld [vmem:[%s4700_s0 + $0xd4] ss:$52 sps:$4 sm:$0xff]   ;;  %v3073_v23 = vld [vmem:[%s4700_s0 + $0xdc] ss:$52 sps:$4 sm:$0xff]  }
  0x1f   :  { %1850 = vmatpush1.bf16.msra.mxu0 %v2978_v30  ;;  %v3057_v24 = vld [vmem:[%s4699_s1 + $0x240] ss:$8 sps:$4 sm:$0xff]   ;;  %v3066_v26 = vld [vmem:[%s4699_s1 + $0x234] ss:$8 sps:$4 sm:$0xff]   ;;  %v3072_v29 = vld [vmem:[%s4700_s0 + $0xd0] ss:$52 sps:$4 sm:$0xff]  }
  0x20   :  { %1953 = vmatpush1.bf16.msra.mxu1 %v2979_v31  ;;  %1851 = vmatprep.subr.bf16.mxu0 %v2980_v32  ;;  %v3060_v25 = vld [vmem:[%s4699_s1 + $0x340] ss:$8 sps:$4 sm:$0xff]   ;;  %v3069_v27 = vld [vmem:[%s4699_s1 + $0x334] ss:$8 sps:$4 sm:$0xff]   ;;  %v3081_v30 = vld [vmem:[%s4700_s0 + $0xd8] ss:$52 sps:$4 sm:$0xff]  }
  0x21   :  { %1954 = vmatprep.subr.bf16.mxu1 %v2982_v33  ;;  %v3067_v31 = vld [vmem:[%s4699_s1 + $0x330] ss:$8 sps:$4 sm:$0xff]   ;;  %v3077_v32 = vld [vmem:[%s4699_s1 + $0x224] ss:$8 sps:$4 sm:$0xff]   ;;  %v3096_v49 = vld [vmem:[%s4699_s1 + $0x300] ss:$8 sps:$4 sm:$0xff]  }
  0x22   :  { %v3080_v33 = vld [vmem:[%s4699_s1 + $0x324] ss:$8 sps:$4 sm:$0xff]   ;;  %v3105_v51 = vld [vmem:[%s4699_s1 + $0x3f4] ss:$8 sps:$4 sm:$0xff]  }
  0x23   :  { %1852 = vmatpush2.bf16.msra.mxu0 %v2984_v34  ;;  %v3088_v34 = vld [vmem:[%s4700_s0 + $0x13c] ss:$52 sps:$4 sm:$0xff]  }
  0x24   :  { %1955 = vmatpush2.bf16.msra.mxu1 %v2985_v35  ;;  %1853 = vmatprep.subr.bf16.mxu0 %v2986_v36  ;;  %v3091_v35 = vld [vmem:[%s4700_s0 + $0x144] ss:$52 sps:$4 sm:$0xff]   ;;  %v3075_v36 = vld [vmem:[%s4699_s1 + $0x220] ss:$8 sps:$4 sm:$0xff]  }
  0x25   :  { %1956 = vmatprep.subr.bf16.mxu1 %v2988_v37  ;;  %v3078_v37 = vld [vmem:[%s4699_s1 + $0x320] ss:$8 sps:$4 sm:$0xff]  }
  0x27   :  { %1854 = vmatpush2.bf16.msra.mxu0 %v2990_v38  ;;  %v3084_v38 = vld [vmem:[%s4699_s1 + $0x214] ss:$8 sps:$4 sm:$0xff]  }
  0x28   :  { %1957 = vmatpush2.bf16.msra.mxu1 %v2991_v39  ;;  %1855 = vmatprep.subr.bf16.mxu0 %v2992_v40  ;;  %v3087_v39 = vld [vmem:[%s4699_s1 + $0x314] ss:$8 sps:$4 sm:$0xff]   ;;  %v3082_v40 = vld [vmem:[%s4699_s1 + $0x210] ss:$8 sps:$4 sm:$0xff]  }
  0x29   :  { %1958 = vmatprep.subr.bf16.mxu1 %v2994_v41  ;;  %v3090_v41 = vld [vmem:[%s4700_s0 + $0x138] ss:$52 sps:$4 sm:$0xff]  }
  0x2b   :  { %1856 = vmatpush2.bf16.msra.mxu0 %v2996_v42  ;;  %v3099_v42 = vld [vmem:[%s4700_s0 + $0x140] ss:$52 sps:$4 sm:$0xff]  }
  0x2c   :  { %1959 = vmatpush2.bf16.msra.mxu1 %v2997_v43  ;;  %1857 = vmatprep.subr.bf16.mxu0 %v2998_v44  ;;  %v3085_v43 = vld [vmem:[%s4699_s1 + $0x310] ss:$8 sps:$4 sm:$0xff]   ;;  %v3095_v44 = vld [vmem:[%s4699_s1 + $0x204] ss:$8 sps:$4 sm:$0xff]  }
  0x2d   :  { %1960 = vmatprep.subr.bf16.mxu1 %v3000_v45  ;;  %v3098_v45 = vld [vmem:[%s4699_s1 + $0x304] ss:$8 sps:$4 sm:$0xff]  }
  0x2f   :  { %1858 = vmatpush2.bf16.msra.mxu0 %v3002_v46  ;;  %v3106_v46 = vld [vmem:[%s4700_s0 + $0x1a4] ss:$52 sps:$4 sm:$0xff]  }
  0x30   :  { %1961 = vmatpush2.bf16.msra.mxu1 %v3003_v47  ;;  %1859 = vmatprep.subr.bf16.mxu0 %v3004_v48  ;;  %v3109_v47 = vld [vmem:[%s4700_s0 + $0x1ac] ss:$52 sps:$4 sm:$0xff]  }
  0x31   :  { %1962 = vmatprep.subr.bf16.mxu1 %v3006_v50  ;;  %v3093_v48 = vld [vmem:[%s4699_s1 + $0x200] ss:$8 sps:$4 sm:$0xff]   ;;  %v3102_v50 = vld [vmem:[%s4699_s1 + $0x2f4] ss:$8 sps:$4 sm:$0xff]  }
  0x33   :  { %1860 = vmatpush2.bf16.msra.mxu0 %v3008_v52  ;;  %v3100_v52 = vld [vmem:[%s4699_s1 + $0x2f0] ss:$8 sps:$4 sm:$0xff]  }
  0x34   :  { %1963 = vmatpush2.bf16.msra.mxu1 %v3009_v53  ;;  %1861 = vmatprep.subr.bf16.mxu0 %v3010_v54  ;;  %v3108_v53 = vld [vmem:[%s4700_s0 + $0x1a0] ss:$52 sps:$4 sm:$0xff]   ;;  %v3117_v54 = vld [vmem:[%s4700_s0 + $0x1a8] ss:$52 sps:$4 sm:$0xff]  }
  0x35   :  { %1964 = vmatprep.subr.bf16.mxu1 %v3012_v55  ;;  %v3103_v55 = vld [vmem:[%s4699_s1 + $0x3f0] ss:$8 sps:$4 sm:$0xff]  }
  0x37   :  { %1862 = vmatpush2.bf16.msra.mxu0 %v3014_v56  ;;  %v3113_v56 = vld [vmem:[%s4699_s1 + $0x2e4] ss:$8 sps:$4 sm:$0xff]  }
  0x38   :  { %1965 = vmatpush2.bf16.msra.mxu1 %v3015_v57  ;;  %1863 = vmatprep.subr.bf16.mxu0 %v3016_v58  ;;  %v3116_v57 = vld [vmem:[%s4699_s1 + $0x3e4] ss:$8 sps:$4 sm:$0xff]  }
  0x39   :  { %1966 = vmatprep.subr.bf16.mxu1 %v3018_v59  ;;  %v3124_v58 = vld [vmem:[%s4700_s0 + $0x20c] ss:$52 sps:$4 sm:$0xff]   ;;  %v3127_v59 = vld [vmem:[%s4700_s0 + $0x214] ss:$52 sps:$4 sm:$0xff]  }
  0x3b   :  { %1864 = vmatpush2.bf16.msra.mxu0 %v3020_v60  ;;  %v3111_v60 = vld [vmem:[%s4699_s1 + $0x2e0] ss:$8 sps:$4 sm:$0xff]  }
  0x3c   :  { %1967 = vmatpush2.bf16.msra.mxu1 %v3021_v61  ;;  %1865 = vmatprep.subr.bf16.mxu0 %v3022_v62  ;;  %v3114_v61 = vld [vmem:[%s4699_s1 + $0x3e0] ss:$8 sps:$4 sm:$0xff]   ;;  %v3120_v62 = vld [vmem:[%s4699_s1 + $0x2d4] ss:$8 sps:$4 sm:$0xff]  }
  0x3d   :  { %1968 = vmatprep.subr.bf16.mxu1 %v3024_v63  ;;  %v3123_v63 = vld [vmem:[%s4699_s1 + $0x3d4] ss:$8 sps:$4 sm:$0xff]  }
  0x3f   :  { %1866 = vmatpush2.bf16.msra.mxu0 %v3026_v0  ;;  %v3118_v0 = vld [vmem:[%s4699_s1 + $0x2d0] ss:$8 sps:$4 sm:$0xff]  }
  0x40   :  { %1969 = vmatpush2.bf16.msra.mxu1 %v3027_v1  ;;  %2041 = vmatprep.subr.bf16.mxu0 %v3036_v2  ;;  %v3121_v1 = vld [vmem:[%s4699_s1 + $0x3d0] ss:$8 sps:$4 sm:$0xff]   ;;  %v3126_v2 = vld [vmem:[%s4700_s0 + $0x208] ss:$52 sps:$4 sm:$0xff]  }
  0x41   :  { %2144 = vmatprep.subr.bf16.mxu1 %v3039_v3  ;;  %v3135_v3 = vld [vmem:[%s4700_s0 + $0x210] ss:$52 sps:$4 sm:$0xff]  }
  0x42   :  { %1868 = vmatmul.mubr.bf16.vlgmr.msra.gmra.mxu0 %v3028_v4  ;;  %v3131_v4 = vld [vmem:[%s4699_s1 + $0x2c4] ss:$8 sps:$4 sm:$0xff]  }
  0x43   :  { %1971 = vmatmul.mubr.bf16.vlgmr.msra.gmra.mxu1 %v3031_v5  ;;  %2042 = vmatpush1.bf16.msra.mxu0 %v3034_v6  ;;  %v3134_v5 = vld [vmem:[%s4699_s1 + $0x3c4] ss:$8 sps:$4 sm:$0xff]   ;;  %v3142_v6 = vld [vmem:[%s4700_s0 + $0x274] ss:$52 sps:$4 sm:$0xff]  }
  0x44   :  { %2145 = vmatpush1.bf16.msra.mxu1 %v3037_v7  ;;  %2043 = vmatprep.subr.bf16.mxu0 %v3042_v8  ;;  %v3145_v7 = vld [vmem:[%s4700_s0 + $0x27c] ss:$52 sps:$4 sm:$0xff]   ;;  %v3129_v8 = vld [vmem:[%s4699_s1 + $0x2c0] ss:$8 sps:$4 sm:$0xff]  }
  0x45   :  { %2146 = vmatprep.subr.bf16.mxu1 %v3045_v9  ;;  %1877 = vmatprep.mubr.bf16.mxu0 %v3052_v10  ;;  %v3132_v9 = vld [vmem:[%s4699_s1 + $0x3c0] ss:$8 sps:$4 sm:$0xff]   ;;  %v3138_v10 = vld [vmem:[%s4699_s1 + $0x2b4] ss:$8 sps:$4 sm:$0xff]  }
  0x46   :  { %1980 = vmatprep.mubr.bf16.mxu1 %v3055_v11  ;;  %v3141_v11 = vld [vmem:[%s4699_s1 + $0x3b4] ss:$8 sps:$4 sm:$0xff]  }
  0x47   :  { %2044 = vmatpush1.bf16.msra.mxu0 %v3040_v12  ;;  %v3136_v12 = vld [vmem:[%s4699_s1 + $0x2b0] ss:$8 sps:$4 sm:$0xff]  }
  0x48   :  { %2147 = vmatpush1.bf16.msra.mxu1 %v3043_v13  ;;  %2045 = vmatprep.subr.bf16.mxu0 %v3048_v14  ;;  %v3139_v13 = vld [vmem:[%s4699_s1 + $0x3b0] ss:$8 sps:$4 sm:$0xff]  }
  0x49   :  { %2148 = vmatprep.subr.bf16.mxu1 %v3051_v15  ;;  %v3144_v14 = vld [vmem:[%s4700_s0 + $0x270] ss:$52 sps:$4 sm:$0xff]   ;;  %v3153_v15 = vld [vmem:[%s4700_s0 + $0x278] ss:$52 sps:$4 sm:$0xff]  }
  0x4a   :  { %1878 = vmatmul.mubr.bf16.gmra.mxu0 %v3054_v17  ;;  %v3152_v17 = vld [vmem:[%s4699_s1 + $0x3a4] ss:$8 sps:$4 sm:$0xff]  }
  0x4b   :  { %1981 = vmatmul.mubr.bf16.gmra.mxu1 %v3063_v18  ;;  %2046 = vmatpush1.bf16.msra.mxu0 %v3046_v16  ;;  %v3149_v16 = vld [vmem:[%s4699_s1 + $0x2a4] ss:$8 sps:$4 sm:$0xff]   ;;  %v3168_v18 = vld [vmem:[%s4700_s0 + $0x14] ss:$52 sps:$4 sm:$0xff]  }
  0x4c   :  { %2149 = vmatpush1.bf16.msra.mxu1 %v3049_v19  ;;  %2047 = vmatprep.subr.bf16.mxu0 %v3059_v20  ;;  %v3171_v19 = vld [vmem:[%s4700_s0 + $0x1c] ss:$52 sps:$4 sm:$0xff]   ;;  %v3147_v20 = vld [vmem:[%s4699_s1 + $0x2a0] ss:$8 sps:$4 sm:$0xff]  }
  0x4d   :  { %2150 = vmatprep.subr.bf16.mxu1 %v3062_v21  ;;  %1887 = vmatprep.mubr.bf16.mxu0 %v3070_v22  ;;  %v3150_v21 = vld [vmem:[%s4699_s1 + $0x3a0] ss:$8 sps:$4 sm:$0xff]   ;;  %v3156_v22 = vld [vmem:[%s4699_s1 + $0x294] ss:$8 sps:$4 sm:$0xff]  }
  0x4e   :  { %1990 = vmatprep.mubr.bf16.mxu1 %v3073_v23  ;;  %v3159_v23 = vld [vmem:[%s4699_s1 + $0x394] ss:$8 sps:$4 sm:$0xff]  }
  0x4f   :  { %2048 = vmatpush1.bf16.msra.mxu0 %v3057_v24  ;;  %v3154_v24 = vld [vmem:[%s4699_s1 + $0x290] ss:$8 sps:$4 sm:$0xff]  }
  0x50   :  { %2151 = vmatpush1.bf16.msra.mxu1 %v3060_v25  ;;  %2049 = vmatprep.subr.bf16.mxu0 %v3066_v26  ;;  %v3157_v25 = vld [vmem:[%s4699_s1 + $0x390] ss:$8 sps:$4 sm:$0xff]   ;;  %v3162_v26 = vld [vmem:[%s4699_s1 + $0x284] ss:$8 sps:$4 sm:$0xff]  }
  0x51   :  { %2152 = vmatprep.subr.bf16.mxu1 %v3069_v27  ;;  %v3165_v27 = vld [vmem:[%s4699_s1 + $0x384] ss:$8 sps:$4 sm:$0xff]  }
  0x52   :  { %1888 = vmatmul.mubr.bf16.gmra.mxu0 %v3072_v29  ;;  %v3163_v29 = vld [vmem:[%s4699_s1 + $0x380] ss:$8 sps:$4 sm:$0xff]  }
  0x53   :  { %1991 = vmatmul.mubr.bf16.gmra.mxu1 %v3081_v30  ;;  %2050 = vmatpush1.bf16.msra.mxu0 %v3064_v28  ;;  %v3160_v28 = vld [vmem:[%s4699_s1 + $0x280] ss:$8 sps:$4 sm:$0xff]   ;;  %v3174_v30 = vld [vmem:[%s4699_s1 + $0x474] ss:$8 sps:$4 sm:$0xff]  }
  0x54   :  { %2153 = vmatpush1.bf16.msra.mxu1 %v3067_v31  ;;  %2051 = vmatprep.subr.bf16.mxu0 %v3077_v32  ;;  %v3177_v31 = vld [vmem:[%s4699_s1 + $0x574] ss:$8 sps:$4 sm:$0xff]   ;;  %v3166_v32 = vld [vmem:[%s4700_s0 + $0x10] ss:$52 sps:$4 sm:$0xff]  }
  0x55   :  { %2154 = vmatprep.subr.bf16.mxu1 %v3080_v33  ;;  %1897 = vmatprep.mubr.bf16.mxu0 %v3088_v34  ;;  %v3169_v33 = vld [vmem:[%s4700_s0 + $0x18] ss:$52 sps:$4 sm:$0xff]  }
  0x56   :  { %2000 = vmatprep.mubr.bf16.mxu1 %v3091_v35  ;;  %v3172_v34 = vld [vmem:[%s4699_s1 + $0x470] ss:$8 sps:$4 sm:$0xff]  }
  0x57   :  { %2052 = vmatpush1.bf16.msra.mxu0 %v3075_v36  ;;  %v3175_v35 = vld [vmem:[%s4699_s1 + $0x570] ss:$8 sps:$4 sm:$0xff]   ;;  %v3180_v36 = vld [vmem:[%s4699_s1 + $0x464] ss:$8 sps:$4 sm:$0xff]  }
  0x58   :  { %2155 = vmatpush1.bf16.msra.mxu1 %v3078_v37  ;;  %2053 = vmatprep.subr.bf16.mxu0 %v3084_v38  ;;  %v3183_v37 = vld [vmem:[%s4699_s1 + $0x564] ss:$8 sps:$4 sm:$0xff]   ;;  %v3184_v38 = vld [vmem:[%s4700_s0 + $0x7c] ss:$52 sps:$4 sm:$0xff]  }
  0x59   :  { %2156 = vmatprep.subr.bf16.mxu1 %v3087_v39  ;;  %v3193_v39 = vld [vmem:[%s4700_s0 + $0x84] ss:$52 sps:$4 sm:$0xff]  }
  0x5a   :  { %1898 = vmatmul.mubr.bf16.gmra.mxu0 %v3090_v41  ;;  %v3181_v41 = vld [vmem:[%s4699_s1 + $0x560] ss:$8 sps:$4 sm:$0xff]  }
  0x5b   :  { %2001 = vmatmul.mubr.bf16.gmra.mxu1 %v3099_v42  ;;  %2054 = vmatpush1.bf16.msra.mxu0 %v3082_v40  ;;  %v3178_v40 = vld [vmem:[%s4699_s1 + $0x460] ss:$8 sps:$4 sm:$0xff]   ;;  %v3189_v42 = vld [vmem:[%s4699_s1 + $0x454] ss:$8 sps:$4 sm:$0xff]  }
  0x5c   :  { %2157 = vmatpush1.bf16.msra.mxu1 %v3085_v43  ;;  %2055 = vmatprep.subr.bf16.mxu0 %v3095_v44  ;;  %v3192_v43 = vld [vmem:[%s4699_s1 + $0x554] ss:$8 sps:$4 sm:$0xff]   ;;  %v3186_v44 = vld [vmem:[%s4700_s0 + $0x78] ss:$52 sps:$4 sm:$0xff]  }
  0x5d   :  { %2158 = vmatprep.subr.bf16.mxu1 %v3098_v45  ;;  %1907 = vmatprep.mubr.bf16.mxu0 %v3106_v46  ;;  %v3187_v45 = vld [vmem:[%s4699_s1 + $0x450] ss:$8 sps:$4 sm:$0xff]  }
  0x5e   :  { %2010 = vmatprep.mubr.bf16.mxu1 %v3109_v47  ;;  %v3190_v46 = vld [vmem:[%s4699_s1 + $0x550] ss:$8 sps:$4 sm:$0xff]   ;;  %v3195_v47 = vld [vmem:[%s4700_s0 + $0x80] ss:$52 sps:$4 sm:$0xff]  }
  0x5f   :  { %2056 = vmatpush1.bf16.msra.mxu0 %v3093_v48  ;;  %v3198_v48 = vld [vmem:[%s4699_s1 + $0x444] ss:$8 sps:$4 sm:$0xff]  }
  0x60   :  { %2159 = vmatpush1.bf16.msra.mxu1 %v3096_v49  ;;  %2057 = vmatprep.subr.bf16.mxu0 %v3102_v50  ;;  %v3201_v49 = vld [vmem:[%s4699_s1 + $0x544] ss:$8 sps:$4 sm:$0xff]  }
  0x61   :  { %2160 = vmatprep.subr.bf16.mxu1 %v3105_v51  ;;  %v3202_v50 = vld [vmem:[%s4700_s0 + $0xe4] ss:$52 sps:$4 sm:$0xff]   ;;  %v3211_v51 = vld [vmem:[%s4700_s0 + $0xec] ss:$52 sps:$4 sm:$0xff]  }
  0x62   :  { %1908 = vmatmul.mubr.bf16.gmra.mxu0 %v3108_v53  ;;  %v3199_v53 = vld [vmem:[%s4699_s1 + $0x540] ss:$8 sps:$4 sm:$0xff]  }
  0x63   :  { %2011 = vmatmul.mubr.bf16.gmra.mxu1 %v3117_v54  ;;  %2058 = vmatpush2.bf16.msra.mxu0 %v3100_v52  ;;  %v3196_v52 = vld [vmem:[%s4699_s1 + $0x440] ss:$8 sps:$4 sm:$0xff]   ;;  %v3207_v54 = vld [vmem:[%s4699_s1 + $0x434] ss:$8 sps:$4 sm:$0xff]  }
  0x64   :  { %2161 = vmatpush2.bf16.msra.mxu1 %v3103_v55  ;;  %2059 = vmatprep.subr.bf16.mxu0 %v3113_v56  ;;  %v3210_v55 = vld [vmem:[%s4699_s1 + $0x534] ss:$8 sps:$4 sm:$0xff]  }
  0x65   :  { %2162 = vmatprep.subr.bf16.mxu1 %v3116_v57  ;;  %1917 = vmatprep.mubr.bf16.mxu0 %v3124_v58  ;;  %v3204_v56 = vld [vmem:[%s4700_s0 + $0xe0] ss:$52 sps:$4 sm:$0xff]   ;;  %v3205_v57 = vld [vmem:[%s4699_s1 + $0x430] ss:$8 sps:$4 sm:$0xff]  }
  0x66   :  { %2020 = vmatprep.mubr.bf16.mxu1 %v3127_v59  ;;  %v3208_v58 = vld [vmem:[%s4699_s1 + $0x530] ss:$8 sps:$4 sm:$0xff]   ;;  %v3213_v59 = vld [vmem:[%s4700_s0 + $0xe8] ss:$52 sps:$4 sm:$0xff]  }
  0x67   :  { %2060 = vmatpush2.bf16.msra.mxu0 %v3111_v60  ;;  %v3216_v60 = vld [vmem:[%s4699_s1 + $0x424] ss:$8 sps:$4 sm:$0xff]  }
  0x68   :  { %2163 = vmatpush2.bf16.msra.mxu1 %v3114_v61  ;;  %2061 = vmatprep.subr.bf16.mxu0 %v3120_v62  ;;  %v3219_v61 = vld [vmem:[%s4699_s1 + $0x524] ss:$8 sps:$4 sm:$0xff]  }
  0x69   :  { %2164 = vmatprep.subr.bf16.mxu1 %v3123_v63  ;;  %v3220_v62 = vld [vmem:[%s4700_s0 + $0x14c] ss:$52 sps:$4 sm:$0xff]   ;;  %v3229_v63 = vld [vmem:[%s4700_s0 + $0x154] ss:$52 sps:$4 sm:$0xff]  }
  0x6a   :  { %1918 = vmatmul.mubr.bf16.gmra.mxu0 %v3126_v2  ;;  %v3225_v2 = vld [vmem:[%s4699_s1 + $0x414] ss:$8 sps:$4 sm:$0xff]  }
  0x6b   :  { %2021 = vmatmul.mubr.bf16.gmra.mxu1 %v3135_v3  ;;  %2062 = vmatpush2.bf16.msra.mxu0 %v3118_v0  ;;  %v3214_v0 = vld [vmem:[%s4699_s1 + $0x420] ss:$8 sps:$4 sm:$0xff]   ;;  %v3228_v3 = vld [vmem:[%s4699_s1 + $0x514] ss:$8 sps:$4 sm:$0xff]  }
  0x6c   :  { %2165 = vmatpush2.bf16.msra.mxu1 %v3121_v1  ;;  %2063 = vmatprep.subr.bf16.mxu0 %v3131_v4  ;;  %v3217_v1 = vld [vmem:[%s4699_s1 + $0x520] ss:$8 sps:$4 sm:$0xff]  }
  0x6d   :  { %2166 = vmatprep.subr.bf16.mxu1 %v3134_v5  ;;  %1927 = vmatprep.mubr.bf16.mxu0 %v3142_v6  ;;  %v3222_v4 = vld [vmem:[%s4700_s0 + $0x148] ss:$52 sps:$4 sm:$0xff]   ;;  %v3223_v5 = vld [vmem:[%s4699_s1 + $0x410] ss:$8 sps:$4 sm:$0xff]  }
  0x6e   :  { %2030 = vmatprep.mubr.bf16.mxu1 %v3145_v7  ;;  %v3226_v6 = vld [vmem:[%s4699_s1 + $0x510] ss:$8 sps:$4 sm:$0xff]  }
  0x6f   :  { %2064 = vmatpush2.bf16.msra.mxu0 %v3129_v8  ;;  %v3231_v7 = vld [vmem:[%s4700_s0 + $0x150] ss:$52 sps:$4 sm:$0xff]  }
  0x70   :  { %2167 = vmatpush2.bf16.msra.mxu1 %v3132_v9  ;;  %2065 = vmatprep.subr.bf16.mxu0 %v3138_v10  ;;  %v3234_v8 = vld [vmem:[%s4699_s1 + $0x404] ss:$8 sps:$4 sm:$0xff]   ;;  %v3238_v10 = vld [vmem:[%s4700_s0 + $0x1b4] ss:$52 sps:$4 sm:$0xff]  }
  0x71   :  { %2168 = vmatprep.subr.bf16.mxu1 %v3141_v11  ;;  %v3237_v9 = vld [vmem:[%s4699_s1 + $0x504] ss:$8 sps:$4 sm:$0xff]   ;;  %v3247_v11 = vld [vmem:[%s4700_s0 + $0x1bc] ss:$52 sps:$4 sm:$0xff]  }
  0x72   :  { %1928 = vmatmul.mubr.bf16.gmra.mxu0 %v3144_v14  ;;  %v3243_v14 = vld [vmem:[%s4699_s1 + $0x4f4] ss:$8 sps:$4 sm:$0xff]  }
  0x73   :  { %2031 = vmatmul.mubr.bf16.gmra.mxu1 %v3153_v15  ;;  %2066 = vmatpush2.bf16.msra.mxu0 %v3136_v12  ;;  %v3232_v12 = vld [vmem:[%s4699_s1 + $0x400] ss:$8 sps:$4 sm:$0xff]   ;;  %v3246_v15 = vld [vmem:[%s4699_s1 + $0x5f4] ss:$8 sps:$4 sm:$0xff]  }
  0x74   :  { %2169 = vmatpush2.bf16.msra.mxu1 %v3139_v13  ;;  %2067 = vmatprep.subr.bf16.mxu0 %v3149_v16  ;;  %v3235_v13 = vld [vmem:[%s4699_s1 + $0x500] ss:$8 sps:$4 sm:$0xff]   ;;  %v3240_v16 = vld [vmem:[%s4700_s0 + $0x1b0] ss:$52 sps:$4 sm:$0xff]  }
  0x75   :  { %2170 = vmatprep.subr.bf16.mxu1 %v3152_v17  ;;  %2073 = vmatprep.mubr.bf16.mxu0 %v3168_v18  ;;  %v3241_v17 = vld [vmem:[%s4699_s1 + $0x4f0] ss:$8 sps:$4 sm:$0xff]  }
  0x76   :  { %2176 = vmatprep.mubr.bf16.mxu1 %v3171_v19  ;;  %v3244_v18 = vld [vmem:[%s4699_s1 + $0x5f0] ss:$8 sps:$4 sm:$0xff]  }
  0x77   :  { %2068 = vmatpush2.bf16.msra.mxu0 %v3147_v20  ;;  %v3249_v19 = vld [vmem:[%s4700_s0 + $0x1b8] ss:$52 sps:$4 sm:$0xff]  }
  0x78   :  { %2171 = vmatpush2.bf16.msra.mxu1 %v3150_v21  ;;  %2069 = vmatprep.subr.bf16.mxu0 %v3156_v22  ;;  %v3252_v20 = vld [vmem:[%s4699_s1 + $0x4e4] ss:$8 sps:$4 sm:$0xff]   ;;  %v3256_v22 = vld [vmem:[%s4700_s0 + $0x21c] ss:$52 sps:$4 sm:$0xff]  }
  0x79   :  { %2172 = vmatprep.subr.bf16.mxu1 %v3159_v23  ;;  %v3255_v21 = vld [vmem:[%s4699_s1 + $0x5e4] ss:$8 sps:$4 sm:$0xff]  }
  0x7a   :  { %v3265_v23 = vld [vmem:[%s4700_s0 + $0x224] ss:$52 sps:$4 sm:$0xff]  }
  0x7b   :  { %2070 = vmatpush2.bf16.msra.mxu0 %v3154_v24  ;;  %v3250_v24 = vld [vmem:[%s4699_s1 + $0x4e0] ss:$8 sps:$4 sm:$0xff]  }
  0x7c   :  { %2173 = vmatpush2.bf16.msra.mxu1 %v3157_v25  ;;  %2071 = vmatprep.subr.bf16.mxu0 %v3162_v26  ;;  %v3253_v25 = vld [vmem:[%s4699_s1 + $0x5e0] ss:$8 sps:$4 sm:$0xff]   ;;  %v3261_v26 = vld [vmem:[%s4699_s1 + $0x4d4] ss:$8 sps:$4 sm:$0xff]  }
  0x7d   :  { %2174 = vmatprep.subr.bf16.mxu1 %v3165_v27  ;;  %v3258_v27 = vld [vmem:[%s4700_s0 + $0x218] ss:$52 sps:$4 sm:$0xff]  }
  0x7f   :  { %2072 = vmatpush2.bf16.msra.mxu0 %v3160_v28  ;;  %v3264_v28 = vld [vmem:[%s4699_s1 + $0x5d4] ss:$8 sps:$4 sm:$0xff]  }
  0x80   :  { %2175 = vmatpush2.bf16.msra.mxu1 %v3163_v29  ;;  %2247 = vmatprep.subr.bf16.mxu0 %v3174_v30  ;;  %v3259_v29 = vld [vmem:[%s4699_s1 + $0x4d0] ss:$8 sps:$4 sm:$0xff]  }
  0x81   :  { %2350 = vmatprep.subr.bf16.mxu1 %v3177_v31  ;;  %v3262_v30 = vld [vmem:[%s4699_s1 + $0x5d0] ss:$8 sps:$4 sm:$0xff]   ;;  %v3267_v31 = vld [vmem:[%s4700_s0 + $0x220] ss:$52 sps:$4 sm:$0xff]  }
  0x82   :  { %2074 = vmatmul.mubr.bf16.vlgmr.msra.gmra.mxu0 %v3166_v32  ;;  %v3270_v32 = vld [vmem:[%s4699_s1 + $0x4c4] ss:$8 sps:$4 sm:$0xff]  }
  0x83   :  { %2177 = vmatmul.mubr.bf16.vlgmr.msra.gmra.mxu1 %v3169_v33  ;;  %2248 = vmatpush1.bf16.msra.mxu0 %v3172_v34  ;;  %v3273_v33 = vld [vmem:[%s4699_s1 + $0x5c4] ss:$8 sps:$4 sm:$0xff]  }
  0x84   :  { %2351 = vmatpush1.bf16.msra.mxu1 %v3175_v35  ;;  %2249 = vmatprep.subr.bf16.mxu0 %v3180_v36  ;;  %v3274_v34 = vld [vmem:[%s4700_s0 + $0x284] ss:$52 sps:$4 sm:$0xff]   ;;  %v3283_v35 = vld [vmem:[%s4700_s0 + $0x28c] ss:$52 sps:$4 sm:$0xff]  }
  0x85   :  { %2352 = vmatprep.subr.bf16.mxu1 %v3183_v37  ;;  %2083 = vmatprep.mubr.bf16.mxu0 %v3184_v38  ;;  %v3268_v36 = vld [vmem:[%s4699_s1 + $0x4c0] ss:$8 sps:$4 sm:$0xff]   ;;  %v3279_v38 = vld [vmem:[%s4699_s1 + $0x4b4] ss:$8 sps:$4 sm:$0xff]  }
  0x86   :  { %2186 = vmatprep.mubr.bf16.mxu1 %v3193_v39  ;;  %v3271_v37 = vld [vmem:[%s4699_s1 + $0x5c0] ss:$8 sps:$4 sm:$0xff]   ;;  %v3282_v39 = vld [vmem:[%s4699_s1 + $0x5b4] ss:$8 sps:$4 sm:$0xff]  }
  0x87   :  { %2250 = vmatpush1.bf16.msra.mxu0 %v3178_v40  ;;  %v3276_v40 = vld [vmem:[%s4700_s0 + $0x280] ss:$52 sps:$4 sm:$0xff]  }
  0x88   :  { %2353 = vmatpush1.bf16.msra.mxu1 %v3181_v41  ;;  %2251 = vmatprep.subr.bf16.mxu0 %v3189_v42  ;;  %v3277_v41 = vld [vmem:[%s4699_s1 + $0x4b0] ss:$8 sps:$4 sm:$0xff]   ;;  %v3285_v42 = vld [vmem:[%s4700_s0 + $0x288] ss:$52 sps:$4 sm:$0xff]  }
  0x89   :  { %2354 = vmatprep.subr.bf16.mxu1 %v3192_v43  ;;  %v3280_v43 = vld [vmem:[%s4699_s1 + $0x5b0] ss:$8 sps:$4 sm:$0xff]  }
  0x8a   :  { %2084 = vmatmul.mubr.bf16.gmra.mxu0 %v3186_v44  ;;  %v3288_v44 = vld [vmem:[%s4699_s1 + $0x4a4] ss:$8 sps:$4 sm:$0xff]  }
  0x8b   :  { %2187 = vmatmul.mubr.bf16.gmra.mxu1 %v3195_v47  ;;  %2252 = vmatpush1.bf16.msra.mxu0 %v3187_v45  ;;  %v3291_v45 = vld [vmem:[%s4699_s1 + $0x5a4] ss:$8 sps:$4 sm:$0xff]  }
  0x8c   :  { %2355 = vmatpush1.bf16.msra.mxu1 %v3190_v46  ;;  %2253 = vmatprep.subr.bf16.mxu0 %v3198_v48  ;;  %v3306_v46 = vld [vmem:[%s4700_s0 + $0x24] ss:$52 sps:$4 sm:$0xff]   ;;  %v3309_v47 = vld [vmem:[%s4700_s0 + $0x2c] ss:$52 sps:$4 sm:$0xff]  }
  0x8d   :  { %2356 = vmatprep.subr.bf16.mxu1 %v3201_v49  ;;  %2093 = vmatprep.mubr.bf16.mxu0 %v3202_v50  ;;  %v3286_v48 = vld [vmem:[%s4699_s1 + $0x4a0] ss:$8 sps:$4 sm:$0xff]   ;;  %v3294_v50 = vld [vmem:[%s4699_s1 + $0x494] ss:$8 sps:$4 sm:$0xff]  }
  0x8e   :  { %2196 = vmatprep.mubr.bf16.mxu1 %v3211_v51  ;;  %v3289_v49 = vld [vmem:[%s4699_s1 + $0x5a0] ss:$8 sps:$4 sm:$0xff]   ;;  %v3297_v51 = vld [vmem:[%s4699_s1 + $0x594] ss:$8 sps:$4 sm:$0xff]  }
  0x8f   :  { %2254 = vmatpush1.bf16.msra.mxu0 %v3196_v52  ;;  %v3292_v52 = vld [vmem:[%s4699_s1 + $0x490] ss:$8 sps:$4 sm:$0xff]  }
  0x90   :  { %2357 = vmatpush1.bf16.msra.mxu1 %v3199_v53  ;;  %2255 = vmatprep.subr.bf16.mxu0 %v3207_v54  ;;  %v3295_v53 = vld [vmem:[%s4699_s1 + $0x590] ss:$8 sps:$4 sm:$0xff]   ;;  %v3300_v54 = vld [vmem:[%s4699_s1 + $0x484] ss:$8 sps:$4 sm:$0xff]  }
  0x91   :  { %2358 = vmatprep.subr.bf16.mxu1 %v3210_v55  ;;  %v3303_v55 = vld [vmem:[%s4699_s1 + $0x584] ss:$8 sps:$4 sm:$0xff]  }
  0x92   :  { %2094 = vmatmul.mubr.bf16.gmra.mxu0 %v3204_v56  ;;  %v3298_v56 = vld [vmem:[%s4699_s1 + $0x480] ss:$8 sps:$4 sm:$0xff]  }
  0x93   :  { %2197 = vmatmul.mubr.bf16.gmra.mxu1 %v3213_v59  ;;  %2256 = vmatpush1.bf16.msra.mxu0 %v3205_v57  ;;  %v3301_v57 = vld [vmem:[%s4699_s1 + $0x580] ss:$8 sps:$4 sm:$0xff]  }
  0x94   :  { %2359 = vmatpush1.bf16.msra.mxu1 %v3208_v58  ;;  %2257 = vmatprep.subr.bf16.mxu0 %v3216_v60  ;;  %v3312_v58 = vld [vmem:[%s4699_s1 + $0x674] ss:$8 sps:$4 sm:$0xff]  }
  0x95   :  { %2360 = vmatprep.subr.bf16.mxu1 %v3219_v61  ;;  %2103 = vmatprep.mubr.bf16.mxu0 %v3220_v62  ;;  %v3304_v59 = vld [vmem:[%s4700_s0 + $0x20] ss:$52 sps:$4 sm:$0xff]   ;;  %v3307_v60 = vld [vmem:[%s4700_s0 + $0x28] ss:$52 sps:$4 sm:$0xff]   ;;  %v3310_v61 = vld [vmem:[%s4699_s1 + $0x670] ss:$8 sps:$4 sm:$0xff]  }
  0x96   :  { %2206 = vmatprep.mubr.bf16.mxu1 %v3229_v63  ;;  %v3313_v62 = vld [vmem:[%s4700_s0 + $0x8c] ss:$52 sps:$4 sm:$0xff]   ;;  %v3315_v63 = vld [vmem:[%s4700_s0 + $0x94] ss:$52 sps:$4 sm:$0xff]  }
  0x97   :  { %2258 = vmatpush1.bf16.msra.mxu0 %v3214_v0  ;;  %v3319_v0 = vld [vmem:[%s4699_s1 + $0x664] ss:$8 sps:$4 sm:$0xff]  }
  0x98   :  { %2361 = vmatpush1.bf16.msra.mxu1 %v3217_v1  ;;  %2259 = vmatprep.subr.bf16.mxu0 %v3225_v2  ;;  %v3317_v1 = vld [vmem:[%s4699_s1 + $0x660] ss:$8 sps:$4 sm:$0xff]  }
  0x99   :  { %2362 = vmatprep.subr.bf16.mxu1 %v3228_v3  ;;  %v3320_v2 = vld [vmem:[%s4700_s0 + $0x88] ss:$52 sps:$4 sm:$0xff]  }
  0x9a   :  { %2104 = vmatmul.mubr.bf16.gmra.mxu0 %v3222_v4  ;;  %v3324_v3 = vld [vmem:[%s4699_s1 + $0x654] ss:$8 sps:$4 sm:$0xff]   ;;  %v3321_v4 = vld [vmem:[%s4700_s0 + $0x90] ss:$52 sps:$4 sm:$0xff]  }
  0x9b   :  { %2207 = vmatmul.mubr.bf16.gmra.mxu1 %v3231_v7  ;;  %2260 = vmatpush1.bf16.msra.mxu0 %v3223_v5  ;;  %v3325_v5 = vld [vmem:[%s4700_s0 + $0xf4] ss:$52 sps:$4 sm:$0xff]   ;;  %v3322_v7 = vld [vmem:[%s4699_s1 + $0x650] ss:$8 sps:$4 sm:$0xff]  }
  0x9c   :  { %2363 = vmatpush1.bf16.msra.mxu1 %v3226_v6  ;;  %2261 = vmatprep.subr.bf16.mxu0 %v3234_v8  ;;  %v3327_v6 = vld [vmem:[%s4700_s0 + $0xfc] ss:$52 sps:$4 sm:$0xff]   ;;  %v3333_v8 = vld [vmem:[%s4699_s1 + $0x644] ss:$8 sps:$4 sm:$0xff]  }
  0x9d   :  { %2364 = vmatprep.subr.bf16.mxu1 %v3237_v9  ;;  %2113 = vmatprep.mubr.bf16.mxu0 %v3238_v10  ;;  %v3331_v9 = vld [vmem:[%s4699_s1 + $0x640] ss:$8 sps:$4 sm:$0xff]   ;;  %v3342_v10 = vld [vmem:[%s4699_s1 + $0x634] ss:$8 sps:$4 sm:$0xff]  }
  0x9e   :  { %2216 = vmatprep.mubr.bf16.mxu1 %v3247_v11  ;;  %v3329_v11 = vld [vmem:[%s4700_s0 + $0xf0] ss:$52 sps:$4 sm:$0xff]  }
  0x9f   :  { %2262 = vmatpush1.bf16.msra.mxu0 %v3232_v12  ;;  %v3330_v12 = vld [vmem:[%s4700_s0 + $0xf8] ss:$52 sps:$4 sm:$0xff]  }
  0xa0   :  { %2365 = vmatpush1.bf16.msra.mxu1 %v3235_v13  ;;  %2263 = vmatprep.subr.bf16.mxu0 %v3243_v14  ;;  %v3334_v13 = vld [vmem:[%s4700_s0 + $0x15c] ss:$52 sps:$4 sm:$0xff]   ;;  %v3336_v14 = vld [vmem:[%s4700_s0 + $0x164] ss:$52 sps:$4 sm:$0xff]  }
  0xa1   :  { %2366 = vmatprep.subr.bf16.mxu1 %v3246_v15  ;;  %v3340_v15 = vld [vmem:[%s4699_s1 + $0x630] ss:$8 sps:$4 sm:$0xff]  }
  0xa2   :  { %2114 = vmatmul.mubr.bf16.gmra.mxu0 %v3240_v16  ;;  %v3351_v16 = vld [vmem:[%s4699_s1 + $0x624] ss:$8 sps:$4 sm:$0xff]  }
  0xa3   :  { %2217 = vmatmul.mubr.bf16.gmra.mxu1 %v3249_v19  ;;  %2264 = vmatpush2.bf16.msra.mxu0 %v3241_v17  ;;  %v3349_v17 = vld [vmem:[%s4699_s1 + $0x620] ss:$8 sps:$4 sm:$0xff]   ;;  %v3338_v19 = vld [vmem:[%s4700_s0 + $0x158] ss:$52 sps:$4 sm:$0xff]  }
  0xa4   :  { %2367 = vmatpush2.bf16.msra.mxu1 %v3244_v18  ;;  %2265 = vmatprep.subr.bf16.mxu0 %v3252_v20  ;;  %v3360_v18 = vld [vmem:[%s4699_s1 + $0x614] ss:$8 sps:$4 sm:$0xff]  }
  0xa5   :  { %2368 = vmatprep.subr.bf16.mxu1 %v3255_v21  ;;  %2123 = vmatprep.mubr.bf16.mxu0 %v3256_v22  ;;  %v3339_v20 = vld [vmem:[%s4700_s0 + $0x160] ss:$52 sps:$4 sm:$0xff]   ;;  %v3343_v21 = vld [vmem:[%s4700_s0 + $0x1c4] ss:$52 sps:$4 sm:$0xff]  }
  0xa6   :  { %2226 = vmatprep.mubr.bf16.mxu1 %v3265_v23  ;;  %v3345_v22 = vld [vmem:[%s4700_s0 + $0x1cc] ss:$52 sps:$4 sm:$0xff]   ;;  %v3358_v23 = vld [vmem:[%s4699_s1 + $0x610] ss:$8 sps:$4 sm:$0xff]  }
  0xa7   :  { %2266 = vmatpush2.bf16.msra.mxu0 %v3250_v24  ;;  %v3369_v24 = vld [vmem:[%s4699_s1 + $0x604] ss:$8 sps:$4 sm:$0xff]  }
  0xa8   :  { %2369 = vmatpush2.bf16.msra.mxu1 %v3253_v25  ;;  %2267 = vmatprep.subr.bf16.mxu0 %v3261_v26  ;;  %v3367_v25 = vld [vmem:[%s4699_s1 + $0x600] ss:$8 sps:$4 sm:$0xff]  }
  0xa9   :  { %2370 = vmatprep.subr.bf16.mxu1 %v3264_v28  ;;  %v3347_v26 = vld [vmem:[%s4700_s0 + $0x1c0] ss:$52 sps:$4 sm:$0xff]  }
  0xaa   :  { %2124 = vmatmul.mubr.bf16.gmra.mxu0 %v3258_v27  ;;  %v3348_v27 = vld [vmem:[%s4700_s0 + $0x1c8] ss:$52 sps:$4 sm:$0xff]   ;;  %v3352_v28 = vld [vmem:[%s4700_s0 + $0x22c] ss:$52 sps:$4 sm:$0xff]  }
  0xab   :  { %2227 = vmatmul.mubr.bf16.gmra.mxu1 %v3267_v31  ;;  %2268 = vmatpush2.bf16.msra.mxu0 %v3259_v29  ;;  %v3354_v29 = vld [vmem:[%s4700_s0 + $0x234] ss:$52 sps:$4 sm:$0xff]   ;;  %v3357_v31 = vld [vmem:[%s4700_s0 + $0x230] ss:$52 sps:$4 sm:$0xff]  }
  0xac   :  { %2371 = vmatpush2.bf16.msra.mxu1 %v3262_v30  ;;  %2269 = vmatprep.subr.bf16.mxu0 %v3270_v32  ;;  %v3356_v30 = vld [vmem:[%s4700_s0 + $0x228] ss:$52 sps:$4 sm:$0xff]  }
  0xad   :  { %2372 = vmatprep.subr.bf16.mxu1 %v3273_v33  ;;  %2133 = vmatprep.mubr.bf16.mxu0 %v3274_v34  ;;  %v3361_v32 = vld [vmem:[%s4700_s0 + $0x294] ss:$52 sps:$4 sm:$0xff]   ;;  %v3363_v33 = vld [vmem:[%s4700_s0 + $0x29c] ss:$52 sps:$4 sm:$0xff]  }
  0xae   :  { %2236 = vmatprep.mubr.bf16.mxu1 %v3283_v35  ;;  %v3365_v34 = vld [vmem:[%s4700_s0 + $0x290] ss:$52 sps:$4 sm:$0xff]   ;;  %v3366_v35 = vld [vmem:[%s4700_s0 + $0x298] ss:$52 sps:$4 sm:$0xff]  }
  0xaf   :  { %2270 = vmatpush2.bf16.msra.mxu0 %v3268_v36  ;;  %v3377_v36 = vmov 0  }
  0xb0   :  { %2373 = vmatpush2.bf16.msra.mxu1 %v3271_v37  ;;  %2271 = vmatprep.subr.bf16.mxu0 %v3279_v38  ;;  %v323_v37 = vlaneseq  ;;  %v3370_v38 = vld [vmem:[%s4700_s0 + $0x30] ss:$52 sps:$4 sm:$0xff]  }
  0xb1   :  { %2374 = vmatprep.subr.bf16.mxu1 %v3282_v39  ;;  %v3371_v39 = vld [vmem:[%s4700_s0 + $0x1d0] ss:$52 sps:$4 sm:$0xff]  }
  0xb2   :  { %2134 = vmatmul.mubr.bf16.gmra.mxu0 %v3276_v40  ;;  %v324_v40 = vshrl.u32 %v323_v37, 7 }
  0xb3   :  { %2237 = vmatmul.mubr.bf16.gmra.mxu1 %v3285_v42  ;;  %2272 = vmatpush2.bf16.msra.mxu0 %v3277_v41  ;;  %v321_v42 = vld [vmem:[%s4701_s2] sm:$0x3] }
  0xb4   :  { %2375 = vmatpush2.bf16.msra.mxu1 %v3280_v43  ;;  %2273 = vmatprep.subr.bf16.mxu0 %v3288_v44  ;;  %v325_v41 = vsub.s32 0, %v324_v40  ;;  %v329_v43 = vsub.s32 1, %v324_v40  ;;  %v3372_v44 = vld [vmem:[%s4700_s0 + $0x98] ss:$52 sps:$4 sm:$0xff]  }
  0xb5   :  { %2376 = vmatprep.subr.bf16.mxu1 %v3291_v45  ;;  %2279 = vmatprep.mubr.bf16.mxu0 %v3306_v46  ;;  %v3373_v45 = vld [vmem:[%s4700_s0 + $0x238] ss:$52 sps:$4 sm:$0xff]  }
  0xb6   :  { %2382 = vmatprep.mubr.bf16.mxu1 %v3309_v47  ;;  %v4289_v46 = vrot.slane %v321_v42, %v325_v41  ;;  %v4291_v47 = vrot.slane %v321_v42, %v329_v43 }
  0xb7   :  { %2274 = vmatpush2.bf16.msra.mxu0 %v3286_v48 }
  0xb8   :  { %2377 = vmatpush2.bf16.msra.mxu1 %v3289_v49  ;;  %2275 = vmatprep.subr.bf16.mxu0 %v3294_v50 }
  0xb9   :  { %2378 = vmatprep.subr.bf16.mxu1 %v3297_v51 }
  0xbb   :  { %2276 = vmatpush2.bf16.msra.mxu0 %v3292_v52 }
  0xbc   :  { %2379 = vmatpush2.bf16.msra.mxu1 %v3295_v53  ;;  %2277 = vmatprep.subr.bf16.mxu0 %v3300_v54 }
  0xbd   :  { %2380 = vmatprep.subr.bf16.mxu1 %v3303_v55 }
  0xbf   :  { %2278 = vmatpush2.bf16.msra.mxu0 %v3298_v56 }
  0xc0   :  { %2381 = vmatpush2.bf16.msra.mxu1 %v3301_v57  ;;  %2453 = vmatprep.subr.bf16.mxu0 %v3312_v58  ;;  %v3374_v57 = vld [vmem:[%s4700_s0 + $0x100] ss:$52 sps:$4 sm:$0xff]  }
  0xc1   :  { %2915 = vmatprep.subr.bf16.mxu1 %v3312_v58  ;;  %v3375_v58 = vld [vmem:[%s4700_s0 + $0x2a0] ss:$52 sps:$4 sm:$0xff]  }
  0xc2   :  { %2280 = vmatmul.mubr.bf16.vlgmr.msra.gmra.mxu0 %v3304_v59 }
  0xc3   :  { %2383 = vmatmul.mubr.bf16.vlgmr.msra.gmra.mxu1 %v3307_v60  ;;  %2454 = vmatpush1.bf16.msra.mxu0 %v3310_v61 }
  0xc4   :  { %2289 = vmatprep.mubr.bf16.mxu0 %v3313_v62  ;;  %2392 = vmatprep.mubr.bf16.mxu1 %v3315_v63 }
  0xc5   :  { %2455 = vmatprep.subr.bf16.mxu0 %v3319_v0  ;;  %2923 = vmatpush1.bf16.msra.mxu1 %v3310_v61 }
  0xc6   :  { %2916 = vmatprep.subr.bf16.mxu1 %v3319_v0 }
  0xc7   :  { %2456 = vmatpush1.bf16.msra.mxu0 %v3317_v1 }
  0xc8   :  { %2457 = vmatprep.subr.bf16.mxu0 %v3324_v3 }
  0xc9   :  { %2924 = vmatpush1.bf16.msra.mxu1 %v3317_v1 }
  0xca   :  { %2290 = vmatmul.mubr.bf16.gmra.mxu0 %v3320_v2  ;;  %2917 = vmatprep.subr.bf16.mxu1 %v3324_v3 }
  0xcb   :  { %2393 = vmatmul.mubr.bf16.gmra.mxu1 %v3321_v4  ;;  %2299 = vmatprep.mubr.bf16.mxu0 %v3325_v5 }
  0xcc   :  { %2402 = vmatprep.mubr.bf16.mxu1 %v3327_v6  ;;  %2458 = vmatpush1.bf16.msra.mxu0 %v3322_v7 }
  0xcd   :  { %2459 = vmatprep.subr.bf16.mxu0 %v3333_v8  ;;  %2925 = vmatpush1.bf16.msra.mxu1 %v3322_v7 }
  0xce   :  { %2918 = vmatprep.subr.bf16.mxu1 %v3333_v8 }
  0xd0   :  { %2460 = vmatpush1.bf16.msra.mxu0 %v3331_v9 }
  0xd1   :  { %2461 = vmatprep.subr.bf16.mxu0 %v3342_v10  ;;  %2926 = vmatpush1.bf16.msra.mxu1 %v3331_v9 }
  0xd2   :  { %2300 = vmatmul.mubr.bf16.gmra.mxu0 %v3329_v11  ;;  %2919 = vmatprep.subr.bf16.mxu1 %v3342_v10  ;;  %v3376_v10 = vld [vmem:[%s4700_s0 + $0x168] ss:$52 sps:$4 sm:$0xff]  }
  0xd3   :  { %2403 = vmatmul.mubr.bf16.gmra.mxu1 %v3330_v12  ;;  %2309 = vmatprep.mubr.bf16.mxu0 %v3334_v13 }
  0xd4   :  { %2412 = vmatprep.mubr.bf16.mxu1 %v3336_v14  ;;  %2462 = vmatpush1.bf16.msra.mxu0 %v3340_v15 }
  0xd5   :  { %2463 = vmatprep.subr.bf16.mxu0 %v3351_v16  ;;  %2927 = vmatpush1.bf16.msra.mxu1 %v3340_v15 }
  0xd6   :  { %2920 = vmatprep.subr.bf16.mxu1 %v3351_v16 }
  0xd8   :  { %2464 = vmatpush1.bf16.msra.mxu0 %v3349_v17 }
  0xd9   :  { %2465 = vmatprep.subr.bf16.mxu0 %v3360_v18  ;;  %2928 = vmatpush1.bf16.msra.mxu1 %v3349_v17 }
  0xda   :  { %2310 = vmatmul.mubr.bf16.gmra.mxu0 %v3338_v19  ;;  %2921 = vmatprep.subr.bf16.mxu1 %v3360_v18 }
  0xdb   :  { %2413 = vmatmul.mubr.bf16.gmra.mxu1 %v3339_v20  ;;  %2319 = vmatprep.mubr.bf16.mxu0 %v3343_v21 }
  0xdc   :  { %2422 = vmatprep.mubr.bf16.mxu1 %v3345_v22  ;;  %2466 = vmatpush1.bf16.msra.mxu0 %v3358_v23 }
  0xdd   :  { %2929 = vmatpush1.bf16.msra.mxu1 %v3358_v23  ;;  %2467 = vmatprep.subr.bf16.mxu0 %v3369_v24 }
  0xde   :  { %2922 = vmatprep.subr.bf16.mxu1 %v3369_v24 }
  0xe0   :  { %2468 = vmatpush1.bf16.msra.mxu0 %v3367_v25 }
  0xe1   :  { %2930 = vmatpush1.bf16.msra.mxu1 %v3367_v25 }
  0xe2   :  { %2320 = vmatmul.mubr.bf16.gmra.mxu0 %v3347_v26 }
  0xe3   :  { %2423 = vmatmul.mubr.bf16.gmra.mxu1 %v3348_v27  ;;  %2329 = vmatprep.mubr.bf16.mxu0 %v3352_v28 }
  0xe4   :  { %2432 = vmatprep.mubr.bf16.mxu1 %v3354_v29 }
  0xea   :  { %2330 = vmatmul.mubr.bf16.gmra.mxu0 %v3356_v30 }
  0xeb   :  { %2433 = vmatmul.mubr.bf16.gmra.mxu1 %v3357_v31  ;;  %2339 = vmatprep.mubr.bf16.mxu0 %v3361_v32 }
  0xec   :  { %2442 = vmatprep.mubr.bf16.mxu1 %v3363_v33 }
  0xf2   :  { %2340 = vmatmul.mubr.bf16.gmra.mxu0 %v3365_v34 }
  0xf3   :  { %2443 = vmatmul.mubr.bf16.gmra.mxu1 %v3366_v35  ;;  %2485 = vmatprep.mubr.bf16.mxu0 %v3377_v36 }
  0xf4   :  { %2525 = vmatprep.mubr.bf16.mxu1 %v3377_v36 }
  0xfa   :  { %2486 = vmatmul.mubr.bf16.vlgmr.msra.gmra.mxu0 %v3370_v38 }
  0xfb   :  { %2526 = vmatmul.mubr.bf16.vlgmr.msra.gmra.mxu1 %v3371_v39  ;;  %2495 = vmatprep.mubr.bf16.mxu0 %v3377_v36 }
  0xfc   :  { %2535 = vmatprep.mubr.bf16.mxu1 %v3377_v36 }
 0x102   :  { %v1869_v48 = vpop.f32.mrf.mxu0  ;;  %2496 = vmatmul.mubr.bf16.gmra.mxu0 %v3372_v44 }
 0x103   :  { %2536 = vmatmul.mubr.bf16.gmra.mxu1 %v3373_v45  ;;  %v1972_v49 = vpop.f32.mrf.mxu1  ;;  %v1870_v50 = vadd.f32 %v1869_v48, %v4289_v46  ;;  %2505 = vmatprep.mubr.bf16.mxu0 %v3377_v36 }
 0x104   :  { %2545 = vmatprep.mubr.bf16.mxu1 %v3377_v36  ;;  %v1871_v51 = vpop.f32.mrf.mxu0 }
 0x105   :  { %v1974_v52 = vpop.f32.mrf.mxu1  ;;  %v1872_v53 = vadd.f32 %v1871_v51, %v4291_v47  ;;  %v4295_v54 = vadd.f32 %v1972_v49, %v1870_v50 }
 0x106   :  { %v1873_v55 = vpop.f32.mrf.mxu0 }
 0x107   :  { %v1976_v56 = vpop.f32.mrf.mxu1  ;;  %v1874_v59 = vadd.f32 %v1873_v55, %v4289_v46  ;;  %v4304_v60 = vadd.f32 %v1974_v52, %v1872_v53 }
 0x108   :  { %v1875_v61 = vpop.f32.mrf.mxu0 }
 0x109   :  { %v1978_v62 = vpop.f32.mrf.mxu1  ;;  %v1876_v63 = vadd.f32 %v1875_v61, %v4291_v47  ;;  %v4307_v0 = vadd.f32 %v1976_v56, %v1874_v59 }
 0x10a   :  { %2506 = vmatmul.mubr.bf16.gmra.mxu0 %v3374_v57  ;;  %v1879_v1 = vpop.f32.mrf.mxu0 }
 0x10b   :  { %2546 = vmatmul.mubr.bf16.gmra.mxu1 %v3375_v58  ;;  %v1982_v2 = vpop.f32.mrf.mxu1  ;;  %v4309_v3 = vadd.f32 %v1978_v62, %v1876_v63  ;;  %v1880_v4 = vadd.f32 %v1879_v1, %v4289_v46  ;;  %2515 = vmatprep.mubr.bf16.mxu0 %v3377_v36 }
 0x10c   :  { %v1881_v5 = vpop.f32.mrf.mxu0 }
 0x10d   :  { %v1984_v6 = vpop.f32.mrf.mxu1  ;;  %v1882_v7 = vadd.f32 %v1881_v5, %v4291_v47  ;;  %v4313_v8 = vadd.f32 %v1982_v2, %v1880_v4 }
 0x10e   :  { %v1883_v9 = vpop.f32.mrf.mxu0 }
 0x10f   :  { %v1986_v11 = vpop.f32.mrf.mxu1  ;;  %v1884_v12 = vadd.f32 %v1883_v9, %v4289_v46  ;;  %v4319_v13 = vadd.f32 %v1984_v6, %v1882_v7 }
 0x110   :  { %v1885_v14 = vpop.f32.mrf.mxu0 }
 0x111   :  { %v1988_v15 = vpop.f32.mrf.mxu1  ;;  %v1886_v16 = vadd.f32 %v1885_v14, %v4291_v47  ;;  %v4322_v17 = vadd.f32 %v1986_v11, %v1884_v12 }
 0x112   :  { %2516 = vmatmul.mubr.bf16.gmra.mxu0 %v3376_v10  ;;  %v1889_v18 = vpop.f32.mrf.mxu0 }
 0x113   :  { %v1992_v19 = vpop.f32.mrf.mxu1  ;;  %v1890_v20 = vadd.f32 %v1889_v18, %v4289_v46  ;;  %v4325_v21 = vadd.f32 %v1988_v15, %v1886_v16 }
 0x114   :  { %v1891_v22 = vpop.f32.mrf.mxu0 }
 0x115   :  { %v1994_v23 = vpop.f32.mrf.mxu1  ;;  %v1892_v24 = vadd.f32 %v1891_v22, %v4291_v47  ;;  %v4328_v25 = vadd.f32 %v1992_v19, %v1890_v20 }
 0x116   :  { %v1893_v26 = vpop.f32.mrf.mxu0 }
 0x117   :  { %v1996_v27 = vpop.f32.mrf.mxu1  ;;  %v1894_v28 = vadd.f32 %v1893_v26, %v4289_v46  ;;  %v4331_v29 = vadd.f32 %v1994_v23, %v1892_v24 }
 0x118   :  { %v1895_v30 = vpop.f32.mrf.mxu0 }
 0x119   :  { %v1998_v31 = vpop.f32.mrf.mxu1  ;;  %v1896_v32 = vadd.f32 %v1895_v30, %v4291_v47  ;;  %v4334_v33 = vadd.f32 %v1996_v27, %v1894_v28 }
 0x11a   :  { %v1899_v34 = vpop.f32.mrf.mxu0 }
 0x11b   :  { %v2002_v35 = vpop.f32.mrf.mxu1  ;;  %v1900_v36 = vadd.f32 %v1899_v34, %v4289_v46  ;;  %v4337_v37 = vadd.f32 %v1998_v31, %v1896_v32 }
 0x11c   :  { %v1901_v38 = vpop.f32.mrf.mxu0 }
 0x11d   :  { %v2004_v39 = vpop.f32.mrf.mxu1  ;;  %v1902_v40 = vadd.f32 %v1901_v38, %v4291_v47  ;;  %v4340_v41 = vadd.f32 %v2002_v35, %v1900_v36 }
 0x11e   :  { %v1903_v42 = vpop.f32.mrf.mxu0 }
 0x11f   :  { %v2006_v43 = vpop.f32.mrf.mxu1  ;;  %v1904_v44 = vadd.f32 %v1903_v42, %v4289_v46  ;;  %v4343_v45 = vadd.f32 %v2004_v39, %v1902_v40 }
 0x120   :  { %v1905_v48 = vpop.f32.mrf.mxu0 }
 0x121   :  { %v2008_v49 = vpop.f32.mrf.mxu1  ;;  %v1906_v50 = vadd.f32 %v1905_v48, %v4291_v47  ;;  %v4346_v51 = vadd.f32 %v2006_v43, %v1904_v44 }
 0x122   :  { %v1909_v52 = vpop.f32.mrf.mxu0 }
 0x123   :  { %v2012_v53 = vpop.f32.mrf.mxu1  ;;  %v1910_v55 = vadd.f32 %v1909_v52, %v4289_v46  ;;  %v4349_v56 = vadd.f32 %v2008_v49, %v1906_v50 }
 0x124   :  { %v1911_v57 = vpop.f32.mrf.mxu0 }
 0x125   :  { %v2014_v58 = vpop.f32.mrf.mxu1  ;;  %v1912_v59 = vadd.f32 %v1911_v57, %v4291_v47  ;;  %v4352_v61 = vadd.f32 %v2012_v53, %v1910_v55 }
 0x126   :  { %v1913_v62 = vpop.f32.mrf.mxu0 }
 0x127   :  { %v2016_v63 = vpop.f32.mrf.mxu1  ;;  %v1914_v1 = vadd.f32 %v1913_v62, %v4289_v46  ;;  %v4355_v2 = vadd.f32 %v2014_v58, %v1912_v59 }
 0x128   :  { %v1915_v4 = vpop.f32.mrf.mxu0 }
 0x129   :  { %v2018_v5 = vpop.f32.mrf.mxu1  ;;  %v1916_v6 = vadd.f32 %v1915_v4, %v4291_v47  ;;  %v4358_v7 = vadd.f32 %v2016_v63, %v1914_v1 }
 0x12a   :  { %v1919_v9 = vpop.f32.mrf.mxu0 }
 0x12b   :  { %v2022_v10 = vpop.f32.mrf.mxu1  ;;  %v1920_v11 = vadd.f32 %v1919_v9, %v4289_v46  ;;  %v4361_v12 = vadd.f32 %v2018_v5, %v1916_v6 }
 0x12c   :  { %v1921_v14 = vpop.f32.mrf.mxu0 }
 0x12d   :  { %v2024_v15 = vpop.f32.mrf.mxu1  ;;  %v1922_v16 = vadd.f32 %v1921_v14, %v4291_v47  ;;  %v4364_v18 = vadd.f32 %v2022_v10, %v1920_v11 }
 0x12e   :  { %v1923_v19 = vpop.f32.mrf.mxu0 }
 0x12f   :  { %v2026_v20 = vpop.f32.mrf.mxu1  ;;  %v1924_v22 = vadd.f32 %v1923_v19, %v4289_v46  ;;  %v4367_v23 = vadd.f32 %v2024_v15, %v1922_v16 }
 0x130   :  { %v1925_v24 = vpop.f32.mrf.mxu0 }
 0x131   :  { %v2028_v26 = vpop.f32.mrf.mxu1  ;;  %v1926_v27 = vadd.f32 %v1925_v24, %v4291_v47  ;;  %v4370_v28 = vadd.f32 %v2026_v20, %v1924_v22 }
 0x132   :  { %v1929_v30 = vpop.f32.mrf.mxu0 }
 0x133   :  { %v2032_v31 = vpop.f32.mrf.mxu1  ;;  %v1930_v32 = vadd.f32 %v1929_v30, %v4289_v46  ;;  %v4373_v34 = vadd.f32 %v2028_v26, %v1926_v27 }
 0x134   :  { %v1931_v35 = vpop.f32.mrf.mxu0 }
 0x135   :  { %v2034_v36 = vpop.f32.mrf.mxu1  ;;  %v1932_v38 = vadd.f32 %v1931_v35, %v4291_v47  ;;  %v4376_v39 = vadd.f32 %v2032_v31, %v1930_v32 }
 0x136   :  { %v1933_v40 = vpop.f32.mrf.mxu0 }
 0x137   :  { %v2036_v42 = vpop.f32.mrf.mxu1  ;;  %v1934_v43 = vadd.f32 %v1933_v40, %v4289_v46  ;;  %v4379_v44 = vadd.f32 %v2034_v36, %v1932_v38 }
 0x138   :  { %v1935_v48 = vpop.f32.mrf.mxu0 }
 0x139   :  { %v2038_v49 = vpop.f32.mrf.mxu1  ;;  %v1936_v50 = vadd.f32 %v1935_v48, %v4291_v47  ;;  %v4382_v52 = vadd.f32 %v2036_v42, %v1934_v43 }
 0x13b   :  { %v4384_v53 = vadd.f32 %v2038_v49, %v1936_v50 }
 0x142   :  { %v2075_v55 = vpop.f32.mrf.mxu0 }
 0x143   :  { %v2178_v57 = vpop.f32.mrf.mxu1  ;;  %v2076_v58 = vadd.f32 %v2075_v55, %v4295_v54 }
 0x144   :  { %v2077_v59 = vpop.f32.mrf.mxu0 }
 0x145   :  { %v2180_v62 = vpop.f32.mrf.mxu1  ;;  %v2078_v63 = vadd.f32 %v2077_v59, %v4304_v60  ;;  %v4388_v1 = vadd.f32 %v2178_v57, %v2076_v58 }
 0x146   :  { %v2079_v46 = vpop.f32.mrf.mxu0 }
 0x147   :  { %v2182_v4 = vpop.f32.mrf.mxu1  ;;  %v2080_v5 = vadd.f32 %v2079_v46, %v4307_v0  ;;  %v4391_v6 = vadd.f32 %v2180_v62, %v2078_v63 }
 0x148   :  { %v2081_v47 = vpop.f32.mrf.mxu0 }
 0x149   :  { %v2184_v9 = vpop.f32.mrf.mxu1  ;;  %v2082_v10 = vadd.f32 %v2081_v47, %v4309_v3  ;;  %v4394_v11 = vadd.f32 %v2182_v4, %v2080_v5 }
 0x14a   :  { %v2085_v14 = vpop.f32.mrf.mxu0 }
 0x14b   :  { %v2188_v54 = vpop.f32.mrf.mxu1  ;;  %v2086_v15 = vadd.f32 %v2085_v14, %v4313_v8  ;;  %v4397_v16 = vadd.f32 %v2184_v9, %v2082_v10 }
 0x14c   :  { %v2087_v60 = vpop.f32.mrf.mxu0 }
 0x14d   :  { %v2190_v19 = vpop.f32.mrf.mxu1  ;;  %v2088_v20 = vadd.f32 %v2087_v60, %v4319_v13  ;;  %v4400_v22 = vadd.f32 %v2188_v54, %v2086_v15 }
 0x14e   :  { %v2089_v0 = vpop.f32.mrf.mxu0 }
 0x14f   :  { %v2192_v24 = vpop.f32.mrf.mxu1  ;;  %v2090_v26 = vadd.f32 %v2089_v0, %v4322_v17  ;;  %v4403_v27 = vadd.f32 %v2190_v19, %v2088_v20 }
 0x150   :  { %v2091_v3 = vpop.f32.mrf.mxu0 }
 0x151   :  { %v2194_v30 = vpop.f32.mrf.mxu1  ;;  %v2092_v31 = vadd.f32 %v2091_v3, %v4325_v21  ;;  %v4406_v32 = vadd.f32 %v2192_v24, %v2090_v26 }
 0x152   :  { %v2095_v8 = vpop.f32.mrf.mxu0 }
 0x153   :  { %v2198_v35 = vpop.f32.mrf.mxu1  ;;  %v2096_v36 = vadd.f32 %v2095_v8, %v4328_v25  ;;  %v4409_v38 = vadd.f32 %v2194_v30, %v2092_v31 }
 0x154   :  { %v2097_v13 = vpop.f32.mrf.mxu0 }
 0x155   :  { %v2200_v40 = vpop.f32.mrf.mxu1  ;;  %v2098_v42 = vadd.f32 %v2097_v13, %v4331_v29  ;;  %v4412_v43 = vadd.f32 %v2198_v35, %v2096_v36 }
 0x156   :  { %v2099_v17 = vpop.f32.mrf.mxu0 }
 0x157   :  { %v2202_v48 = vpop.f32.mrf.mxu1  ;;  %v2100_v49 = vadd.f32 %v2099_v17, %v4334_v33  ;;  %v4415_v50 = vadd.f32 %v2200_v40, %v2098_v42 }
 0x158   :  { %v2101_v21 = vpop.f32.mrf.mxu0 }
 0x159   :  { %v2204_v55 = vpop.f32.mrf.mxu1  ;;  %v2102_v57 = vadd.f32 %v2101_v21, %v4337_v37  ;;  %v4418_v58 = vadd.f32 %v2202_v48, %v2100_v49 }
 0x15a   :  { %v2105_v25 = vpop.f32.mrf.mxu0 }
 0x15b   :  { %4703 = vst [vmem:[#allocation2_spill] sm:$0xff] %v4418_v58  ;;  %v2208_v59 = vpop.f32.mrf.mxu1  ;;  %v2106_v62 = vadd.f32 %v2105_v25, %v4340_v41  ;;  %v4421_v63 = vadd.f32 %v2204_v55, %v2102_v57 }
 0x15c   :  { %v2107_v29 = vpop.f32.mrf.mxu0 }
 0x15d   :  { %4704 = vst [vmem:[#allocation3_spill] sm:$0xff] %v4421_v63  ;;  %v2210_v46 = vpop.f32.mrf.mxu1  ;;  %v2108_v4 = vadd.f32 %v2107_v29, %v4343_v45  ;;  %v4424_v5 = vadd.f32 %v2208_v59, %v2106_v62 }
 0x15e   :  { %v2109_v33 = vpop.f32.mrf.mxu0 }
 0x15f   :  { %4705 = vst [vmem:[#allocation4_spill] sm:$0xff] %v4424_v5  ;;  %v2212_v47 = vpop.f32.mrf.mxu1  ;;  %v2110_v9 = vadd.f32 %v2109_v33, %v4346_v51  ;;  %v4427_v10 = vadd.f32 %v2210_v46, %v2108_v4 }
 0x160   :  { %v2111_v37 = vpop.f32.mrf.mxu0 }
 0x161   :  { %4706 = vst [vmem:[#allocation5_spill] sm:$0xff] %v4427_v10  ;;  %v2214_v14 = vpop.f32.mrf.mxu1  ;;  %v2112_v54 = vadd.f32 %v2111_v37, %v4349_v56  ;;  %v4430_v15 = vadd.f32 %v2212_v47, %v2110_v9 }
 0x162   :  { %v2115_v41 = vpop.f32.mrf.mxu0 }
 0x163   :  { %4707 = vst [vmem:[#allocation6_spill] sm:$0xff] %v4430_v15  ;;  %v2218_v60 = vpop.f32.mrf.mxu1  ;;  %v2116_v19 = vadd.f32 %v2115_v41, %v4352_v61  ;;  %v4433_v20 = vadd.f32 %v2214_v14, %v2112_v54 }
 0x164   :  { %v2117_v45 = vpop.f32.mrf.mxu0 }
 0x165   :  { %4708 = vst [vmem:[#allocation7_spill] sm:$0xff] %v4433_v20  ;;  %v2220_v0 = vpop.f32.mrf.mxu1  ;;  %v2118_v24 = vadd.f32 %v2117_v45, %v4355_v2  ;;  %v4436_v26 = vadd.f32 %v2218_v60, %v2116_v19 }
 0x166   :  { %v2119_v51 = vpop.f32.mrf.mxu0 }
 0x167   :  { %v2222_v3 = vpop.f32.mrf.mxu1  ;;  %v2120_v30 = vadd.f32 %v2119_v51, %v4358_v7  ;;  %v4439_v31 = vadd.f32 %v2220_v0, %v2118_v24 }
 0x168   :  { %v2121_v56 = vpop.f32.mrf.mxu0 }
 0x169   :  { %v2224_v8 = vpop.f32.mrf.mxu1  ;;  %v2122_v35 = vadd.f32 %v2121_v56, %v4361_v12  ;;  %v4442_v36 = vadd.f32 %v2222_v3, %v2120_v30 }
 0x16a   :  { %v2125_v61 = vpop.f32.mrf.mxu0 }
 0x16b   :  { %v2228_v13 = vpop.f32.mrf.mxu1  ;;  %v2126_v40 = vadd.f32 %v2125_v61, %v4364_v18  ;;  %v4445_v42 = vadd.f32 %v2224_v8, %v2122_v35 }
 0x16c   :  { %v2127_v2 = vpop.f32.mrf.mxu0 }
 0x16d   :  { %v2230_v17 = vpop.f32.mrf.mxu1  ;;  %v2128_v48 = vadd.f32 %v2127_v2, %v4367_v23  ;;  %v4448_v49 = vadd.f32 %v2228_v13, %v2126_v40 }
 0x16e   :  { %v2129_v7 = vpop.f32.mrf.mxu0 }
 0x16f   :  { %v2232_v21 = vpop.f32.mrf.mxu1  ;;  %v2130_v55 = vadd.f32 %v2129_v7, %v4370_v28  ;;  %v4451_v57 = vadd.f32 %v2230_v17, %v2128_v48 }
 0x170   :  { %v2131_v12 = vpop.f32.mrf.mxu0 }
 0x171   :  { %v2234_v25 = vpop.f32.mrf.mxu1  ;;  %v2132_v59 = vadd.f32 %v2131_v12, %v4373_v34  ;;  %v4454_v62 = vadd.f32 %v2232_v21, %v2130_v55 }
 0x172   :  { %v2135_v18 = vpop.f32.mrf.mxu0 }
 0x173   :  { %v2238_v29 = vpop.f32.mrf.mxu1  ;;  %v2136_v46 = vadd.f32 %v2135_v18, %v4376_v39  ;;  %v4457_v4 = vadd.f32 %v2234_v25, %v2132_v59 }
 0x174   :  { %v2137_v23 = vpop.f32.mrf.mxu0 }
 0x175   :  { %v2240_v33 = vpop.f32.mrf.mxu1  ;;  %v2138_v47 = vadd.f32 %v2137_v23, %v4379_v44  ;;  %v4460_v9 = vadd.f32 %v2238_v29, %v2136_v46 }
 0x176   :  { %v2139_v28 = vpop.f32.mrf.mxu0 }
 0x177   :  { %v2242_v37 = vpop.f32.mrf.mxu1  ;;  %v2140_v14 = vadd.f32 %v2139_v28, %v4382_v52  ;;  %v4463_v54 = vadd.f32 %v2240_v33, %v2138_v47 }
 0x178   :  { %v2141_v34 = vpop.f32.mrf.mxu0 }
 0x179   :  { %4709 = vst [vmem:[#allocation8_spill] sm:$0xff] %v4463_v54  ;;  %v2244_v41 = vpop.f32.mrf.mxu1  ;;  %v2142_v60 = vadd.f32 %v2141_v34, %v4384_v53  ;;  %v4466_v19 = vadd.f32 %v2242_v37, %v2140_v14 }
 0x17b   :  { %4710 = vst [vmem:[#allocation9_spill] sm:$0xff] %v4466_v19  ;;  %v4468_v39 = vadd.f32 %v2244_v41, %v2142_v60 }
 0x17d   :  { %4711 = vst [vmem:[#allocation10_spill] sm:$0xff] %v4468_v39 }
 0x182   :  { %v2281_v45 = vpop.f32.mrf.mxu0 }
 0x183   :  { %v2384_v0 = vpop.f32.mrf.mxu1  ;;  %v2282_v63 = vadd.f32 %v2281_v45, %v4388_v1 }
 0x184   :  { %v2283_v24 = vpop.f32.mrf.mxu0 }
 0x185   :  { %v4470_v44 = vpop.f32.mrf.mxu1  ;;  %v2284_v58 = vadd.f32 %v2283_v24, %v4391_v6 }
 0x186   :  { %v2285_v51 = vpop.f32.mrf.mxu0 }
 0x187   :  { %v4472_v3 = vpop.f32.mrf.mxu1  ;;  %v2286_v54 = vadd.f32 %v2285_v51, %v4394_v11  ;;  %v2387_v6 = vadd.f32 %v4470_v44, %v2284_v58 }
 0x188   :  { %v2287_v30 = vpop.f32.mrf.mxu0 }
 0x189   :  { %v4474_v52 = vpop.f32.mrf.mxu1  ;;  %v2389_v11 = vadd.f32 %v4472_v3, %v2286_v54 }
 0x18a   :  { %v4476_v56 = vpop.f32.mrf.mxu0 }
 0x18b   :  { %v4478_v8 = vpop.f32.mrf.mxu1 }
 0x18c   :  { %v4480_v53 = vpop.f32.mrf.mxu0 }
 0x18d   :  { %v4482_v35 = vpop.f32.mrf.mxu1  ;;  %v2294_v58 = vadd.f32 %v4480_v53, %v4403_v27 }
 0x18e   :  { %v4484_v61 = vpop.f32.mrf.mxu0 }
 0x18f   :  { %v4486_v13 = vpop.f32.mrf.mxu1  ;;  %v2296_v27 = vadd.f32 %v4484_v61, %v4406_v32 }
 0x190   :  { %v4488_v40 = vpop.f32.mrf.mxu0 }
 0x191   :  { %v4490_v2 = vpop.f32.mrf.mxu1  ;;  %v2298_v32 = vadd.f32 %v4488_v40, %v4409_v38  ;;  %v2399_v38 = vadd.f32 %v4486_v13, %v2296_v27 }
 0x192   :  { %v4492_v17 = vpop.f32.mrf.mxu0 }
 0x193   :  { %v4494_v48 = vpop.f32.mrf.mxu1  ;;  %v2302_v40 = vadd.f32 %v4492_v17, %v4412_v43  ;;  %v2401_v43 = vadd.f32 %v4490_v2, %v2298_v32 }
 0x194   :  { %4712 = vst [vmem:[#allocation11_spill] sm:$0xff] %v4494_v48  ;;  %v4496_v7 = vpop.f32.mrf.mxu0 }
 0x195   :  { %v4498_v21 = vpop.f32.mrf.mxu1 }
 0x196   :  { %4713 = vst [vmem:[#allocation12_spill] sm:$0xff] %v4498_v21  ;;  %v4500_v55 = vpop.f32.mrf.mxu0 }
 0x197   :  { %4714 = vst [vmem:[#allocation13_spill] sm:$0xff] %v4500_v55  ;;  %v4502_v12 = vpop.f32.mrf.mxu1 }
 0x198   :  { %4715 = vst [vmem:[#allocation14_spill] sm:$0xff] %v4502_v12  ;;  %v4504_v25 = vpop.f32.mrf.mxu0 }
 0x199   :  { %4716 = vst [vmem:[#allocation15_spill] sm:$0xff] %v4504_v25  ;;  %v4506_v59 = vpop.f32.mrf.mxu1 }
 0x19a   :  { %4717 = vst [vmem:[#allocation16_spill] sm:$0xff] %v4506_v59  ;;  %v4508_v18 = vpop.f32.mrf.mxu0 }
 0x19b   :  { %4718 = vst [vmem:[#allocation17_spill] sm:$0xff] %v4508_v18  ;;  %v4510_v29 = vpop.f32.mrf.mxu1 }
 0x19c   :  { %4719 = vst [vmem:[#allocation18_spill] sm:$0xff] %v4510_v29  ;;  %v4512_v46 = vpop.f32.mrf.mxu0 }
 0x19d   :  { %4720 = vst [vmem:[#allocation19_spill] sm:$0xff] %v4512_v46  ;;  %v4514_v23 = vpop.f32.mrf.mxu1 }
 0x19e   :  { %4721 = vst [vmem:[#allocation20_spill] sm:$0xff] %v4514_v23  ;;  %v4516_v33 = vpop.f32.mrf.mxu0 }
 0x19f   :  { %4722 = vst [vmem:[#allocation21_spill] sm:$0xff] %v4516_v33  ;;  %v4518_v47 = vpop.f32.mrf.mxu1  ;;  %v4744_v32 = vld [vmem:[#allocation14_spill] sm:$0xff] }
 0x1a0   :  { %4723 = vst [vmem:[#allocation22_spill] sm:$0xff] %v4518_v47  ;;  %v4520_v28 = vpop.f32.mrf.mxu0 }
 0x1a1   :  { %4724 = vst [vmem:[#allocation23_spill] sm:$0xff] %v4520_v28  ;;  %v4522_v37 = vpop.f32.mrf.mxu1 }
 0x1a2   :  { %4725 = vst [vmem:[#allocation24_spill] sm:$0xff] %v4522_v37  ;;  %v2321_v14 = vpop.f32.mrf.mxu0 }
 0x1a3   :  { %v2424_v34 = vpop.f32.mrf.mxu1  ;;  %v2322_v21 = vadd.f32 %v2321_v14, %v4436_v26  ;;  %v2288_v26 = vadd.f32 %v2287_v30, %v4397_v16 }
 0x1a4   :  { %v2323_v41 = vpop.f32.mrf.mxu0 }
 0x1a5   :  { %v2426_v60 = vpop.f32.mrf.mxu1  ;;  %v2324_v48 = vadd.f32 %v2323_v41, %v4439_v31  ;;  %v2425_v1 = vadd.f32 %v2424_v34, %v2322_v21  ;;  %v2391_v21 = vadd.f32 %v4474_v52, %v2288_v26 }
 0x1a6   :  { %v2325_v20 = vpop.f32.mrf.mxu0 }
 0x1a7   :  { %v2428_v15 = vpop.f32.mrf.mxu1  ;;  %v2427_v24 = vadd.f32 %v2426_v60, %v2324_v48 }
 0x1a8   :  { %v2327_v10 = vpop.f32.mrf.mxu0 }
 0x1a9   :  { %v2430_v29 = vpop.f32.mrf.mxu1  ;;  %v2328_v45 = vadd.f32 %v2327_v10, %v4445_v42 }
 0x1aa   :  { %v2331_v59 = vpop.f32.mrf.mxu0 }
 0x1ab   :  { %v2434_v46 = vpop.f32.mrf.mxu1  ;;  %v2431_v44 = vadd.f32 %v2430_v29, %v2328_v45  ;;  %v2397_v29 = vadd.f32 %v4482_v35, %v2294_v58 }
 0x1ac   :  { %v2333_v18 = vpop.f32.mrf.mxu0 }
 0x1ad   :  { %v4524_v23 = vpop.f32.mrf.mxu1  ;;  %v2334_v54 = vadd.f32 %v2333_v18, %v4451_v57 }
 0x1ae   :  { %v2335_v33 = vpop.f32.mrf.mxu0 }
 0x1af   :  { %v4526_v5 = vpop.f32.mrf.mxu1  ;;  %v2336_v53 = vadd.f32 %v2335_v33, %v4454_v62  ;;  %v2437_v62 = vadd.f32 %v4524_v23, %v2334_v54 }
 0x1b0   :  { %v4528_v47 = vpop.f32.mrf.mxu0 }
 0x1b1   :  { %v4530_v28 = vpop.f32.mrf.mxu1  ;;  %v2338_v61 = vadd.f32 %v4528_v47, %v4457_v4  ;;  %v2439_v4 = vadd.f32 %v4526_v5, %v2336_v53  ;;  %v2304_v5 = vadd.f32 %v4496_v7, %v4415_v50  ;;  %v4734_v50 = vld [vmem:[#allocation11_spill] sm:$0xff]  ;;  %v4743_v53 = vld [vmem:[#allocation10_spill] sm:$0xff] }
 0x1b2   :  { %4726 = vst [vmem:[#allocation25_spill] sm:$0xff] %v4530_v28  ;;  %v4532_v37 = vpop.f32.mrf.mxu0  ;;  %v2405_v7 = vadd.f32 %v4734_v50, %v2302_v40 }
 0x1b3   :  { %v4534_v12 = vpop.f32.mrf.mxu1  ;;  %v2342_v23 = vadd.f32 %v4532_v37, %v4460_v9  ;;  %v4732_v37 = vld [vmem:[#allocation8_spill] sm:$0xff] }
 0x1b4   :  { %4727 = vst [vmem:[#allocation26_spill] sm:$0xff] %v4534_v12  ;;  %v4536_v39 = vpop.f32.mrf.mxu0  ;;  %v2326_v12 = vadd.f32 %v2325_v20, %v4442_v36  ;;  %v2292_v20 = vadd.f32 %v4476_v56, %v4400_v22 }
 0x1b5   :  { %4728 = vst [vmem:[#allocation27_spill] sm:$0xff] %v4536_v39  ;;  %v4538_v25 = vpop.f32.mrf.mxu1 }
 0x1b6   :  { %4729 = vst [vmem:[#allocation28_spill] sm:$0xff] %v4538_v25  ;;  %v4542_v19 = vpop.f32.mrf.mxu0  ;;  %v2385_v25 = vadd.f32 %v2384_v0, %v2282_v63  ;;  %v2429_v36 = vadd.f32 %v2428_v15, %v2326_v12  ;;  %v2332_v63 = vadd.f32 %v2331_v59, %v4448_v49  ;;  %v2395_v56 = vadd.f32 %v4478_v8, %v2292_v20 }
 0x1b7   :  { %v4544_v55 = vpop.f32.mrf.mxu1 }
 0x1b8   :  { %4730 = vst [vmem:[#allocation29_spill] sm:$0xff] %v4544_v55  ;;  %v4550_v28 = vpop.f32.mrf.mxu0  ;;  %v2435_v57 = vadd.f32 %v2434_v46, %v2332_v63 }
 0x1b9   :  { %v4552_v39 = vpop.f32.mrf.mxu1  ;;  %v4731_v9 = vld [vmem:[#allocation25_spill] sm:$0xff] }
 0x1ba   :  { %v2487_v14 = vpop.f32.mrf.mxu0  ;;  %v2441_v17 = vadd.f32 %v4731_v9, %v2338_v61  ;;  %v4745_v61 = vld [vmem:[#allocation4_spill] sm:$0xff] }
 0x1bb   :  { %v2527_v55 = vpop.f32.mrf.mxu1  ;;  %v2488_v31 = vadd.f32 %v2487_v14, %v2385_v25 }
 0x1bc   :  { %v2528_v41 = vadd.f32 %v2527_v55, %v2425_v1  ;;  %v2489_v0 = vpop.f32.mrf.mxu0 }
 0x1bd   :  { %v2529_v51 = vpop.f32.mrf.mxu1  ;;  %v2556_v16 = vmax.f32 %v2488_v31, 0.0  ;;  %v2490_v10 = vadd.f32 %v2489_v0, %v2387_v6  ;;  %v4735_v0 = vld [vmem:[#allocation2_spill] sm:$0xff] }
 0x1be   :  { %v2572_v30 = vmax.f32 %v2528_v41, 0.0  ;;  %v2530_v42 = vadd.f32 %v2529_v51, %v2427_v24  ;;  %v2491_v3 = vpop.f32.mrf.mxu0  ;;  %v4733_v24 = vld [vmem:[#allocation27_spill] sm:$0xff]  ;;  %v4736_v51 = vld [vmem:[#allocation13_spill] sm:$0xff] }
 0x1bf   :  { %v2531_v48 = vpop.f32.mrf.mxu1  ;;  %2584 = vst [vmem:[%s4702_s3] sm:$0xff] %v2556_v16  ;;  %v2557_v22 = vmax.f32 %v2490_v10, 0.0  ;;  %v2492_v49 = vadd.f32 %v2491_v3, %v2389_v11  ;;  %v2344_v31 = vadd.f32 %v4733_v24, %v4732_v37  ;;  %v2306_v16 = vadd.f32 %v4736_v51, %v4735_v0  ;;  %v4751_v24 = vld [vmem:[#allocation18_spill] sm:$0xff]  ;;  %v4754_v0 = vld [vmem:[#allocation20_spill] sm:$0xff] }
 0x1c0   :  { %2600 = vst [vmem:[%s4702_s3 + $0x80] sm:$0xff] %v2572_v30  ;;  %v2573_v15 = vmax.f32 %v2530_v42, 0.0  ;;  %v2532_v52 = vadd.f32 %v2531_v48, %v2429_v36  ;;  %v2493_v55 = vpop.f32.mrf.mxu0  ;;  %v4737_v30 = vld [vmem:[#allocation26_spill] sm:$0xff]  ;;  %v4738_v42 = vld [vmem:[#allocation9_spill] sm:$0xff] }
 0x1c1   :  { %v2533_v12 = vpop.f32.mrf.mxu1  ;;  %2585 = vst [vmem:[%s4702_s3 + $0x8] sm:$0xff] %v2557_v22  ;;  %v2558_v25 = vmax.f32 %v2492_v49, 0.0  ;;  %v2494_v18 = vadd.f32 %v2493_v55, %v2391_v21  ;;  %v2445_v10 = vadd.f32 %v4737_v30, %v2342_v23  ;;  %v2346_v21 = vadd.f32 %v4542_v19, %v4738_v42  ;;  %v4742_v19 = vld [vmem:[#allocation28_spill] sm:$0xff]  ;;  %v4755_v30 = vld [vmem:[#allocation7_spill] sm:$0xff] }
 0x1c2   :  { %2601 = vst [vmem:[%s4702_s3 + $0x88] sm:$0xff] %v2573_v15  ;;  %v2574_v59 = vmax.f32 %v2532_v52, 0.0  ;;  %v2534_v8 = vadd.f32 %v2533_v12, %v2431_v44  ;;  %v2497_v46 = vpop.f32.mrf.mxu0  ;;  %v4739_v15 = vld [vmem:[#allocation12_spill] sm:$0xff]  ;;  %v4740_v52 = vld [vmem:[#allocation3_spill] sm:$0xff]  ;;  %v2348_v55 = vadd.f32 %v4550_v28, %v4743_v53  ;;  %v4747_v28 = vld [vmem:[#allocation29_spill] sm:$0xff] }
 0x1c3   :  { %v2537_v33 = vpop.f32.mrf.mxu1  ;;  %2586 = vst [vmem:[%s4702_s3 + $0x10] sm:$0xff] %v2558_v25  ;;  %v2559_v34 = vmax.f32 %v2494_v18, 0.0  ;;  %v2498_v60 = vadd.f32 %v2497_v46, %v2395_v56  ;;  %v2407_v49 = vadd.f32 %v4739_v15, %v2304_v5  ;;  %v4741_v56 = vld [vmem:[#allocation15_spill] sm:$0xff]  ;;  %v4746_v46 = vld [vmem:[#allocation17_spill] sm:$0xff]  ;;  %v4748_v23 = vld [vmem:[#allocation16_spill] sm:$0xff] }
 0x1c4   :  { %2602 = vst [vmem:[%s4702_s3 + $0x90] sm:$0xff] %v2574_v59  ;;  %v2575_v35 = vmax.f32 %v2534_v8, 0.0  ;;  %v2538_v1 = vadd.f32 %v2537_v33, %v2435_v57  ;;  %v2499_v47 = vpop.f32.mrf.mxu0  ;;  %v2308_v27 = vadd.f32 %v4741_v56, %v4740_v52  ;;  %v2447_v57 = vadd.f32 %v4742_v19, %v2344_v31  ;;  %v4758_v52 = vld [vmem:[#allocation24_spill] sm:$0xff] }
 0x1c5   :  { %v2539_v26 = vpop.f32.mrf.mxu1  ;;  %2587 = vst [vmem:[%s4702_s3 + $0x18] sm:$0xff] %v2559_v34  ;;  %v2560_v45 = vmax.f32 %v2498_v60, 0.0  ;;  %v2500_v14 = vadd.f32 %v2499_v47, %v2397_v29  ;;  %v2312_v33 = vadd.f32 %v4746_v46, %v4745_v61  ;;  %v2449_v34 = vadd.f32 %v4747_v28, %v2346_v21 }
 0x1c6   :  { %2603 = vst [vmem:[%s4702_s3 + $0x98] sm:$0xff] %v2575_v35  ;;  %v2576_v13 = vmax.f32 %v2538_v1, 0.0  ;;  %v2540_v6 = vadd.f32 %v2539_v26, %v2437_v62  ;;  %v2501_v41 = vpop.f32.mrf.mxu0  ;;  %v2409_v62 = vadd.f32 %v4744_v32, %v2306_v16  ;;  %v2411_v47 = vadd.f32 %v4748_v23, %v2308_v27  ;;  %v4749_v26 = vld [vmem:[#allocation5_spill] sm:$0xff] }
 0x1c7   :  { %v2541_v11 = vpop.f32.mrf.mxu1  ;;  %2588 = vst [vmem:[%s4702_s3 + $0x20] sm:$0xff] %v2560_v45  ;;  %v2561_v20 = vmax.f32 %v2500_v14, 0.0  ;;  %v2502_v36 = vadd.f32 %v2501_v41, %v2399_v38  ;;  %v4750_v45 = vld [vmem:[#allocation19_spill] sm:$0xff]  ;;  %v2451_v14 = vadd.f32 %v4552_v39, %v2348_v55  ;;  %v2415_v31 = vadd.f32 %v4751_v24, %v2312_v33  ;;  %v4752_v41 = vld [vmem:[#allocation6_spill] sm:$0xff] }
 0x1c8   :  { %2604 = vst [vmem:[%s4702_s3 + $0xa0] sm:$0xff] %v2576_v13  ;;  %v2577_v2 = vmax.f32 %v2540_v6, 0.0  ;;  %v2542_v63 = vadd.f32 %v2541_v11, %v2439_v4  ;;  %v2503_v58 = vpop.f32.mrf.mxu0  ;;  %v2314_v13 = vadd.f32 %v4750_v45, %v4749_v26  ;;  %v4753_v11 = vld [vmem:[#allocation21_spill] sm:$0xff] }
 0x1c9   :  { %v2543_v44 = vpop.f32.mrf.mxu1  ;;  %2589 = vst [vmem:[%s4702_s3 + $0x28] sm:$0xff] %v2561_v20  ;;  %v2562_v54 = vmax.f32 %v2502_v36, 0.0  ;;  %v2504_v48 = vadd.f32 %v2503_v58, %v2401_v43  ;;  %v2316_v20 = vadd.f32 %v4753_v11, %v4752_v41 }
 0x1ca   :  { %2605 = vst [vmem:[%s4702_s3 + $0xa8] sm:$0xff] %v2577_v2  ;;  %v2578_v3 = vmax.f32 %v2542_v63, 0.0  ;;  %v2544_v22 = vadd.f32 %v2543_v44, %v2441_v17  ;;  %v2507_v12 = vpop.f32.mrf.mxu0  ;;  %v2417_v51 = vadd.f32 %v4754_v0, %v2314_v13 }
 0x1cb   :  { %v2547_v25 = vpop.f32.mrf.mxu1  ;;  %2590 = vst [vmem:[%s4702_s3 + $0x30] sm:$0xff] %v2562_v54  ;;  %v2563_v59 = vmax.f32 %v2504_v48, 0.0  ;;  %v2508_v8 = vadd.f32 %v2507_v12, %v2405_v7 }
 0x1cc   :  { %2606 = vst [vmem:[%s4702_s3 + $0xb0] sm:$0xff] %v2578_v3  ;;  %v2579_v18 = vmax.f32 %v2544_v22, 0.0  ;;  %v2548_v29 = vadd.f32 %v2547_v25, %v2445_v10  ;;  %v2509_v35 = vpop.f32.mrf.mxu0  ;;  %v4756_v10 = vld [vmem:[#allocation23_spill] sm:$0xff]  ;;  %v4757_v3 = vld [vmem:[#allocation22_spill] sm:$0xff] }
 0x1cd   :  { %v2549_v60 = vpop.f32.mrf.mxu1  ;;  %2591 = vst [vmem:[%s4702_s3 + $0x38] sm:$0xff] %v2563_v59  ;;  %v2564_v1 = vmax.f32 %v2508_v8, 0.0  ;;  %v2510_v40 = vadd.f32 %v2509_v35, %v2407_v49  ;;  %v2318_v42 = vadd.f32 %v4756_v10, %v4755_v30  ;;  %v2419_v48 = vadd.f32 %v4757_v3, %v2316_v20 }
 0x1ce   :  { %2607 = vst [vmem:[%s4702_s3 + $0xb8] sm:$0xff] %v2579_v18  ;;  %v2580_v38 = vmax.f32 %v2548_v29, 0.0  ;;  %v2550_v4 = vadd.f32 %v2549_v60, %v2447_v57  ;;  %v2511_v6 = vpop.f32.mrf.mxu0 }
 0x1cf   :  { %v2551_v43 = vpop.f32.mrf.mxu1  ;;  %2592 = vst [vmem:[%s4702_s3 + $0x40] sm:$0xff] %v2564_v1  ;;  %v2565_v5 = vmax.f32 %v2510_v40, 0.0  ;;  %v2512_v17 = vadd.f32 %v2511_v6, %v2409_v62  ;;  %v2421_v56 = vadd.f32 %v4758_v52, %v2318_v42 }
 0x1d0   :  { %2608 = vst [vmem:[%s4702_s3 + $0xc0] sm:$0xff] %v2580_v38  ;;  %v2581_v9 = vmax.f32 %v2550_v4, 0.0  ;;  %v2552_v37 = vadd.f32 %v2551_v43, %v2449_v34  ;;  %v2513_v39 = vpop.f32.mrf.mxu0 }
 0x1d1   :  { %v2553_v2 = vpop.f32.mrf.mxu1  ;;  %2593 = vst [vmem:[%s4702_s3 + $0x48] sm:$0xff] %v2565_v5  ;;  %v2566_v36 = vmax.f32 %v2512_v17, 0.0  ;;  %v2514_v50 = vadd.f32 %v2513_v39, %v2411_v47 }
 0x1d2   :  { %2609 = vst [vmem:[%s4702_s3 + $0xc8] sm:$0xff] %v2581_v9  ;;  %v2582_v63 = vmax.f32 %v2552_v37, 0.0  ;;  %v2554_v7 = vadd.f32 %v2553_v2, %v2451_v14  ;;  %v2517_v16 = vpop.f32.mrf.mxu0 }
 0x1d3   :  { %2594 = vst [vmem:[%s4702_s3 + $0x50] sm:$0xff] %v2566_v36  ;;  %v2567_v21 = vmax.f32 %v2514_v50, 0.0  ;;  %v2518_v44 = vadd.f32 %v2517_v16, %v2415_v31 }
 0x1d4   :  { %2610 = vst [vmem:[%s4702_s3 + $0xd0] sm:$0xff] %v2582_v63  ;;  %v2583_v58 = vmax.f32 %v2554_v7, 0.0  ;;  %v2519_v54 = vpop.f32.mrf.mxu0 }
 0x1d5   :  { %2595 = vst [vmem:[%s4702_s3 + $0x58] sm:$0xff] %v2567_v21  ;;  %v2568_v22 = vmax.f32 %v2518_v44, 0.0  ;;  %v2520_v15 = vadd.f32 %v2519_v54, %v2417_v51 }
 0x1d6   :  { %2611 = vst [vmem:[%s4702_s3 + $0xd8] sm:$0xff] %v2583_v58  ;;  %v2521_v49 = vpop.f32.mrf.mxu0 }
 0x1d7   :  { %2596 = vst [vmem:[%s4702_s3 + $0x60] sm:$0xff] %v2568_v22  ;;  %v2569_v27 = vmax.f32 %v2520_v15, 0.0  ;;  %v2522_v19 = vadd.f32 %v2521_v49, %v2419_v48 }
 0x1d8   :  { %v2523_v57 = vpop.f32.mrf.mxu0 }
 0x1d9   :  { %2597 = vst [vmem:[%s4702_s3 + $0x68] sm:$0xff] %v2569_v27  ;;  %v2570_v53 = vmax.f32 %v2522_v19, 0.0  ;;  %v2524_v55 = vadd.f32 %v2523_v57, %v2421_v56 }
 0x1db   :  { %2598 = vst [vmem:[%s4702_s3 + $0x70] sm:$0xff] %v2570_v53  ;;  %v2571_v12 = vmax.f32 %v2524_v55, 0.0 }
 0x1dd   :  { %2599 = vst [vmem:[%s4702_s3 + $0x78] sm:$0xff] %v2571_v12 }

// kernel: alexnet_conv_forward.9
= control target key start
LH: loop header
LB: loop body
LE: loop exit
PB: predicated region body
PF: predicated region fallthrough
CT: control target
= control target key end

     0   :  { %s782_s30 = smov 0   ;;  %s850_s0 = inlined_call_operand.vmem [shape: f32[2,3,3,256], index: 0, kind: input, shape index: {}]   ;;  %s851_s1 = inlined_call_operand.vmem [shape: f32[2,3,3,256], index: 1, kind: input, shape index: {}]   ;;  %s852_s2 = inlined_call_operand.vmem [shape: f32[2,3,3,256], index: 2, kind: input, shape index: {}]   ;;  %s853_s3 = inlined_call_operand.vmem [shape: f32[2,3,3,256], index: 3, kind: input, shape index: {}]   ;;  %s854_s4 = inlined_call_operand.vmem [shape: f32[2,3,3,256], index: 4, kind: input, shape index: {}]   ;;  %s855_s5 = inlined_call_operand.vmem [shape: f32[2,3,3,256], index: 5, kind: input, shape index: {}]   ;;  %s856_s6 = inlined_call_operand.vmem [shape: f32[2,3,3,256], index: 6, kind: input, shape index: {}]   ;;  %s857_s7 = inlined_call_operand.vmem [shape: f32[2,3,3,256], index: 7, kind: input, shape index: {}]   ;;  %s858_s8 = inlined_call_operand.vmem [shape: f32[2,3,3,256], index: 8, kind: input, shape index: {}]   ;;  %s859_s9 = inlined_call_operand.vmem [shape: f32[2,3,3,256], index: 9, kind: output, shape index: {}]  }
   0x1 LB: > { %s698_s10 = sadd.s32 4294967295, %s730_s30   ;;  %p702_p0 = scmp.ge.s32.totalorder %s730_s30, 1  ;;  %s730_s30 = sphi %s782_s30, %s19_s30  }
   0x2   : > { %p367_p1 = scmp.lt.s32.totalorder %s730_s30, 3 }
   0x4   : > { %p368_p2 = pnand %p702_p0, %p367_p1 }
   0x5   : > { %p443_p3 = scmp.lt.s32.totalorder (!%p368_p2), %s698_s10, 1 }
   0x6   : > { %371 = sbr.rel (%p368_p2) target bundleno = 35 (0x23), region = 56 }
   0xb   : > { %s861_s10 = smov (!%p443_p3, %s698_s10), 1 }
   0xc   : > { %s790_s11 = smul.u32 24, %s861_s10 }
   0xe   : > { %s447_s14 = scalar_lea.vmem %s850_s0, %s790_s11  ;;  %s452_s17 = scalar_lea.vmem %s851_s1, %s790_s11 }
   0xf   : > { %s457_s20 = scalar_lea.vmem %s852_s2, %s790_s11  ;;  %s462_s23 = scalar_lea.vmem %s853_s3, %s790_s11  ;;  %v493_v0 = vld [vmem:[%s447_s14] sm:$0x77]  ;;  %v494_v2 = vld [vmem:[%s447_s14 + $0x8] sm:$0x77]  ;;  %v495_v17 = vld [vmem:[%s447_s14 + $0x10] sm:$0x77] }
  0x10   : > { %v496_v1 = vld [vmem:[%s452_s17] sm:$0x77]  ;;  %s812_s26 = scalar_lea.vmem %s854_s4, %s790_s11  ;;  %v497_v5 = vld [vmem:[%s452_s17 + $0x8] sm:$0x77]  ;;  %s818_s29 = scalar_lea.vmem %s855_s5, %s790_s11  ;;  %v498_v18 = vld [vmem:[%s452_s17 + $0x10] sm:$0x77] }
  0x11   : > { %v499_v3 = vmax.f32 %v493_v0, %v496_v1  ;;  %v502_v4 = vld [vmem:[%s457_s20] sm:$0x77]  ;;  %v500_v7 = vmax.f32 %v494_v2, %v497_v5  ;;  %v503_v8 = vld [vmem:[%s457_s20 + $0x8] sm:$0x77]  ;;  %s825_s13 = scalar_lea.vmem %s856_s6, %s790_s11  ;;  %v504_v19 = vld [vmem:[%s457_s20 + $0x10] sm:$0x77]  ;;  %s482_s18 = scalar_lea.vmem %s857_s7, %s790_s11  ;;  %v501_v22 = vmax.f32 %v495_v17, %v498_v18 }
  0x12   : > { %v508_v6 = vld [vmem:[%s462_s23] sm:$0x77]  ;;  %v509_v10 = vld [vmem:[%s462_s23 + $0x8] sm:$0x77]  ;;  %v510_v25 = vld [vmem:[%s462_s23 + $0x10] sm:$0x77]  ;;  %s487_s22 = scalar_lea.vmem %s858_s8, %s790_s11  ;;  %s492_s20 = scalar_lea.vmem %s859_s9, %s790_s11 }
  0x13   : > { %v505_v9 = vmax.f32 %v499_v3, %v502_v4  ;;  %v514_v11 = vld [vmem:[%s812_s26] sm:$0x77]  ;;  %v506_v12 = vmax.f32 %v500_v7, %v503_v8  ;;  %v515_v15 = vld [vmem:[%s812_s26 + $0x8] sm:$0x77]  ;;  %v507_v28 = vmax.f32 %v501_v22, %v504_v19  ;;  %v516_v31 = vld [vmem:[%s812_s26 + $0x10] sm:$0x77] }
  0x14   : > { %v520_v14 = vld [vmem:[%s818_s29] sm:$0x77]  ;;  %v521_v21 = vld [vmem:[%s818_s29 + $0x8] sm:$0x77]  ;;  %v522_v37 = vld [vmem:[%s818_s29 + $0x10] sm:$0x77] }
  0x15   : > { %v511_v13 = vmax.f32 %v505_v9, %v508_v6  ;;  %v512_v16 = vmax.f32 %v506_v12, %v509_v10  ;;  %v526_v23 = vld [vmem:[%s825_s13] sm:$0x77]  ;;  %v527_v27 = vld [vmem:[%s825_s13 + $0x8] sm:$0x77]  ;;  %v513_v34 = vmax.f32 %v507_v28, %v510_v25  ;;  %v528_v42 = vld [vmem:[%s825_s13 + $0x10] sm:$0x77] }
  0x16   : > { %v532_v29 = vld [vmem:[%s482_s18] sm:$0x77]  ;;  %v533_v33 = vld [vmem:[%s482_s18 + $0x8] sm:$0x77]  ;;  %v534_v46 = vld [vmem:[%s482_s18 + $0x10] sm:$0x77] }
  0x17   : > { %v517_v20 = vmax.f32 %v511_v13, %v514_v11  ;;  %v518_v24 = vmax.f32 %v512_v16, %v515_v15  ;;  %v538_v35 = vld [vmem:[%s487_s22] sm:$0x77]  ;;  %v539_v39 = vld [vmem:[%s487_s22 + $0x8] sm:$0x77]  ;;  %v519_v40 = vmax.f32 %v513_v34, %v516_v31  ;;  %v540_v48 = vld [vmem:[%s487_s22 + $0x10] sm:$0x77] }
  0x19   : > { %v523_v26 = vmax.f32 %v517_v20, %v520_v14  ;;  %v524_v30 = vmax.f32 %v518_v24, %v521_v21  ;;  %v525_v44 = vmax.f32 %v519_v40, %v522_v37 }
  0x1b   : > { %v529_v32 = vmax.f32 %v523_v26, %v526_v23  ;;  %v530_v36 = vmax.f32 %v524_v30, %v527_v27  ;;  %v531_v47 = vmax.f32 %v525_v44, %v528_v42 }
  0x1d   : > { %v535_v38 = vmax.f32 %v529_v32, %v532_v29  ;;  %v536_v41 = vmax.f32 %v530_v36, %v533_v33  ;;  %v537_v49 = vmax.f32 %v531_v47, %v534_v46 }
  0x1f   : > { %v541_v43 = vmax.f32 %v535_v38, %v538_v35  ;;  %v542_v45 = vmax.f32 %v536_v41, %v539_v39  ;;  %v543_v50 = vmax.f32 %v537_v49, %v540_v48 }
  0x21   : > { %544 = vst [vmem:[%s492_s20] sm:$0x77] %v541_v43  ;;  %545 = vst [vmem:[%s492_s20 + $0x8] sm:$0x77] %v542_v45 }
  0x22   : > { %546 = vst [vmem:[%s492_s20 + $0x10] sm:$0x77] %v543_v50 }
  0x23 PF: > { %s19_s30 = sadd.s32 1, %s730_s30  }
  0x24   : > { %p16_p4 = scmp.ge.s32.totalorder %s19_s30, 4  }
  0x26   :  { %18 = sbr.rel (!%p16_p4) target bundleno = 1 (0x1), region = 110 }

// kernel: alexnet_conv_forward.10
= control target key start
LH: loop header
LB: loop body
LE: loop exit
PB: predicated region body
PF: predicated region fallthrough
CT: control target
= control target key end

     0   :  { %s5608_s1 = inlined_call_operand.vmem [shape: bf16[1792,384], index: 1, kind: input, shape index: {}]   ;;  %s5609_s0 = inlined_call_operand.vmem [shape: bf16[32,1792], index: 0, kind: input, shape index: {}]   ;;  %s5610_s2 = inlined_call_operand.vmem [shape: f32[1,384], index: 2, kind: input, shape index: {}]   ;;  %s5611_s3 = inlined_call_operand.vmem [shape: f32[32,384], index: 3, kind: output, shape index: {}]  }
   0x1   :  { %v3758_v0 = vld [vmem:[%s5608_s1 + $0xac] ss:$12 sps:$4 sm:$0xff]   ;;  %v3762_v2 = vld [vmem:[%s5608_s1 + $0xa8] ss:$12 sps:$4 sm:$0xff]   ;;  %v3768_v6 = vld [vmem:[%s5608_s1 + $0x90] ss:$12 sps:$4 sm:$0xff]  }
   0x2   :  { %v3760_v1 = vld [vmem:[%s5608_s1 + $0x22c] ss:$12 sps:$4 sm:$0xff]   ;;  %2440 = vmatprep.subr.bf16.mxu0 %v3758_v0  ;;  %v3763_v3 = vld [vmem:[%s5608_s1 + $0x228] ss:$12 sps:$4 sm:$0xff]   ;;  %v3769_v7 = vld [vmem:[%s5608_s1 + $0x210] ss:$12 sps:$4 sm:$0xff]  }
   0x3   :  { %2493 = vmatprep.subr.bf16.mxu1 %v3760_v1  ;;  %v3764_v4 = vld [vmem:[%s5608_s1 + $0x94] ss:$12 sps:$4 sm:$0xff]   ;;  %2441 = vmatpush1.bf16.msra.mxu0 %v3762_v2  ;;  %v3770_v8 = vld [vmem:[%s5608_s1 + $0x7c] ss:$12 sps:$4 sm:$0xff]   ;;  %v3774_v10 = vld [vmem:[%s5608_s1 + $0x78] ss:$12 sps:$4 sm:$0xff]  }
   0x4   :  { %2494 = vmatpush1.bf16.msra.mxu1 %v3763_v3  ;;  %v3766_v5 = vld [vmem:[%s5608_s1 + $0x214] ss:$12 sps:$4 sm:$0xff]   ;;  %2442 = vmatprep.subr.bf16.mxu0 %v3764_v4  ;;  %v3772_v9 = vld [vmem:[%s5608_s1 + $0x1fc] ss:$12 sps:$4 sm:$0xff]   ;;  %v3775_v11 = vld [vmem:[%s5608_s1 + $0x1f8] ss:$12 sps:$4 sm:$0xff]  }
   0x5   :  { %2495 = vmatprep.subr.bf16.mxu1 %v3766_v5  ;;  %v3776_v12 = vld [vmem:[%s5608_s1 + $0x64] ss:$12 sps:$4 sm:$0xff]   ;;  %v3780_v14 = vld [vmem:[%s5608_s1 + $0x60] ss:$12 sps:$4 sm:$0xff]   ;;  %v3786_v18 = vld [vmem:[%s5608_s1 + $0x48] ss:$12 sps:$4 sm:$0xff]  }
   0x6   :  { %v3778_v13 = vld [vmem:[%s5608_s1 + $0x1e4] ss:$12 sps:$4 sm:$0xff]   ;;  %v3781_v15 = vld [vmem:[%s5608_s1 + $0x1e0] ss:$12 sps:$4 sm:$0xff]   ;;  %v3787_v19 = vld [vmem:[%s5608_s1 + $0x1c8] ss:$12 sps:$4 sm:$0xff]  }
   0x7   :  { %2443 = vmatpush1.bf16.msra.mxu0 %v3768_v6  ;;  %v3782_v16 = vld [vmem:[%s5608_s1 + $0x4c] ss:$12 sps:$4 sm:$0xff]   ;;  %v3788_v20 = vld [vmem:[%s5608_s1 + $0x34] ss:$12 sps:$4 sm:$0xff]   ;;  %v3792_v22 = vld [vmem:[%s5608_s1 + $0x30] ss:$12 sps:$4 sm:$0xff]  }
   0x8   :  { %2496 = vmatpush1.bf16.msra.mxu1 %v3769_v7  ;;  %2444 = vmatprep.subr.bf16.mxu0 %v3770_v8  ;;  %v3784_v17 = vld [vmem:[%s5608_s1 + $0x1cc] ss:$12 sps:$4 sm:$0xff]   ;;  %v3790_v21 = vld [vmem:[%s5608_s1 + $0x1b4] ss:$12 sps:$4 sm:$0xff]   ;;  %v3793_v23 = vld [vmem:[%s5608_s1 + $0x1b0] ss:$12 sps:$4 sm:$0xff]  }
   0x9   :  { %2497 = vmatprep.subr.bf16.mxu1 %v3772_v9  ;;  %v3794_v24 = vld [vmem:[%s5608_s1 + $0x1c] ss:$12 sps:$4 sm:$0xff]   ;;  %v3798_v26 = vld [vmem:[%s5608_s1 + $0x18] ss:$12 sps:$4 sm:$0xff]   ;;  %v3804_v30 = vld [vmem:[%s5608_s1] ss:$12 sps:$4 sm:$0xff]  }
   0xa   :  { %v3796_v25 = vld [vmem:[%s5608_s1 + $0x19c] ss:$12 sps:$4 sm:$0xff]   ;;  %v3799_v27 = vld [vmem:[%s5608_s1 + $0x198] ss:$12 sps:$4 sm:$0xff]   ;;  %v3805_v31 = vld [vmem:[%s5608_s1 + $0x180] ss:$12 sps:$4 sm:$0xff]  }
   0xb   :  { %2445 = vmatpush1.bf16.msra.mxu0 %v3774_v10  ;;  %v3800_v28 = vld [vmem:[%s5608_s1 + $0x4] ss:$12 sps:$4 sm:$0xff]   ;;  %v3806_v32 = vld [vmem:[%s5608_s1 + $0x16c] ss:$12 sps:$4 sm:$0xff]   ;;  %v3810_v34 = vld [vmem:[%s5608_s1 + $0x168] ss:$12 sps:$4 sm:$0xff]  }
   0xc   :  { %2498 = vmatpush1.bf16.msra.mxu1 %v3775_v11  ;;  %2446 = vmatprep.subr.bf16.mxu0 %v3776_v12  ;;  %v3802_v29 = vld [vmem:[%s5608_s1 + $0x184] ss:$12 sps:$4 sm:$0xff]   ;;  %v3808_v33 = vld [vmem:[%s5608_s1 + $0x2ec] ss:$12 sps:$4 sm:$0xff]   ;;  %v3811_v35 = vld [vmem:[%s5608_s1 + $0x2e8] ss:$12 sps:$4 sm:$0xff]  }
   0xd   :  { %2499 = vmatprep.subr.bf16.mxu1 %v3778_v13  ;;  %v3812_v36 = vld [vmem:[%s5608_s1 + $0x154] ss:$12 sps:$4 sm:$0xff]   ;;  %v3816_v38 = vld [vmem:[%s5608_s1 + $0x150] ss:$12 sps:$4 sm:$0xff]   ;;  %v3822_v42 = vld [vmem:[%s5608_s1 + $0x138] ss:$12 sps:$4 sm:$0xff]  }
   0xe   :  { %v3814_v37 = vld [vmem:[%s5608_s1 + $0x2d4] ss:$12 sps:$4 sm:$0xff]   ;;  %v3817_v39 = vld [vmem:[%s5608_s1 + $0x2d0] ss:$12 sps:$4 sm:$0xff]   ;;  %v3823_v43 = vld [vmem:[%s5608_s1 + $0x2b8] ss:$12 sps:$4 sm:$0xff]  }
   0xf   :  { %2447 = vmatpush1.bf16.msra.mxu0 %v3780_v14  ;;  %v3818_v40 = vld [vmem:[%s5608_s1 + $0x13c] ss:$12 sps:$4 sm:$0xff]   ;;  %v3824_v44 = vld [vmem:[%s5608_s1 + $0x124] ss:$12 sps:$4 sm:$0xff]   ;;  %v3828_v46 = vld [vmem:[%s5608_s1 + $0x120] ss:$12 sps:$4 sm:$0xff]  }
  0x10   :  { %2500 = vmatpush1.bf16.msra.mxu1 %v3781_v15  ;;  %2448 = vmatprep.subr.bf16.mxu0 %v3782_v16  ;;  %v3820_v41 = vld [vmem:[%s5608_s1 + $0x2bc] ss:$12 sps:$4 sm:$0xff]   ;;  %v3826_v45 = vld [vmem:[%s5608_s1 + $0x2a4] ss:$12 sps:$4 sm:$0xff]   ;;  %v3829_v47 = vld [vmem:[%s5608_s1 + $0x2a0] ss:$12 sps:$4 sm:$0xff]  }
  0x11   :  { %2501 = vmatprep.subr.bf16.mxu1 %v3784_v17  ;;  %v3830_v48 = vld [vmem:[%s5608_s1 + $0x10c] ss:$12 sps:$4 sm:$0xff]   ;;  %v3856_v49 = vld [vmem:[%s5609_s0 + $0x4] ss:$56 sps:$4 sm:$0xff]   ;;  %v3834_v52 = vld [vmem:[%s5608_s1 + $0x108] ss:$12 sps:$4 sm:$0xff]  }
  0x12   :  { %v3832_v50 = vld [vmem:[%s5608_s1 + $0x28c] ss:$12 sps:$4 sm:$0xff]   ;;  %2472 = vmatprep.mubr.bf16.mxu0 %v3856_v49  ;;  %v3835_v53 = vld [vmem:[%s5608_s1 + $0x288] ss:$12 sps:$4 sm:$0xff]   ;;  %v3840_v56 = vld [vmem:[%s5608_s1 + $0xf0] ss:$12 sps:$4 sm:$0xff]  }
  0x13   :  { %2449 = vmatpush1.bf16.msra.mxu0 %v3786_v18  ;;  %v3859_v51 = vld [vmem:[%s5609_s0 + $0xc] ss:$56 sps:$4 sm:$0xff]   ;;  %v3836_v54 = vld [vmem:[%s5608_s1 + $0xf4] ss:$12 sps:$4 sm:$0xff]   ;;  %v3841_v57 = vld [vmem:[%s5608_s1 + $0x270] ss:$12 sps:$4 sm:$0xff]  }
  0x14   :  { %2502 = vmatpush1.bf16.msra.mxu1 %v3787_v19  ;;  %2450 = vmatprep.subr.bf16.mxu0 %v3788_v20  ;;  %v3838_v55 = vld [vmem:[%s5608_s1 + $0x274] ss:$12 sps:$4 sm:$0xff]   ;;  %v3842_v58 = vld [vmem:[%s5608_s1 + $0xdc] ss:$12 sps:$4 sm:$0xff]   ;;  %v3846_v60 = vld [vmem:[%s5608_s1 + $0xd8] ss:$12 sps:$4 sm:$0xff]  }
  0x15   :  { %2503 = vmatprep.subr.bf16.mxu1 %v3790_v21  ;;  %2525 = vmatprep.mubr.bf16.mxu1 %v3859_v51  ;;  %v3844_v59 = vld [vmem:[%s5608_s1 + $0x25c] ss:$12 sps:$4 sm:$0xff]   ;;  %v3847_v61 = vld [vmem:[%s5608_s1 + $0x258] ss:$12 sps:$4 sm:$0xff]   ;;  %v3852_v0 = vld [vmem:[%s5608_s1 + $0xc0] ss:$12 sps:$4 sm:$0xff]  }
  0x16   :  { %v3848_v62 = vld [vmem:[%s5608_s1 + $0xc4] ss:$12 sps:$4 sm:$0xff]   ;;  %v3853_v1 = vld [vmem:[%s5608_s1 + $0x240] ss:$12 sps:$4 sm:$0xff]   ;;  %v3860_v6 = vld [vmem:[%s5608_s1 + $0x3a8] ss:$12 sps:$4 sm:$0xff]  }
  0x17   :  { %2451 = vmatpush1.bf16.msra.mxu0 %v3792_v22  ;;  %v3850_v63 = vld [vmem:[%s5608_s1 + $0x244] ss:$12 sps:$4 sm:$0xff]   ;;  %v3862_v2 = vld [vmem:[%s5608_s1 + $0x3ac] ss:$12 sps:$4 sm:$0xff]   ;;  %v3857_v5 = vld [vmem:[%s5609_s0 + $0x8] ss:$56 sps:$4 sm:$0xff]  }
  0x18   :  { %2504 = vmatpush1.bf16.msra.mxu1 %v3793_v23  ;;  %2452 = vmatprep.subr.bf16.mxu0 %v3794_v24  ;;  %v3865_v3 = vld [vmem:[%s5608_s1 + $0x52c] ss:$12 sps:$4 sm:$0xff]   ;;  %v3863_v7 = vld [vmem:[%s5608_s1 + $0x528] ss:$12 sps:$4 sm:$0xff]   ;;  %v3866_v10 = vld [vmem:[%s5608_s1 + $0x390] ss:$12 sps:$4 sm:$0xff]  }
  0x19   :  { %2505 = vmatprep.subr.bf16.mxu1 %v3796_v25  ;;  %v3854_v4 = vld [vmem:[%s5609_s0] ss:$56 sps:$4 sm:$0xff]   ;;  %v3869_v11 = vld [vmem:[%s5608_s1 + $0x510] ss:$12 sps:$4 sm:$0xff]   ;;  %v3932_v22 = vld [vmem:[%s5609_s0 + $0x74] ss:$56 sps:$4 sm:$0xff]  }
  0x1a   :  { %v3868_v8 = vld [vmem:[%s5608_s1 + $0x394] ss:$12 sps:$4 sm:$0xff]   ;;  %v3874_v12 = vld [vmem:[%s5608_s1 + $0x37c] ss:$12 sps:$4 sm:$0xff]   ;;  %v3872_v14 = vld [vmem:[%s5608_s1 + $0x378] ss:$12 sps:$4 sm:$0xff]  }
  0x1b   :  { %2453 = vmatpush1.bf16.msra.mxu0 %v3798_v26  ;;  %v3871_v9 = vld [vmem:[%s5608_s1 + $0x514] ss:$12 sps:$4 sm:$0xff]   ;;  %v3877_v13 = vld [vmem:[%s5608_s1 + $0x4fc] ss:$12 sps:$4 sm:$0xff]   ;;  %v3875_v15 = vld [vmem:[%s5608_s1 + $0x4f8] ss:$12 sps:$4 sm:$0xff]  }
  0x1c   :  { %2506 = vmatpush1.bf16.msra.mxu1 %v3799_v27  ;;  %2454 = vmatprep.subr.bf16.mxu0 %v3800_v28  ;;  %v3880_v16 = vld [vmem:[%s5608_s1 + $0x364] ss:$12 sps:$4 sm:$0xff]   ;;  %v3878_v18 = vld [vmem:[%s5608_s1 + $0x360] ss:$12 sps:$4 sm:$0xff]   ;;  %v3884_v23 = vld [vmem:[%s5608_s1 + $0x348] ss:$12 sps:$4 sm:$0xff]  }
  0x1d   :  { %2507 = vmatprep.subr.bf16.mxu1 %v3802_v29  ;;  %v3883_v17 = vld [vmem:[%s5608_s1 + $0x4e4] ss:$12 sps:$4 sm:$0xff]   ;;  %v3881_v19 = vld [vmem:[%s5608_s1 + $0x4e0] ss:$12 sps:$4 sm:$0xff]   ;;  %v3887_v24 = vld [vmem:[%s5608_s1 + $0x4c8] ss:$12 sps:$4 sm:$0xff]  }
  0x1e   :  { %v3886_v20 = vld [vmem:[%s5608_s1 + $0x34c] ss:$12 sps:$4 sm:$0xff]   ;;  %v3892_v25 = vld [vmem:[%s5608_s1 + $0x334] ss:$12 sps:$4 sm:$0xff]   ;;  %v3940_v27 = vld [vmem:[%s5609_s0 + $0x70] ss:$56 sps:$4 sm:$0xff]  }
  0x1f   :  { %2455 = vmatpush1.bf16.msra.mxu0 %v3804_v30  ;;  %v3889_v21 = vld [vmem:[%s5608_s1 + $0x4cc] ss:$12 sps:$4 sm:$0xff]   ;;  %v3895_v26 = vld [vmem:[%s5608_s1 + $0x4b4] ss:$12 sps:$4 sm:$0xff]   ;;  %v3890_v28 = vld [vmem:[%s5608_s1 + $0x330] ss:$12 sps:$4 sm:$0xff]  }
  0x20   :  { %2508 = vmatpush1.bf16.msra.mxu1 %v3805_v31  ;;  %2456 = vmatprep.subr.bf16.mxu0 %v3806_v32  ;;  %v3941_v29 = vld [vmem:[%s5609_s0 + $0x7c] ss:$56 sps:$4 sm:$0xff]   ;;  %v3943_v31 = vld [vmem:[%s5609_s0 + $0x78] ss:$56 sps:$4 sm:$0xff]  }
  0x21   :  { %2509 = vmatprep.subr.bf16.mxu1 %v3808_v33  ;;  %v3893_v30 = vld [vmem:[%s5608_s1 + $0x4b0] ss:$12 sps:$4 sm:$0xff]  }
  0x22   :  { %v3898_v32 = vld [vmem:[%s5608_s1 + $0x31c] ss:$12 sps:$4 sm:$0xff]  }
  0x23   :  { %2457 = vmatpush2.bf16.msra.mxu0 %v3810_v34  ;;  %v3901_v33 = vld [vmem:[%s5608_s1 + $0x49c] ss:$12 sps:$4 sm:$0xff]   ;;  %v3896_v34 = vld [vmem:[%s5608_s1 + $0x318] ss:$12 sps:$4 sm:$0xff]  }
  0x24   :  { %2510 = vmatpush2.bf16.msra.mxu1 %v3811_v35  ;;  %2458 = vmatprep.subr.bf16.mxu0 %v3812_v36  ;;  %v3899_v35 = vld [vmem:[%s5608_s1 + $0x498] ss:$12 sps:$4 sm:$0xff]   ;;  %v3917_v49 = vld [vmem:[%s5608_s1 + $0x5d0] ss:$12 sps:$4 sm:$0xff]  }
  0x25   :  { %2511 = vmatprep.subr.bf16.mxu1 %v3814_v37  ;;  %v3904_v36 = vld [vmem:[%s5608_s1 + $0x304] ss:$12 sps:$4 sm:$0xff]   ;;  %v3925_v51 = vld [vmem:[%s5608_s1 + $0x5bc] ss:$12 sps:$4 sm:$0xff]  }
  0x26   :  { %v3907_v37 = vld [vmem:[%s5608_s1 + $0x484] ss:$12 sps:$4 sm:$0xff]  }
  0x27   :  { %2459 = vmatpush2.bf16.msra.mxu0 %v3816_v38  ;;  %v3902_v38 = vld [vmem:[%s5608_s1 + $0x300] ss:$12 sps:$4 sm:$0xff]  }
  0x28   :  { %2512 = vmatpush2.bf16.msra.mxu1 %v3817_v39  ;;  %2460 = vmatprep.subr.bf16.mxu0 %v3818_v40  ;;  %v3905_v39 = vld [vmem:[%s5608_s1 + $0x480] ss:$12 sps:$4 sm:$0xff]  }
  0x29   :  { %2513 = vmatprep.subr.bf16.mxu1 %v3820_v41  ;;  %v3910_v40 = vld [vmem:[%s5608_s1 + $0x46c] ss:$12 sps:$4 sm:$0xff]  }
  0x2a   :  { %v3964_v41 = vld [vmem:[%s5609_s0 + $0x14] ss:$56 sps:$4 sm:$0xff]  }
  0x2b   :  { %2461 = vmatpush2.bf16.msra.mxu0 %v3822_v42  ;;  %v3913_v42 = vld [vmem:[%s5608_s1 + $0x5ec] ss:$12 sps:$4 sm:$0xff]  }
  0x2c   :  { %2514 = vmatpush2.bf16.msra.mxu1 %v3823_v43  ;;  %2462 = vmatprep.subr.bf16.mxu0 %v3824_v44  ;;  %v3967_v43 = vld [vmem:[%s5609_s0 + $0x1c] ss:$56 sps:$4 sm:$0xff]  }
  0x2d   :  { %2515 = vmatprep.subr.bf16.mxu1 %v3826_v45  ;;  %v3908_v44 = vld [vmem:[%s5608_s1 + $0x468] ss:$12 sps:$4 sm:$0xff]  }
  0x2e   :  { %v3911_v45 = vld [vmem:[%s5608_s1 + $0x5e8] ss:$12 sps:$4 sm:$0xff]  }
  0x2f   :  { %2463 = vmatpush2.bf16.msra.mxu0 %v3828_v46  ;;  %v3916_v46 = vld [vmem:[%s5608_s1 + $0x454] ss:$12 sps:$4 sm:$0xff]  }
  0x30   :  { %2516 = vmatpush2.bf16.msra.mxu1 %v3829_v47  ;;  %2464 = vmatprep.subr.bf16.mxu0 %v3830_v48  ;;  %v3919_v47 = vld [vmem:[%s5608_s1 + $0x5d4] ss:$12 sps:$4 sm:$0xff]   ;;  %v3914_v48 = vld [vmem:[%s5608_s1 + $0x450] ss:$12 sps:$4 sm:$0xff]  }
  0x31   :  { %2517 = vmatprep.subr.bf16.mxu1 %v3832_v50  ;;  %v3922_v50 = vld [vmem:[%s5608_s1 + $0x43c] ss:$12 sps:$4 sm:$0xff]  }
  0x33   :  { %2465 = vmatpush2.bf16.msra.mxu0 %v3834_v52  ;;  %v3920_v52 = vld [vmem:[%s5608_s1 + $0x438] ss:$12 sps:$4 sm:$0xff]  }
  0x34   :  { %2518 = vmatpush2.bf16.msra.mxu1 %v3835_v53  ;;  %2466 = vmatprep.subr.bf16.mxu0 %v3836_v54  ;;  %v3923_v53 = vld [vmem:[%s5608_s1 + $0x5b8] ss:$12 sps:$4 sm:$0xff]  }
  0x35   :  { %2519 = vmatprep.subr.bf16.mxu1 %v3838_v55  ;;  %v3928_v54 = vld [vmem:[%s5608_s1 + $0x424] ss:$12 sps:$4 sm:$0xff]  }
  0x36   :  { %v3931_v55 = vld [vmem:[%s5608_s1 + $0x5a4] ss:$12 sps:$4 sm:$0xff]  }
  0x37   :  { %2467 = vmatpush2.bf16.msra.mxu0 %v3840_v56  ;;  %v3926_v56 = vld [vmem:[%s5608_s1 + $0x420] ss:$12 sps:$4 sm:$0xff]  }
  0x38   :  { %2520 = vmatpush2.bf16.msra.mxu1 %v3841_v57  ;;  %2468 = vmatprep.subr.bf16.mxu0 %v3842_v58  ;;  %v3929_v57 = vld [vmem:[%s5608_s1 + $0x5a0] ss:$12 sps:$4 sm:$0xff]  }
  0x39   :  { %2521 = vmatprep.subr.bf16.mxu1 %v3844_v59  ;;  %v3936_v58 = vld [vmem:[%s5608_s1 + $0x40c] ss:$12 sps:$4 sm:$0xff]  }
  0x3a   :  { %v3939_v59 = vld [vmem:[%s5608_s1 + $0x58c] ss:$12 sps:$4 sm:$0xff]  }
  0x3b   :  { %2469 = vmatpush2.bf16.msra.mxu0 %v3846_v60  ;;  %v3934_v60 = vld [vmem:[%s5608_s1 + $0x408] ss:$12 sps:$4 sm:$0xff]  }
  0x3c   :  { %2522 = vmatpush2.bf16.msra.mxu1 %v3847_v61  ;;  %2470 = vmatprep.subr.bf16.mxu0 %v3848_v62  ;;  %v3937_v61 = vld [vmem:[%s5608_s1 + $0x588] ss:$12 sps:$4 sm:$0xff]  }
  0x3d   :  { %2523 = vmatprep.subr.bf16.mxu1 %v3850_v63  ;;  %v3946_v62 = vld [vmem:[%s5608_s1 + $0x3f4] ss:$12 sps:$4 sm:$0xff]  }
  0x3e   :  { %v3949_v63 = vld [vmem:[%s5608_s1 + $0x574] ss:$12 sps:$4 sm:$0xff]  }
  0x3f   :  { %2471 = vmatpush2.bf16.msra.mxu0 %v3852_v0  ;;  %v3944_v0 = vld [vmem:[%s5608_s1 + $0x3f0] ss:$12 sps:$4 sm:$0xff]  }
  0x40   :  { %2524 = vmatpush2.bf16.msra.mxu1 %v3853_v1  ;;  %2546 = vmatprep.subr.bf16.mxu0 %v3862_v2  ;;  %v3947_v1 = vld [vmem:[%s5608_s1 + $0x570] ss:$12 sps:$4 sm:$0xff]  }
  0x41   :  { %2599 = vmatprep.subr.bf16.mxu1 %v3865_v3  ;;  %v3952_v2 = vld [vmem:[%s5608_s1 + $0x3dc] ss:$12 sps:$4 sm:$0xff]  }
  0x42   :  { %2473 = vmatmul.mubr.bf16.vlgmr.msra.gmra.mxu0 %v3854_v4  ;;  %v3955_v3 = vld [vmem:[%s5608_s1 + $0x55c] ss:$12 sps:$4 sm:$0xff]   ;;  %v3950_v4 = vld [vmem:[%s5608_s1 + $0x3d8] ss:$12 sps:$4 sm:$0xff]  }
  0x43   :  { %2526 = vmatmul.mubr.bf16.vlgmr.msra.gmra.mxu1 %v3857_v5  ;;  %2547 = vmatpush1.bf16.msra.mxu0 %v3860_v6  ;;  %v3953_v5 = vld [vmem:[%s5608_s1 + $0x558] ss:$12 sps:$4 sm:$0xff]  }
  0x44   :  { %2600 = vmatpush1.bf16.msra.mxu1 %v3863_v7  ;;  %2548 = vmatprep.subr.bf16.mxu0 %v3868_v8  ;;  %v3958_v6 = vld [vmem:[%s5608_s1 + $0x3c4] ss:$12 sps:$4 sm:$0xff]   ;;  %v3956_v8 = vld [vmem:[%s5608_s1 + $0x3c0] ss:$12 sps:$4 sm:$0xff]  }
  0x45   :  { %2601 = vmatprep.subr.bf16.mxu1 %v3871_v9  ;;  %2482 = vmatprep.mubr.bf16.mxu0 %v3932_v22  ;;  %v3961_v7 = vld [vmem:[%s5608_s1 + $0x544] ss:$12 sps:$4 sm:$0xff]   ;;  %v3959_v9 = vld [vmem:[%s5608_s1 + $0x540] ss:$12 sps:$4 sm:$0xff]   ;;  %v3985_v22 = vld [vmem:[%s5608_s1 + $0x67c] ss:$12 sps:$4 sm:$0xff]  }
  0x46   :  { %2535 = vmatprep.mubr.bf16.mxu1 %v3941_v29  ;;  %v3997_v29 = vld [vmem:[%s5608_s1 + $0x7e4] ss:$12 sps:$4 sm:$0xff]  }
  0x47   :  { %2549 = vmatpush1.bf16.msra.mxu0 %v3866_v10  ;;  %v3970_v10 = vld [vmem:[%s5608_s1 + $0x6ac] ss:$12 sps:$4 sm:$0xff]  }
  0x48   :  { %2602 = vmatpush1.bf16.msra.mxu1 %v3869_v11  ;;  %2550 = vmatprep.subr.bf16.mxu0 %v3874_v12  ;;  %v3973_v11 = vld [vmem:[%s5608_s1 + $0x82c] ss:$12 sps:$4 sm:$0xff]   ;;  %v3962_v12 = vld [vmem:[%s5609_s0 + $0x10] ss:$56 sps:$4 sm:$0xff]  }
  0x49   :  { %2603 = vmatprep.subr.bf16.mxu1 %v3877_v13  ;;  %v3965_v13 = vld [vmem:[%s5609_s0 + $0x18] ss:$56 sps:$4 sm:$0xff]  }
  0x4a   :  { %2483 = vmatmul.mubr.bf16.gmra.mxu0 %v3940_v27  ;;  %v3991_v27 = vld [vmem:[%s5609_s0 + $0x88] ss:$56 sps:$4 sm:$0xff]  }
  0x4b   :  { %2551 = vmatpush1.bf16.msra.mxu0 %v3872_v14  ;;  %2536 = vmatmul.mubr.bf16.gmra.mxu1 %v3943_v31  ;;  %v3968_v14 = vld [vmem:[%s5608_s1 + $0x6a8] ss:$12 sps:$4 sm:$0xff]   ;;  %v3995_v31 = vld [vmem:[%s5608_s1 + $0x7e0] ss:$12 sps:$4 sm:$0xff]  }
  0x4c   :  { %2604 = vmatpush1.bf16.msra.mxu1 %v3875_v15  ;;  %2552 = vmatprep.subr.bf16.mxu0 %v3880_v16  ;;  %v3971_v15 = vld [vmem:[%s5608_s1 + $0x828] ss:$12 sps:$4 sm:$0xff]  }
  0x4d   :  { %2605 = vmatprep.subr.bf16.mxu1 %v3883_v17  ;;  %2578 = vmatprep.mubr.bf16.mxu0 %v3964_v41  ;;  %v3976_v16 = vld [vmem:[%s5608_s1 + $0x694] ss:$12 sps:$4 sm:$0xff]   ;;  %v4007_v41 = vld [vmem:[%s5608_s1 + $0x7b0] ss:$12 sps:$4 sm:$0xff]  }
  0x4e   :  { %2631 = vmatprep.mubr.bf16.mxu1 %v3967_v43  ;;  %v3979_v17 = vld [vmem:[%s5608_s1 + $0x814] ss:$12 sps:$4 sm:$0xff]   ;;  %v4015_v43 = vld [vmem:[%s5608_s1 + $0x79c] ss:$12 sps:$4 sm:$0xff]  }
  0x4f   :  { %2553 = vmatpush1.bf16.msra.mxu0 %v3878_v18  ;;  %v3980_v18 = vld [vmem:[%s5609_s0 + $0x84] ss:$56 sps:$4 sm:$0xff]  }
  0x50   :  { %2606 = vmatpush1.bf16.msra.mxu1 %v3881_v19  ;;  %2554 = vmatprep.subr.bf16.mxu0 %v3886_v20  ;;  %v3989_v19 = vld [vmem:[%s5609_s0 + $0x8c] ss:$56 sps:$4 sm:$0xff]   ;;  %v3974_v20 = vld [vmem:[%s5608_s1 + $0x690] ss:$12 sps:$4 sm:$0xff]  }
  0x51   :  { %2607 = vmatprep.subr.bf16.mxu1 %v3889_v21  ;;  %v3977_v21 = vld [vmem:[%s5608_s1 + $0x810] ss:$12 sps:$4 sm:$0xff]  }
  0x53   :  { %2555 = vmatpush1.bf16.msra.mxu0 %v3884_v23  ;;  %v3988_v23 = vld [vmem:[%s5608_s1 + $0x7fc] ss:$12 sps:$4 sm:$0xff]  }
  0x54   :  { %2608 = vmatpush1.bf16.msra.mxu1 %v3887_v24  ;;  %2556 = vmatprep.subr.bf16.mxu0 %v3892_v25  ;;  %v3982_v24 = vld [vmem:[%s5609_s0 + $0x80] ss:$56 sps:$4 sm:$0xff]  }
  0x55   :  { %2609 = vmatprep.subr.bf16.mxu1 %v3895_v26  ;;  %v3983_v25 = vld [vmem:[%s5608_s1 + $0x678] ss:$12 sps:$4 sm:$0xff]  }
  0x56   :  { %v3986_v26 = vld [vmem:[%s5608_s1 + $0x7f8] ss:$12 sps:$4 sm:$0xff]  }
  0x57   :  { %2557 = vmatpush1.bf16.msra.mxu0 %v3890_v28  ;;  %v3994_v28 = vld [vmem:[%s5608_s1 + $0x664] ss:$12 sps:$4 sm:$0xff]  }
  0x58   :  { %2610 = vmatpush1.bf16.msra.mxu1 %v3893_v30  ;;  %2558 = vmatprep.subr.bf16.mxu0 %v3898_v32  ;;  %v3992_v30 = vld [vmem:[%s5608_s1 + $0x660] ss:$12 sps:$4 sm:$0xff]  }
  0x59   :  { %2611 = vmatprep.subr.bf16.mxu1 %v3901_v33  ;;  %v4000_v32 = vld [vmem:[%s5608_s1 + $0x64c] ss:$12 sps:$4 sm:$0xff]   ;;  %v4072_v33 = vld [vmem:[%s5609_s0 + $0x24] ss:$56 sps:$4 sm:$0xff]  }
  0x5b   :  { %2559 = vmatpush1.bf16.msra.mxu0 %v3896_v34  ;;  %v4003_v34 = vld [vmem:[%s5608_s1 + $0x7cc] ss:$12 sps:$4 sm:$0xff]  }
  0x5c   :  { %2612 = vmatpush1.bf16.msra.mxu1 %v3899_v35  ;;  %2560 = vmatprep.subr.bf16.mxu0 %v3904_v36  ;;  %v4075_v35 = vld [vmem:[%s5609_s0 + $0x2c] ss:$56 sps:$4 sm:$0xff]   ;;  %v3998_v36 = vld [vmem:[%s5608_s1 + $0x648] ss:$12 sps:$4 sm:$0xff]  }
  0x5d   :  { %2613 = vmatprep.subr.bf16.mxu1 %v3907_v37  ;;  %v4001_v37 = vld [vmem:[%s5608_s1 + $0x7c8] ss:$12 sps:$4 sm:$0xff]  }
  0x5f   :  { %2561 = vmatpush1.bf16.msra.mxu0 %v3902_v38  ;;  %v4006_v38 = vld [vmem:[%s5608_s1 + $0x634] ss:$12 sps:$4 sm:$0xff]  }
  0x60   :  { %2614 = vmatpush1.bf16.msra.mxu1 %v3905_v39  ;;  %2562 = vmatprep.subr.bf16.mxu0 %v3910_v40  ;;  %v4009_v39 = vld [vmem:[%s5608_s1 + $0x7b4] ss:$12 sps:$4 sm:$0xff]   ;;  %v4004_v40 = vld [vmem:[%s5608_s1 + $0x630] ss:$12 sps:$4 sm:$0xff]  }
  0x61   :  { %2615 = vmatprep.subr.bf16.mxu1 %v3913_v42  ;;  %v4012_v42 = vld [vmem:[%s5608_s1 + $0x61c] ss:$12 sps:$4 sm:$0xff]  }
  0x63   :  { %2563 = vmatpush2.bf16.msra.mxu0 %v3908_v44  ;;  %v4010_v44 = vld [vmem:[%s5608_s1 + $0x618] ss:$12 sps:$4 sm:$0xff]  }
  0x64   :  { %2616 = vmatpush2.bf16.msra.mxu1 %v3911_v45  ;;  %2564 = vmatprep.subr.bf16.mxu0 %v3916_v46  ;;  %v4013_v45 = vld [vmem:[%s5608_s1 + $0x798] ss:$12 sps:$4 sm:$0xff]  }
  0x65   :  { %2617 = vmatprep.subr.bf16.mxu1 %v3919_v47  ;;  %v4018_v46 = vld [vmem:[%s5608_s1 + $0x604] ss:$12 sps:$4 sm:$0xff]  }
  0x66   :  { %v4021_v47 = vld [vmem:[%s5608_s1 + $0x784] ss:$12 sps:$4 sm:$0xff]  }
  0x67   :  { %2565 = vmatpush2.bf16.msra.mxu0 %v3914_v48  ;;  %v4016_v48 = vld [vmem:[%s5608_s1 + $0x600] ss:$12 sps:$4 sm:$0xff]  }
  0x68   :  { %2618 = vmatpush2.bf16.msra.mxu1 %v3917_v49  ;;  %2566 = vmatprep.subr.bf16.mxu0 %v3922_v50  ;;  %v4019_v49 = vld [vmem:[%s5608_s1 + $0x780] ss:$12 sps:$4 sm:$0xff]  }
  0x69   :  { %2619 = vmatprep.subr.bf16.mxu1 %v3925_v51  ;;  %v4024_v50 = vld [vmem:[%s5608_s1 + $0x76c] ss:$12 sps:$4 sm:$0xff]  }
  0x6a   :  { %v4027_v51 = vld [vmem:[%s5608_s1 + $0x8ec] ss:$12 sps:$4 sm:$0xff]  }
  0x6b   :  { %2567 = vmatpush2.bf16.msra.mxu0 %v3920_v52  ;;  %v4022_v52 = vld [vmem:[%s5608_s1 + $0x768] ss:$12 sps:$4 sm:$0xff]  }
  0x6c   :  { %2620 = vmatpush2.bf16.msra.mxu1 %v3923_v53  ;;  %2568 = vmatprep.subr.bf16.mxu0 %v3928_v54  ;;  %v4025_v53 = vld [vmem:[%s5608_s1 + $0x8e8] ss:$12 sps:$4 sm:$0xff]  }
  0x6d   :  { %2621 = vmatprep.subr.bf16.mxu1 %v3931_v55  ;;  %v4030_v54 = vld [vmem:[%s5608_s1 + $0x754] ss:$12 sps:$4 sm:$0xff]  }
  0x6e   :  { %v4033_v55 = vld [vmem:[%s5608_s1 + $0x8d4] ss:$12 sps:$4 sm:$0xff]  }
  0x6f   :  { %2569 = vmatpush2.bf16.msra.mxu0 %v3926_v56  ;;  %v4028_v56 = vld [vmem:[%s5608_s1 + $0x750] ss:$12 sps:$4 sm:$0xff]  }
  0x70   :  { %2622 = vmatpush2.bf16.msra.mxu1 %v3929_v57  ;;  %2570 = vmatprep.subr.bf16.mxu0 %v3936_v58  ;;  %v4031_v57 = vld [vmem:[%s5608_s1 + $0x8d0] ss:$12 sps:$4 sm:$0xff]  }
  0x71   :  { %2623 = vmatprep.subr.bf16.mxu1 %v3939_v59  ;;  %v4036_v58 = vld [vmem:[%s5608_s1 + $0x73c] ss:$12 sps:$4 sm:$0xff]  }
  0x72   :  { %v4039_v59 = vld [vmem:[%s5608_s1 + $0x8bc] ss:$12 sps:$4 sm:$0xff]  }
  0x73   :  { %2571 = vmatpush2.bf16.msra.mxu0 %v3934_v60  ;;  %v4034_v60 = vld [vmem:[%s5608_s1 + $0x738] ss:$12 sps:$4 sm:$0xff]  }
  0x74   :  { %2624 = vmatpush2.bf16.msra.mxu1 %v3937_v61  ;;  %2572 = vmatprep.subr.bf16.mxu0 %v3946_v62  ;;  %v4037_v61 = vld [vmem:[%s5608_s1 + $0x8b8] ss:$12 sps:$4 sm:$0xff]  }
  0x75   :  { %2625 = vmatprep.subr.bf16.mxu1 %v3949_v63  ;;  %v4042_v62 = vld [vmem:[%s5608_s1 + $0x724] ss:$12 sps:$4 sm:$0xff]  }
  0x76   :  { %v4045_v63 = vld [vmem:[%s5608_s1 + $0x8a4] ss:$12 sps:$4 sm:$0xff]  }
  0x77   :  { %2573 = vmatpush2.bf16.msra.mxu0 %v3944_v0  ;;  %v4040_v0 = vld [vmem:[%s5608_s1 + $0x720] ss:$12 sps:$4 sm:$0xff]  }
  0x78   :  { %2626 = vmatpush2.bf16.msra.mxu1 %v3947_v1  ;;  %2574 = vmatprep.subr.bf16.mxu0 %v3952_v2  ;;  %v4043_v1 = vld [vmem:[%s5608_s1 + $0x8a0] ss:$12 sps:$4 sm:$0xff]  }
  0x79   :  { %2627 = vmatprep.subr.bf16.mxu1 %v3955_v3  ;;  %v4048_v2 = vld [vmem:[%s5608_s1 + $0x70c] ss:$12 sps:$4 sm:$0xff]  }
  0x7a   :  { %v4051_v3 = vld [vmem:[%s5608_s1 + $0x88c] ss:$12 sps:$4 sm:$0xff]  }
  0x7b   :  { %2575 = vmatpush2.bf16.msra.mxu0 %v3950_v4  ;;  %v4046_v4 = vld [vmem:[%s5608_s1 + $0x708] ss:$12 sps:$4 sm:$0xff]  }
  0x7c   :  { %2628 = vmatpush2.bf16.msra.mxu1 %v3953_v5  ;;  %2576 = vmatprep.subr.bf16.mxu0 %v3958_v6  ;;  %v4049_v5 = vld [vmem:[%s5608_s1 + $0x888] ss:$12 sps:$4 sm:$0xff]  }
  0x7d   :  { %2629 = vmatprep.subr.bf16.mxu1 %v3961_v7  ;;  %v4054_v6 = vld [vmem:[%s5608_s1 + $0x6f4] ss:$12 sps:$4 sm:$0xff]  }
  0x7e   :  { %v4057_v7 = vld [vmem:[%s5608_s1 + $0x874] ss:$12 sps:$4 sm:$0xff]  }
  0x7f   :  { %2577 = vmatpush2.bf16.msra.mxu0 %v3956_v8  ;;  %v4052_v8 = vld [vmem:[%s5608_s1 + $0x6f0] ss:$12 sps:$4 sm:$0xff]  }
  0x80   :  { %2630 = vmatpush2.bf16.msra.mxu1 %v3959_v9  ;;  %2652 = vmatprep.subr.bf16.mxu0 %v3970_v10  ;;  %v4055_v9 = vld [vmem:[%s5608_s1 + $0x870] ss:$12 sps:$4 sm:$0xff]  }
  0x81   :  { %2705 = vmatprep.subr.bf16.mxu1 %v3973_v11  ;;  %v4060_v10 = vld [vmem:[%s5608_s1 + $0x6dc] ss:$12 sps:$4 sm:$0xff]  }
  0x82   :  { %2579 = vmatmul.mubr.bf16.vlgmr.msra.gmra.mxu0 %v3962_v12  ;;  %v4063_v11 = vld [vmem:[%s5608_s1 + $0x85c] ss:$12 sps:$4 sm:$0xff]   ;;  %v4058_v12 = vld [vmem:[%s5608_s1 + $0x6d8] ss:$12 sps:$4 sm:$0xff]  }
  0x83   :  { %2632 = vmatmul.mubr.bf16.vlgmr.msra.gmra.mxu1 %v3965_v13  ;;  %2653 = vmatpush1.bf16.msra.mxu0 %v3968_v14  ;;  %v4061_v13 = vld [vmem:[%s5608_s1 + $0x858] ss:$12 sps:$4 sm:$0xff]  }
  0x84   :  { %2706 = vmatpush1.bf16.msra.mxu1 %v3971_v15  ;;  %2654 = vmatprep.subr.bf16.mxu0 %v3976_v16  ;;  %v4066_v14 = vld [vmem:[%s5608_s1 + $0x6c4] ss:$12 sps:$4 sm:$0xff]   ;;  %v4064_v16 = vld [vmem:[%s5608_s1 + $0x6c0] ss:$12 sps:$4 sm:$0xff]  }
  0x85   :  { %2707 = vmatprep.subr.bf16.mxu1 %v3979_v17  ;;  %2588 = vmatprep.mubr.bf16.mxu0 %v3980_v18  ;;  %v4069_v15 = vld [vmem:[%s5608_s1 + $0x844] ss:$12 sps:$4 sm:$0xff]   ;;  %v4067_v17 = vld [vmem:[%s5608_s1 + $0x840] ss:$12 sps:$4 sm:$0xff]  }
  0x86   :  { %2641 = vmatprep.mubr.bf16.mxu1 %v3989_v19  ;;  %v4078_v18 = vld [vmem:[%s5608_s1 + $0x9ac] ss:$12 sps:$4 sm:$0xff]  }
  0x87   :  { %2655 = vmatpush1.bf16.msra.mxu0 %v3974_v20  ;;  %v4922_v19 = vld [vmem:[%s5609_s0 + $0x20] ss:$56 sps:$4 sm:$0xff]  }
  0x88   :  { %2708 = vmatpush1.bf16.msra.mxu1 %v3977_v21  ;;  %2656 = vmatprep.subr.bf16.mxu0 %v3985_v22  ;;  %v4927_v20 = vld [vmem:[%s5609_s0 + $0x28] ss:$56 sps:$4 sm:$0xff]   ;;  %v4079_v21 = vld [vmem:[%s5608_s1 + $0x170] ss:$12 sps:$4 sm:$0xff]  }
  0x89   :  { %2709 = vmatprep.subr.bf16.mxu1 %v3988_v23  ;;  %v4076_v22 = vld [vmem:[%s5608_s1 + $0x9a8] ss:$12 sps:$4 sm:$0xff]   ;;  %v4080_v23 = vld [vmem:[%s5608_s1 + $0xb0] ss:$12 sps:$4 sm:$0xff]  }
  0x8a   :  { %2589 = vmatmul.mubr.bf16.gmra.mxu0 %v3982_v24  ;;  %v4083_v24 = vld [vmem:[%s5608_s1 + $0x994] ss:$12 sps:$4 sm:$0xff]  }
  0x8b   :  { %2642 = vmatmul.mubr.bf16.gmra.mxu1 %v3991_v27  ;;  %2657 = vmatpush1.bf16.msra.mxu0 %v3983_v25  ;;  %v4084_v25 = vld [vmem:[%s5608_s1 + $0x158] ss:$12 sps:$4 sm:$0xff]   ;;  %v4081_v27 = vld [vmem:[%s5608_s1 + $0x990] ss:$12 sps:$4 sm:$0xff]  }
  0x8c   :  { %2710 = vmatpush1.bf16.msra.mxu1 %v3986_v26  ;;  %2658 = vmatprep.subr.bf16.mxu0 %v3994_v28  ;;  %v4947_v26 = vld [vmem:[%s5609_s0 + $0x94] ss:$56 sps:$4 sm:$0xff]  }
  0x8d   :  { %2711 = vmatprep.subr.bf16.mxu1 %v3997_v29  ;;  %2684 = vmatprep.mubr.bf16.mxu0 %v4072_v33  ;;  %v4955_v28 = vld [vmem:[%s5609_s0 + $0x9c] ss:$56 sps:$4 sm:$0xff]   ;;  %v4085_v29 = vld [vmem:[%s5608_s1 + $0x98] ss:$12 sps:$4 sm:$0xff]  }
  0x8e   :  { %2737 = vmatprep.mubr.bf16.mxu1 %v4075_v35  ;;  %v4089_v33 = vld [vmem:[%s5608_s1 + $0x978] ss:$12 sps:$4 sm:$0xff]  }
  0x8f   :  { %2659 = vmatpush1.bf16.msra.mxu0 %v3992_v30  ;;  %v4091_v30 = vld [vmem:[%s5608_s1 + $0x97c] ss:$12 sps:$4 sm:$0xff]   ;;  %v4984_v35 = vld [vmem:[%s5609_s0 + $0x98] ss:$56 sps:$4 sm:$0xff]  }
  0x90   :  { %2712 = vmatpush1.bf16.msra.mxu1 %v3995_v31  ;;  %2660 = vmatprep.subr.bf16.mxu0 %v4000_v32  ;;  %v4092_v31 = vld [vmem:[%s5608_s1 + $0x140] ss:$12 sps:$4 sm:$0xff]   ;;  %v4972_v32 = vld [vmem:[%s5609_s0 + $0x90] ss:$56 sps:$4 sm:$0xff]  }
  0x91   :  { %2713 = vmatprep.subr.bf16.mxu1 %v4003_v34  ;;  %v4095_v34 = vld [vmem:[%s5608_s1 + $0x80] ss:$12 sps:$4 sm:$0xff]  }
  0x93   :  { %2661 = vmatpush1.bf16.msra.mxu0 %v3998_v36  ;;  %v4099_v36 = vld [vmem:[%s5608_s1 + $0x964] ss:$12 sps:$4 sm:$0xff]  }
  0x94   :  { %2714 = vmatpush1.bf16.msra.mxu1 %v4001_v37  ;;  %2662 = vmatprep.subr.bf16.mxu0 %v4006_v38  ;;  %v4100_v37 = vld [vmem:[%s5608_s1 + $0x128] ss:$12 sps:$4 sm:$0xff]   ;;  %v4097_v38 = vld [vmem:[%s5608_s1 + $0x960] ss:$12 sps:$4 sm:$0xff]  }
  0x95   :  { %2715 = vmatprep.subr.bf16.mxu1 %v4009_v39  ;;  %v4998_v39 = vld [vmem:[%s5609_s0 + $0x34] ss:$56 sps:$4 sm:$0xff]  }
  0x97   :  { %2663 = vmatpush1.bf16.msra.mxu0 %v4004_v40  ;;  %v4101_v40 = vld [vmem:[%s5608_s1 + $0x68] ss:$12 sps:$4 sm:$0xff]  }
  0x98   :  { %2716 = vmatpush1.bf16.msra.mxu1 %v4007_v41  ;;  %2664 = vmatprep.subr.bf16.mxu0 %v4012_v42  ;;  %v4104_v41 = vld [vmem:[%s5608_s1 + $0x94c] ss:$12 sps:$4 sm:$0xff]   ;;  %v4105_v42 = vld [vmem:[%s5608_s1 + $0x110] ss:$12 sps:$4 sm:$0xff]  }
  0x99   :  { %2717 = vmatprep.subr.bf16.mxu1 %v4015_v43  ;;  %v4102_v43 = vld [vmem:[%s5608_s1 + $0x948] ss:$12 sps:$4 sm:$0xff]  }
  0x9b   :  { %2665 = vmatpush1.bf16.msra.mxu0 %v4010_v44  ;;  %v4248_v44 = vld [vmem:[%s5609_s0 + $0x4] ss:$56 sps:$4 sm:$0xff]  }
  0x9c   :  { %2718 = vmatpush1.bf16.msra.mxu1 %v4013_v45  ;;  %2666 = vmatprep.subr.bf16.mxu0 %v4018_v46  ;;  %v4106_v45 = vld [vmem:[%s5608_s1 + $0x50] ss:$12 sps:$4 sm:$0xff]   ;;  %v4109_v46 = vld [vmem:[%s5608_s1 + $0x934] ss:$12 sps:$4 sm:$0xff]  }
  0x9d   :  { %2719 = vmatprep.subr.bf16.mxu1 %v4021_v47  ;;  %v4110_v47 = vld [vmem:[%s5608_s1 + $0xf8] ss:$12 sps:$4 sm:$0xff]  }
  0x9f   :  { %2667 = vmatpush1.bf16.msra.mxu0 %v4016_v48  ;;  %v4107_v48 = vld [vmem:[%s5608_s1 + $0x930] ss:$12 sps:$4 sm:$0xff]  }
  0xa0   :  { %2720 = vmatpush1.bf16.msra.mxu1 %v4019_v49  ;;  %2668 = vmatprep.subr.bf16.mxu0 %v4024_v50  ;;  %v4111_v49 = vld [vmem:[%s5608_s1 + $0x38] ss:$12 sps:$4 sm:$0xff]   ;;  %v4114_v50 = vld [vmem:[%s5608_s1 + $0x91c] ss:$12 sps:$4 sm:$0xff]  }
  0xa1   :  { %2721 = vmatprep.subr.bf16.mxu1 %v4027_v51  ;;  %v4115_v51 = vld [vmem:[%s5608_s1 + $0xe0] ss:$12 sps:$4 sm:$0xff]  }
  0xa3   :  { %2669 = vmatpush2.bf16.msra.mxu0 %v4022_v52  ;;  %v4112_v52 = vld [vmem:[%s5608_s1 + $0x918] ss:$12 sps:$4 sm:$0xff]  }
  0xa4   :  { %2722 = vmatpush2.bf16.msra.mxu1 %v4025_v53  ;;  %2670 = vmatprep.subr.bf16.mxu0 %v4030_v54  ;;  %v4116_v53 = vld [vmem:[%s5608_s1 + $0x20] ss:$12 sps:$4 sm:$0xff]   ;;  %v4119_v54 = vld [vmem:[%s5608_s1 + $0x904] ss:$12 sps:$4 sm:$0xff]  }
  0xa5   :  { %2723 = vmatprep.subr.bf16.mxu1 %v4033_v55  ;;  %v4120_v55 = vld [vmem:[%s5608_s1 + $0xc8] ss:$12 sps:$4 sm:$0xff]  }
  0xa7   :  { %2671 = vmatpush2.bf16.msra.mxu0 %v4028_v56  ;;  %v4117_v56 = vld [vmem:[%s5608_s1 + $0x900] ss:$12 sps:$4 sm:$0xff]  }
  0xa8   :  { %2724 = vmatpush2.bf16.msra.mxu1 %v4031_v57  ;;  %2672 = vmatprep.subr.bf16.mxu0 %v4036_v58  ;;  %v4121_v57 = vld [vmem:[%s5608_s1 + $0x8] ss:$12 sps:$4 sm:$0xff]   ;;  %v4124_v58 = vld [vmem:[%s5608_s1 + $0xa6c] ss:$12 sps:$4 sm:$0xff]  }
  0xa9   :  { %2725 = vmatprep.subr.bf16.mxu1 %v4039_v59  ;;  %v4125_v59 = vld [vmem:[%s5608_s1 + $0x2f0] ss:$12 sps:$4 sm:$0xff]  }
  0xab   :  { %2673 = vmatpush2.bf16.msra.mxu0 %v4034_v60  ;;  %v4122_v60 = vld [vmem:[%s5608_s1 + $0xa68] ss:$12 sps:$4 sm:$0xff]  }
  0xac   :  { %2726 = vmatpush2.bf16.msra.mxu1 %v4037_v61  ;;  %2674 = vmatprep.subr.bf16.mxu0 %v4042_v62  ;;  %v4126_v61 = vld [vmem:[%s5608_s1 + $0x230] ss:$12 sps:$4 sm:$0xff]   ;;  %v4129_v62 = vld [vmem:[%s5608_s1 + $0xa54] ss:$12 sps:$4 sm:$0xff]  }
  0xad   :  { %2727 = vmatprep.subr.bf16.mxu1 %v4045_v63  ;;  %v4130_v63 = vld [vmem:[%s5608_s1 + $0x2d8] ss:$12 sps:$4 sm:$0xff]  }
  0xaf   :  { %2675 = vmatpush2.bf16.msra.mxu0 %v4040_v0  ;;  %v4127_v0 = vld [vmem:[%s5608_s1 + $0xa50] ss:$12 sps:$4 sm:$0xff]  }
  0xb0   :  { %2728 = vmatpush2.bf16.msra.mxu1 %v4043_v1  ;;  %2676 = vmatprep.subr.bf16.mxu0 %v4048_v2  ;;  %v4249_v1 = vld [vmem:[%s5609_s0] ss:$56 sps:$4 sm:$0xff]  }
  0xb1   :  { %2729 = vmatprep.subr.bf16.mxu1 %v4051_v3  ;;  %v4131_v2 = vld [vmem:[%s5608_s1 + $0x218] ss:$12 sps:$4 sm:$0xff]   ;;  %v4134_v3 = vld [vmem:[%s5608_s1 + $0xa3c] ss:$12 sps:$4 sm:$0xff]  }
  0xb3   :  { %2677 = vmatpush2.bf16.msra.mxu0 %v4046_v4  ;;  %v4135_v4 = vld [vmem:[%s5608_s1 + $0x2c0] ss:$12 sps:$4 sm:$0xff]  }
  0xb4   :  { %2730 = vmatpush2.bf16.msra.mxu1 %v4049_v5  ;;  %2678 = vmatprep.subr.bf16.mxu0 %v4054_v6  ;;  %v4132_v5 = vld [vmem:[%s5608_s1 + $0xa38] ss:$12 sps:$4 sm:$0xff]   ;;  %v4250_v6 = vld [vmem:[%s5609_s0 + $0x74] ss:$56 sps:$4 sm:$0xff]  }
  0xb5   :  { %2731 = vmatprep.subr.bf16.mxu1 %v4057_v7  ;;  %v4136_v7 = vld [vmem:[%s5608_s1 + $0x200] ss:$12 sps:$4 sm:$0xff]  }
  0xb7   :  { %2679 = vmatpush2.bf16.msra.mxu0 %v4052_v8  ;;  %v4139_v8 = vld [vmem:[%s5608_s1 + $0xa24] ss:$12 sps:$4 sm:$0xff]  }
  0xb8   :  { %2732 = vmatpush2.bf16.msra.mxu1 %v4055_v9  ;;  %2680 = vmatprep.subr.bf16.mxu0 %v4060_v10  ;;  %v4140_v9 = vld [vmem:[%s5608_s1 + $0x2a8] ss:$12 sps:$4 sm:$0xff]   ;;  %v4137_v10 = vld [vmem:[%s5608_s1 + $0xa20] ss:$12 sps:$4 sm:$0xff]  }
  0xb9   :  { %2733 = vmatprep.subr.bf16.mxu1 %v4063_v11  ;;  %v4141_v11 = vld [vmem:[%s5608_s1 + $0x1e8] ss:$12 sps:$4 sm:$0xff]  }
  0xbb   :  { %2681 = vmatpush2.bf16.msra.mxu0 %v4058_v12  ;;  %v4251_v12 = vld [vmem:[%s5609_s0 + $0x70] ss:$56 sps:$4 sm:$0xff]  }
  0xbc   :  { %2734 = vmatpush2.bf16.msra.mxu1 %v4061_v13  ;;  %2682 = vmatprep.subr.bf16.mxu0 %v4066_v14  ;;  %v4144_v13 = vld [vmem:[%s5608_s1 + $0xa0c] ss:$12 sps:$4 sm:$0xff]   ;;  %v4145_v14 = vld [vmem:[%s5608_s1 + $0x290] ss:$12 sps:$4 sm:$0xff]  }
  0xbd   :  { %2735 = vmatprep.subr.bf16.mxu1 %v4069_v15  ;;  %v4142_v15 = vld [vmem:[%s5608_s1 + $0xa08] ss:$12 sps:$4 sm:$0xff]  }
  0xbf   :  { %2683 = vmatpush2.bf16.msra.mxu0 %v4064_v16  ;;  %v4252_v16 = vld [vmem:[%s5609_s0 + $0xc] ss:$56 sps:$4 sm:$0xff]  }
  0xc0   :  { %2736 = vmatpush2.bf16.msra.mxu1 %v4067_v17  ;;  %2758 = vmatprep.subr.bf16.mxu0 %v4078_v18  ;;  %v4146_v17 = vld [vmem:[%s5608_s1 + $0x1d0] ss:$12 sps:$4 sm:$0xff]   ;;  %v4149_v18 = vld [vmem:[%s5608_s1 + $0x9f4] ss:$12 sps:$4 sm:$0xff]  }
  0xc1   :  { %3546 = vmatprep.subr.bf16.mxu1 %v4079_v21  ;;  %v4150_v21 = vld [vmem:[%s5608_s1 + $0x278] ss:$12 sps:$4 sm:$0xff]  }
  0xc2   :  { %2685 = vmatmul.mubr.bf16.vlgmr.msra.gmra.mxu0 %v4922_v19 }
  0xc3   :  { %2738 = vmatmul.mubr.bf16.vlgmr.msra.gmra.mxu1 %v4927_v20  ;;  %2759 = vmatpush1.bf16.msra.mxu0 %v4076_v22  ;;  %v4147_v22 = vld [vmem:[%s5608_s1 + $0x9f0] ss:$12 sps:$4 sm:$0xff]  }
  0xc4   :  { %3547 = vmatpush3.bf16.msra.mxu1 %v4080_v23  ;;  %2760 = vmatprep.subr.bf16.mxu0 %v4083_v24  ;;  %v4151_v23 = vld [vmem:[%s5608_s1 + $0x1b8] ss:$12 sps:$4 sm:$0xff]   ;;  %v4154_v24 = vld [vmem:[%s5608_s1 + $0x9dc] ss:$12 sps:$4 sm:$0xff]  }
  0xc5   :  { %3548 = vmatprep.subr.bf16.mxu1 %v4084_v25  ;;  %2694 = vmatprep.mubr.bf16.mxu0 %v4947_v26  ;;  %v4155_v25 = vld [vmem:[%s5608_s1 + $0x260] ss:$12 sps:$4 sm:$0xff]  }
  0xc6   :  { %2747 = vmatprep.mubr.bf16.mxu1 %v4955_v28 }
  0xc7   :  { %2761 = vmatpush1.bf16.msra.mxu0 %v4081_v27  ;;  %v4152_v27 = vld [vmem:[%s5608_s1 + $0x9d8] ss:$12 sps:$4 sm:$0xff]  }
  0xc8   :  { %3549 = vmatpush3.bf16.msra.mxu1 %v4085_v29  ;;  %2762 = vmatprep.subr.bf16.mxu0 %v4091_v30  ;;  %v4156_v29 = vld [vmem:[%s5608_s1 + $0x1a0] ss:$12 sps:$4 sm:$0xff]   ;;  %v4159_v30 = vld [vmem:[%s5608_s1 + $0x9c4] ss:$12 sps:$4 sm:$0xff]  }
  0xc9   :  { %3550 = vmatprep.subr.bf16.mxu1 %v4092_v31  ;;  %v4160_v31 = vld [vmem:[%s5608_s1 + $0x248] ss:$12 sps:$4 sm:$0xff]  }
  0xca   :  { %2695 = vmatmul.mubr.bf16.gmra.mxu0 %v4972_v32 }
  0xcb   :  { %2748 = vmatmul.mubr.bf16.gmra.mxu1 %v4984_v35  ;;  %2763 = vmatpush1.bf16.msra.mxu0 %v4089_v33  ;;  %v4157_v33 = vld [vmem:[%s5608_s1 + $0x9c0] ss:$12 sps:$4 sm:$0xff]  }
  0xcc   :  { %3551 = vmatpush3.bf16.msra.mxu1 %v4095_v34  ;;  %2764 = vmatprep.subr.bf16.mxu0 %v4099_v36  ;;  %v4161_v34 = vld [vmem:[%s5608_s1 + $0x188] ss:$12 sps:$4 sm:$0xff]   ;;  %v4165_v36 = vld [vmem:[%s5608_s1 + $0x470] ss:$12 sps:$4 sm:$0xff]  }
  0xcd   :  { %3552 = vmatprep.subr.bf16.mxu1 %v4100_v37  ;;  %2843 = vmatprep.mubr.bf16.mxu1 %v4248_v44  ;;  %v5171_v37 = vld [vmem:[%s5609_s0 + $0x30] ss:$56 sps:$4 sm:$0xff]   ;;  %v4171_v44 = vld [vmem:[%s5608_s1 + $0x398] ss:$12 sps:$4 sm:$0xff]  }
  0xce   :  { %2790 = vmatprep.mubr.bf16.mxu0 %v4998_v39 }
  0xcf   :  { %2765 = vmatpush1.bf16.msra.mxu0 %v4097_v38  ;;  %v4166_v38 = vld [vmem:[%s5608_s1 + $0x5f0] ss:$12 sps:$4 sm:$0xff]  }
  0xd0   :  { %3553 = vmatpush3.bf16.msra.mxu1 %v4101_v40  ;;  %2766 = vmatprep.subr.bf16.mxu0 %v4104_v41  ;;  %v4167_v40 = vld [vmem:[%s5608_s1 + $0x3b0] ss:$12 sps:$4 sm:$0xff]  }
  0xd1   :  { %3554 = vmatprep.subr.bf16.mxu1 %v4105_v42  ;;  %v4168_v41 = vld [vmem:[%s5608_s1 + $0x530] ss:$12 sps:$4 sm:$0xff]   ;;  %v4169_v42 = vld [vmem:[%s5608_s1 + $0x458] ss:$12 sps:$4 sm:$0xff]  }
  0xd3   :  { %2767 = vmatpush1.bf16.msra.mxu0 %v4102_v43  ;;  %v4170_v43 = vld [vmem:[%s5608_s1 + $0x5d8] ss:$12 sps:$4 sm:$0xff]  }
  0xd4   :  { %3555 = vmatpush3.bf16.msra.mxu1 %v4106_v45  ;;  %2768 = vmatprep.subr.bf16.mxu0 %v4109_v46  ;;  %v5194_v45 = vld [vmem:[%s5609_s0 + $0xa4] ss:$56 sps:$4 sm:$0xff]   ;;  %v4253_v46 = vld [vmem:[%s5609_s0 + $0x8] ss:$56 sps:$4 sm:$0xff]  }
  0xd5   :  { %3556 = vmatprep.subr.bf16.mxu1 %v4110_v47  ;;  %v4172_v47 = vld [vmem:[%s5608_s1 + $0x518] ss:$12 sps:$4 sm:$0xff]  }
  0xd7   :  { %2769 = vmatpush1.bf16.msra.mxu0 %v4107_v48  ;;  %v4176_v48 = vld [vmem:[%s5608_s1 + $0x440] ss:$12 sps:$4 sm:$0xff]  }
  0xd8   :  { %3557 = vmatpush3.bf16.msra.mxu1 %v4111_v49  ;;  %2770 = vmatprep.subr.bf16.mxu0 %v4114_v50  ;;  %v5209_v49 = vld [vmem:[%s5609_s0 + $0xa0] ss:$56 sps:$4 sm:$0xff]  }
  0xd9   :  { %3558 = vmatprep.subr.bf16.mxu1 %v4115_v51  ;;  %v4177_v50 = vld [vmem:[%s5608_s1 + $0x5c0] ss:$12 sps:$4 sm:$0xff]   ;;  %v4254_v51 = vld [vmem:[%s5609_s0 + $0x7c] ss:$56 sps:$4 sm:$0xff]  }
  0xdb   :  { %2771 = vmatpush1.bf16.msra.mxu0 %v4112_v52  ;;  %v4178_v52 = vld [vmem:[%s5608_s1 + $0x380] ss:$12 sps:$4 sm:$0xff]  }
  0xdc   :  { %3559 = vmatpush3.bf16.msra.mxu1 %v4116_v53  ;;  %2772 = vmatprep.subr.bf16.mxu0 %v4119_v54  ;;  %v4179_v53 = vld [vmem:[%s5608_s1 + $0x500] ss:$12 sps:$4 sm:$0xff]   ;;  %v4180_v54 = vld [vmem:[%s5608_s1 + $0x428] ss:$12 sps:$4 sm:$0xff]  }
  0xdd   :  { %3560 = vmatprep.subr.bf16.mxu1 %v4120_v55  ;;  %v4181_v55 = vld [vmem:[%s5608_s1 + $0x5a8] ss:$12 sps:$4 sm:$0xff]  }
  0xdf   :  { %2773 = vmatpush1.bf16.msra.mxu0 %v4117_v56  ;;  %v4182_v56 = vld [vmem:[%s5608_s1 + $0x368] ss:$12 sps:$4 sm:$0xff]  }
  0xe0   :  { %3561 = vmatpush3.bf16.msra.mxu1 %v4121_v57  ;;  %2774 = vmatprep.subr.bf16.mxu0 %v4124_v58  ;;  %v4255_v57 = vld [vmem:[%s5609_s0 + $0x78] ss:$56 sps:$4 sm:$0xff]   ;;  %v4183_v58 = vld [vmem:[%s5608_s1 + $0x4e8] ss:$12 sps:$4 sm:$0xff]  }
  0xe1   :  { %3574 = vmatprep.subr.bf16.mxu1 %v4125_v59  ;;  %v4184_v59 = vld [vmem:[%s5608_s1 + $0x410] ss:$12 sps:$4 sm:$0xff]  }
  0xe3   :  { %2844 = vmatmul.mubr.bf16.vlgmr.msra.gmra.mxu1 %v4249_v1  ;;  %2775 = vmatpush2.bf16.msra.mxu0 %v4122_v60  ;;  %v4185_v60 = vld [vmem:[%s5608_s1 + $0x590] ss:$12 sps:$4 sm:$0xff]   ;;  %v4188_v1 = vld [vmem:[%s5608_s1 + $0x3f8] ss:$12 sps:$4 sm:$0xff]  }
  0xe4   :  { %3575 = vmatpush3.bf16.msra.mxu1 %v4126_v61  ;;  %2776 = vmatprep.subr.bf16.mxu0 %v4129_v62  ;;  %v4186_v61 = vld [vmem:[%s5608_s1 + $0x350] ss:$12 sps:$4 sm:$0xff]   ;;  %v4256_v62 = vld [vmem:[%s5609_s0 + $0x14] ss:$56 sps:$4 sm:$0xff]  }
  0xe5   :  { %3576 = vmatprep.subr.bf16.mxu1 %v4130_v63  ;;  %2851 = vmatprep.mubr.bf16.mxu1 %v4250_v6  ;;  %v4257_v63 = vld [vmem:[%s5609_s0 + $0x1c] ss:$56 sps:$4 sm:$0xff]   ;;  %v4193_v6 = vld [vmem:[%s5608_s1 + $0x560] ss:$12 sps:$4 sm:$0xff]  }
  0xe7   :  { %2777 = vmatpush2.bf16.msra.mxu0 %v4127_v0  ;;  %v4187_v0 = vld [vmem:[%s5608_s1 + $0x4d0] ss:$12 sps:$4 sm:$0xff]  }
  0xe8   :  { %3577 = vmatpush3.bf16.msra.mxu1 %v4131_v2  ;;  %2778 = vmatprep.subr.bf16.mxu0 %v4134_v3  ;;  %v4189_v2 = vld [vmem:[%s5608_s1 + $0x578] ss:$12 sps:$4 sm:$0xff]  }
  0xe9   :  { %3578 = vmatprep.subr.bf16.mxu1 %v4135_v4  ;;  %v4190_v3 = vld [vmem:[%s5608_s1 + $0x338] ss:$12 sps:$4 sm:$0xff]  }
  0xea   :  { %v4191_v4 = vld [vmem:[%s5608_s1 + $0x4b8] ss:$12 sps:$4 sm:$0xff]  }
  0xeb   :  { %2852 = vmatmul.mubr.bf16.gmra.mxu1 %v4251_v12  ;;  %2779 = vmatpush2.bf16.msra.mxu0 %v4132_v5  ;;  %v4192_v5 = vld [vmem:[%s5608_s1 + $0x3e0] ss:$12 sps:$4 sm:$0xff]   ;;  %v4199_v12 = vld [vmem:[%s5608_s1 + $0x488] ss:$12 sps:$4 sm:$0xff]  }
  0xec   :  { %3579 = vmatpush3.bf16.msra.mxu1 %v4136_v7  ;;  %2780 = vmatprep.subr.bf16.mxu0 %v4139_v8  ;;  %v4194_v7 = vld [vmem:[%s5608_s1 + $0x320] ss:$12 sps:$4 sm:$0xff]  }
  0xed   :  { %3580 = vmatprep.subr.bf16.mxu1 %v4140_v9  ;;  %2892 = vmatprep.mubr.bf16.mxu1 %v4252_v16  ;;  %v4195_v8 = vld [vmem:[%s5608_s1 + $0x4a0] ss:$12 sps:$4 sm:$0xff]   ;;  %v4196_v9 = vld [vmem:[%s5608_s1 + $0x3c8] ss:$12 sps:$4 sm:$0xff]   ;;  %v4203_v16 = vld [vmem:[%s5608_s1 + $0x830] ss:$12 sps:$4 sm:$0xff]  }
  0xef   :  { %2781 = vmatpush2.bf16.msra.mxu0 %v4137_v10  ;;  %v4197_v10 = vld [vmem:[%s5608_s1 + $0x548] ss:$12 sps:$4 sm:$0xff]  }
  0xf0   :  { %3581 = vmatpush3.bf16.msra.mxu1 %v4141_v11  ;;  %2782 = vmatprep.subr.bf16.mxu0 %v4144_v13  ;;  %v4198_v11 = vld [vmem:[%s5608_s1 + $0x308] ss:$12 sps:$4 sm:$0xff]   ;;  %v4200_v13 = vld [vmem:[%s5608_s1 + $0x770] ss:$12 sps:$4 sm:$0xff]  }
  0xf1   :  { %3582 = vmatprep.subr.bf16.mxu1 %v4145_v14  ;;  %v4201_v14 = vld [vmem:[%s5608_s1 + $0x8f0] ss:$12 sps:$4 sm:$0xff]  }
  0xf3   :  { %2783 = vmatpush2.bf16.msra.mxu0 %v4142_v15  ;;  %v4202_v15 = vld [vmem:[%s5608_s1 + $0x6b0] ss:$12 sps:$4 sm:$0xff]  }
  0xf4   :  { %3583 = vmatpush3.bf16.msra.mxu1 %v4146_v17  ;;  %2784 = vmatprep.subr.bf16.mxu0 %v4149_v18  ;;  %v4204_v17 = vld [vmem:[%s5608_s1 + $0x758] ss:$12 sps:$4 sm:$0xff]  }
  0xf5   :  { %3584 = vmatprep.subr.bf16.mxu1 %v4150_v21  ;;  %v4205_v18 = vld [vmem:[%s5608_s1 + $0x8d8] ss:$12 sps:$4 sm:$0xff]   ;;  %v4258_v21 = vld [vmem:[%s5609_s0 + $0x10] ss:$56 sps:$4 sm:$0xff]  }
  0xf7   :  { %2785 = vmatpush2.bf16.msra.mxu0 %v4147_v22  ;;  %v4259_v22 = vld [vmem:[%s5609_s0 + $0x18] ss:$56 sps:$4 sm:$0xff]  }
  0xf8   :  { %3585 = vmatpush3.bf16.msra.mxu1 %v4151_v23  ;;  %2786 = vmatprep.subr.bf16.mxu0 %v4154_v24  ;;  %v4206_v23 = vld [vmem:[%s5608_s1 + $0x698] ss:$12 sps:$4 sm:$0xff]  }
  0xf9   :  { %3586 = vmatprep.subr.bf16.mxu1 %v4155_v25  ;;  %v4207_v24 = vld [vmem:[%s5608_s1 + $0x818] ss:$12 sps:$4 sm:$0xff]   ;;  %v4208_v25 = vld [vmem:[%s5608_s1 + $0x740] ss:$12 sps:$4 sm:$0xff]  }
  0xfb   :  { %2787 = vmatpush2.bf16.msra.mxu0 %v4152_v27  ;;  %v4209_v27 = vld [vmem:[%s5608_s1 + $0x8c0] ss:$12 sps:$4 sm:$0xff]  }
  0xfc   :  { %3587 = vmatpush3.bf16.msra.mxu1 %v4156_v29  ;;  %2788 = vmatprep.subr.bf16.mxu0 %v4159_v30  ;;  %v4260_v29 = vld [vmem:[%s5609_s0 + $0x84] ss:$56 sps:$4 sm:$0xff]  }
  0xfd   :  { %3588 = vmatprep.subr.bf16.mxu1 %v4160_v31  ;;  %v4261_v30 = vld [vmem:[%s5609_s0 + $0x8c] ss:$56 sps:$4 sm:$0xff]  }
  0xfe   :  { %v4210_v31 = vld [vmem:[%s5608_s1 + $0x680] ss:$12 sps:$4 sm:$0xff]  }
  0xff   :  { %2789 = vmatpush2.bf16.msra.mxu0 %v4157_v33  ;;  %v4211_v33 = vld [vmem:[%s5608_s1 + $0x800] ss:$12 sps:$4 sm:$0xff]  }
 0x100   :  { %3589 = vmatpush3.bf16.msra.mxu1 %v4161_v34  ;;  %3602 = vmatprep.subr.bf16.mxu0 %v4165_v36  ;;  %v4212_v34 = vld [vmem:[%s5608_s1 + $0x728] ss:$12 sps:$4 sm:$0xff]  }
 0x101   :  { %3630 = vmatprep.subr.bf16.mxu1 %v4166_v38  ;;  %v4213_v36 = vld [vmem:[%s5608_s1 + $0x8a8] ss:$12 sps:$4 sm:$0xff]   ;;  %v4262_v38 = vld [vmem:[%s5609_s0 + $0x80] ss:$56 sps:$4 sm:$0xff]  }
 0x102   :  { %2791 = vmatmul.mubr.bf16.vlgmr.msra.gmra.mxu0 %v5171_v37 }
 0x103   :  { %2893 = vmatmul.mubr.bf16.vlgmr.msra.gmra.mxu1 %v4253_v46  ;;  %3603 = vmatpush3.bf16.msra.mxu0 %v4167_v40  ;;  %v4263_v40 = vld [vmem:[%s5609_s0 + $0x88] ss:$56 sps:$4 sm:$0xff]   ;;  %v4264_v46 = vld [vmem:[%s5609_s0 + $0x24] ss:$56 sps:$4 sm:$0xff]  }
 0x104   :  { %3631 = vmatpush3.bf16.msra.mxu1 %v4168_v41  ;;  %3604 = vmatprep.subr.bf16.mxu0 %v4169_v42  ;;  %v4214_v41 = vld [vmem:[%s5608_s1 + $0x668] ss:$12 sps:$4 sm:$0xff]  }
 0x105   :  { %3632 = vmatprep.subr.bf16.mxu1 %v4170_v43  ;;  %2800 = vmatprep.mubr.bf16.mxu0 %v5194_v45  ;;  %v4215_v42 = vld [vmem:[%s5608_s1 + $0x7e8] ss:$12 sps:$4 sm:$0xff]   ;;  %v4216_v43 = vld [vmem:[%s5608_s1 + $0x710] ss:$12 sps:$4 sm:$0xff]  }
 0x106   :  { %2900 = vmatprep.mubr.bf16.mxu1 %v4254_v51  ;;  %v4220_v51 = vld [vmem:[%s5608_s1 + $0x6f8] ss:$12 sps:$4 sm:$0xff]  }
 0x107   :  { %3605 = vmatpush3.bf16.msra.mxu0 %v4171_v44  ;;  %v4217_v44 = vld [vmem:[%s5608_s1 + $0x890] ss:$12 sps:$4 sm:$0xff]  }
 0x108   :  { %3633 = vmatpush3.bf16.msra.mxu1 %v4172_v47  ;;  %3606 = vmatprep.subr.bf16.mxu0 %v4176_v48  ;;  %v4265_v47 = vld [vmem:[%s5609_s0 + $0x2c] ss:$56 sps:$4 sm:$0xff]   ;;  %v4218_v48 = vld [vmem:[%s5608_s1 + $0x650] ss:$12 sps:$4 sm:$0xff]  }
 0x109   :  { %3634 = vmatprep.subr.bf16.mxu1 %v4177_v50  ;;  %v4219_v50 = vld [vmem:[%s5608_s1 + $0x7d0] ss:$12 sps:$4 sm:$0xff]  }
 0x10a   :  { %2801 = vmatmul.mubr.bf16.gmra.mxu0 %v5209_v49 }
 0x10b   :  { %2901 = vmatmul.mubr.bf16.gmra.mxu1 %v4255_v57  ;;  %3607 = vmatpush3.bf16.msra.mxu0 %v4178_v52  ;;  %v4221_v52 = vld [vmem:[%s5608_s1 + $0x878] ss:$12 sps:$4 sm:$0xff]   ;;  %v4226_v57 = vld [vmem:[%s5608_s1 + $0x620] ss:$12 sps:$4 sm:$0xff]  }
 0x10c   :  { %3635 = vmatpush3.bf16.msra.mxu1 %v4179_v53  ;;  %3608 = vmatprep.subr.bf16.mxu0 %v4180_v54  ;;  %v4222_v53 = vld [vmem:[%s5608_s1 + $0x638] ss:$12 sps:$4 sm:$0xff]  }
 0x10d   :  { %3636 = vmatprep.subr.bf16.mxu1 %v4181_v55  ;;  %2941 = vmatprep.mubr.bf16.mxu0 %v4256_v62  ;;  %v4223_v54 = vld [vmem:[%s5608_s1 + $0x7b8] ss:$12 sps:$4 sm:$0xff]   ;;  %v4224_v55 = vld [vmem:[%s5608_s1 + $0x6e0] ss:$12 sps:$4 sm:$0xff]   ;;  %v4231_v62 = vld [vmem:[%s5608_s1 + $0x788] ss:$12 sps:$4 sm:$0xff]  }
 0x10e   :  { %2990 = vmatprep.mubr.bf16.mxu1 %v4257_v63  ;;  %v4232_v63 = vld [vmem:[%s5608_s1 + $0xa70] ss:$12 sps:$4 sm:$0xff]  }
 0x10f   :  { %3609 = vmatpush3.bf16.msra.mxu0 %v4182_v56  ;;  %v4225_v56 = vld [vmem:[%s5608_s1 + $0x860] ss:$12 sps:$4 sm:$0xff]  }
 0x110   :  { %3637 = vmatpush3.bf16.msra.mxu1 %v4183_v58  ;;  %3610 = vmatprep.subr.bf16.mxu0 %v4184_v59  ;;  %v4227_v58 = vld [vmem:[%s5608_s1 + $0x7a0] ss:$12 sps:$4 sm:$0xff]   ;;  %v4228_v59 = vld [vmem:[%s5608_s1 + $0x6c8] ss:$12 sps:$4 sm:$0xff]  }
 0x111   :  { %3638 = vmatprep.subr.bf16.mxu1 %v4185_v60  ;;  %v4229_v60 = vld [vmem:[%s5608_s1 + $0x848] ss:$12 sps:$4 sm:$0xff]  }
 0x113   :  { %3611 = vmatpush3.bf16.msra.mxu0 %v4186_v61  ;;  %v4230_v61 = vld [vmem:[%s5608_s1 + $0x608] ss:$12 sps:$4 sm:$0xff]  }
 0x114   :  { %3639 = vmatpush3.bf16.msra.mxu1 %v4187_v0  ;;  %3612 = vmatprep.subr.bf16.mxu0 %v4188_v1  ;;  %v4233_v0 = vld [vmem:[%s5608_s1 + $0x9b0] ss:$12 sps:$4 sm:$0xff]   ;;  %v4234_v1 = vld [vmem:[%s5608_s1 + $0xa58] ss:$12 sps:$4 sm:$0xff]  }
 0x115   :  { %3640 = vmatprep.subr.bf16.mxu1 %v4189_v2  ;;  %v4235_v2 = vld [vmem:[%s5608_s1 + $0x998] ss:$12 sps:$4 sm:$0xff]  }
 0x117   :  { %3613 = vmatpush3.bf16.msra.mxu0 %v4190_v3  ;;  %v4236_v3 = vld [vmem:[%s5608_s1 + $0xa40] ss:$12 sps:$4 sm:$0xff]  }
 0x118   :  { %3641 = vmatpush3.bf16.msra.mxu1 %v4191_v4  ;;  %3614 = vmatprep.subr.bf16.mxu0 %v4192_v5  ;;  %v4245_v4 = vld [vmem:[%s5608_s1 + $0x920] ss:$12 sps:$4 sm:$0xff]   ;;  %v4246_v5 = vld [vmem:[%s5608_s1 + $0x9c8] ss:$12 sps:$4 sm:$0xff]  }
 0x119   :  { %3642 = vmatprep.subr.bf16.mxu1 %v4193_v6  ;;  %v4247_v6 = vld [vmem:[%s5608_s1 + $0x908] ss:$12 sps:$4 sm:$0xff]  }
 0x11b   :  { %3615 = vmatpush3.bf16.msra.mxu0 %v4194_v7  ;;  %v5470_v7 = vpop.f32.mrf.mxu1 }
 0x11c   :  { %3643 = vmatpush3.bf16.msra.mxu1 %v4195_v8  ;;  %3616 = vmatprep.subr.bf16.mxu0 %v4196_v9 }
 0x11d   :  { %3644 = vmatprep.subr.bf16.mxu1 %v4197_v10  ;;  %v2529_v8 = vpop.f32.mrf.mxu1 }
 0x11f   :  { %3617 = vmatpush3.bf16.msra.mxu0 %v4198_v11  ;;  %v2531_v9 = vpop.f32.mrf.mxu1  ;;  %v2474_v11 = vpop.f32.mrf.mxu0 }
 0x120   :  { %3645 = vmatpush3.bf16.msra.mxu1 %v4199_v12  ;;  %3658 = vmatprep.subr.bf16.mxu0 %v4200_v13 }
 0x121   :  { %3686 = vmatprep.subr.bf16.mxu1 %v4201_v14  ;;  %v5474_v10 = vpop.f32.mrf.mxu1  ;;  %v2476_v13 = vpop.f32.mrf.mxu0 }
 0x122   :  { %2942 = vmatmul.mubr.bf16.vlgmr.msra.gmra.mxu0 %v4258_v21 }
 0x123   :  { %2991 = vmatmul.mubr.bf16.vlgmr.msra.gmra.mxu1 %v4259_v22  ;;  %3659 = vmatpush3.bf16.msra.mxu0 %v4202_v15  ;;  %v5476_v12 = vpop.f32.mrf.mxu1  ;;  %v2478_v15 = vpop.f32.mrf.mxu0 }
 0x124   :  { %3687 = vmatpush3.bf16.msra.mxu1 %v4203_v16  ;;  %3660 = vmatprep.subr.bf16.mxu0 %v4204_v17 }
 0x125   :  { %3688 = vmatprep.subr.bf16.mxu1 %v4205_v18  ;;  %2949 = vmatprep.mubr.bf16.mxu0 %v4260_v29  ;;  %v5478_v14 = vpop.f32.mrf.mxu1  ;;  %v2480_v17 = vpop.f32.mrf.mxu0 }
 0x126   :  { %2998 = vmatprep.mubr.bf16.mxu1 %v4261_v30 }
 0x127   :  { %3661 = vmatpush3.bf16.msra.mxu0 %v4206_v23  ;;  %v5480_v16 = vpop.f32.mrf.mxu1  ;;  %v2484_v21 = vpop.f32.mrf.mxu0 }
 0x128   :  { %3689 = vmatpush3.bf16.msra.mxu1 %v4207_v24  ;;  %3662 = vmatprep.subr.bf16.mxu0 %v4208_v25 }
 0x129   :  { %3690 = vmatprep.subr.bf16.mxu1 %v4209_v27  ;;  %v5482_v18 = vpop.f32.mrf.mxu1 }
 0x12a   :  { %2950 = vmatmul.mubr.bf16.gmra.mxu0 %v4262_v38 }
 0x12b   :  { %2999 = vmatmul.mubr.bf16.gmra.mxu1 %v4263_v40  ;;  %3663 = vmatpush3.bf16.msra.mxu0 %v4210_v31 }
 0x12c   :  { %3691 = vmatpush3.bf16.msra.mxu1 %v4211_v33  ;;  %3664 = vmatprep.subr.bf16.mxu0 %v4212_v34 }
 0x12d   :  { %3692 = vmatprep.subr.bf16.mxu1 %v4213_v36  ;;  %3039 = vmatprep.mubr.bf16.mxu0 %v4264_v46 }
 0x12e   :  { %3088 = vmatprep.mubr.bf16.mxu1 %v4265_v47 }
 0x12f   :  { %3665 = vmatpush3.bf16.msra.mxu0 %v4214_v41 }
 0x130   :  { %3693 = vmatpush3.bf16.msra.mxu1 %v4215_v42  ;;  %3666 = vmatprep.subr.bf16.mxu0 %v4216_v43 }
 0x131   :  { %3694 = vmatprep.subr.bf16.mxu1 %v4217_v44 }
 0x133   :  { %3667 = vmatpush3.bf16.msra.mxu0 %v4218_v48 }
 0x134   :  { %3695 = vmatpush3.bf16.msra.mxu1 %v4219_v50  ;;  %3668 = vmatprep.subr.bf16.mxu0 %v4220_v51  ;;  %v493_v50 = vlaneseq }
 0x135   :  { %3696 = vmatprep.subr.bf16.mxu1 %v4221_v52 }
 0x137   :  { %3669 = vmatpush3.bf16.msra.mxu0 %v4222_v53 }
 0x138   :  { %3697 = vmatpush3.bf16.msra.mxu1 %v4223_v54  ;;  %3670 = vmatprep.subr.bf16.mxu0 %v4224_v55  ;;  %v5506_v54 = vshrl.u32 %v493_v50, 7 }
 0x139   :  { %3698 = vmatprep.subr.bf16.mxu1 %v4225_v56 }
 0x13a   :  { %5614 = vst [vmem:[#allocation2_spill] sm:$0xff] %v5506_v54 }
 0x13b   :  { %3671 = vmatpush3.bf16.msra.mxu0 %v4226_v57  ;;  %v495_v57 = vsub.s32 0, %v5506_v54 }
 0x13c   :  { %3699 = vmatpush3.bf16.msra.mxu1 %v4227_v58  ;;  %3672 = vmatprep.subr.bf16.mxu0 %v4228_v59  ;;  %v5514_v58 = vld [vmem:[%s5610_s2] sm:$0x7] }
 0x13d   :  { %3700 = vmatprep.subr.bf16.mxu1 %v4229_v60  ;;  %5615 = vst [vmem:[#allocation3_spill] sm:$0xff] %v5514_v58  ;;  %v499_v60 = vsub.s32 1, %v5506_v54 }
 0x13f   :  { %3673 = vmatpush3.bf16.msra.mxu0 %v4230_v61 }
 0x140   :  { %3701 = vmatpush3.bf16.msra.mxu1 %v4231_v62  ;;  %3714 = vmatprep.subr.bf16.mxu0 %v4232_v63  ;;  %v496_v62 = vrot.slane %v5514_v58, %v495_v57 }
 0x141   :  { %3742 = vmatprep.subr.bf16.mxu1 %v4232_v63 }
 0x142   :  { %3040 = vmatmul.mubr.bf16.vlgmr.msra.gmra.mxu0 %v4922_v19  ;;  %v4237_v19 = vld [vmem:[%s5608_s1 + $0x980] ss:$12 sps:$4 sm:$0xff]   ;;  %v2485_v50 = vadd.f32 %v2484_v21, %v496_v62 }
 0x143   :  { %3089 = vmatmul.mubr.bf16.vlgmr.msra.gmra.mxu1 %v4927_v20  ;;  %3715 = vmatpush3.bf16.msra.mxu0 %v4233_v0  ;;  %v4238_v20 = vld [vmem:[%s5608_s1 + $0xa28] ss:$12 sps:$4 sm:$0xff]   ;;  %v2633_v22 = vpop.f32.mrf.mxu1 }
 0x144   :  { %3750 = vmatpush3.bf16.msra.mxu1 %v4233_v0  ;;  %3716 = vmatprep.subr.bf16.mxu0 %v4234_v1  ;;  %v500_v0 = vrot.slane %v5514_v58, %v499_v60 }
 0x145   :  { %3743 = vmatprep.subr.bf16.mxu1 %v4234_v1  ;;  %3047 = vmatprep.mubr.bf16.mxu0 %v4947_v26  ;;  %v4239_v26 = vld [vmem:[%s5608_s1 + $0x968] ss:$12 sps:$4 sm:$0xff]   ;;  %v2635_v23 = vpop.f32.mrf.mxu1 }
 0x146   :  { %3096 = vmatprep.mubr.bf16.mxu1 %v4955_v28  ;;  %v4240_v28 = vld [vmem:[%s5608_s1 + $0xa10] ss:$12 sps:$4 sm:$0xff]  }
 0x147   :  { %3717 = vmatpush3.bf16.msra.mxu0 %v4235_v2  ;;  %v5484_v24 = vpop.f32.mrf.mxu1 }
 0x148   :  { %3751 = vmatpush3.bf16.msra.mxu1 %v4235_v2  ;;  %3718 = vmatprep.subr.bf16.mxu0 %v4236_v3 }
 0x149   :  { %3744 = vmatprep.subr.bf16.mxu1 %v4236_v3  ;;  %v5486_v27 = vpop.f32.mrf.mxu1  ;;  %v2475_v3 = vadd.f32 %v2474_v11, %v496_v62 }
 0x14a   :  { %3048 = vmatmul.mubr.bf16.gmra.mxu0 %v4972_v32  ;;  %v4241_v32 = vld [vmem:[%s5608_s1 + $0x950] ss:$12 sps:$4 sm:$0xff]  }
 0x14b   :  { %3097 = vmatmul.mubr.bf16.gmra.mxu1 %v4984_v35  ;;  %3719 = vmatpush3.bf16.msra.mxu0 %v4237_v19  ;;  %v4242_v35 = vld [vmem:[%s5608_s1 + $0x9f8] ss:$12 sps:$4 sm:$0xff]   ;;  %v5488_v30 = vpop.f32.mrf.mxu1 }
 0x14c   :  { %3752 = vmatpush3.bf16.msra.mxu1 %v4237_v19  ;;  %3720 = vmatprep.subr.bf16.mxu0 %v4238_v20  ;;  %v2477_v19 = vadd.f32 %v2476_v13, %v500_v0 }
 0x14d   :  { %3745 = vmatprep.subr.bf16.mxu1 %v4238_v20  ;;  %3137 = vmatprep.mubr.bf16.mxu0 %v4998_v39  ;;  %v4243_v39 = vld [vmem:[%s5608_s1 + $0x938] ss:$12 sps:$4 sm:$0xff]   ;;  %v5490_v33 = vpop.f32.mrf.mxu1 }
 0x14e   :  { %3145 = vmatprep.mubr.bf16.mxu1 %v5194_v45  ;;  %v4244_v45 = vld [vmem:[%s5608_s1 + $0x9e0] ss:$12 sps:$4 sm:$0xff]  }
 0x14f   :  { %3721 = vmatpush3.bf16.msra.mxu0 %v4239_v26  ;;  %v5492_v36 = vpop.f32.mrf.mxu1 }
 0x150   :  { %3753 = vmatpush3.bf16.msra.mxu1 %v4239_v26  ;;  %3722 = vmatprep.subr.bf16.mxu0 %v4240_v28 }
 0x151   :  { %3746 = vmatprep.subr.bf16.mxu1 %v4240_v28  ;;  %v5494_v40 = vpop.f32.mrf.mxu1  ;;  %v2528_v28 = vadd.f32 %v5470_v7, %v2475_v3  ;;  %v2538_v7 = vadd.f32 %v5476_v12, %v2485_v50 }
 0x153   :  { %3723 = vmatpush3.bf16.msra.mxu0 %v4241_v32 }
 0x154   :  { %3754 = vmatpush3.bf16.msra.mxu1 %v4241_v32  ;;  %3724 = vmatprep.subr.bf16.mxu0 %v4242_v35  ;;  %v2479_v32 = vadd.f32 %v2478_v15, %v496_v62 }
 0x155   :  { %3747 = vmatprep.subr.bf16.mxu1 %v4242_v35  ;;  %v2530_v35 = vadd.f32 %v2529_v8, %v2477_v19 }
 0x157   :  { %3725 = vmatpush3.bf16.msra.mxu0 %v4243_v39 }
 0x158   :  { %3755 = vmatpush3.bf16.msra.mxu1 %v4243_v39  ;;  %3726 = vmatprep.subr.bf16.mxu0 %v4244_v45  ;;  %v2481_v39 = vadd.f32 %v2480_v17, %v500_v0 }
 0x159   :  { %3748 = vmatprep.subr.bf16.mxu1 %v4244_v45 }
 0x15b   :  { %3727 = vmatpush3.bf16.msra.mxu0 %v4245_v4 }
 0x15c   :  { %3756 = vmatpush3.bf16.msra.mxu1 %v4245_v4  ;;  %3728 = vmatprep.subr.bf16.mxu0 %v4246_v5 }
 0x15d   :  { %3749 = vmatprep.subr.bf16.mxu1 %v4246_v5 }
 0x15f   :  { %3729 = vmatpush3.bf16.msra.mxu0 %v4247_v6 }
 0x160   :  { %3757 = vmatpush3.bf16.msra.mxu1 %v4247_v6  ;;  %v2532_v6 = vadd.f32 %v2531_v9, %v2479_v32 }
 0x162   :  { %3138 = vmatmul.mubr.bf16.vlgmr.msra.gmra.mxu0 %v5171_v37  ;;  %v2486_v37 = vpop.f32.mrf.mxu0 }
 0x163   :  { %3146 = vmatmul.mubr.bf16.vlgmr.msra.gmra.mxu1 %v5209_v49  ;;  %v2487_v60 = vadd.f32 %v2486_v37, %v500_v0 }
 0x164   :  { %v2488_v49 = vpop.f32.mrf.mxu0 }
 0x165   :  { %v2489_v58 = vadd.f32 %v2488_v49, %v496_v62 }
 0x166   :  { %v2490_v25 = vpop.f32.mrf.mxu0 }
 0x167   :  { %v2491_v3 = vadd.f32 %v2490_v25, %v500_v0 }
 0x168   :  { %v2580_v29 = vpop.f32.mrf.mxu0 }
 0x169   :  { %v2581_v45 = vadd.f32 %v2580_v29, %v2528_v28  ;;  %v2540_v29 = vadd.f32 %v5478_v14, %v2487_v60 }
 0x16a   :  { %v2582_v31 = vpop.f32.mrf.mxu0 }
 0x16b   :  { %v2583_v57 = vadd.f32 %v2582_v31, %v2530_v35  ;;  %v2634_v11 = vadd.f32 %v2633_v22, %v2581_v45  ;;  %v2542_v22 = vadd.f32 %v5480_v16, %v2489_v58 }
 0x16c   :  { %v2584_v34 = vpop.f32.mrf.mxu0 }
 0x16d   :  { %v2585_v13 = vadd.f32 %v2584_v34, %v2532_v6  ;;  %v2636_v8 = vadd.f32 %v2635_v23, %v2583_v57  ;;  %v2544_v23 = vadd.f32 %v5482_v18, %v2491_v3 }
 0x16e   :  { %v2586_v38 = vpop.f32.mrf.mxu0 }
 0x16f   :  { %v2638_v21 = vadd.f32 %v5484_v24, %v2585_v13 }
 0x170   :  { %v2590_v42 = vpop.f32.mrf.mxu0 }
 0x171   :  { %v2591_v37 = vadd.f32 %v2590_v42, %v2538_v7 }
 0x172   :  { %v2592_v44 = vpop.f32.mrf.mxu0 }
 0x173   :  { %v2593_v49 = vadd.f32 %v2592_v44, %v2540_v29  ;;  %v2644_v25 = vadd.f32 %v5488_v30, %v2591_v37 }
 0x174   :  { %v2594_v47 = vpop.f32.mrf.mxu0 }
 0x175   :  { %v2646_v16 = vadd.f32 %v5490_v33, %v2593_v49 }
 0x176   :  { %v5502_v51 = vpop.f32.mrf.mxu0 }
 0x177   :  { %v2597_v44 = vadd.f32 %v5502_v51, %v2544_v23 }
 0x182   :  { %v2686_v53 = vpop.f32.mrf.mxu0 }
 0x183   :  { %v2739_v41 = vpop.f32.mrf.mxu1  ;;  %v2687_v17 = vadd.f32 %v2686_v53, %v2634_v11 }
 0x184   :  { %v2688_v56 = vpop.f32.mrf.mxu0 }
 0x185   :  { %v5496_v43 = vpop.f32.mrf.mxu1  ;;  %v2740_v62 = vadd.f32 %v2739_v41, %v2687_v17 }
 0x186   :  { %v2690_v61 = vpop.f32.mrf.mxu0 }
 0x187   :  { %v5498_v46 = vpop.f32.mrf.mxu1  ;;  %v2691_v12 = vadd.f32 %v2690_v61, %v2638_v21 }
 0x188   :  { %v2692_v1 = vpop.f32.mrf.mxu0 }
 0x189   :  { %v5500_v48 = vpop.f32.mrf.mxu1 }
 0x18a   :  { %v2696_v20 = vpop.f32.mrf.mxu0 }
 0x18b   :  { %v5504_v52 = vpop.f32.mrf.mxu1  ;;  %v2697_v41 = vadd.f32 %v2696_v20, %v2644_v25 }
 0x18c   :  { %v2698_v4 = vpop.f32.mrf.mxu0 }
 0x18d   :  { %v5508_v55 = vpop.f32.mrf.mxu1  ;;  %v2750_v19 = vadd.f32 %v5504_v52, %v2697_v41 }
 0x18e   :  { %v2700_v54 = vpop.f32.mrf.mxu0 }
 0x18f   :  { %v5516_v59 = vpop.f32.mrf.mxu1 }
 0x190   :  { %v2702_v31 = vpop.f32.mrf.mxu0 }
 0x191   :  { %v5520_v63 = vpop.f32.mrf.mxu1 }
 0x1a3   :  { %v5523_v2 = vpop.f32.mrf.mxu1 }
 0x1a4   :  { %5616 = vst [vmem:[#allocation4_spill] sm:$0xff] %v5523_v2  ;;  %v2534_v2 = vadd.f32 %v5474_v10, %v2481_v39  ;;  %v2689_v10 = vadd.f32 %v2688_v56, %v2636_v8 }
 0x1a5   :  { %v5525_v26 = vpop.f32.mrf.mxu1 }
 0x1a6   :  { %5617 = vst [vmem:[#allocation5_spill] sm:$0xff] %v5525_v26  ;;  %v2587_v15 = vadd.f32 %v2586_v38, %v2534_v2  ;;  %v2595_v38 = vadd.f32 %v2594_v47, %v2542_v22  ;;  %v2742_v24 = vadd.f32 %v5496_v43, %v2689_v10  ;;  %v2699_v43 = vadd.f32 %v2698_v4, %v2646_v16 }
 0x1a7   :  { %v5528_v5 = vpop.f32.mrf.mxu1 }
 0x1a8   :  { %v2640_v34 = vadd.f32 %v5486_v27, %v2587_v15  ;;  %v2744_v27 = vadd.f32 %v5498_v46, %v2691_v12  ;;  %v2648_v47 = vadd.f32 %v5492_v36, %v2595_v38  ;;  %v2752_v35 = vadd.f32 %v5508_v55, %v2699_v43 }
 0x1a9   :  { %v5531_v26 = vpop.f32.mrf.mxu1 }
 0x1aa   :  { %v2693_v42 = vadd.f32 %v2692_v1, %v2640_v34  ;;  %v2650_v1 = vadd.f32 %v5494_v40, %v2597_v44  ;;  %v2701_v20 = vadd.f32 %v2700_v54, %v2648_v47 }
 0x1ab   :  { %v5535_v9 = vpop.f32.mrf.mxu1 }
 0x1ac   :  { %v2746_v30 = vadd.f32 %v5500_v48, %v2693_v42  ;;  %v2703_v39 = vadd.f32 %v2702_v31, %v2650_v1  ;;  %v2754_v4 = vadd.f32 %v5516_v59, %v2701_v20  ;;  %v5619_v1 = vld [vmem:[#allocation3_spill] sm:$0xff] }
 0x1ad   :  { %v5541_v53 = vpop.f32.mrf.mxu1  ;;  %v5621_v20 = vld [vmem:[#allocation5_spill] sm:$0xff] }
 0x1ae   :  { %v2756_v55 = vadd.f32 %v5520_v63, %v2703_v39 }
 0x1af   :  { %v5549_v0 = vpop.f32.mrf.mxu1 }
 0x1b1   :  { %v5560_v48 = vpop.f32.mrf.mxu1 }
 0x1c2   :  { %v2792_v14 = vpop.f32.mrf.mxu0 }
 0x1c3   :  { %v2793_v56 = vadd.f32 %v2792_v14, %v2740_v62  ;;  %v3590_v52 = vpop.f32.mrf.mxu1 }
 0x1c4   :  { %v2794_v58 = vpop.f32.mrf.mxu0 }
 0x1c5   :  { %v3154_v61 = vmax.f32 %v2793_v56, 0.0  ;;  %v2795_v18 = vadd.f32 %v2794_v58, %v2742_v24  ;;  %v3591_v13 = vpop.f32.mrf.mxu1 }
 0x1c6   :  { %v2796_v2 = vpop.f32.mrf.mxu0 }
 0x1c7   :  { %3166 = vst [vmem:[%s5611_s3] sm:$0xff] %v3154_v61  ;;  %v3155_v33 = vmax.f32 %v2795_v18, 0.0  ;;  %v2797_v51 = vadd.f32 %v2796_v2, %v2744_v27  ;;  %v3593_v63 = vpop.f32.mrf.mxu1 }
 0x1c8   :  { %v2798_v46 = vpop.f32.mrf.mxu0 }
 0x1c9   :  { %3167 = vst [vmem:[%s5611_s3 + $0x8] sm:$0xff] %v3155_v33  ;;  %v3157_v36 = vmax.f32 %v2797_v51, 0.0  ;;  %v2799_v28 = vadd.f32 %v2798_v46, %v2746_v30  ;;  %v3594_v17 = vpop.f32.mrf.mxu1  ;;  %v5618_v30 = vld [vmem:[#allocation2_spill] sm:$0xff] }
 0x1ca   :  { %v2802_v32 = vpop.f32.mrf.mxu0  ;;  %v503_v43 = vsub.s32 2, %v5618_v30 }
 0x1cb   :  { %3169 = vst [vmem:[%s5611_s3 + $0x18] sm:$0xff] %v3157_v36  ;;  %v3158_v40 = vmax.f32 %v2799_v28, 0.0  ;;  %v2803_v45 = vadd.f32 %v2802_v32, %v2750_v19  ;;  %v3596_v29 = vpop.f32.mrf.mxu1  ;;  %v5620_v19 = vld [vmem:[#allocation4_spill] sm:$0xff]  ;;  %v3570_v28 = vadd.f32 %v5541_v53, %v5535_v9 }
 0x1cc   :  { %v2804_v54 = vpop.f32.mrf.mxu0  ;;  %v504_v46 = vrot.slane %v5619_v1, %v503_v43  ;;  %v3564_v36 = vadd.f32 %v5621_v20, %v5620_v19 }
 0x1cd   :  { %3170 = vst [vmem:[%s5611_s3 + $0x20] sm:$0xff] %v3158_v40  ;;  %v3160_v6 = vmax.f32 %v2803_v45, 0.0  ;;  %v2805_v50 = vadd.f32 %v2804_v54, %v2752_v35  ;;  %v3597_v3 = vpop.f32.mrf.mxu1  ;;  %v3592_v35 = vadd.f32 %v3591_v13, %v3590_v52  ;;  %v3567_v45 = vadd.f32 %v5531_v26, %v5528_v5 }
 0x1ce   :  { %v2806_v57 = vpop.f32.mrf.mxu0  ;;  %v3598_v39 = vadd.f32 %v3597_v3, %v3596_v29  ;;  %v3573_v54 = vadd.f32 %v5560_v48, %v5549_v0 }
 0x1cf   :  { %3172 = vst [vmem:[%s5611_s3 + $0x30] sm:$0xff] %v3160_v6  ;;  %v3161_v60 = vmax.f32 %v2805_v50, 0.0  ;;  %v2807_v11 = vadd.f32 %v2806_v57, %v2754_v4  ;;  %v3599_v21 = vpop.f32.mrf.mxu1  ;;  %v2846_v4 = vadd.f32 %v3564_v36, %v504_v46  ;;  %v2854_v6 = vadd.f32 %v3570_v28, %v504_v46 }
 0x1d0   :  { %v2808_v7 = vpop.f32.mrf.mxu0  ;;  %v2849_v53 = vadd.f32 %v3567_v45, %v504_v46  ;;  %v2857_v52 = vadd.f32 %v3573_v54, %v504_v46 }
 0x1d1   :  { %3173 = vst [vmem:[%s5611_s3 + $0x38] sm:$0xff] %v3161_v60  ;;  %v3163_v59 = vmax.f32 %v2807_v11, 0.0  ;;  %v2809_v8 = vadd.f32 %v2808_v7, %v2756_v55  ;;  %v3600_v10 = vpop.f32.mrf.mxu1  ;;  %v3595_v55 = vadd.f32 %v3594_v17, %v3593_v63  ;;  %v2895_v7 = vadd.f32 %v3592_v35, %v2846_v4 }
 0x1d2   :  { %v3601_v60 = vadd.f32 %v3600_v10, %v3599_v21 }
 0x1d3   :  { %3175 = vst [vmem:[%s5611_s3 + $0x48] sm:$0xff] %v3163_v59  ;;  %v3164_v15 = vmax.f32 %v2809_v8, 0.0  ;;  %v2903_v59 = vadd.f32 %v3598_v39, %v2854_v6  ;;  %v2898_v5 = vadd.f32 %v3595_v55, %v2849_v53 }
 0x1d4   :  { %v2906_v3 = vadd.f32 %v3601_v60, %v2857_v52 }
 0x1d5   :  { %3176 = vst [vmem:[%s5611_s3 + $0x50] sm:$0xff] %v3164_v15 }
 0x1e2   :  { %v3618_v37 = vpop.f32.mrf.mxu0 }
 0x1e3   :  { %v3646_v49 = vpop.f32.mrf.mxu1 }
 0x1e4   :  { %v3619_v22 = vpop.f32.mrf.mxu0 }
 0x1e5   :  { %v3647_v34 = vpop.f32.mrf.mxu1  ;;  %v3620_v50 = vadd.f32 %v3619_v22, %v3618_v37 }
 0x1e6   :  { %v3621_v31 = vpop.f32.mrf.mxu0  ;;  %v3648_v48 = vadd.f32 %v3647_v34, %v3646_v49 }
 0x1e7   :  { %v3649_v12 = vpop.f32.mrf.mxu1  ;;  %v2944_v15 = vadd.f32 %v3620_v50, %v2895_v7 }
 0x1e8   :  { %v3622_v62 = vpop.f32.mrf.mxu0 }
 0x1e9   :  { %v3650_v38 = vpop.f32.mrf.mxu1  ;;  %v3623_v13 = vadd.f32 %v3622_v62, %v3621_v31  ;;  %v2993_v10 = vadd.f32 %v3648_v48, %v2944_v15 }
 0x1ea   :  { %v3624_v23 = vpop.f32.mrf.mxu0 }
 0x1eb   :  { %v3652_v25 = vpop.f32.mrf.mxu1  ;;  %v2947_v63 = vadd.f32 %v3623_v13, %v2898_v5 }
 0x1ec   :  { %v3625_v14 = vpop.f32.mrf.mxu0 }
 0x1ed   :  { %v3653_v42 = vpop.f32.mrf.mxu1  ;;  %v3626_v57 = vadd.f32 %v3625_v14, %v3624_v23  ;;  %v3651_v14 = vadd.f32 %v3650_v38, %v3649_v12 }
 0x1ee   :  { %v3627_v24 = vpop.f32.mrf.mxu0  ;;  %v3654_v26 = vadd.f32 %v3653_v42, %v3652_v25 }
 0x1ef   :  { %v3655_v16 = vpop.f32.mrf.mxu1  ;;  %v2952_v29 = vadd.f32 %v3626_v57, %v2903_v59  ;;  %v2996_v25 = vadd.f32 %v3651_v14, %v2947_v63 }
 0x1f0   :  { %v3628_v56 = vpop.f32.mrf.mxu0 }
 0x1f1   :  { %v3656_v58 = vpop.f32.mrf.mxu1  ;;  %v3629_v8 = vadd.f32 %v3628_v56, %v3627_v24  ;;  %v3001_v23 = vadd.f32 %v3654_v26, %v2952_v29 }
 0x1f2   :  { %v3657_v21 = vadd.f32 %v3656_v58, %v3655_v16 }
 0x1f3   :  { %v2955_v17 = vadd.f32 %v3629_v8, %v2906_v3 }
 0x1f5   :  { %v3004_v42 = vadd.f32 %v3657_v21, %v2955_v17 }
 0x202   :  { %v3674_v44 = vpop.f32.mrf.mxu0 }
 0x203   :  { %v3702_v41 = vpop.f32.mrf.mxu1 }
 0x204   :  { %v3675_v27 = vpop.f32.mrf.mxu0 }
 0x205   :  { %v3703_v18 = vpop.f32.mrf.mxu1  ;;  %v3676_v30 = vadd.f32 %v3675_v27, %v3674_v44 }
 0x206   :  { %v3677_v61 = vpop.f32.mrf.mxu0  ;;  %v3704_v49 = vadd.f32 %v3703_v18, %v3702_v41 }
 0x207   :  { %v5583_v2 = vpop.f32.mrf.mxu1  ;;  %v3042_v62 = vadd.f32 %v3676_v30, %v2993_v10 }
 0x208   :  { %v3678_v47 = vpop.f32.mrf.mxu0 }
 0x209   :  { %v3706_v51 = vpop.f32.mrf.mxu1  ;;  %v3679_v43 = vadd.f32 %v3678_v47, %v3677_v61  ;;  %v3091_v16 = vadd.f32 %v3704_v49, %v3042_v62 }
 0x20a   :  { %v3680_v33 = vpop.f32.mrf.mxu0  ;;  %v3707_v38 = vadd.f32 %v3706_v51, %v5583_v2 }
 0x20b   :  { %v3708_v32 = vpop.f32.mrf.mxu1  ;;  %v3045_v34 = vadd.f32 %v3679_v43, %v2996_v25 }
 0x20c   :  { %v3681_v40 = vpop.f32.mrf.mxu0 }
 0x20d   :  { %v3709_v11 = vpop.f32.mrf.mxu1  ;;  %v3682_v37 = vadd.f32 %v3681_v40, %v3680_v33  ;;  %v3094_v35 = vadd.f32 %v3707_v38, %v3045_v34 }
 0x20e   :  { %v3683_v9 = vpop.f32.mrf.mxu0  ;;  %v3710_v56 = vadd.f32 %v3709_v11, %v3708_v32 }
 0x20f   :  { %v3711_v0 = vpop.f32.mrf.mxu1  ;;  %v3050_v24 = vadd.f32 %v3682_v37, %v3001_v23 }
 0x210   :  { %v3684_v22 = vpop.f32.mrf.mxu0 }
 0x211   :  { %v3685_v1 = vadd.f32 %v3684_v22, %v3683_v9  ;;  %v3712_v31 = vpop.f32.mrf.mxu1  ;;  %v3099_v58 = vadd.f32 %v3710_v56, %v3050_v24 }
 0x212   :  { %v3713_v27 = vadd.f32 %v3712_v31, %v3711_v0 }
 0x213   :  { %v3053_v44 = vadd.f32 %v3685_v1, %v3004_v42 }
 0x215   :  { %v3102_v39 = vadd.f32 %v3713_v27, %v3053_v44 }
 0x222   :  { %v3730_v46 = vpop.f32.mrf.mxu0 }
 0x223   :  { %v3736_v19 = vpop.f32.mrf.mxu1 }
 0x224   :  { %v3731_v33 = vpop.f32.mrf.mxu0 }
 0x225   :  { %v3737_v20 = vpop.f32.mrf.mxu1  ;;  %v3732_v36 = vadd.f32 %v3731_v33, %v3730_v46 }
 0x226   :  { %v3738_v12 = vadd.f32 %v3737_v20, %v3736_v19  ;;  %v3733_v61 = vpop.f32.mrf.mxu0 }
 0x227   :  { %v3739_v47 = vpop.f32.mrf.mxu1  ;;  %v3140_v28 = vadd.f32 %v3732_v36, %v3091_v16 }
 0x228   :  { %v3148_v32 = vadd.f32 %v3738_v12, %v3099_v58  ;;  %v3734_v40 = vpop.f32.mrf.mxu0 }
 0x229   :  { %v3740_v45 = vpop.f32.mrf.mxu1  ;;  %v3156_v41 = vmax.f32 %v3140_v28, 0.0  ;;  %v3735_v54 = vadd.f32 %v3734_v40, %v3733_v61 }
 0x22a   :  { %v3162_v18 = vmax.f32 %v3148_v32, 0.0  ;;  %v3741_v4 = vadd.f32 %v3740_v45, %v3739_v47 }
 0x22b   :  { %3168 = vst [vmem:[%s5611_s3 + $0x10] sm:$0xff] %v3156_v41  ;;  %v3143_v2 = vadd.f32 %v3735_v54, %v3094_v35 }
 0x22c   :  { %3174 = vst [vmem:[%s5611_s3 + $0x40] sm:$0xff] %v3162_v18  ;;  %v3151_v51 = vadd.f32 %v3741_v4, %v3102_v39 }
 0x22d   :  { %v3159_v6 = vmax.f32 %v3143_v2, 0.0 }
 0x22e   :  { %v3165_v50 = vmax.f32 %v3151_v51, 0.0 }
 0x22f   :  { %3171 = vst [vmem:[%s5611_s3 + $0x28] sm:$0xff] %v3159_v6 }
 0x230   :  { %3177 = vst [vmem:[%s5611_s3 + $0x58] sm:$0xff] %v3165_v50 }

// kernel: alexnet_conv_forward.11
= control target key start
LH: loop header
LB: loop body
LE: loop exit
PB: predicated region body
PF: predicated region fallthrough
CT: control target
= control target key end

     0   :  { %s6676_s1 = inlined_call_operand.vmem [shape: bf16[3456,256], index: 1, kind: input, shape index: {}]   ;;  %s6677_s0 = inlined_call_operand.vmem [shape: bf16[32,3456], index: 0, kind: input, shape index: {}]   ;;  %s6678_s2 = inlined_call_operand.vmem [shape: f32[1,256], index: 2, kind: input, shape index: {}]   ;;  %s6679_s3 = inlined_call_operand.vmem [shape: f32[32,256], index: 3, kind: output, shape index: {}]  }
   0x1   :  { %v4196_v0 = vld [vmem:[%s6676_s1 + $0x74] ss:$8 sps:$4 sm:$0xff]   ;;  %v4198_v1 = vld [vmem:[%s6676_s1 + $0x70] ss:$8 sps:$4 sm:$0xff]   ;;  %v4202_v4 = vld [vmem:[%s6676_s1 + $0x64] ss:$8 sps:$4 sm:$0xff]  }
   0x2   :  { %2947 = vmatprep.subr.bf16.mxu0 %v4196_v0  ;;  %v4199_v2 = vld [vmem:[%s6676_s1 + $0x174] ss:$8 sps:$4 sm:$0xff]   ;;  %v4201_v3 = vld [vmem:[%s6676_s1 + $0x170] ss:$8 sps:$4 sm:$0xff]   ;;  %v4204_v5 = vld [vmem:[%s6676_s1 + $0x60] ss:$8 sps:$4 sm:$0xff]  }
   0x3   :  { %2948 = vmatpush1.bf16.msra.mxu0 %v4198_v1  ;;  %3000 = vmatprep.subr.bf16.mxu1 %v4199_v2  ;;  %v4205_v6 = vld [vmem:[%s6676_s1 + $0x164] ss:$8 sps:$4 sm:$0xff]   ;;  %v4207_v7 = vld [vmem:[%s6676_s1 + $0x160] ss:$8 sps:$4 sm:$0xff]   ;;  %v4208_v8 = vld [vmem:[%s6676_s1 + $0x54] ss:$8 sps:$4 sm:$0xff]  }
   0x4   :  { %3001 = vmatpush1.bf16.msra.mxu1 %v4201_v3  ;;  %2949 = vmatprep.subr.bf16.mxu0 %v4202_v4  ;;  %v4210_v9 = vld [vmem:[%s6676_s1 + $0x50] ss:$8 sps:$4 sm:$0xff]   ;;  %v4211_v10 = vld [vmem:[%s6676_s1 + $0x154] ss:$8 sps:$4 sm:$0xff]   ;;  %v4214_v11 = vld [vmem:[%s6676_s1 + $0x44] ss:$8 sps:$4 sm:$0xff]  }
   0x5   :  { %3002 = vmatprep.subr.bf16.mxu1 %v4205_v6  ;;  %v4213_v12 = vld [vmem:[%s6676_s1 + $0x150] ss:$8 sps:$4 sm:$0xff]   ;;  %v4217_v13 = vld [vmem:[%s6676_s1 + $0x144] ss:$8 sps:$4 sm:$0xff]   ;;  %v4216_v14 = vld [vmem:[%s6676_s1 + $0x40] ss:$8 sps:$4 sm:$0xff]  }
   0x6   :  { %v4220_v15 = vld [vmem:[%s6676_s1 + $0x34] ss:$8 sps:$4 sm:$0xff]   ;;  %v4219_v16 = vld [vmem:[%s6676_s1 + $0x140] ss:$8 sps:$4 sm:$0xff]   ;;  %v4222_v18 = vld [vmem:[%s6676_s1 + $0x30] ss:$8 sps:$4 sm:$0xff]  }
   0x7   :  { %2950 = vmatpush1.bf16.msra.mxu0 %v4204_v5  ;;  %v4223_v17 = vld [vmem:[%s6676_s1 + $0x134] ss:$8 sps:$4 sm:$0xff]   ;;  %v4226_v19 = vld [vmem:[%s6676_s1 + $0x24] ss:$8 sps:$4 sm:$0xff]   ;;  %v4225_v20 = vld [vmem:[%s6676_s1 + $0x130] ss:$8 sps:$4 sm:$0xff]  }
   0x8   :  { %2951 = vmatprep.subr.bf16.mxu0 %v4208_v8  ;;  %3003 = vmatpush1.bf16.msra.mxu1 %v4207_v7  ;;  %v4229_v21 = vld [vmem:[%s6676_s1 + $0x124] ss:$8 sps:$4 sm:$0xff]   ;;  %v4228_v22 = vld [vmem:[%s6676_s1 + $0x20] ss:$8 sps:$4 sm:$0xff]   ;;  %v4232_v23 = vld [vmem:[%s6676_s1 + $0x14] ss:$8 sps:$4 sm:$0xff]  }
   0x9   :  { %3004 = vmatprep.subr.bf16.mxu1 %v4211_v10  ;;  %v4231_v24 = vld [vmem:[%s6676_s1 + $0x120] ss:$8 sps:$4 sm:$0xff]   ;;  %v4235_v25 = vld [vmem:[%s6676_s1 + $0x114] ss:$8 sps:$4 sm:$0xff]   ;;  %v4234_v26 = vld [vmem:[%s6676_s1 + $0x10] ss:$8 sps:$4 sm:$0xff]  }
   0xa   :  { %v4238_v27 = vld [vmem:[%s6676_s1 + $0x4] ss:$8 sps:$4 sm:$0xff]   ;;  %v4237_v28 = vld [vmem:[%s6676_s1 + $0x110] ss:$8 sps:$4 sm:$0xff]   ;;  %v4240_v30 = vld [vmem:[%s6676_s1] ss:$8 sps:$4 sm:$0xff]  }
   0xb   :  { %2952 = vmatpush1.bf16.msra.mxu0 %v4210_v9  ;;  %v4241_v29 = vld [vmem:[%s6676_s1 + $0x104] ss:$8 sps:$4 sm:$0xff]   ;;  %v4244_v31 = vld [vmem:[%s6676_s1 + $0xf4] ss:$8 sps:$4 sm:$0xff]   ;;  %v4243_v32 = vld [vmem:[%s6676_s1 + $0x100] ss:$8 sps:$4 sm:$0xff]  }
   0xc   :  { %2953 = vmatprep.subr.bf16.mxu0 %v4214_v11  ;;  %3005 = vmatpush1.bf16.msra.mxu1 %v4213_v12  ;;  %v4247_v33 = vld [vmem:[%s6676_s1 + $0x1f4] ss:$8 sps:$4 sm:$0xff]   ;;  %v4246_v34 = vld [vmem:[%s6676_s1 + $0xf0] ss:$8 sps:$4 sm:$0xff]   ;;  %v4250_v35 = vld [vmem:[%s6676_s1 + $0xe4] ss:$8 sps:$4 sm:$0xff]  }
   0xd   :  { %3006 = vmatprep.subr.bf16.mxu1 %v4217_v13  ;;  %v4249_v36 = vld [vmem:[%s6676_s1 + $0x1f0] ss:$8 sps:$4 sm:$0xff]   ;;  %v4253_v37 = vld [vmem:[%s6676_s1 + $0x1e4] ss:$8 sps:$4 sm:$0xff]   ;;  %v4252_v38 = vld [vmem:[%s6676_s1 + $0xe0] ss:$8 sps:$4 sm:$0xff]  }
   0xe   :  { %v4256_v39 = vld [vmem:[%s6676_s1 + $0xd4] ss:$8 sps:$4 sm:$0xff]   ;;  %v4255_v40 = vld [vmem:[%s6676_s1 + $0x1e0] ss:$8 sps:$4 sm:$0xff]   ;;  %v4258_v42 = vld [vmem:[%s6676_s1 + $0xd0] ss:$8 sps:$4 sm:$0xff]  }
   0xf   :  { %2954 = vmatpush1.bf16.msra.mxu0 %v4216_v14  ;;  %v4259_v41 = vld [vmem:[%s6676_s1 + $0x1d4] ss:$8 sps:$4 sm:$0xff]   ;;  %v4262_v43 = vld [vmem:[%s6676_s1 + $0xc4] ss:$8 sps:$4 sm:$0xff]   ;;  %v4261_v44 = vld [vmem:[%s6676_s1 + $0x1d0] ss:$8 sps:$4 sm:$0xff]  }
  0x10   :  { %2955 = vmatprep.subr.bf16.mxu0 %v4220_v15  ;;  %3007 = vmatpush1.bf16.msra.mxu1 %v4219_v16  ;;  %v4265_v45 = vld [vmem:[%s6676_s1 + $0x1c4] ss:$8 sps:$4 sm:$0xff]   ;;  %v4264_v46 = vld [vmem:[%s6676_s1 + $0xc0] ss:$8 sps:$4 sm:$0xff]   ;;  %v4268_v48 = vld [vmem:[%s6676_s1 + $0xb4] ss:$8 sps:$4 sm:$0xff]  }
  0x11   :  { %3008 = vmatprep.subr.bf16.mxu1 %v4223_v17  ;;  %v4293_v47 = vld [vmem:[%s6677_s0 + $0x4] ss:$108 sps:$4 sm:$0xff]   ;;  %v4267_v49 = vld [vmem:[%s6676_s1 + $0x1c0] ss:$8 sps:$4 sm:$0xff]   ;;  %v4271_v50 = vld [vmem:[%s6676_s1 + $0x1b4] ss:$8 sps:$4 sm:$0xff]  }
  0x12   :  { %2979 = vmatprep.mubr.bf16.mxu0 %v4293_v47  ;;  %v4300_v51 = vld [vmem:[%s6677_s0 + $0xc] ss:$108 sps:$4 sm:$0xff]   ;;  %v4276_v56 = vld [vmem:[%s6676_s1 + $0xa0] ss:$8 sps:$4 sm:$0xff]   ;;  %v4280_v57 = vld [vmem:[%s6676_s1 + $0x94] ss:$8 sps:$4 sm:$0xff]  }
  0x13   :  { %2956 = vmatpush1.bf16.msra.mxu0 %v4222_v18  ;;  %v4270_v52 = vld [vmem:[%s6676_s1 + $0xb0] ss:$8 sps:$4 sm:$0xff]   ;;  %v4274_v53 = vld [vmem:[%s6676_s1 + $0xa4] ss:$8 sps:$4 sm:$0xff]   ;;  %3032 = vmatprep.mubr.bf16.mxu1 %v4300_v51  ;;  %v4279_v58 = vld [vmem:[%s6676_s1 + $0x1a0] ss:$8 sps:$4 sm:$0xff]  }
  0x14   :  { %2957 = vmatprep.subr.bf16.mxu0 %v4226_v19  ;;  %3009 = vmatpush1.bf16.msra.mxu1 %v4225_v20  ;;  %v4273_v54 = vld [vmem:[%s6676_s1 + $0x1b0] ss:$8 sps:$4 sm:$0xff]   ;;  %v4277_v55 = vld [vmem:[%s6676_s1 + $0x1a4] ss:$8 sps:$4 sm:$0xff]   ;;  %v4283_v59 = vld [vmem:[%s6676_s1 + $0x194] ss:$8 sps:$4 sm:$0xff]  }
  0x15   :  { %3010 = vmatprep.subr.bf16.mxu1 %v4229_v21  ;;  %v4282_v60 = vld [vmem:[%s6676_s1 + $0x90] ss:$8 sps:$4 sm:$0xff]   ;;  %v4286_v61 = vld [vmem:[%s6676_s1 + $0x84] ss:$8 sps:$4 sm:$0xff]   ;;  %v4288_v0 = vld [vmem:[%s6676_s1 + $0x80] ss:$8 sps:$4 sm:$0xff]  }
  0x16   :  { %v4285_v62 = vld [vmem:[%s6676_s1 + $0x190] ss:$8 sps:$4 sm:$0xff]   ;;  %v4289_v63 = vld [vmem:[%s6676_s1 + $0x184] ss:$8 sps:$4 sm:$0xff]   ;;  %v4297_v1 = vld [vmem:[%s6676_s1 + $0x274] ss:$8 sps:$4 sm:$0xff]  }
  0x17   :  { %2958 = vmatpush1.bf16.msra.mxu0 %v4228_v22  ;;  %v4294_v2 = vld [vmem:[%s6676_s1 + $0x180] ss:$8 sps:$4 sm:$0xff]   ;;  %v4303_v4 = vld [vmem:[%s6676_s1 + $0x374] ss:$8 sps:$4 sm:$0xff]   ;;  %v4295_v5 = vld [vmem:[%s6676_s1 + $0x270] ss:$8 sps:$4 sm:$0xff]  }
  0x18   :  { %2959 = vmatprep.subr.bf16.mxu0 %v4232_v23  ;;  %3011 = vmatpush1.bf16.msra.mxu1 %v4231_v24  ;;  %v4291_v3 = vld [vmem:[%s6677_s0] ss:$108 sps:$4 sm:$0xff]   ;;  %v4298_v6 = vld [vmem:[%s6677_s0 + $0x8] ss:$108 sps:$4 sm:$0xff]   ;;  %v4301_v8 = vld [vmem:[%s6676_s1 + $0x370] ss:$8 sps:$4 sm:$0xff]  }
  0x19   :  { %3012 = vmatprep.subr.bf16.mxu1 %v4235_v25  ;;  %v4306_v7 = vld [vmem:[%s6676_s1 + $0x264] ss:$8 sps:$4 sm:$0xff]   ;;  %v4304_v10 = vld [vmem:[%s6676_s1 + $0x260] ss:$8 sps:$4 sm:$0xff]   ;;  %v4312_v11 = vld [vmem:[%s6676_s1 + $0x254] ss:$8 sps:$4 sm:$0xff]  }
  0x1a   :  { %v4309_v9 = vld [vmem:[%s6676_s1 + $0x364] ss:$8 sps:$4 sm:$0xff]   ;;  %v4307_v12 = vld [vmem:[%s6676_s1 + $0x360] ss:$8 sps:$4 sm:$0xff]   ;;  %v4315_v13 = vld [vmem:[%s6676_s1 + $0x354] ss:$8 sps:$4 sm:$0xff]  }
  0x1b   :  { %2960 = vmatpush1.bf16.msra.mxu0 %v4234_v26  ;;  %v4310_v14 = vld [vmem:[%s6676_s1 + $0x250] ss:$8 sps:$4 sm:$0xff]   ;;  %v4318_v15 = vld [vmem:[%s6676_s1 + $0x244] ss:$8 sps:$4 sm:$0xff]   ;;  %v4316_v18 = vld [vmem:[%s6676_s1 + $0x240] ss:$8 sps:$4 sm:$0xff]  }
  0x1c   :  { %2961 = vmatprep.subr.bf16.mxu0 %v4238_v27  ;;  %3013 = vmatpush1.bf16.msra.mxu1 %v4237_v28  ;;  %v4313_v16 = vld [vmem:[%s6676_s1 + $0x350] ss:$8 sps:$4 sm:$0xff]   ;;  %v4321_v17 = vld [vmem:[%s6676_s1 + $0x344] ss:$8 sps:$4 sm:$0xff]   ;;  %v4324_v19 = vld [vmem:[%s6676_s1 + $0x234] ss:$8 sps:$4 sm:$0xff]  }
  0x1d   :  { %3014 = vmatprep.subr.bf16.mxu1 %v4241_v29  ;;  %v4319_v20 = vld [vmem:[%s6676_s1 + $0x340] ss:$8 sps:$4 sm:$0xff]   ;;  %v4322_v21 = vld [vmem:[%s6676_s1 + $0x230] ss:$8 sps:$4 sm:$0xff]   ;;  %v4327_v22 = vld [vmem:[%s6676_s1 + $0x334] ss:$8 sps:$4 sm:$0xff]  }
  0x1e   :  { %v4325_v23 = vld [vmem:[%s6676_s1 + $0x330] ss:$8 sps:$4 sm:$0xff]   ;;  %v4373_v24 = vld [vmem:[%s6677_s0 + $0xdc] ss:$108 sps:$4 sm:$0xff]   ;;  %v4330_v25 = vld [vmem:[%s6676_s1 + $0x224] ss:$8 sps:$4 sm:$0xff]  }
  0x1f   :  { %2962 = vmatpush1.bf16.msra.mxu0 %v4240_v30  ;;  %v4333_v26 = vld [vmem:[%s6676_s1 + $0x324] ss:$8 sps:$4 sm:$0xff]   ;;  %v4328_v29 = vld [vmem:[%s6676_s1 + $0x220] ss:$8 sps:$4 sm:$0xff]   ;;  %v4363_v51 = vld [vmem:[%s6676_s1 + $0x3d4] ss:$8 sps:$4 sm:$0xff]  }
  0x20   :  { %2963 = vmatprep.subr.bf16.mxu0 %v4244_v31  ;;  %3015 = vmatpush1.bf16.msra.mxu1 %v4243_v32  ;;  %v4378_v27 = vld [vmem:[%s6677_s0 + $0xd8] ss:$108 sps:$4 sm:$0xff]   ;;  %v4384_v30 = vld [vmem:[%s6677_s0 + $0xe0] ss:$108 sps:$4 sm:$0xff]   ;;  %v4336_v31 = vld [vmem:[%s6676_s1 + $0x214] ss:$8 sps:$4 sm:$0xff]  }
  0x21   :  { %3016 = vmatprep.subr.bf16.mxu1 %v4247_v33  ;;  %v4379_v28 = vld [vmem:[%s6677_s0 + $0xe4] ss:$108 sps:$4 sm:$0xff]   ;;  %v4331_v32 = vld [vmem:[%s6676_s1 + $0x320] ss:$8 sps:$4 sm:$0xff]   ;;  %v4339_v33 = vld [vmem:[%s6676_s1 + $0x314] ss:$8 sps:$4 sm:$0xff]  }
  0x22   :  { %v4357_v47 = vld [vmem:[%s6676_s1 + $0x3e4] ss:$8 sps:$4 sm:$0xff]  }
  0x23   :  { %2964 = vmatpush2.bf16.msra.mxu0 %v4246_v34  ;;  %v4334_v34 = vld [vmem:[%s6676_s1 + $0x210] ss:$8 sps:$4 sm:$0xff]  }
  0x24   :  { %2965 = vmatprep.subr.bf16.mxu0 %v4250_v35  ;;  %3017 = vmatpush2.bf16.msra.mxu1 %v4249_v36  ;;  %v4342_v35 = vld [vmem:[%s6676_s1 + $0x204] ss:$8 sps:$4 sm:$0xff]   ;;  %v4337_v36 = vld [vmem:[%s6676_s1 + $0x310] ss:$8 sps:$4 sm:$0xff]  }
  0x25   :  { %3018 = vmatprep.subr.bf16.mxu1 %v4253_v37  ;;  %v4345_v37 = vld [vmem:[%s6676_s1 + $0x304] ss:$8 sps:$4 sm:$0xff]  }
  0x27   :  { %2966 = vmatpush2.bf16.msra.mxu0 %v4252_v38  ;;  %v4340_v38 = vld [vmem:[%s6676_s1 + $0x200] ss:$8 sps:$4 sm:$0xff]  }
  0x28   :  { %2967 = vmatprep.subr.bf16.mxu0 %v4256_v39  ;;  %3019 = vmatpush2.bf16.msra.mxu1 %v4255_v40  ;;  %v4402_v39 = vld [vmem:[%s6677_s0 + $0x14] ss:$108 sps:$4 sm:$0xff]  }
  0x29   :  { %3020 = vmatprep.subr.bf16.mxu1 %v4259_v41  ;;  %v4348_v40 = vld [vmem:[%s6676_s1 + $0x2f4] ss:$8 sps:$4 sm:$0xff]   ;;  %v4343_v41 = vld [vmem:[%s6676_s1 + $0x300] ss:$8 sps:$4 sm:$0xff]  }
  0x2b   :  { %2968 = vmatpush2.bf16.msra.mxu0 %v4258_v42  ;;  %v4351_v42 = vld [vmem:[%s6676_s1 + $0x3f4] ss:$8 sps:$4 sm:$0xff]  }
  0x2c   :  { %2969 = vmatprep.subr.bf16.mxu0 %v4262_v43  ;;  %3021 = vmatpush2.bf16.msra.mxu1 %v4261_v44  ;;  %v4408_v43 = vld [vmem:[%s6677_s0 + $0x1c] ss:$108 sps:$4 sm:$0xff]   ;;  %v4346_v44 = vld [vmem:[%s6676_s1 + $0x2f0] ss:$8 sps:$4 sm:$0xff]  }
  0x2d   :  { %3022 = vmatprep.subr.bf16.mxu1 %v4265_v45  ;;  %v4354_v45 = vld [vmem:[%s6676_s1 + $0x2e4] ss:$8 sps:$4 sm:$0xff]  }
  0x2f   :  { %2970 = vmatpush2.bf16.msra.mxu0 %v4264_v46  ;;  %v4349_v46 = vld [vmem:[%s6676_s1 + $0x3f0] ss:$8 sps:$4 sm:$0xff]  }
  0x30   :  { %2971 = vmatprep.subr.bf16.mxu0 %v4268_v48  ;;  %3023 = vmatpush2.bf16.msra.mxu1 %v4267_v49  ;;  %v4352_v48 = vld [vmem:[%s6676_s1 + $0x2e0] ss:$8 sps:$4 sm:$0xff]   ;;  %v4360_v49 = vld [vmem:[%s6676_s1 + $0x2d4] ss:$8 sps:$4 sm:$0xff]  }
  0x31   :  { %3024 = vmatprep.subr.bf16.mxu1 %v4271_v50  ;;  %v4355_v50 = vld [vmem:[%s6676_s1 + $0x3e0] ss:$8 sps:$4 sm:$0xff]  }
  0x33   :  { %2972 = vmatpush2.bf16.msra.mxu0 %v4270_v52  ;;  %v4358_v52 = vld [vmem:[%s6676_s1 + $0x2d0] ss:$8 sps:$4 sm:$0xff]  }
  0x34   :  { %2973 = vmatprep.subr.bf16.mxu0 %v4274_v53  ;;  %3025 = vmatpush2.bf16.msra.mxu1 %v4273_v54  ;;  %v4366_v53 = vld [vmem:[%s6676_s1 + $0x2c4] ss:$8 sps:$4 sm:$0xff]   ;;  %v4361_v54 = vld [vmem:[%s6676_s1 + $0x3d0] ss:$8 sps:$4 sm:$0xff]  }
  0x35   :  { %3026 = vmatprep.subr.bf16.mxu1 %v4277_v55  ;;  %v4369_v55 = vld [vmem:[%s6676_s1 + $0x3c4] ss:$8 sps:$4 sm:$0xff]  }
  0x37   :  { %2974 = vmatpush2.bf16.msra.mxu0 %v4276_v56  ;;  %v4364_v56 = vld [vmem:[%s6676_s1 + $0x2c0] ss:$8 sps:$4 sm:$0xff]  }
  0x38   :  { %2975 = vmatprep.subr.bf16.mxu0 %v4280_v57  ;;  %3027 = vmatpush2.bf16.msra.mxu1 %v4279_v58  ;;  %v4372_v57 = vld [vmem:[%s6676_s1 + $0x2b4] ss:$8 sps:$4 sm:$0xff]   ;;  %v4367_v58 = vld [vmem:[%s6676_s1 + $0x3c0] ss:$8 sps:$4 sm:$0xff]  }
  0x39   :  { %3028 = vmatprep.subr.bf16.mxu1 %v4283_v59  ;;  %v4377_v59 = vld [vmem:[%s6676_s1 + $0x3b4] ss:$8 sps:$4 sm:$0xff]  }
  0x3b   :  { %2976 = vmatpush2.bf16.msra.mxu0 %v4282_v60  ;;  %v4370_v60 = vld [vmem:[%s6676_s1 + $0x2b0] ss:$8 sps:$4 sm:$0xff]  }
  0x3c   :  { %2977 = vmatprep.subr.bf16.mxu0 %v4286_v61  ;;  %3029 = vmatpush2.bf16.msra.mxu1 %v4285_v62  ;;  %v4383_v61 = vld [vmem:[%s6676_s1 + $0x2a4] ss:$8 sps:$4 sm:$0xff]   ;;  %v4375_v62 = vld [vmem:[%s6676_s1 + $0x3b0] ss:$8 sps:$4 sm:$0xff]  }
  0x3d   :  { %3030 = vmatprep.subr.bf16.mxu1 %v4289_v63  ;;  %v4387_v63 = vld [vmem:[%s6676_s1 + $0x3a4] ss:$8 sps:$4 sm:$0xff]  }
  0x3f   :  { %2978 = vmatpush2.bf16.msra.mxu0 %v4288_v0  ;;  %v4381_v0 = vld [vmem:[%s6676_s1 + $0x2a0] ss:$8 sps:$4 sm:$0xff]  }
  0x40   :  { %3053 = vmatprep.subr.bf16.mxu0 %v4297_v1  ;;  %3031 = vmatpush2.bf16.msra.mxu1 %v4294_v2  ;;  %v4390_v1 = vld [vmem:[%s6676_s1 + $0x294] ss:$8 sps:$4 sm:$0xff]   ;;  %v4385_v2 = vld [vmem:[%s6676_s1 + $0x3a0] ss:$8 sps:$4 sm:$0xff]  }
  0x41   :  { %3106 = vmatprep.subr.bf16.mxu1 %v4303_v4  ;;  %v4388_v4 = vld [vmem:[%s6676_s1 + $0x290] ss:$8 sps:$4 sm:$0xff]  }
  0x42   :  { %2980 = vmatmul.mubr.bf16.vlgmr.msra.gmra.mxu0 %v4291_v3  ;;  %v4393_v3 = vld [vmem:[%s6676_s1 + $0x394] ss:$8 sps:$4 sm:$0xff]  }
  0x43   :  { %3054 = vmatpush1.bf16.msra.mxu0 %v4295_v5  ;;  %3033 = vmatmul.mubr.bf16.vlgmr.msra.gmra.mxu1 %v4298_v6  ;;  %v4396_v5 = vld [vmem:[%s6676_s1 + $0x284] ss:$8 sps:$4 sm:$0xff]   ;;  %v4391_v6 = vld [vmem:[%s6676_s1 + $0x390] ss:$8 sps:$4 sm:$0xff]  }
  0x44   :  { %3055 = vmatprep.subr.bf16.mxu0 %v4306_v7  ;;  %3107 = vmatpush1.bf16.msra.mxu1 %v4301_v8  ;;  %v4399_v7 = vld [vmem:[%s6676_s1 + $0x384] ss:$8 sps:$4 sm:$0xff]   ;;  %v4394_v8 = vld [vmem:[%s6676_s1 + $0x280] ss:$8 sps:$4 sm:$0xff]  }
  0x45   :  { %3108 = vmatprep.subr.bf16.mxu1 %v4309_v9  ;;  %2989 = vmatprep.mubr.bf16.mxu0 %v4373_v24  ;;  %v4397_v9 = vld [vmem:[%s6676_s1 + $0x380] ss:$8 sps:$4 sm:$0xff]   ;;  %v4429_v24 = vld [vmem:[%s6676_s1 + $0x554] ss:$8 sps:$4 sm:$0xff]  }
  0x46   :  { %3042 = vmatprep.mubr.bf16.mxu1 %v4379_v28  ;;  %v4427_v28 = vld [vmem:[%s6676_s1 + $0x550] ss:$8 sps:$4 sm:$0xff]  }
  0x47   :  { %3056 = vmatpush1.bf16.msra.mxu0 %v4304_v10  ;;  %v4400_v10 = vld [vmem:[%s6677_s0 + $0x10] ss:$108 sps:$4 sm:$0xff]  }
  0x48   :  { %3057 = vmatprep.subr.bf16.mxu0 %v4312_v11  ;;  %3109 = vmatpush1.bf16.msra.mxu1 %v4307_v12  ;;  %v4405_v11 = vld [vmem:[%s6676_s1 + $0x474] ss:$8 sps:$4 sm:$0xff]   ;;  %v4403_v12 = vld [vmem:[%s6676_s1 + $0x470] ss:$8 sps:$4 sm:$0xff]  }
  0x49   :  { %3110 = vmatprep.subr.bf16.mxu1 %v4315_v13  ;;  %v4406_v13 = vld [vmem:[%s6677_s0 + $0x18] ss:$108 sps:$4 sm:$0xff]  }
  0x4a   :  { %2990 = vmatmul.mubr.bf16.gmra.mxu0 %v4378_v27  ;;  %v4432_v27 = vld [vmem:[%s6676_s1 + $0x444] ss:$8 sps:$4 sm:$0xff]  }
  0x4b   :  { %3058 = vmatpush1.bf16.msra.mxu0 %v4310_v14  ;;  %3043 = vmatmul.mubr.bf16.gmra.mxu1 %v4384_v30  ;;  %v4411_v14 = vld [vmem:[%s6676_s1 + $0x574] ss:$8 sps:$4 sm:$0xff]   ;;  %v4430_v30 = vld [vmem:[%s6676_s1 + $0x440] ss:$8 sps:$4 sm:$0xff]  }
  0x4c   :  { %3059 = vmatprep.subr.bf16.mxu0 %v4318_v15  ;;  %3111 = vmatpush1.bf16.msra.mxu1 %v4313_v16  ;;  %v4409_v15 = vld [vmem:[%s6676_s1 + $0x570] ss:$8 sps:$4 sm:$0xff]  }
  0x4d   :  { %3112 = vmatprep.subr.bf16.mxu1 %v4321_v17  ;;  %3085 = vmatprep.mubr.bf16.mxu0 %v4402_v39  ;;  %v4418_v16 = vld [vmem:[%s6677_s0 + $0xec] ss:$108 sps:$4 sm:$0xff]  }
  0x4e   :  { %3138 = vmatprep.mubr.bf16.mxu1 %v4408_v43  ;;  %v4414_v17 = vld [vmem:[%s6676_s1 + $0x464] ss:$8 sps:$4 sm:$0xff]   ;;  %v4453_v43 = vld [vmem:[%s6676_s1 + $0x514] ss:$8 sps:$4 sm:$0xff]  }
  0x4f   :  { %3060 = vmatpush1.bf16.msra.mxu0 %v4316_v18  ;;  %v4424_v18 = vld [vmem:[%s6677_s0 + $0xf4] ss:$108 sps:$4 sm:$0xff]   ;;  %v4447_v39 = vld [vmem:[%s6676_s1 + $0x524] ss:$8 sps:$4 sm:$0xff]  }
  0x50   :  { %3061 = vmatprep.subr.bf16.mxu0 %v4324_v19  ;;  %3113 = vmatpush1.bf16.msra.mxu1 %v4319_v20  ;;  %v4417_v19 = vld [vmem:[%s6676_s1 + $0x564] ss:$8 sps:$4 sm:$0xff]   ;;  %v4412_v20 = vld [vmem:[%s6676_s1 + $0x460] ss:$8 sps:$4 sm:$0xff]  }
  0x51   :  { %3114 = vmatprep.subr.bf16.mxu1 %v4327_v22  ;;  %v4415_v22 = vld [vmem:[%s6676_s1 + $0x560] ss:$8 sps:$4 sm:$0xff]  }
  0x53   :  { %3062 = vmatpush1.bf16.msra.mxu0 %v4322_v21  ;;  %v4423_v21 = vld [vmem:[%s6676_s1 + $0x454] ss:$8 sps:$4 sm:$0xff]  }
  0x54   :  { %3063 = vmatprep.subr.bf16.mxu0 %v4330_v25  ;;  %3115 = vmatpush1.bf16.msra.mxu1 %v4325_v23  ;;  %v4420_v23 = vld [vmem:[%s6677_s0 + $0xe8] ss:$108 sps:$4 sm:$0xff]   ;;  %v4421_v25 = vld [vmem:[%s6676_s1 + $0x450] ss:$8 sps:$4 sm:$0xff]  }
  0x55   :  { %3116 = vmatprep.subr.bf16.mxu1 %v4333_v26  ;;  %v4426_v26 = vld [vmem:[%s6677_s0 + $0xf0] ss:$108 sps:$4 sm:$0xff]  }
  0x57   :  { %3064 = vmatpush1.bf16.msra.mxu0 %v4328_v29  ;;  %v4435_v29 = vld [vmem:[%s6676_s1 + $0x544] ss:$8 sps:$4 sm:$0xff]  }
  0x58   :  { %3065 = vmatprep.subr.bf16.mxu0 %v4336_v31  ;;  %3117 = vmatpush1.bf16.msra.mxu1 %v4331_v32  ;;  %v4510_v31 = vld [vmem:[%s6677_s0 + $0x24] ss:$108 sps:$4 sm:$0xff]   ;;  %v4438_v32 = vld [vmem:[%s6676_s1 + $0x434] ss:$8 sps:$4 sm:$0xff]  }
  0x59   :  { %3118 = vmatprep.subr.bf16.mxu1 %v4339_v33  ;;  %v4433_v33 = vld [vmem:[%s6676_s1 + $0x540] ss:$8 sps:$4 sm:$0xff]  }
  0x5b   :  { %3066 = vmatpush1.bf16.msra.mxu0 %v4334_v34  ;;  %v4441_v34 = vld [vmem:[%s6676_s1 + $0x534] ss:$8 sps:$4 sm:$0xff]  }
  0x5c   :  { %3067 = vmatprep.subr.bf16.mxu0 %v4342_v35  ;;  %3119 = vmatpush1.bf16.msra.mxu1 %v4337_v36  ;;  %v4516_v35 = vld [vmem:[%s6677_s0 + $0x2c] ss:$108 sps:$4 sm:$0xff]  }
  0x5d   :  { %3120 = vmatprep.subr.bf16.mxu1 %v4345_v37  ;;  %v4436_v36 = vld [vmem:[%s6676_s1 + $0x430] ss:$8 sps:$4 sm:$0xff]   ;;  %v4444_v37 = vld [vmem:[%s6676_s1 + $0x424] ss:$8 sps:$4 sm:$0xff]  }
  0x5f   :  { %3068 = vmatpush1.bf16.msra.mxu0 %v4340_v38  ;;  %v4439_v38 = vld [vmem:[%s6676_s1 + $0x530] ss:$8 sps:$4 sm:$0xff]  }
  0x60   :  { %3069 = vmatprep.subr.bf16.mxu0 %v4348_v40  ;;  %3121 = vmatpush1.bf16.msra.mxu1 %v4343_v41  ;;  %v4442_v40 = vld [vmem:[%s6676_s1 + $0x420] ss:$8 sps:$4 sm:$0xff]   ;;  %v4450_v41 = vld [vmem:[%s6676_s1 + $0x414] ss:$8 sps:$4 sm:$0xff]  }
  0x61   :  { %3122 = vmatprep.subr.bf16.mxu1 %v4351_v42  ;;  %v4445_v42 = vld [vmem:[%s6676_s1 + $0x520] ss:$8 sps:$4 sm:$0xff]  }
  0x63   :  { %3070 = vmatpush2.bf16.msra.mxu0 %v4346_v44  ;;  %v4448_v44 = vld [vmem:[%s6676_s1 + $0x410] ss:$8 sps:$4 sm:$0xff]  }
  0x64   :  { %3071 = vmatprep.subr.bf16.mxu0 %v4354_v45  ;;  %3123 = vmatpush2.bf16.msra.mxu1 %v4349_v46  ;;  %v4456_v45 = vld [vmem:[%s6676_s1 + $0x404] ss:$8 sps:$4 sm:$0xff]   ;;  %v4451_v46 = vld [vmem:[%s6676_s1 + $0x510] ss:$8 sps:$4 sm:$0xff]  }
  0x65   :  { %3124 = vmatprep.subr.bf16.mxu1 %v4357_v47  ;;  %v4459_v47 = vld [vmem:[%s6676_s1 + $0x504] ss:$8 sps:$4 sm:$0xff]  }
  0x67   :  { %3072 = vmatpush2.bf16.msra.mxu0 %v4352_v48  ;;  %v4454_v48 = vld [vmem:[%s6676_s1 + $0x400] ss:$8 sps:$4 sm:$0xff]  }
  0x68   :  { %3073 = vmatprep.subr.bf16.mxu0 %v4360_v49  ;;  %3125 = vmatpush2.bf16.msra.mxu1 %v4355_v50  ;;  %v4462_v49 = vld [vmem:[%s6676_s1 + $0x4f4] ss:$8 sps:$4 sm:$0xff]   ;;  %v4457_v50 = vld [vmem:[%s6676_s1 + $0x500] ss:$8 sps:$4 sm:$0xff]  }
  0x69   :  { %3126 = vmatprep.subr.bf16.mxu1 %v4363_v51  ;;  %v4465_v51 = vld [vmem:[%s6676_s1 + $0x5f4] ss:$8 sps:$4 sm:$0xff]  }
  0x6b   :  { %3074 = vmatpush2.bf16.msra.mxu0 %v4358_v52  ;;  %v4460_v52 = vld [vmem:[%s6676_s1 + $0x4f0] ss:$8 sps:$4 sm:$0xff]  }
  0x6c   :  { %3075 = vmatprep.subr.bf16.mxu0 %v4366_v53  ;;  %3127 = vmatpush2.bf16.msra.mxu1 %v4361_v54  ;;  %v4468_v53 = vld [vmem:[%s6676_s1 + $0x4e4] ss:$8 sps:$4 sm:$0xff]   ;;  %v4463_v54 = vld [vmem:[%s6676_s1 + $0x5f0] ss:$8 sps:$4 sm:$0xff]  }
  0x6d   :  { %3128 = vmatprep.subr.bf16.mxu1 %v4369_v55  ;;  %v4471_v55 = vld [vmem:[%s6676_s1 + $0x5e4] ss:$8 sps:$4 sm:$0xff]  }
  0x6f   :  { %3076 = vmatpush2.bf16.msra.mxu0 %v4364_v56  ;;  %v4466_v56 = vld [vmem:[%s6676_s1 + $0x4e0] ss:$8 sps:$4 sm:$0xff]  }
  0x70   :  { %3077 = vmatprep.subr.bf16.mxu0 %v4372_v57  ;;  %3129 = vmatpush2.bf16.msra.mxu1 %v4367_v58  ;;  %v4474_v57 = vld [vmem:[%s6676_s1 + $0x4d4] ss:$8 sps:$4 sm:$0xff]   ;;  %v4469_v58 = vld [vmem:[%s6676_s1 + $0x5e0] ss:$8 sps:$4 sm:$0xff]  }
  0x71   :  { %3130 = vmatprep.subr.bf16.mxu1 %v4377_v59  ;;  %v4477_v59 = vld [vmem:[%s6676_s1 + $0x5d4] ss:$8 sps:$4 sm:$0xff]  }
  0x73   :  { %3078 = vmatpush2.bf16.msra.mxu0 %v4370_v60  ;;  %v4472_v60 = vld [vmem:[%s6676_s1 + $0x4d0] ss:$8 sps:$4 sm:$0xff]  }
  0x74   :  { %3079 = vmatprep.subr.bf16.mxu0 %v4383_v61  ;;  %3131 = vmatpush2.bf16.msra.mxu1 %v4375_v62  ;;  %v4480_v61 = vld [vmem:[%s6676_s1 + $0x4c4] ss:$8 sps:$4 sm:$0xff]   ;;  %v4475_v62 = vld [vmem:[%s6676_s1 + $0x5d0] ss:$8 sps:$4 sm:$0xff]  }
  0x75   :  { %3132 = vmatprep.subr.bf16.mxu1 %v4387_v63  ;;  %v4483_v63 = vld [vmem:[%s6676_s1 + $0x5c4] ss:$8 sps:$4 sm:$0xff]  }
  0x77   :  { %3080 = vmatpush2.bf16.msra.mxu0 %v4381_v0  ;;  %v4478_v0 = vld [vmem:[%s6676_s1 + $0x4c0] ss:$8 sps:$4 sm:$0xff]  }
  0x78   :  { %3081 = vmatprep.subr.bf16.mxu0 %v4390_v1  ;;  %3133 = vmatpush2.bf16.msra.mxu1 %v4385_v2  ;;  %v4486_v1 = vld [vmem:[%s6676_s1 + $0x4b4] ss:$8 sps:$4 sm:$0xff]   ;;  %v4481_v2 = vld [vmem:[%s6676_s1 + $0x5c0] ss:$8 sps:$4 sm:$0xff]  }
  0x79   :  { %3134 = vmatprep.subr.bf16.mxu1 %v4393_v3  ;;  %v4489_v3 = vld [vmem:[%s6676_s1 + $0x5b4] ss:$8 sps:$4 sm:$0xff]  }
  0x7b   :  { %3082 = vmatpush2.bf16.msra.mxu0 %v4388_v4  ;;  %v4484_v4 = vld [vmem:[%s6676_s1 + $0x4b0] ss:$8 sps:$4 sm:$0xff]  }
  0x7c   :  { %3083 = vmatprep.subr.bf16.mxu0 %v4396_v5  ;;  %3135 = vmatpush2.bf16.msra.mxu1 %v4391_v6  ;;  %v4492_v5 = vld [vmem:[%s6676_s1 + $0x4a4] ss:$8 sps:$4 sm:$0xff]   ;;  %v4487_v6 = vld [vmem:[%s6676_s1 + $0x5b0] ss:$8 sps:$4 sm:$0xff]  }
  0x7d   :  { %3136 = vmatprep.subr.bf16.mxu1 %v4399_v7  ;;  %v4495_v7 = vld [vmem:[%s6676_s1 + $0x5a4] ss:$8 sps:$4 sm:$0xff]  }
  0x7f   :  { %3084 = vmatpush2.bf16.msra.mxu0 %v4394_v8  ;;  %v4490_v8 = vld [vmem:[%s6676_s1 + $0x4a0] ss:$8 sps:$4 sm:$0xff]  }
  0x80   :  { %3159 = vmatprep.subr.bf16.mxu0 %v4405_v11  ;;  %3137 = vmatpush2.bf16.msra.mxu1 %v4397_v9  ;;  %v4498_v9 = vld [vmem:[%s6676_s1 + $0x494] ss:$8 sps:$4 sm:$0xff]  }
  0x81   :  { %3212 = vmatprep.subr.bf16.mxu1 %v4411_v14  ;;  %v4501_v11 = vld [vmem:[%s6676_s1 + $0x594] ss:$8 sps:$4 sm:$0xff]   ;;  %v4499_v14 = vld [vmem:[%s6676_s1 + $0x590] ss:$8 sps:$4 sm:$0xff]  }
  0x82   :  { %3086 = vmatmul.mubr.bf16.vlgmr.msra.gmra.mxu0 %v4400_v10  ;;  %v4493_v10 = vld [vmem:[%s6676_s1 + $0x5a0] ss:$8 sps:$4 sm:$0xff]  }
  0x83   :  { %3160 = vmatpush1.bf16.msra.mxu0 %v4403_v12  ;;  %3095 = vmatprep.mubr.bf16.mxu0 %v4418_v16  ;;  %v4496_v12 = vld [vmem:[%s6676_s1 + $0x490] ss:$8 sps:$4 sm:$0xff]   ;;  %v4502_v16 = vld [vmem:[%s6676_s1 + $0x480] ss:$8 sps:$4 sm:$0xff]  }
  0x84   :  { %3139 = vmatmul.mubr.bf16.vlgmr.msra.gmra.mxu1 %v4406_v13  ;;  %3161 = vmatprep.subr.bf16.mxu0 %v4414_v17  ;;  %v4504_v13 = vld [vmem:[%s6676_s1 + $0x484] ss:$8 sps:$4 sm:$0xff]   ;;  %v4505_v17 = vld [vmem:[%s6676_s1 + $0x580] ss:$8 sps:$4 sm:$0xff]  }
  0x85   :  { %3213 = vmatpush1.bf16.msra.mxu1 %v4409_v15  ;;  %3148 = vmatprep.mubr.bf16.mxu1 %v4424_v18  ;;  %v4507_v15 = vld [vmem:[%s6676_s1 + $0x584] ss:$8 sps:$4 sm:$0xff]   ;;  %v4513_v18 = vld [vmem:[%s6676_s1 + $0x674] ss:$8 sps:$4 sm:$0xff]  }
  0x86   :  { %3214 = vmatprep.subr.bf16.mxu1 %v4417_v19  ;;  %v4508_v19 = vld [vmem:[%s6677_s0 + $0x20] ss:$108 sps:$4 sm:$0xff]  }
  0x87   :  { %3162 = vmatpush1.bf16.msra.mxu0 %v4412_v20  ;;  %v4511_v20 = vld [vmem:[%s6676_s1 + $0x670] ss:$8 sps:$4 sm:$0xff]  }
  0x88   :  { %3163 = vmatprep.subr.bf16.mxu0 %v4423_v21  ;;  %v4514_v21 = vld [vmem:[%s6677_s0 + $0x28] ss:$108 sps:$4 sm:$0xff]  }
  0x89   :  { %3215 = vmatpush1.bf16.msra.mxu1 %v4415_v22  ;;  %v4519_v22 = vld [vmem:[%s6676_s1 + $0x774] ss:$8 sps:$4 sm:$0xff]  }
  0x8a   :  { %3096 = vmatmul.mubr.bf16.gmra.mxu0 %v4420_v23  ;;  %3216 = vmatprep.subr.bf16.mxu1 %v4429_v24  ;;  %v4526_v23 = vld [vmem:[%s6677_s0 + $0xfc] ss:$108 sps:$4 sm:$0xff]   ;;  %v4522_v24 = vld [vmem:[%s6676_s1 + $0x664] ss:$8 sps:$4 sm:$0xff]  }
  0x8b   :  { %3164 = vmatpush1.bf16.msra.mxu0 %v4421_v25  ;;  %3191 = vmatprep.mubr.bf16.mxu0 %v4510_v31  ;;  %v4517_v25 = vld [vmem:[%s6676_s1 + $0x770] ss:$8 sps:$4 sm:$0xff]  }
  0x8c   :  { %3149 = vmatmul.mubr.bf16.gmra.mxu1 %v4426_v26  ;;  %3165 = vmatprep.subr.bf16.mxu0 %v4432_v27  ;;  %v4532_v26 = vld [vmem:[%s6677_s0 + $0x104] ss:$108 sps:$4 sm:$0xff]   ;;  %v4520_v27 = vld [vmem:[%s6676_s1 + $0x660] ss:$8 sps:$4 sm:$0xff]  }
  0x8d   :  { %3217 = vmatpush1.bf16.msra.mxu1 %v4427_v28  ;;  %3244 = vmatprep.mubr.bf16.mxu1 %v4516_v35  ;;  %v4525_v28 = vld [vmem:[%s6676_s1 + $0x764] ss:$8 sps:$4 sm:$0xff]   ;;  %v4618_v35 = vld [vmem:[%s6677_s0 + $0x34] ss:$108 sps:$4 sm:$0xff]  }
  0x8e   :  { %3218 = vmatprep.subr.bf16.mxu1 %v4435_v29  ;;  %v4523_v29 = vld [vmem:[%s6676_s1 + $0x760] ss:$8 sps:$4 sm:$0xff]   ;;  %v4528_v31 = vld [vmem:[%s6677_s0 + $0xf8] ss:$108 sps:$4 sm:$0xff]  }
  0x8f   :  { %3166 = vmatpush1.bf16.msra.mxu0 %v4430_v30  ;;  %v4531_v30 = vld [vmem:[%s6676_s1 + $0x654] ss:$8 sps:$4 sm:$0xff]  }
  0x90   :  { %3167 = vmatprep.subr.bf16.mxu0 %v4438_v32  ;;  %v4529_v32 = vld [vmem:[%s6676_s1 + $0x650] ss:$8 sps:$4 sm:$0xff]  }
  0x91   :  { %3219 = vmatpush1.bf16.msra.mxu1 %v4433_v33  ;;  %v4534_v33 = vld [vmem:[%s6677_s0 + $0x100] ss:$108 sps:$4 sm:$0xff]  }
  0x92   :  { %3220 = vmatprep.subr.bf16.mxu1 %v4441_v34  ;;  %v4537_v34 = vld [vmem:[%s6676_s1 + $0x754] ss:$8 sps:$4 sm:$0xff]  }
  0x93   :  { %3168 = vmatpush1.bf16.msra.mxu0 %v4436_v36  ;;  %v4540_v36 = vld [vmem:[%s6676_s1 + $0x644] ss:$8 sps:$4 sm:$0xff]  }
  0x94   :  { %3169 = vmatprep.subr.bf16.mxu0 %v4444_v37  ;;  %v4535_v37 = vld [vmem:[%s6676_s1 + $0x750] ss:$8 sps:$4 sm:$0xff]  }
  0x95   :  { %3221 = vmatpush1.bf16.msra.mxu1 %v4439_v38  ;;  %v4624_v38 = vld [vmem:[%s6677_s0 + $0x3c] ss:$108 sps:$4 sm:$0xff]  }
  0x96   :  { %3222 = vmatprep.subr.bf16.mxu1 %v4447_v39  ;;  %v4543_v39 = vld [vmem:[%s6676_s1 + $0x744] ss:$8 sps:$4 sm:$0xff]  }
  0x97   :  { %3170 = vmatpush1.bf16.msra.mxu0 %v4442_v40  ;;  %v4538_v40 = vld [vmem:[%s6676_s1 + $0x640] ss:$8 sps:$4 sm:$0xff]  }
  0x98   :  { %3171 = vmatprep.subr.bf16.mxu0 %v4450_v41  ;;  %v4546_v41 = vld [vmem:[%s6676_s1 + $0x634] ss:$8 sps:$4 sm:$0xff]  }
  0x99   :  { %3223 = vmatpush1.bf16.msra.mxu1 %v4445_v42  ;;  %v4541_v42 = vld [vmem:[%s6676_s1 + $0x740] ss:$8 sps:$4 sm:$0xff]  }
  0x9a   :  { %3224 = vmatprep.subr.bf16.mxu1 %v4453_v43  ;;  %v4549_v43 = vld [vmem:[%s6676_s1 + $0x734] ss:$8 sps:$4 sm:$0xff]  }
  0x9b   :  { %3172 = vmatpush1.bf16.msra.mxu0 %v4448_v44  ;;  %v4544_v44 = vld [vmem:[%s6676_s1 + $0x630] ss:$8 sps:$4 sm:$0xff]  }
  0x9c   :  { %3173 = vmatprep.subr.bf16.mxu0 %v4456_v45  ;;  %v4552_v45 = vld [vmem:[%s6676_s1 + $0x624] ss:$8 sps:$4 sm:$0xff]  }
  0x9d   :  { %3225 = vmatpush1.bf16.msra.mxu1 %v4451_v46  ;;  %v4547_v46 = vld [vmem:[%s6676_s1 + $0x730] ss:$8 sps:$4 sm:$0xff]  }
  0x9e   :  { %3226 = vmatprep.subr.bf16.mxu1 %v4459_v47  ;;  %v4555_v47 = vld [vmem:[%s6676_s1 + $0x724] ss:$8 sps:$4 sm:$0xff]  }
  0x9f   :  { %3174 = vmatpush1.bf16.msra.mxu0 %v4454_v48  ;;  %v4550_v48 = vld [vmem:[%s6676_s1 + $0x620] ss:$8 sps:$4 sm:$0xff]  }
  0xa0   :  { %3175 = vmatprep.subr.bf16.mxu0 %v4462_v49  ;;  %v4558_v49 = vld [vmem:[%s6676_s1 + $0x614] ss:$8 sps:$4 sm:$0xff]  }
  0xa1   :  { %3227 = vmatpush1.bf16.msra.mxu1 %v4457_v50  ;;  %v4553_v50 = vld [vmem:[%s6676_s1 + $0x720] ss:$8 sps:$4 sm:$0xff]  }
  0xa2   :  { %3228 = vmatprep.subr.bf16.mxu1 %v4465_v51  ;;  %v4561_v51 = vld [vmem:[%s6676_s1 + $0x714] ss:$8 sps:$4 sm:$0xff]  }
  0xa3   :  { %3176 = vmatpush2.bf16.msra.mxu0 %v4460_v52  ;;  %v4556_v52 = vld [vmem:[%s6676_s1 + $0x610] ss:$8 sps:$4 sm:$0xff]  }
  0xa4   :  { %3177 = vmatprep.subr.bf16.mxu0 %v4468_v53  ;;  %v4564_v53 = vld [vmem:[%s6676_s1 + $0x604] ss:$8 sps:$4 sm:$0xff]  }
  0xa5   :  { %3229 = vmatpush2.bf16.msra.mxu1 %v4463_v54  ;;  %v4559_v54 = vld [vmem:[%s6676_s1 + $0x710] ss:$8 sps:$4 sm:$0xff]  }
  0xa6   :  { %3230 = vmatprep.subr.bf16.mxu1 %v4471_v55  ;;  %v4567_v55 = vld [vmem:[%s6676_s1 + $0x704] ss:$8 sps:$4 sm:$0xff]  }
  0xa7   :  { %3178 = vmatpush2.bf16.msra.mxu0 %v4466_v56  ;;  %v4562_v56 = vld [vmem:[%s6676_s1 + $0x600] ss:$8 sps:$4 sm:$0xff]  }
  0xa8   :  { %3179 = vmatprep.subr.bf16.mxu0 %v4474_v57  ;;  %v4570_v57 = vld [vmem:[%s6676_s1 + $0x6f4] ss:$8 sps:$4 sm:$0xff]  }
  0xa9   :  { %3231 = vmatpush2.bf16.msra.mxu1 %v4469_v58  ;;  %v4565_v58 = vld [vmem:[%s6676_s1 + $0x700] ss:$8 sps:$4 sm:$0xff]  }
  0xaa   :  { %3232 = vmatprep.subr.bf16.mxu1 %v4477_v59  ;;  %v4573_v59 = vld [vmem:[%s6676_s1 + $0x7f4] ss:$8 sps:$4 sm:$0xff]  }
  0xab   :  { %3180 = vmatpush2.bf16.msra.mxu0 %v4472_v60  ;;  %v4568_v60 = vld [vmem:[%s6676_s1 + $0x6f0] ss:$8 sps:$4 sm:$0xff]  }
  0xac   :  { %3181 = vmatprep.subr.bf16.mxu0 %v4480_v61  ;;  %v4576_v61 = vld [vmem:[%s6676_s1 + $0x6e4] ss:$8 sps:$4 sm:$0xff]  }
  0xad   :  { %3233 = vmatpush2.bf16.msra.mxu1 %v4475_v62  ;;  %v4571_v62 = vld [vmem:[%s6676_s1 + $0x7f0] ss:$8 sps:$4 sm:$0xff]  }
  0xae   :  { %3234 = vmatprep.subr.bf16.mxu1 %v4483_v63  ;;  %v4579_v63 = vld [vmem:[%s6676_s1 + $0x7e4] ss:$8 sps:$4 sm:$0xff]  }
  0xaf   :  { %3182 = vmatpush2.bf16.msra.mxu0 %v4478_v0  ;;  %v4574_v0 = vld [vmem:[%s6676_s1 + $0x6e0] ss:$8 sps:$4 sm:$0xff]  }
  0xb0   :  { %3183 = vmatprep.subr.bf16.mxu0 %v4486_v1  ;;  %v4582_v1 = vld [vmem:[%s6676_s1 + $0x6d4] ss:$8 sps:$4 sm:$0xff]  }
  0xb1   :  { %3235 = vmatpush2.bf16.msra.mxu1 %v4481_v2  ;;  %v4577_v2 = vld [vmem:[%s6676_s1 + $0x7e0] ss:$8 sps:$4 sm:$0xff]  }
  0xb2   :  { %3236 = vmatprep.subr.bf16.mxu1 %v4489_v3  ;;  %v4585_v3 = vld [vmem:[%s6676_s1 + $0x7d4] ss:$8 sps:$4 sm:$0xff]  }
  0xb3   :  { %3184 = vmatpush2.bf16.msra.mxu0 %v4484_v4  ;;  %v4580_v4 = vld [vmem:[%s6676_s1 + $0x6d0] ss:$8 sps:$4 sm:$0xff]  }
  0xb4   :  { %3185 = vmatprep.subr.bf16.mxu0 %v4492_v5  ;;  %v4588_v5 = vld [vmem:[%s6676_s1 + $0x6c4] ss:$8 sps:$4 sm:$0xff]  }
  0xb5   :  { %3237 = vmatpush2.bf16.msra.mxu1 %v4487_v6  ;;  %v4583_v6 = vld [vmem:[%s6676_s1 + $0x7d0] ss:$8 sps:$4 sm:$0xff]  }
  0xb6   :  { %3238 = vmatprep.subr.bf16.mxu1 %v4495_v7  ;;  %v4591_v7 = vld [vmem:[%s6676_s1 + $0x7c4] ss:$8 sps:$4 sm:$0xff]  }
  0xb7   :  { %3186 = vmatpush2.bf16.msra.mxu0 %v4490_v8  ;;  %v4586_v8 = vld [vmem:[%s6676_s1 + $0x6c0] ss:$8 sps:$4 sm:$0xff]  }
  0xb8   :  { %3187 = vmatprep.subr.bf16.mxu0 %v4498_v9  ;;  %v4594_v9 = vld [vmem:[%s6676_s1 + $0x6b4] ss:$8 sps:$4 sm:$0xff]  }
  0xb9   :  { %3239 = vmatpush2.bf16.msra.mxu1 %v4493_v10  ;;  %v4589_v10 = vld [vmem:[%s6676_s1 + $0x7c0] ss:$8 sps:$4 sm:$0xff]  }
  0xba   :  { %3240 = vmatprep.subr.bf16.mxu1 %v4501_v11  ;;  %v4597_v11 = vld [vmem:[%s6676_s1 + $0x7b4] ss:$8 sps:$4 sm:$0xff]  }
  0xbb   :  { %3188 = vmatpush2.bf16.msra.mxu0 %v4496_v12  ;;  %v4592_v12 = vld [vmem:[%s6676_s1 + $0x6b0] ss:$8 sps:$4 sm:$0xff]  }
  0xbc   :  { %3189 = vmatprep.subr.bf16.mxu0 %v4504_v13  ;;  %v4600_v13 = vld [vmem:[%s6676_s1 + $0x6a4] ss:$8 sps:$4 sm:$0xff]  }
  0xbd   :  { %3241 = vmatpush2.bf16.msra.mxu1 %v4499_v14  ;;  %v4595_v14 = vld [vmem:[%s6676_s1 + $0x7b0] ss:$8 sps:$4 sm:$0xff]  }
  0xbe   :  { %3242 = vmatprep.subr.bf16.mxu1 %v4507_v15  ;;  %v4603_v15 = vld [vmem:[%s6676_s1 + $0x7a4] ss:$8 sps:$4 sm:$0xff]  }
  0xbf   :  { %3190 = vmatpush2.bf16.msra.mxu0 %v4502_v16  ;;  %v4598_v16 = vld [vmem:[%s6676_s1 + $0x6a0] ss:$8 sps:$4 sm:$0xff]  }
  0xc0   :  { %3265 = vmatprep.subr.bf16.mxu0 %v4513_v18  ;;  %v4606_v18 = vld [vmem:[%s6676_s1 + $0x694] ss:$8 sps:$4 sm:$0xff]  }
  0xc1   :  { %3243 = vmatpush2.bf16.msra.mxu1 %v4505_v17  ;;  %v505_v17 = vlaneseq }
  0xc2   :  { %3192 = vmatmul.mubr.bf16.vlgmr.msra.gmra.mxu0 %v4508_v19  ;;  %3318 = vmatprep.subr.bf16.mxu1 %v4519_v22  ;;  %v4601_v19 = vld [vmem:[%s6676_s1 + $0x7a0] ss:$8 sps:$4 sm:$0xff]  }
  0xc3   :  { %3266 = vmatpush1.bf16.msra.mxu0 %v4511_v20  ;;  %3201 = vmatprep.mubr.bf16.mxu0 %v4526_v23  ;;  %v4609_v20 = vld [vmem:[%s6676_s1 + $0x794] ss:$8 sps:$4 sm:$0xff]   ;;  %v506_v22 = vshrl.u32 %v505_v17, 7  ;;  %v4612_v23 = vld [vmem:[%s6676_s1 + $0x684] ss:$8 sps:$4 sm:$0xff]  }
  0xc4   :  { %3245 = vmatmul.mubr.bf16.vlgmr.msra.gmra.mxu1 %v4514_v21  ;;  %3267 = vmatprep.subr.bf16.mxu0 %v4522_v24  ;;  %v4604_v21 = vld [vmem:[%s6676_s1 + $0x690] ss:$8 sps:$4 sm:$0xff]  }
  0xc5   :  { %3319 = vmatpush1.bf16.msra.mxu1 %v4517_v25  ;;  %3254 = vmatprep.mubr.bf16.mxu1 %v4532_v26  ;;  %v4607_v24 = vld [vmem:[%s6676_s1 + $0x790] ss:$8 sps:$4 sm:$0xff]   ;;  %v4610_v25 = vld [vmem:[%s6676_s1 + $0x680] ss:$8 sps:$4 sm:$0xff]   ;;  %v4615_v26 = vld [vmem:[%s6676_s1 + $0x784] ss:$8 sps:$4 sm:$0xff]  }
  0xc6   :  { %3320 = vmatprep.subr.bf16.mxu1 %v4525_v28  ;;  %v503_v28 = vld [vmem:[%s6678_s2] sm:$0x3] }
  0xc7   :  { %3268 = vmatpush1.bf16.msra.mxu0 %v4520_v27  ;;  %v4613_v27 = vld [vmem:[%s6676_s1 + $0x780] ss:$8 sps:$4 sm:$0xff]  }
  0xc8   :  { %3269 = vmatprep.subr.bf16.mxu0 %v4531_v30  ;;  %v4621_v30 = vld [vmem:[%s6676_s1 + $0x874] ss:$8 sps:$4 sm:$0xff]  }
  0xc9   :  { %3321 = vmatpush1.bf16.msra.mxu1 %v4523_v29  ;;  %v507_v29 = vsub.s32 0, %v506_v22 }
  0xca   :  { %3202 = vmatmul.mubr.bf16.gmra.mxu0 %v4528_v31  ;;  %3322 = vmatprep.subr.bf16.mxu1 %v4537_v34  ;;  %v4616_v31 = vld [vmem:[%s6677_s0 + $0x30] ss:$108 sps:$4 sm:$0xff]   ;;  %v4622_v34 = vld [vmem:[%s6677_s0 + $0x38] ss:$108 sps:$4 sm:$0xff]  }
  0xcb   :  { %3270 = vmatpush1.bf16.msra.mxu0 %v4529_v32  ;;  %3297 = vmatprep.mubr.bf16.mxu0 %v4618_v35  ;;  %v4619_v32 = vld [vmem:[%s6676_s1 + $0x870] ss:$8 sps:$4 sm:$0xff]   ;;  %v4627_v35 = vld [vmem:[%s6676_s1 + $0x974] ss:$8 sps:$4 sm:$0xff]  }
  0xcc   :  { %3255 = vmatmul.mubr.bf16.gmra.mxu1 %v4534_v33  ;;  %3271 = vmatprep.subr.bf16.mxu0 %v4540_v36  ;;  %v511_v33 = vsub.s32 1, %v506_v22  ;;  %v5809_v36 = vrot.slane %v503_v28, %v507_v29  ;;  %v4667_v29 = vld [vmem:[%s6676_s1 + $0x910] ss:$8 sps:$4 sm:$0xff]  }
  0xcd   :  { %3323 = vmatpush1.bf16.msra.mxu1 %v4535_v37  ;;  %3350 = vmatprep.mubr.bf16.mxu1 %v4624_v38  ;;  %v4634_v37 = vld [vmem:[%s6677_s0 + $0x10c] ss:$108 sps:$4 sm:$0xff]  }
  0xce   :  { %3324 = vmatprep.subr.bf16.mxu1 %v4543_v39  ;;  %v4630_v38 = vld [vmem:[%s6676_s1 + $0x864] ss:$8 sps:$4 sm:$0xff]   ;;  %v5817_v39 = vrot.slane %v503_v28, %v511_v33 }
  0xcf   :  { %3272 = vmatpush1.bf16.msra.mxu0 %v4538_v40  ;;  %v4625_v40 = vld [vmem:[%s6676_s1 + $0x970] ss:$8 sps:$4 sm:$0xff]  }
  0xd0   :  { %3273 = vmatprep.subr.bf16.mxu0 %v4546_v41  ;;  %v4640_v41 = vld [vmem:[%s6677_s0 + $0x114] ss:$108 sps:$4 sm:$0xff]  }
  0xd1   :  { %3325 = vmatpush1.bf16.msra.mxu1 %v4541_v42 }
  0xd2   :  { %3326 = vmatprep.subr.bf16.mxu1 %v4549_v43  ;;  %v4628_v43 = vld [vmem:[%s6676_s1 + $0x860] ss:$8 sps:$4 sm:$0xff]  }
  0xd3   :  { %3274 = vmatpush1.bf16.msra.mxu0 %v4544_v44  ;;  %v4633_v44 = vld [vmem:[%s6676_s1 + $0x964] ss:$8 sps:$4 sm:$0xff]  }
  0xd4   :  { %3275 = vmatprep.subr.bf16.mxu0 %v4552_v45 }
  0xd5   :  { %3327 = vmatpush1.bf16.msra.mxu1 %v4547_v46  ;;  %v4631_v46 = vld [vmem:[%s6676_s1 + $0x960] ss:$8 sps:$4 sm:$0xff]  }
  0xd6   :  { %3328 = vmatprep.subr.bf16.mxu1 %v4555_v47 }
  0xd7   :  { %3276 = vmatpush1.bf16.msra.mxu0 %v4550_v48 }
  0xd8   :  { %3277 = vmatprep.subr.bf16.mxu0 %v4558_v49  ;;  %v4639_v49 = vld [vmem:[%s6676_s1 + $0x854] ss:$8 sps:$4 sm:$0xff]  }
  0xd9   :  { %3329 = vmatpush1.bf16.msra.mxu1 %v4553_v50 }
  0xda   :  { %3330 = vmatprep.subr.bf16.mxu1 %v4561_v51 }
  0xdb   :  { %3278 = vmatpush1.bf16.msra.mxu0 %v4556_v52  ;;  %v4636_v52 = vld [vmem:[%s6677_s0 + $0x108] ss:$108 sps:$4 sm:$0xff]  }
  0xdc   :  { %3279 = vmatprep.subr.bf16.mxu0 %v4564_v53  ;;  %v4637_v53 = vld [vmem:[%s6676_s1 + $0x850] ss:$8 sps:$4 sm:$0xff]  }
  0xdd   :  { %3331 = vmatpush1.bf16.msra.mxu1 %v4559_v54 }
  0xde   :  { %3332 = vmatprep.subr.bf16.mxu1 %v4567_v55 }
  0xdf   :  { %3280 = vmatpush1.bf16.msra.mxu0 %v4562_v56  ;;  %v4642_v56 = vld [vmem:[%s6677_s0 + $0x110] ss:$108 sps:$4 sm:$0xff]  }
  0xe0   :  { %3281 = vmatprep.subr.bf16.mxu0 %v4570_v57  ;;  %v4645_v57 = vld [vmem:[%s6676_s1 + $0x954] ss:$8 sps:$4 sm:$0xff]  }
  0xe1   :  { %3333 = vmatpush1.bf16.msra.mxu1 %v4565_v58 }
  0xe2   :  { %3334 = vmatprep.subr.bf16.mxu1 %v4573_v59 }
  0xe3   :  { %3282 = vmatpush2.bf16.msra.mxu0 %v4568_v60  ;;  %v4726_v60 = vld [vmem:[%s6677_s0 + $0x44] ss:$108 sps:$4 sm:$0xff]  }
  0xe4   :  { %3283 = vmatprep.subr.bf16.mxu0 %v4576_v61 }
  0xe5   :  { %3335 = vmatpush2.bf16.msra.mxu1 %v4571_v62 }
  0xe6   :  { %3336 = vmatprep.subr.bf16.mxu1 %v4579_v63  ;;  %v4648_v63 = vld [vmem:[%s6676_s1 + $0x844] ss:$8 sps:$4 sm:$0xff]  }
  0xe7   :  { %3284 = vmatpush2.bf16.msra.mxu0 %v4574_v0 }
  0xe8   :  { %3285 = vmatprep.subr.bf16.mxu0 %v4582_v1 }
  0xe9   :  { %3337 = vmatpush2.bf16.msra.mxu1 %v4577_v2  ;;  %v4643_v2 = vld [vmem:[%s6676_s1 + $0x950] ss:$8 sps:$4 sm:$0xff]  }
  0xea   :  { %3338 = vmatprep.subr.bf16.mxu1 %v4585_v3  ;;  %v4732_v3 = vld [vmem:[%s6677_s0 + $0x4c] ss:$108 sps:$4 sm:$0xff]  }
  0xeb   :  { %3286 = vmatpush2.bf16.msra.mxu0 %v4580_v4 }
  0xec   :  { %3287 = vmatprep.subr.bf16.mxu0 %v4588_v5  ;;  %v4651_v5 = vld [vmem:[%s6676_s1 + $0x944] ss:$8 sps:$4 sm:$0xff]  }
  0xed   :  { %3339 = vmatpush2.bf16.msra.mxu1 %v4583_v6 }
  0xee   :  { %3340 = vmatprep.subr.bf16.mxu1 %v4591_v7  ;;  %v4646_v7 = vld [vmem:[%s6676_s1 + $0x840] ss:$8 sps:$4 sm:$0xff]  }
  0xef   :  { %3288 = vmatpush2.bf16.msra.mxu0 %v4586_v8  ;;  %v4654_v8 = vld [vmem:[%s6676_s1 + $0x834] ss:$8 sps:$4 sm:$0xff]  }
  0xf0   :  { %3289 = vmatprep.subr.bf16.mxu0 %v4594_v9  ;;  %v4649_v9 = vld [vmem:[%s6676_s1 + $0x940] ss:$8 sps:$4 sm:$0xff]  }
  0xf1   :  { %3341 = vmatpush2.bf16.msra.mxu1 %v4589_v10  ;;  %v4657_v10 = vld [vmem:[%s6676_s1 + $0x934] ss:$8 sps:$4 sm:$0xff]  }
  0xf2   :  { %3342 = vmatprep.subr.bf16.mxu1 %v4597_v11  ;;  %v4652_v11 = vld [vmem:[%s6676_s1 + $0x830] ss:$8 sps:$4 sm:$0xff]  }
  0xf3   :  { %3290 = vmatpush2.bf16.msra.mxu0 %v4592_v12  ;;  %v4660_v12 = vld [vmem:[%s6676_s1 + $0x824] ss:$8 sps:$4 sm:$0xff]  }
  0xf4   :  { %3291 = vmatprep.subr.bf16.mxu0 %v4600_v13  ;;  %v4655_v13 = vld [vmem:[%s6676_s1 + $0x930] ss:$8 sps:$4 sm:$0xff]  }
  0xf5   :  { %3343 = vmatpush2.bf16.msra.mxu1 %v4595_v14  ;;  %v4663_v14 = vld [vmem:[%s6676_s1 + $0x924] ss:$8 sps:$4 sm:$0xff]  }
  0xf6   :  { %3344 = vmatprep.subr.bf16.mxu1 %v4603_v15  ;;  %v4658_v15 = vld [vmem:[%s6676_s1 + $0x820] ss:$8 sps:$4 sm:$0xff]  }
  0xf7   :  { %3292 = vmatpush2.bf16.msra.mxu0 %v4598_v16  ;;  %v4666_v16 = vld [vmem:[%s6676_s1 + $0x814] ss:$8 sps:$4 sm:$0xff]  }
  0xf8   :  { %3293 = vmatprep.subr.bf16.mxu0 %v4606_v18  ;;  %v4661_v18 = vld [vmem:[%s6676_s1 + $0x920] ss:$8 sps:$4 sm:$0xff]  }
  0xf9   :  { %3345 = vmatpush2.bf16.msra.mxu1 %v4601_v19 }
  0xfa   :  { %3346 = vmatprep.subr.bf16.mxu1 %v4609_v20  ;;  %v4669_v20 = vld [vmem:[%s6676_s1 + $0x914] ss:$8 sps:$4 sm:$0xff]  }
  0xfb   :  { %3294 = vmatpush2.bf16.msra.mxu0 %v4604_v21 }
  0xfc   :  { %3295 = vmatprep.subr.bf16.mxu0 %v4612_v23  ;;  %v4664_v23 = vld [vmem:[%s6676_s1 + $0x810] ss:$8 sps:$4 sm:$0xff]  }
  0xfd   :  { %3347 = vmatpush2.bf16.msra.mxu1 %v4607_v24 }
  0xfe   :  { %3348 = vmatprep.subr.bf16.mxu1 %v4615_v26  ;;  %v4672_v26 = vld [vmem:[%s6676_s1 + $0x804] ss:$8 sps:$4 sm:$0xff]  }
  0xff   :  { %3296 = vmatpush2.bf16.msra.mxu0 %v4610_v25 }
 0x100   :  { %3371 = vmatprep.subr.bf16.mxu0 %v4621_v30 }
 0x101   :  { %3349 = vmatpush2.bf16.msra.mxu1 %v4613_v27 }
 0x102   :  { %v2981_v42 = vpop.f32.mrf.mxu0  ;;  %3298 = vmatmul.mubr.bf16.vlgmr.msra.gmra.mxu0 %v4616_v31  ;;  %3424 = vmatprep.subr.bf16.mxu1 %v4627_v35  ;;  %v4670_v35 = vld [vmem:[%s6676_s1 + $0x800] ss:$8 sps:$4 sm:$0xff]  }
 0x103   :  { %v2982_v45 = vadd.f32 %v2981_v42, %v5809_v36  ;;  %3372 = vmatpush1.bf16.msra.mxu0 %v4619_v32  ;;  %3307 = vmatprep.mubr.bf16.mxu0 %v4634_v37  ;;  %v3034_v48 = vpop.f32.mrf.mxu1  ;;  %v4675_v32 = vld [vmem:[%s6676_s1 + $0x904] ss:$8 sps:$4 sm:$0xff]  }
 0x104   :  { %v2983_v47 = vpop.f32.mrf.mxu0  ;;  %3351 = vmatmul.mubr.bf16.vlgmr.msra.gmra.mxu1 %v4622_v34  ;;  %3373 = vmatprep.subr.bf16.mxu0 %v4630_v38 }
 0x105   :  { %v2984_v50 = vadd.f32 %v2983_v47, %v5817_v39  ;;  %v5839_v51 = vadd.f32 %v3034_v48, %v2982_v45  ;;  %3425 = vmatpush1.bf16.msra.mxu1 %v4625_v40  ;;  %3360 = vmatprep.mubr.bf16.mxu1 %v4640_v41  ;;  %v3036_v55 = vpop.f32.mrf.mxu1  ;;  %v4673_v41 = vld [vmem:[%s6676_s1 + $0x900] ss:$8 sps:$4 sm:$0xff]   ;;  %v4679_v45 = vld [vmem:[%s6676_s1 + $0x9f0] ss:$8 sps:$4 sm:$0xff]   ;;  %v4690_v48 = vld [vmem:[%s6676_s1 + $0x8d4] ss:$8 sps:$4 sm:$0xff]  }
 0x106   :  { %v2985_v54 = vpop.f32.mrf.mxu0  ;;  %3426 = vmatprep.subr.bf16.mxu1 %v4633_v44  ;;  %v4684_v44 = vld [vmem:[%s6676_s1 + $0x8e4] ss:$8 sps:$4 sm:$0xff]   ;;  %v4682_v47 = vld [vmem:[%s6676_s1 + $0x8e0] ss:$8 sps:$4 sm:$0xff]  }
 0x107   :  { %v2986_v58 = vadd.f32 %v2985_v54, %v5809_v36  ;;  %v5854_v59 = vadd.f32 %v3036_v55, %v2984_v50  ;;  %3374 = vmatpush1.bf16.msra.mxu0 %v4628_v43  ;;  %v3038_v62 = vpop.f32.mrf.mxu1  ;;  %v4676_v43 = vld [vmem:[%s6676_s1 + $0x8f0] ss:$8 sps:$4 sm:$0xff]   ;;  %v4693_v50 = vld [vmem:[%s6676_s1 + $0x9d4] ss:$8 sps:$4 sm:$0xff]   ;;  %v4699_v55 = vld [vmem:[%s6676_s1 + $0x9c4] ss:$8 sps:$4 sm:$0xff]  }
 0x108   :  { %v2987_v61 = vpop.f32.mrf.mxu0  ;;  %3375 = vmatprep.subr.bf16.mxu0 %v4639_v49  ;;  %v4685_v49 = vld [vmem:[%s6676_s1 + $0x9e0] ss:$8 sps:$4 sm:$0xff]   ;;  %v4691_v54 = vld [vmem:[%s6676_s1 + $0x9d0] ss:$8 sps:$4 sm:$0xff]  }
 0x109   :  { %v2988_v0 = vadd.f32 %v2987_v61, %v5817_v39  ;;  %v5863_v1 = vadd.f32 %v3038_v62, %v2986_v58  ;;  %3427 = vmatpush1.bf16.msra.mxu1 %v4631_v46  ;;  %v3040_v4 = vpop.f32.mrf.mxu1  ;;  %v4687_v46 = vld [vmem:[%s6676_s1 + $0x9e4] ss:$8 sps:$4 sm:$0xff]   ;;  %v4697_v58 = vld [vmem:[%s6676_s1 + $0x9c0] ss:$8 sps:$4 sm:$0xff]   ;;  %v4700_v61 = vld [vmem:[%s6676_s1 + $0x8b0] ss:$8 sps:$4 sm:$0xff]  }
 0x10a   :  { %3308 = vmatmul.mubr.bf16.gmra.mxu0 %v4636_v52  ;;  %3428 = vmatprep.subr.bf16.mxu1 %v4645_v57  ;;  %v2991_v17 = vpop.f32.mrf.mxu0  ;;  %v4688_v52 = vld [vmem:[%s6676_s1 + $0x8d0] ss:$8 sps:$4 sm:$0xff]   ;;  %v4702_v57 = vld [vmem:[%s6676_s1 + $0x8b4] ss:$8 sps:$4 sm:$0xff]   ;;  %v4708_v62 = vld [vmem:[%s6676_s1 + $0x8a4] ss:$8 sps:$4 sm:$0xff]  }
 0x10b   :  { %v5874_v6 = vadd.f32 %v3040_v4, %v2988_v0  ;;  %3376 = vmatpush1.bf16.msra.mxu0 %v4637_v53  ;;  %3403 = vmatprep.mubr.bf16.mxu0 %v4726_v60  ;;  %v2992_v19 = vadd.f32 %v2991_v17, %v5809_v36  ;;  %v3044_v22 = vpop.f32.mrf.mxu1  ;;  %v4696_v53 = vld [vmem:[%s6676_s1 + $0x8c4] ss:$8 sps:$4 sm:$0xff]   ;;  %v4705_v60 = vld [vmem:[%s6676_s1 + $0x9b4] ss:$8 sps:$4 sm:$0xff]   ;;  %v4709_v4 = vld [vmem:[%s6676_s1 + $0x9a0] ss:$8 sps:$4 sm:$0xff]  }
 0x10c   :  { %3361 = vmatmul.mubr.bf16.gmra.mxu1 %v4642_v56  ;;  %3377 = vmatprep.subr.bf16.mxu0 %v4648_v63  ;;  %v2993_v21 = vpop.f32.mrf.mxu0  ;;  %v4694_v56 = vld [vmem:[%s6676_s1 + $0x8c0] ss:$8 sps:$4 sm:$0xff]   ;;  %v4703_v63 = vld [vmem:[%s6676_s1 + $0x9b0] ss:$8 sps:$4 sm:$0xff]   ;;  %v4711_v0 = vld [vmem:[%s6676_s1 + $0x9a4] ss:$8 sps:$4 sm:$0xff]  }
 0x10d   :  { %3429 = vmatpush1.bf16.msra.mxu1 %v4643_v2  ;;  %3456 = vmatprep.mubr.bf16.mxu1 %v4732_v3  ;;  %v2994_v24 = vadd.f32 %v2993_v21, %v5817_v39  ;;  %v5917_v25 = vadd.f32 %v3044_v22, %v2992_v19  ;;  %v3046_v28 = vpop.f32.mrf.mxu1  ;;  %v4706_v2 = vld [vmem:[%s6676_s1 + $0x8a0] ss:$8 sps:$4 sm:$0xff]   ;;  %v4714_v3 = vld [vmem:[%s6676_s1 + $0x894] ss:$8 sps:$4 sm:$0xff]   ;;  %v4748_v21 = vld [vmem:[%s6677_s0 + $0x124] ss:$108 sps:$4 sm:$0xff]  }
 0x10e   :  { %3430 = vmatprep.subr.bf16.mxu1 %v4651_v5  ;;  %v2995_v27 = vpop.f32.mrf.mxu0  ;;  %v4717_v5 = vld [vmem:[%s6676_s1 + $0x994] ss:$8 sps:$4 sm:$0xff]   ;;  %v4736_v22 = vld [vmem:[%s6676_s1 + $0xa60] ss:$8 sps:$4 sm:$0xff]  }
 0x10f   :  { %3378 = vmatpush1.bf16.msra.mxu0 %v4646_v7  ;;  %v2996_v30 = vadd.f32 %v2995_v27, %v5809_v36  ;;  %v5926_v31 = vadd.f32 %v3046_v28, %v2994_v24  ;;  %v3048_v34 = vpop.f32.mrf.mxu1  ;;  %v4678_v36 = vld [vmem:[%s6676_s1 + $0x8f4] ss:$8 sps:$4 sm:$0xff]   ;;  %v4712_v7 = vld [vmem:[%s6676_s1 + $0x890] ss:$8 sps:$4 sm:$0xff]  }
 0x110   :  { %3379 = vmatprep.subr.bf16.mxu0 %v4654_v8  ;;  %v2997_v33 = vpop.f32.mrf.mxu0  ;;  %v4720_v8 = vld [vmem:[%s6676_s1 + $0x884] ss:$8 sps:$4 sm:$0xff]   ;;  %v4735_v17 = vld [vmem:[%s6676_s1 + $0xb74] ss:$8 sps:$4 sm:$0xff]  }
 0x111   :  { %3431 = vmatpush1.bf16.msra.mxu1 %v4649_v9  ;;  %v2998_v37 = vadd.f32 %v2997_v33, %v5817_v39  ;;  %v5935_v38 = vadd.f32 %v3048_v34, %v2996_v30  ;;  %v3050_v40 = vpop.f32.mrf.mxu1  ;;  %v4681_v39 = vld [vmem:[%s6676_s1 + $0x9f4] ss:$8 sps:$4 sm:$0xff]   ;;  %v4715_v9 = vld [vmem:[%s6676_s1 + $0x990] ss:$8 sps:$4 sm:$0xff]   ;;  %v4756_v33 = vld [vmem:[%s6676_s1 + $0xa44] ss:$8 sps:$4 sm:$0xff]  }
 0x112   :  { %3432 = vmatprep.subr.bf16.mxu1 %v4657_v10  ;;  %v4718_v10 = vld [vmem:[%s6676_s1 + $0x880] ss:$8 sps:$4 sm:$0xff]   ;;  %v4747_v24 = vld [vmem:[%s6676_s1 + $0xa54] ss:$8 sps:$4 sm:$0xff]   ;;  %v4744_v27 = vld [vmem:[%s6677_s0 + $0x118] ss:$108 sps:$4 sm:$0xff]  }
 0x113   :  { %3380 = vmatpush1.bf16.msra.mxu0 %v4652_v11  ;;  %v5943_v42 = vadd.f32 %v3050_v40, %v2998_v37  ;;  %v4723_v11 = vld [vmem:[%s6676_s1 + $0x984] ss:$8 sps:$4 sm:$0xff]   ;;  %v4742_v19 = vld [vmem:[%s6677_s0 + $0x11c] ss:$108 sps:$4 sm:$0xff]   ;;  %v4834_v30 = vld [vmem:[%s6677_s0 + $0x54] ss:$108 sps:$4 sm:$0xff]  }
 0x114   :  { %3381 = vmatprep.subr.bf16.mxu0 %v4660_v12  ;;  %v4721_v12 = vld [vmem:[%s6676_s1 + $0x980] ss:$8 sps:$4 sm:$0xff]   ;;  %v4753_v28 = vld [vmem:[%s6676_s1 + $0xb54] ss:$8 sps:$4 sm:$0xff]   ;;  %v4751_v34 = vld [vmem:[%s6676_s1 + $0xb50] ss:$8 sps:$4 sm:$0xff]  }
 0x115   :  { %3433 = vmatpush1.bf16.msra.mxu1 %v4655_v13  ;;  %v4729_v13 = vld [vmem:[%s6676_s1 + $0xa74] ss:$8 sps:$4 sm:$0xff]   ;;  %v4759_v37 = vld [vmem:[%s6676_s1 + $0xb44] ss:$8 sps:$4 sm:$0xff]  }
 0x116   :  { %3434 = vmatprep.subr.bf16.mxu1 %v4663_v14  ;;  %v4724_v14 = vld [vmem:[%s6677_s0 + $0x40] ss:$108 sps:$4 sm:$0xff]   ;;  %v4762_v40 = vld [vmem:[%s6676_s1 + $0xa34] ss:$8 sps:$4 sm:$0xff]  }
 0x117   :  { %3382 = vmatpush1.bf16.msra.mxu0 %v4658_v15  ;;  %v4727_v15 = vld [vmem:[%s6676_s1 + $0xa70] ss:$8 sps:$4 sm:$0xff]  }
 0x118   :  { %3383 = vmatprep.subr.bf16.mxu0 %v4666_v16  ;;  %v4730_v16 = vld [vmem:[%s6677_s0 + $0x48] ss:$108 sps:$4 sm:$0xff]  }
 0x119   :  { %3435 = vmatpush1.bf16.msra.mxu1 %v4661_v18  ;;  %v4733_v18 = vld [vmem:[%s6676_s1 + $0xb70] ss:$8 sps:$4 sm:$0xff]  }
 0x11a   :  { %3436 = vmatprep.subr.bf16.mxu1 %v4669_v20  ;;  %v4738_v20 = vld [vmem:[%s6676_s1 + $0xa64] ss:$8 sps:$4 sm:$0xff]  }
 0x11b   :  { %3384 = vmatpush1.bf16.msra.mxu0 %v4664_v23  ;;  %v4741_v23 = vld [vmem:[%s6676_s1 + $0xb64] ss:$8 sps:$4 sm:$0xff]  }
 0x11c   :  { %3385 = vmatprep.subr.bf16.mxu0 %v4672_v26  ;;  %v4739_v26 = vld [vmem:[%s6676_s1 + $0xb60] ss:$8 sps:$4 sm:$0xff]  }
 0x11d   :  { %3437 = vmatpush1.bf16.msra.mxu1 %v4667_v29  ;;  %v4745_v29 = vld [vmem:[%s6676_s1 + $0xa50] ss:$8 sps:$4 sm:$0xff]  }
 0x11e   :  { %3438 = vmatprep.subr.bf16.mxu1 %v4675_v32  ;;  %v4750_v32 = vld [vmem:[%s6677_s0 + $0x120] ss:$108 sps:$4 sm:$0xff]  }
 0x11f   :  { %3386 = vmatpush1.bf16.msra.mxu0 %v4670_v35  ;;  %v4840_v35 = vld [vmem:[%s6677_s0 + $0x5c] ss:$108 sps:$4 sm:$0xff]  }
 0x120   :  { %3387 = vmatprep.subr.bf16.mxu0 %v4678_v36  ;;  %v4754_v36 = vld [vmem:[%s6676_s1 + $0xa40] ss:$8 sps:$4 sm:$0xff]  }
 0x121   :  { %3439 = vmatpush1.bf16.msra.mxu1 %v4673_v41  ;;  %v4757_v41 = vld [vmem:[%s6676_s1 + $0xb40] ss:$8 sps:$4 sm:$0xff]  }
 0x122   :  { %3440 = vmatprep.subr.bf16.mxu1 %v4681_v39  ;;  %v4765_v39 = vld [vmem:[%s6676_s1 + $0xb34] ss:$8 sps:$4 sm:$0xff]  }
 0x123   :  { %3388 = vmatpush2.bf16.msra.mxu0 %v4676_v43  ;;  %v4760_v43 = vld [vmem:[%s6676_s1 + $0xa30] ss:$8 sps:$4 sm:$0xff]  }
 0x124   :  { %3389 = vmatprep.subr.bf16.mxu0 %v4684_v44  ;;  %v4768_v44 = vld [vmem:[%s6676_s1 + $0xa24] ss:$8 sps:$4 sm:$0xff]  }
 0x125   :  { %3441 = vmatpush2.bf16.msra.mxu1 %v4679_v45  ;;  %v4763_v45 = vld [vmem:[%s6676_s1 + $0xb30] ss:$8 sps:$4 sm:$0xff]  }
 0x126   :  { %3442 = vmatprep.subr.bf16.mxu1 %v4687_v46  ;;  %v4771_v46 = vld [vmem:[%s6676_s1 + $0xb24] ss:$8 sps:$4 sm:$0xff]  }
 0x127   :  { %3390 = vmatpush2.bf16.msra.mxu0 %v4682_v47  ;;  %v4766_v47 = vld [vmem:[%s6676_s1 + $0xa20] ss:$8 sps:$4 sm:$0xff]  }
 0x128   :  { %3391 = vmatprep.subr.bf16.mxu0 %v4690_v48  ;;  %v4774_v48 = vld [vmem:[%s6676_s1 + $0xa14] ss:$8 sps:$4 sm:$0xff]  }
 0x129   :  { %3443 = vmatpush2.bf16.msra.mxu1 %v4685_v49  ;;  %v4769_v49 = vld [vmem:[%s6676_s1 + $0xb20] ss:$8 sps:$4 sm:$0xff]  }
 0x12a   :  { %3444 = vmatprep.subr.bf16.mxu1 %v4693_v50  ;;  %v4777_v50 = vld [vmem:[%s6676_s1 + $0xb14] ss:$8 sps:$4 sm:$0xff]  }
 0x12b   :  { %3392 = vmatpush2.bf16.msra.mxu0 %v4688_v52  ;;  %v4772_v52 = vld [vmem:[%s6676_s1 + $0xa10] ss:$8 sps:$4 sm:$0xff]  }
 0x12c   :  { %3393 = vmatprep.subr.bf16.mxu0 %v4696_v53  ;;  %v4780_v53 = vld [vmem:[%s6676_s1 + $0xa04] ss:$8 sps:$4 sm:$0xff]  }
 0x12d   :  { %3445 = vmatpush2.bf16.msra.mxu1 %v4691_v54  ;;  %v4775_v54 = vld [vmem:[%s6676_s1 + $0xb10] ss:$8 sps:$4 sm:$0xff]  }
 0x12e   :  { %3446 = vmatprep.subr.bf16.mxu1 %v4699_v55  ;;  %v4783_v55 = vld [vmem:[%s6676_s1 + $0xb04] ss:$8 sps:$4 sm:$0xff]  }
 0x12f   :  { %3394 = vmatpush2.bf16.msra.mxu0 %v4694_v56  ;;  %v4778_v56 = vld [vmem:[%s6676_s1 + $0xa00] ss:$8 sps:$4 sm:$0xff]  }
 0x130   :  { %3395 = vmatprep.subr.bf16.mxu0 %v4702_v57  ;;  %v4786_v57 = vld [vmem:[%s6676_s1 + $0xaf4] ss:$8 sps:$4 sm:$0xff]  }
 0x131   :  { %3447 = vmatpush2.bf16.msra.mxu1 %v4697_v58  ;;  %v4781_v58 = vld [vmem:[%s6676_s1 + $0xb00] ss:$8 sps:$4 sm:$0xff]  }
 0x132   :  { %3448 = vmatprep.subr.bf16.mxu1 %v4705_v60  ;;  %v4789_v60 = vld [vmem:[%s6676_s1 + $0xbf4] ss:$8 sps:$4 sm:$0xff]  }
 0x133   :  { %3396 = vmatpush2.bf16.msra.mxu0 %v4700_v61  ;;  %v4784_v61 = vld [vmem:[%s6676_s1 + $0xaf0] ss:$8 sps:$4 sm:$0xff]  }
 0x134   :  { %3397 = vmatprep.subr.bf16.mxu0 %v4708_v62  ;;  %v4792_v62 = vld [vmem:[%s6676_s1 + $0xae4] ss:$8 sps:$4 sm:$0xff]  }
 0x135   :  { %3449 = vmatpush2.bf16.msra.mxu1 %v4703_v63  ;;  %v4787_v63 = vld [vmem:[%s6676_s1 + $0xbf0] ss:$8 sps:$4 sm:$0xff]  }
 0x136   :  { %3450 = vmatprep.subr.bf16.mxu1 %v4711_v0  ;;  %v4795_v0 = vld [vmem:[%s6676_s1 + $0xbe4] ss:$8 sps:$4 sm:$0xff]  }
 0x137   :  { %3398 = vmatpush2.bf16.msra.mxu0 %v4706_v2  ;;  %v4790_v2 = vld [vmem:[%s6676_s1 + $0xae0] ss:$8 sps:$4 sm:$0xff]  }
 0x138   :  { %3399 = vmatprep.subr.bf16.mxu0 %v4714_v3  ;;  %v4798_v3 = vld [vmem:[%s6676_s1 + $0xad4] ss:$8 sps:$4 sm:$0xff]  }
 0x139   :  { %3451 = vmatpush2.bf16.msra.mxu1 %v4709_v4  ;;  %v4793_v4 = vld [vmem:[%s6676_s1 + $0xbe0] ss:$8 sps:$4 sm:$0xff]  }
 0x13a   :  { %3452 = vmatprep.subr.bf16.mxu1 %v4717_v5  ;;  %v4801_v5 = vld [vmem:[%s6676_s1 + $0xbd4] ss:$8 sps:$4 sm:$0xff]  }
 0x13b   :  { %3400 = vmatpush2.bf16.msra.mxu0 %v4712_v7  ;;  %v4796_v7 = vld [vmem:[%s6676_s1 + $0xad0] ss:$8 sps:$4 sm:$0xff]  }
 0x13c   :  { %3401 = vmatprep.subr.bf16.mxu0 %v4720_v8  ;;  %v4804_v8 = vld [vmem:[%s6676_s1 + $0xac4] ss:$8 sps:$4 sm:$0xff]  }
 0x13d   :  { %3453 = vmatpush2.bf16.msra.mxu1 %v4715_v9  ;;  %v4799_v9 = vld [vmem:[%s6676_s1 + $0xbd0] ss:$8 sps:$4 sm:$0xff]  }
 0x13e   :  { %3454 = vmatprep.subr.bf16.mxu1 %v4723_v11  ;;  %v4802_v11 = vld [vmem:[%s6676_s1 + $0xac0] ss:$8 sps:$4 sm:$0xff]  }
 0x13f   :  { %3402 = vmatpush2.bf16.msra.mxu0 %v4718_v10  ;;  %v4807_v10 = vld [vmem:[%s6676_s1 + $0xbc4] ss:$8 sps:$4 sm:$0xff]  }
 0x140   :  { %3477 = vmatprep.subr.bf16.mxu0 %v4729_v13  ;;  %v4805_v13 = vld [vmem:[%s6676_s1 + $0xbc0] ss:$8 sps:$4 sm:$0xff]  }
 0x141   :  { %3455 = vmatpush2.bf16.msra.mxu1 %v4721_v12  ;;  %v4810_v12 = vld [vmem:[%s6676_s1 + $0xab4] ss:$8 sps:$4 sm:$0xff]  }
 0x142   :  { %3404 = vmatmul.mubr.bf16.vlgmr.msra.gmra.mxu0 %v4724_v14  ;;  %3530 = vmatprep.subr.bf16.mxu1 %v4735_v17  ;;  %v4813_v14 = vld [vmem:[%s6676_s1 + $0xbb4] ss:$8 sps:$4 sm:$0xff]   ;;  %v4811_v17 = vld [vmem:[%s6676_s1 + $0xbb0] ss:$8 sps:$4 sm:$0xff]  }
 0x143   :  { %3478 = vmatpush1.bf16.msra.mxu0 %v4727_v15  ;;  %3413 = vmatprep.mubr.bf16.mxu0 %v4742_v19  ;;  %v4808_v15 = vld [vmem:[%s6676_s1 + $0xab0] ss:$8 sps:$4 sm:$0xff]   ;;  %v4814_v19 = vld [vmem:[%s6676_s1 + $0xaa0] ss:$8 sps:$4 sm:$0xff]  }
 0x144   :  { %3457 = vmatmul.mubr.bf16.vlgmr.msra.gmra.mxu1 %v4730_v16  ;;  %3479 = vmatprep.subr.bf16.mxu0 %v4738_v20  ;;  %v4816_v16 = vld [vmem:[%s6676_s1 + $0xaa4] ss:$8 sps:$4 sm:$0xff]   ;;  %v4822_v20 = vld [vmem:[%s6676_s1 + $0xa94] ss:$8 sps:$4 sm:$0xff]  }
 0x145   :  { %3531 = vmatpush1.bf16.msra.mxu1 %v4733_v18  ;;  %3466 = vmatprep.mubr.bf16.mxu1 %v4748_v21  ;;  %v4819_v18 = vld [vmem:[%s6676_s1 + $0xba4] ss:$8 sps:$4 sm:$0xff]   ;;  %v4817_v21 = vld [vmem:[%s6676_s1 + $0xba0] ss:$8 sps:$4 sm:$0xff]  }
 0x146   :  { %3532 = vmatprep.subr.bf16.mxu1 %v4741_v23  ;;  %v4820_v23 = vld [vmem:[%s6676_s1 + $0xa90] ss:$8 sps:$4 sm:$0xff]  }
 0x147   :  { %3480 = vmatpush1.bf16.msra.mxu0 %v4736_v22  ;;  %v4825_v22 = vld [vmem:[%s6676_s1 + $0xb94] ss:$8 sps:$4 sm:$0xff]  }
 0x148   :  { %3481 = vmatprep.subr.bf16.mxu0 %v4747_v24  ;;  %v4828_v24 = vld [vmem:[%s6676_s1 + $0xa84] ss:$8 sps:$4 sm:$0xff]  }
 0x149   :  { %3533 = vmatpush1.bf16.msra.mxu1 %v4739_v26  ;;  %v4823_v26 = vld [vmem:[%s6676_s1 + $0xb90] ss:$8 sps:$4 sm:$0xff]  }
 0x14a   :  { %3414 = vmatmul.mubr.bf16.gmra.mxu0 %v4744_v27  ;;  %3534 = vmatprep.subr.bf16.mxu1 %v4753_v28  ;;  %v4831_v27 = vld [vmem:[%s6676_s1 + $0xb84] ss:$8 sps:$4 sm:$0xff]   ;;  %v4826_v28 = vld [vmem:[%s6676_s1 + $0xa80] ss:$8 sps:$4 sm:$0xff]  }
 0x14b   :  { %3482 = vmatpush1.bf16.msra.mxu0 %v4745_v29  ;;  %3509 = vmatprep.mubr.bf16.mxu0 %v4834_v30  ;;  %v4837_v29 = vld [vmem:[%s6676_s1 + $0xc74] ss:$8 sps:$4 sm:$0xff]   ;;  %v4829_v30 = vld [vmem:[%s6676_s1 + $0xb80] ss:$8 sps:$4 sm:$0xff]  }
 0x14c   :  { %3467 = vmatmul.mubr.bf16.gmra.mxu1 %v4750_v32  ;;  %3483 = vmatprep.subr.bf16.mxu0 %v4756_v33  ;;  %v4832_v32 = vld [vmem:[%s6677_s0 + $0x50] ss:$108 sps:$4 sm:$0xff]  }
 0x14d   :  { %3535 = vmatpush1.bf16.msra.mxu1 %v4751_v34  ;;  %3562 = vmatprep.mubr.bf16.mxu1 %v4840_v35  ;;  %v4870_v33 = vld [vmem:[%s6676_s1 + $0xd74] ss:$8 sps:$4 sm:$0xff]   ;;  %v4835_v34 = vld [vmem:[%s6676_s1 + $0xc70] ss:$8 sps:$4 sm:$0xff]  }
 0x14e   :  { %3536 = vmatprep.subr.bf16.mxu1 %v4759_v37  ;;  %v4844_v35 = vld [vmem:[%s6677_s0 + $0x12c] ss:$108 sps:$4 sm:$0xff]  }
 0x14f   :  { %3484 = vmatpush1.bf16.msra.mxu0 %v4754_v36  ;;  %v4838_v37 = vld [vmem:[%s6677_s0 + $0x58] ss:$108 sps:$4 sm:$0xff]  }
 0x150   :  { %3485 = vmatprep.subr.bf16.mxu0 %v4762_v40  ;;  %v4843_v36 = vld [vmem:[%s6676_s1 + $0xc64] ss:$8 sps:$4 sm:$0xff]   ;;  %v4850_v40 = vld [vmem:[%s6677_s0 + $0x134] ss:$108 sps:$4 sm:$0xff]  }
 0x151   :  { %3537 = vmatpush1.bf16.msra.mxu1 %v4757_v41  ;;  %v4868_v41 = vld [vmem:[%s6676_s1 + $0xd70] ss:$8 sps:$4 sm:$0xff]  }
 0x152   :  { %3538 = vmatprep.subr.bf16.mxu1 %v4765_v39  ;;  %v4876_v39 = vld [vmem:[%s6676_s1 + $0xd64] ss:$8 sps:$4 sm:$0xff]  }
 0x153   :  { %3486 = vmatpush1.bf16.msra.mxu0 %v4760_v43  ;;  %v4841_v43 = vld [vmem:[%s6676_s1 + $0xc60] ss:$8 sps:$4 sm:$0xff]  }
 0x154   :  { %3487 = vmatprep.subr.bf16.mxu0 %v4768_v44  ;;  %v4849_v44 = vld [vmem:[%s6676_s1 + $0xc54] ss:$8 sps:$4 sm:$0xff]  }
 0x155   :  { %3539 = vmatpush1.bf16.msra.mxu1 %v4763_v45  ;;  %v4874_v45 = vld [vmem:[%s6676_s1 + $0xd60] ss:$8 sps:$4 sm:$0xff]  }
 0x156   :  { %3540 = vmatprep.subr.bf16.mxu1 %v4771_v46  ;;  %v4846_v46 = vld [vmem:[%s6677_s0 + $0x128] ss:$108 sps:$4 sm:$0xff]  }
 0x157   :  { %3488 = vmatpush1.bf16.msra.mxu0 %v4766_v47  ;;  %v4882_v47 = vld [vmem:[%s6676_s1 + $0xd54] ss:$8 sps:$4 sm:$0xff]  }
 0x158   :  { %3489 = vmatprep.subr.bf16.mxu0 %v4774_v48  ;;  %v4847_v48 = vld [vmem:[%s6676_s1 + $0xc50] ss:$8 sps:$4 sm:$0xff]  }
 0x159   :  { %3541 = vmatpush1.bf16.msra.mxu1 %v4769_v49  ;;  %v4919_v49 = vld [vmem:[%s6677_s0 + $0x64] ss:$108 sps:$4 sm:$0xff]  }
 0x15a   :  { %3542 = vmatprep.subr.bf16.mxu1 %v4777_v50  ;;  %v4852_v50 = vld [vmem:[%s6677_s0 + $0x130] ss:$108 sps:$4 sm:$0xff]  }
 0x15b   :  { %3490 = vmatpush1.bf16.msra.mxu0 %v4772_v52  ;;  %v4855_v52 = vld [vmem:[%s6676_s1 + $0xc44] ss:$8 sps:$4 sm:$0xff]  }
 0x15c   :  { %3491 = vmatprep.subr.bf16.mxu0 %v4780_v53  ;;  %v4880_v53 = vld [vmem:[%s6676_s1 + $0xd50] ss:$8 sps:$4 sm:$0xff]  }
 0x15d   :  { %3543 = vmatpush1.bf16.msra.mxu1 %v4775_v54  ;;  %v4888_v54 = vld [vmem:[%s6676_s1 + $0xd44] ss:$8 sps:$4 sm:$0xff]  }
 0x15e   :  { %3544 = vmatprep.subr.bf16.mxu1 %v4783_v55  ;;  %v4853_v55 = vld [vmem:[%s6676_s1 + $0xc40] ss:$8 sps:$4 sm:$0xff]  }
 0x15f   :  { %3492 = vmatpush1.bf16.msra.mxu0 %v4778_v56  ;;  %v4858_v56 = vld [vmem:[%s6676_s1 + $0xc34] ss:$8 sps:$4 sm:$0xff]  }
 0x160   :  { %3493 = vmatprep.subr.bf16.mxu0 %v4786_v57  ;;  %v4886_v57 = vld [vmem:[%s6676_s1 + $0xd40] ss:$8 sps:$4 sm:$0xff]  }
 0x161   :  { %3545 = vmatpush1.bf16.msra.mxu1 %v4781_v58  ;;  %v4924_v58 = vmov 0  }
 0x162   :  { %3546 = vmatprep.subr.bf16.mxu1 %v4789_v60  ;;  %v4894_v60 = vld [vmem:[%s6676_s1 + $0xd34] ss:$8 sps:$4 sm:$0xff]  }
 0x163   :  { %3494 = vmatpush2.bf16.msra.mxu0 %v4784_v61  ;;  %v4856_v61 = vld [vmem:[%s6676_s1 + $0xc30] ss:$8 sps:$4 sm:$0xff]  }
 0x164   :  { %3495 = vmatprep.subr.bf16.mxu0 %v4792_v62  ;;  %v4861_v62 = vld [vmem:[%s6676_s1 + $0xc24] ss:$8 sps:$4 sm:$0xff]  }
 0x165   :  { %3547 = vmatpush2.bf16.msra.mxu1 %v4787_v63  ;;  %v4892_v63 = vld [vmem:[%s6676_s1 + $0xd30] ss:$8 sps:$4 sm:$0xff]  }
 0x166   :  { %3548 = vmatprep.subr.bf16.mxu1 %v4795_v0  ;;  %v4900_v0 = vld [vmem:[%s6676_s1 + $0xd24] ss:$8 sps:$4 sm:$0xff]  }
 0x167   :  { %3496 = vmatpush2.bf16.msra.mxu0 %v4790_v2  ;;  %v4859_v2 = vld [vmem:[%s6676_s1 + $0xc20] ss:$8 sps:$4 sm:$0xff]  }
 0x168   :  { %3497 = vmatprep.subr.bf16.mxu0 %v4798_v3  ;;  %v4864_v3 = vld [vmem:[%s6676_s1 + $0xc14] ss:$8 sps:$4 sm:$0xff]  }
 0x169   :  { %3549 = vmatpush2.bf16.msra.mxu1 %v4793_v4  ;;  %v4898_v4 = vld [vmem:[%s6676_s1 + $0xd20] ss:$8 sps:$4 sm:$0xff]  }
 0x16a   :  { %3550 = vmatprep.subr.bf16.mxu1 %v4801_v5  ;;  %v4906_v5 = vld [vmem:[%s6676_s1 + $0xd14] ss:$8 sps:$4 sm:$0xff]  }
 0x16b   :  { %3498 = vmatpush2.bf16.msra.mxu0 %v4796_v7  ;;  %v4862_v7 = vld [vmem:[%s6676_s1 + $0xc10] ss:$8 sps:$4 sm:$0xff]  }
 0x16c   :  { %3499 = vmatprep.subr.bf16.mxu0 %v4804_v8  ;;  %v4867_v8 = vld [vmem:[%s6676_s1 + $0xc04] ss:$8 sps:$4 sm:$0xff]  }
 0x16d   :  { %3551 = vmatpush2.bf16.msra.mxu1 %v4799_v9  ;;  %v4904_v9 = vld [vmem:[%s6676_s1 + $0xd10] ss:$8 sps:$4 sm:$0xff]  }
 0x16e   :  { %3552 = vmatprep.subr.bf16.mxu1 %v4807_v10  ;;  %v4912_v10 = vld [vmem:[%s6676_s1 + $0xd04] ss:$8 sps:$4 sm:$0xff]  }
 0x16f   :  { %3500 = vmatpush2.bf16.msra.mxu0 %v4802_v11  ;;  %v4865_v11 = vld [vmem:[%s6676_s1 + $0xc00] ss:$8 sps:$4 sm:$0xff]  }
 0x170   :  { %3501 = vmatprep.subr.bf16.mxu0 %v4810_v12  ;;  %v4873_v12 = vld [vmem:[%s6676_s1 + $0xcf4] ss:$8 sps:$4 sm:$0xff]  }
 0x171   :  { %3553 = vmatpush2.bf16.msra.mxu1 %v4805_v13  ;;  %v4910_v13 = vld [vmem:[%s6676_s1 + $0xd00] ss:$8 sps:$4 sm:$0xff]  }
 0x172   :  { %3554 = vmatprep.subr.bf16.mxu1 %v4813_v14  ;;  %v4871_v14 = vld [vmem:[%s6676_s1 + $0xcf0] ss:$8 sps:$4 sm:$0xff]  }
 0x173   :  { %3502 = vmatpush2.bf16.msra.mxu0 %v4808_v15  ;;  %v4879_v15 = vld [vmem:[%s6676_s1 + $0xce4] ss:$8 sps:$4 sm:$0xff]  }
 0x174   :  { %3503 = vmatprep.subr.bf16.mxu0 %v4816_v16  ;;  %v4916_v16 = vld [vmem:[%s6677_s0 + $0x68] ss:$108 sps:$4 sm:$0xff]  }
 0x175   :  { %3555 = vmatpush2.bf16.msra.mxu1 %v4811_v17  ;;  %v4877_v17 = vld [vmem:[%s6676_s1 + $0xce0] ss:$8 sps:$4 sm:$0xff]  }
 0x176   :  { %3556 = vmatprep.subr.bf16.mxu1 %v4819_v18  ;;  %v4885_v18 = vld [vmem:[%s6676_s1 + $0xcd4] ss:$8 sps:$4 sm:$0xff]  }
 0x177   :  { %3504 = vmatpush2.bf16.msra.mxu0 %v4814_v19  ;;  %v4883_v19 = vld [vmem:[%s6676_s1 + $0xcd0] ss:$8 sps:$4 sm:$0xff]  }
 0x178   :  { %3505 = vmatprep.subr.bf16.mxu0 %v4822_v20  ;;  %v4891_v20 = vld [vmem:[%s6676_s1 + $0xcc4] ss:$8 sps:$4 sm:$0xff]  }
 0x179   :  { %3557 = vmatpush2.bf16.msra.mxu1 %v4817_v21  ;;  %v4920_v21 = vld [vmem:[%s6677_s0 + $0x140] ss:$108 sps:$4 sm:$0xff]  }
 0x17a   :  { %3558 = vmatprep.subr.bf16.mxu1 %v4825_v22  ;;  %v4889_v22 = vld [vmem:[%s6676_s1 + $0xcc0] ss:$8 sps:$4 sm:$0xff]  }
 0x17b   :  { %3506 = vmatpush2.bf16.msra.mxu0 %v4820_v23  ;;  %v4897_v23 = vld [vmem:[%s6676_s1 + $0xcb4] ss:$8 sps:$4 sm:$0xff]  }
 0x17c   :  { %3507 = vmatprep.subr.bf16.mxu0 %v4828_v24  ;;  %v4895_v24 = vld [vmem:[%s6676_s1 + $0xcb0] ss:$8 sps:$4 sm:$0xff]  }
 0x17d   :  { %3559 = vmatpush2.bf16.msra.mxu1 %v4823_v26  ;;  %v4903_v26 = vld [vmem:[%s6676_s1 + $0xca4] ss:$8 sps:$4 sm:$0xff]  }
 0x17e   :  { %3560 = vmatprep.subr.bf16.mxu1 %v4831_v27  ;;  %v4901_v27 = vld [vmem:[%s6676_s1 + $0xca0] ss:$8 sps:$4 sm:$0xff]  }
 0x17f   :  { %3508 = vmatpush2.bf16.msra.mxu0 %v4826_v28  ;;  %v4909_v28 = vld [vmem:[%s6676_s1 + $0xc94] ss:$8 sps:$4 sm:$0xff]  }
 0x180   :  { %3583 = vmatprep.subr.bf16.mxu0 %v4837_v29  ;;  %v4907_v29 = vld [vmem:[%s6676_s1 + $0xc90] ss:$8 sps:$4 sm:$0xff]  }
 0x181   :  { %3561 = vmatpush2.bf16.msra.mxu1 %v4829_v30  ;;  %v4915_v30 = vld [vmem:[%s6676_s1 + $0xc84] ss:$8 sps:$4 sm:$0xff]  }
 0x182   :  { %3510 = vmatmul.mubr.bf16.vlgmr.msra.gmra.mxu0 %v4832_v32  ;;  %3636 = vmatprep.subr.bf16.mxu1 %v4870_v33  ;;  %v4913_v32 = vld [vmem:[%s6676_s1 + $0xc80] ss:$8 sps:$4 sm:$0xff]  }
 0x183   :  { %3584 = vmatpush1.bf16.msra.mxu0 %v4835_v34  ;;  %3519 = vmatprep.mubr.bf16.mxu0 %v4844_v35  ;;  %v4917_v33 = vld [vmem:[%s6677_s0 + $0x60] ss:$108 sps:$4 sm:$0xff]   ;;  %v4921_v34 = vld [vmem:[%s6677_s0 + $0x13c] ss:$108 sps:$4 sm:$0xff]   ;;  %v4923_v35 = vld [vmem:[%s6677_s0 + $0x138] ss:$108 sps:$4 sm:$0xff]  }
 0x184   :  { %3563 = vmatmul.mubr.bf16.vlgmr.msra.gmra.mxu1 %v4838_v37  ;;  %3585 = vmatprep.subr.bf16.mxu0 %v4843_v36  ;;  %v6434_v37 = vpop.f32.mrf.mxu1 }
 0x185   :  { %3572 = vmatprep.mubr.bf16.mxu1 %v4850_v40  ;;  %3637 = vmatpush1.bf16.msra.mxu1 %v4868_v41  ;;  %v6440_v41 = vpop.f32.mrf.mxu0 }
 0x186   :  { %3638 = vmatprep.subr.bf16.mxu1 %v4876_v39  ;;  %v6436_v36 = vpop.f32.mrf.mxu1 }
 0x187   :  { %3586 = vmatpush1.bf16.msra.mxu0 %v4841_v43  ;;  %v6444_v43 = vpop.f32.mrf.mxu0 }
 0x188   :  { %3587 = vmatprep.subr.bf16.mxu0 %v4849_v44  ;;  %v6438_v40 = vpop.f32.mrf.mxu1 }
 0x189   :  { %3639 = vmatpush1.bf16.msra.mxu1 %v4874_v45  ;;  %v6448_v45 = vpop.f32.mrf.mxu0 }
 0x18a   :  { %3520 = vmatmul.mubr.bf16.gmra.mxu0 %v4846_v46  ;;  %3640 = vmatprep.subr.bf16.mxu1 %v4882_v47  ;;  %v6442_v39 = vpop.f32.mrf.mxu1 }
 0x18b   :  { %3588 = vmatpush1.bf16.msra.mxu0 %v4847_v48  ;;  %3615 = vmatprep.mubr.bf16.mxu0 %v4919_v49  ;;  %v6452_v47 = vpop.f32.mrf.mxu0 }
 0x18c   :  { %3573 = vmatmul.mubr.bf16.gmra.mxu1 %v4852_v50  ;;  %3589 = vmatprep.subr.bf16.mxu0 %v4855_v52  ;;  %v6446_v44 = vpop.f32.mrf.mxu1 }
 0x18d   :  { %3641 = vmatpush1.bf16.msra.mxu1 %v4880_v53  ;;  %3668 = vmatprep.mubr.bf16.mxu1 %v4924_v58  ;;  %v6456_v49 = vpop.f32.mrf.mxu0 }
 0x18e   :  { %3642 = vmatprep.subr.bf16.mxu1 %v4888_v54  ;;  %v6450_v46 = vpop.f32.mrf.mxu1 }
 0x18f   :  { %3590 = vmatpush1.bf16.msra.mxu0 %v4853_v55  ;;  %v6462_v53 = vpop.f32.mrf.mxu0 }
 0x190   :  { %3591 = vmatprep.subr.bf16.mxu0 %v4858_v56  ;;  %v6454_v48 = vpop.f32.mrf.mxu1 }
 0x191   :  { %3643 = vmatpush1.bf16.msra.mxu1 %v4886_v57  ;;  %v6466_v55 = vpop.f32.mrf.mxu0 }
 0x192   :  { %3644 = vmatprep.subr.bf16.mxu1 %v4894_v60  ;;  %v6458_v50 = vpop.f32.mrf.mxu1 }
 0x193   :  { %3592 = vmatpush1.bf16.msra.mxu0 %v4856_v61  ;;  %v6470_v57 = vpop.f32.mrf.mxu0 }
 0x194   :  { %3593 = vmatprep.subr.bf16.mxu0 %v4861_v62  ;;  %v6460_v52 = vpop.f32.mrf.mxu1 }
 0x195   :  { %3645 = vmatpush1.bf16.msra.mxu1 %v4892_v63 }
 0x196   :  { %3646 = vmatprep.subr.bf16.mxu1 %v4900_v0  ;;  %v6464_v54 = vpop.f32.mrf.mxu1 }
 0x197   :  { %3594 = vmatpush1.bf16.msra.mxu0 %v4859_v2 }
 0x198   :  { %3595 = vmatprep.subr.bf16.mxu0 %v4864_v3  ;;  %v6468_v56 = vpop.f32.mrf.mxu1 }
 0x199   :  { %3647 = vmatpush1.bf16.msra.mxu1 %v4898_v4 }
 0x19a   :  { %3648 = vmatprep.subr.bf16.mxu1 %v4906_v5  ;;  %v6472_v60 = vpop.f32.mrf.mxu1 }
 0x19b   :  { %3596 = vmatpush1.bf16.msra.mxu0 %v4862_v7 }
 0x19c   :  { %3597 = vmatprep.subr.bf16.mxu0 %v4867_v8  ;;  %v6474_v62 = vpop.f32.mrf.mxu1 }
 0x19d   :  { %3649 = vmatpush1.bf16.msra.mxu1 %v4904_v9 }
 0x19e   :  { %3650 = vmatprep.subr.bf16.mxu1 %v4912_v10  ;;  %v6478_v0 = vpop.f32.mrf.mxu1 }
 0x19f   :  { %3598 = vmatpush1.bf16.msra.mxu0 %v4865_v11 }
 0x1a0   :  { %3599 = vmatprep.subr.bf16.mxu0 %v4873_v12  ;;  %v6482_v3 = vpop.f32.mrf.mxu1 }
 0x1a1   :  { %3651 = vmatpush1.bf16.msra.mxu1 %v4910_v13 }
 0x1a2   :  { %v6486_v5 = vpop.f32.mrf.mxu1 }
 0x1a3   :  { %3600 = vmatpush2.bf16.msra.mxu0 %v4871_v14  ;;  %6680 = vst [vmem:[#allocation2_spill] sm:$0xff] %v6486_v5 }
 0x1a4   :  { %3601 = vmatprep.subr.bf16.mxu0 %v4879_v15  ;;  %3669 = vmatmul.mubr.bf16.vlgmr.msra.gmra.mxu1 %v4916_v16 }
 0x1a5   :  { %3678 = vmatprep.mubr.bf16.mxu1 %v4924_v58  ;;  %v3193_v58 = vpop.f32.mrf.mxu0 }
 0x1a7   :  { %3602 = vmatpush2.bf16.msra.mxu0 %v4877_v17  ;;  %v3195_v61 = vpop.f32.mrf.mxu0 }
 0x1a8   :  { %3603 = vmatprep.subr.bf16.mxu0 %v4885_v18 }
 0x1a9   :  { %v6476_v63 = vpop.f32.mrf.mxu0 }
 0x1ab   :  { %3604 = vmatpush2.bf16.msra.mxu0 %v4883_v19  ;;  %v6480_v2 = vpop.f32.mrf.mxu0 }
 0x1ac   :  { %3605 = vmatprep.subr.bf16.mxu0 %v4891_v20  ;;  %3679 = vmatmul.mubr.bf16.gmra.mxu1 %v4920_v21 }
 0x1ad   :  { %v6484_v4 = vpop.f32.mrf.mxu0 }
 0x1af   :  { %3606 = vmatpush2.bf16.msra.mxu0 %v4889_v22  ;;  %v6490_v8 = vpop.f32.mrf.mxu0 }
 0x1b0   :  { %3607 = vmatprep.subr.bf16.mxu0 %v4897_v23 }
 0x1b1   :  { %v6494_v10 = vpop.f32.mrf.mxu0 }
 0x1b3   :  { %3608 = vmatpush2.bf16.msra.mxu0 %v4895_v24  ;;  %v6498_v12 = vpop.f32.mrf.mxu0 }
 0x1b4   :  { %3609 = vmatprep.subr.bf16.mxu0 %v4903_v26 }
 0x1b7   :  { %3610 = vmatpush2.bf16.msra.mxu0 %v4901_v27 }
 0x1b8   :  { %3611 = vmatprep.subr.bf16.mxu0 %v4909_v28 }
 0x1bb   :  { %3612 = vmatpush2.bf16.msra.mxu0 %v4907_v29 }
 0x1bc   :  { %3613 = vmatprep.subr.bf16.mxu0 %v4915_v30 }
 0x1bf   :  { %3614 = vmatpush2.bf16.msra.mxu0 %v4913_v32 }
 0x1c2   :  { %3616 = vmatmul.mubr.bf16.vlgmr.msra.gmra.mxu0 %v4917_v33  ;;  %v3299_v13 = vpop.f32.mrf.mxu0 }
 0x1c3   :  { %3625 = vmatprep.mubr.bf16.mxu0 %v4921_v34 }
 0x1c4   :  { %v6488_v7 = vpop.f32.mrf.mxu1  ;;  %v3301_v15 = vpop.f32.mrf.mxu0 }
 0x1c6   :  { %v6492_v9 = vpop.f32.mrf.mxu1  ;;  %v6504_v17 = vpop.f32.mrf.mxu0 }
 0x1c8   :  { %v6496_v11 = vpop.f32.mrf.mxu1  ;;  %v6508_v19 = vpop.f32.mrf.mxu0 }
 0x1ca   :  { %3626 = vmatmul.mubr.bf16.gmra.mxu0 %v4923_v35  ;;  %v6500_v14 = vpop.f32.mrf.mxu1  ;;  %v6512_v21 = vpop.f32.mrf.mxu0 }
 0x1cc   :  { %v6502_v16 = vpop.f32.mrf.mxu1  ;;  %v6518_v24 = vpop.f32.mrf.mxu0 }
 0x1cd   :  { %6681 = vst [vmem:[#allocation3_spill] sm:$0xff] %v6502_v16 }
 0x1ce   :  { %v6506_v18 = vpop.f32.mrf.mxu1  ;;  %v6522_v27 = vpop.f32.mrf.mxu0 }
 0x1cf   :  { %6682 = vst [vmem:[#allocation4_spill] sm:$0xff] %v6506_v18  ;;  %6686 = vst [vmem:[#allocation8_spill] sm:$0xff] %v6522_v27 }
 0x1d0   :  { %v6510_v20 = vpop.f32.mrf.mxu1  ;;  %v6526_v29 = vpop.f32.mrf.mxu0 }
 0x1d1   :  { %6683 = vst [vmem:[#allocation5_spill] sm:$0xff] %v6510_v20  ;;  %6688 = vst [vmem:[#allocation10_spill] sm:$0xff] %v6526_v29 }
 0x1d2   :  { %v6514_v22 = vpop.f32.mrf.mxu1 }
 0x1d3   :  { %6684 = vst [vmem:[#allocation6_spill] sm:$0xff] %v6514_v22 }
 0x202   :  { %v3405_v30 = vpop.f32.mrf.mxu0 }
 0x204   :  { %v6516_v23 = vpop.f32.mrf.mxu1  ;;  %v6530_v33 = vpop.f32.mrf.mxu0 }
 0x206   :  { %v6520_v26 = vpop.f32.mrf.mxu1  ;;  %v6534_v35 = vpop.f32.mrf.mxu0 }
 0x207   :  { %6685 = vst [vmem:[#allocation7_spill] sm:$0xff] %v6520_v26 }
 0x208   :  { %v6524_v28 = vpop.f32.mrf.mxu1  ;;  %v6538_v20 = vpop.f32.mrf.mxu0 }
 0x209   :  { %6687 = vst [vmem:[#allocation9_spill] sm:$0xff] %v6524_v28  ;;  %6692 = vst [vmem:[#allocation14_spill] sm:$0xff] %v6538_v20 }
 0x20a   :  { %v6528_v32 = vpop.f32.mrf.mxu1  ;;  %v6542_v26 = vpop.f32.mrf.mxu0 }
 0x20b   :  { %6689 = vst [vmem:[#allocation11_spill] sm:$0xff] %v6528_v32 }
 0x20c   :  { %v6532_v34 = vpop.f32.mrf.mxu1  ;;  %v6548_v27 = vpop.f32.mrf.mxu0 }
 0x20d   :  { %6690 = vst [vmem:[#allocation12_spill] sm:$0xff] %v6532_v34  ;;  %6696 = vst [vmem:[#allocation18_spill] sm:$0xff] %v6548_v27 }
 0x20e   :  { %v6536_v22 = vpop.f32.mrf.mxu1  ;;  %v6552_v16 = vpop.f32.mrf.mxu0 }
 0x20f   :  { %6691 = vst [vmem:[#allocation13_spill] sm:$0xff] %v6536_v22  ;;  %6698 = vst [vmem:[#allocation20_spill] sm:$0xff] %v6552_v16 }
 0x210   :  { %v6540_v18 = vpop.f32.mrf.mxu1  ;;  %v6556_v5 = vpop.f32.mrf.mxu0 }
 0x211   :  { %6693 = vst [vmem:[#allocation15_spill] sm:$0xff] %v6540_v18  ;;  %6700 = vst [vmem:[#allocation22_spill] sm:$0xff] %v6556_v5  ;;  %v3088_v18 = vadd.f32 %v6440_v41, %v5839_v51  ;;  %v3098_v51 = vadd.f32 %v6456_v49, %v5917_v25  ;;  %v3102_v25 = vadd.f32 %v6466_v55, %v5935_v38 }
 0x212   :  { %v6544_v28 = vpop.f32.mrf.mxu1 }
 0x213   :  { %6694 = vst [vmem:[#allocation16_spill] sm:$0xff] %v6544_v28  ;;  %v3090_v28 = vadd.f32 %v6444_v43, %v5854_v59  ;;  %v3155_v38 = vadd.f32 %v6454_v48, %v3102_v25 }
 0x215   :  { %v3143_v5 = vadd.f32 %v6436_v36, %v3090_v28  ;;  %v6705_v28 = vld [vmem:[#allocation8_spill] sm:$0xff] }
 0x242   :  { %v6558_v22 = vpop.f32.mrf.mxu0 }
 0x244   :  { %v6546_v29 = vpop.f32.mrf.mxu1 }
 0x245   :  { %6695 = vst [vmem:[#allocation17_spill] sm:$0xff] %v6546_v29  ;;  %v6566_v29 = vpop.f32.mrf.mxu0 }
 0x246   :  { %v6550_v32 = vpop.f32.mrf.mxu1 }
 0x247   :  { %6697 = vst [vmem:[#allocation19_spill] sm:$0xff] %v6550_v32  ;;  %v3141_v32 = vadd.f32 %v6434_v37, %v3088_v18  ;;  %v6578_v41 = vpop.f32.mrf.mxu0  ;;  %v3100_v37 = vadd.f32 %v6462_v53, %v5926_v31 }
 0x248   :  { %v6554_v34 = vpop.f32.mrf.mxu1 }
 0x249   :  { %6699 = vst [vmem:[#allocation21_spill] sm:$0xff] %v6554_v34  ;;  %v3092_v34 = vadd.f32 %v6448_v45, %v5863_v1  ;;  %v3194_v16 = vadd.f32 %v3193_v58, %v3141_v32  ;;  %v3151_v45 = vadd.f32 %v6446_v44, %v3098_v51  ;;  %v3153_v31 = vadd.f32 %v6450_v46, %v3100_v37  ;;  %v6706_v32 = vld [vmem:[#allocation7_spill] sm:$0xff]  ;;  %v6708_v51 = vld [vmem:[#allocation4_spill] sm:$0xff] }
 0x24a   :  { %v6560_v20 = vpop.f32.mrf.mxu1 }
 0x24b   :  { %6701 = vst [vmem:[#allocation23_spill] sm:$0xff] %v6560_v20  ;;  %v3094_v20 = vadd.f32 %v6452_v47, %v5874_v6  ;;  %v3145_v43 = vadd.f32 %v6438_v40, %v3092_v34  ;;  %v3247_v36 = vadd.f32 %v6460_v52, %v3194_v16  ;;  %v3517_v47 = vpop.f32.mrf.mxu0  ;;  %v3204_v52 = vadd.f32 %v6484_v4, %v3151_v45  ;;  %v6707_v34 = vld [vmem:[#allocation14_spill] sm:$0xff]  ;;  %v6711_v45 = vld [vmem:[#allocation5_spill] sm:$0xff] }
 0x24c   :  { %v6568_v27 = vpop.f32.mrf.mxu1  ;;  %v3206_v55 = vadd.f32 %v6490_v8, %v3153_v31  ;;  %v6713_v31 = vld [vmem:[#allocation11_spill] sm:$0xff] }
 0x24d   :  { %6702 = vst [vmem:[#allocation24_spill] sm:$0xff] %v6568_v27  ;;  %v3196_v27 = vadd.f32 %v3195_v61, %v3143_v5  ;;  %v3147_v1 = vadd.f32 %v6442_v39, %v3094_v20  ;;  %v3198_v6 = vadd.f32 %v6476_v63, %v3145_v43  ;;  %v3300_v61 = vadd.f32 %v3299_v13, %v3247_v36  ;;  %v3521_v63 = vpop.f32.mrf.mxu0  ;;  %v6703_v20 = vld [vmem:[#allocation2_spill] sm:$0xff] }
 0x24e   :  { %v6580_v59 = vpop.f32.mrf.mxu1  ;;  %v3104_v39 = vadd.f32 %v6470_v57, %v5943_v42  ;;  %v3257_v57 = vadd.f32 %v6474_v62, %v3204_v52  ;;  %v6714_v52 = vld [vmem:[#allocation17_spill] sm:$0xff] }
 0x24f   :  { %v3249_v40 = vadd.f32 %v6464_v54, %v3196_v27  ;;  %v3200_v58 = vadd.f32 %v6480_v2, %v3147_v1  ;;  %v3251_v44 = vadd.f32 %v6468_v56, %v3198_v6  ;;  %v3353_v2 = vadd.f32 %v6488_v7, %v3300_v61  ;;  %v3523_v16 = vpop.f32.mrf.mxu0  ;;  %v6704_v27 = vld [vmem:[#allocation3_spill] sm:$0xff]  ;;  %v6710_v1 = vld [vmem:[#allocation9_spill] sm:$0xff] }
 0x250   :  { %v6591_v49 = vpop.f32.mrf.mxu1  ;;  %v3157_v42 = vadd.f32 %v6458_v50, %v3104_v39  ;;  %v3208_v56 = vadd.f32 %v6494_v10, %v3155_v38  ;;  %v3310_v7 = vadd.f32 %v6512_v21, %v3257_v57 }
 0x251   :  { %v3302_v53 = vadd.f32 %v3301_v15, %v3249_v40  ;;  %v3253_v54 = vadd.f32 %v6472_v60, %v3200_v58  ;;  %v3304_v46 = vadd.f32 %v6504_v17, %v3251_v44  ;;  %v3406_v13 = vadd.f32 %v3405_v30, %v3353_v2  ;;  %v6712_v40 = vld [vmem:[#allocation18_spill] sm:$0xff] }
 0x252   :  { %v6602_v5 = vpop.f32.mrf.mxu1  ;;  %v3259_v15 = vadd.f32 %v6478_v0, %v3206_v55  ;;  %v3210_v60 = vadd.f32 %v6498_v12, %v3157_v42  ;;  %v3261_v62 = vadd.f32 %v6482_v3, %v3208_v56  ;;  %v3363_v21 = vadd.f32 %v6704_v27, %v3310_v7  ;;  %v6716_v55 = vld [vmem:[#allocation12_spill] sm:$0xff]  ;;  %v6723_v27 = vld [vmem:[#allocation23_spill] sm:$0xff] }
 0x253   :  { %v3355_v48 = vadd.f32 %v6492_v9, %v3302_v53  ;;  %v3306_v8 = vadd.f32 %v6508_v19, %v3253_v54  ;;  %v3357_v17 = vadd.f32 %v6496_v11, %v3304_v46  ;;  %v3459_v19 = vadd.f32 %v6516_v23, %v3406_v13  ;;  %v3525_v11 = vpop.f32.mrf.mxu0  ;;  %v6715_v53 = vld [vmem:[#allocation6_spill] sm:$0xff]  ;;  %v6717_v54 = vld [vmem:[#allocation20_spill] sm:$0xff] }
 0x254   :  { %v3312_v10 = vadd.f32 %v6518_v24, %v3259_v15  ;;  %v3263_v12 = vadd.f32 %v6703_v20, %v3210_v60  ;;  %v3314_v30 = vadd.f32 %v6705_v28, %v3261_v62  ;;  %v3416_v23 = vadd.f32 %v6542_v26, %v3363_v21  ;;  %v6720_v15 = vld [vmem:[#allocation22_spill] sm:$0xff] }
 0x255   :  { %v3408_v50 = vadd.f32 %v6530_v33, %v3355_v48  ;;  %v3359_v9 = vadd.f32 %v6500_v14, %v3306_v8  ;;  %v3410_v0 = vadd.f32 %v6534_v35, %v3357_v17  ;;  %v3512_v24 = vadd.f32 %v6558_v22, %v3459_v19  ;;  %v6709_v14 = vld [vmem:[#allocation10_spill] sm:$0xff]  ;;  %v3527_v61 = vpop.f32.mrf.mxu0  ;;  %v6719_v8 = vld [vmem:[#allocation13_spill] sm:$0xff] }
 0x256   :  { %v3365_v43 = vadd.f32 %v6708_v51, %v3312_v10  ;;  %v3316_v37 = vadd.f32 %v6709_v14, %v3263_v12  ;;  %v3367_v25 = vadd.f32 %v6711_v45, %v3314_v30  ;;  %v3469_v26 = vadd.f32 %v6716_v55, %v3416_v23 }
 0x257   :  { %v3461_v33 = vadd.f32 %v6706_v32, %v3408_v50  ;;  %v3412_v3 = vadd.f32 %v6707_v34, %v3359_v9  ;;  %v3463_v36 = vadd.f32 %v6710_v1, %v3410_v0  ;;  %v3565_v22 = vadd.f32 %v6714_v52, %v3512_v24  ;;  %v6721_v50 = vld [vmem:[#allocation21_spill] sm:$0xff]  ;;  %v6722_v9 = vld [vmem:[#allocation15_spill] sm:$0xff]  ;;  %v6724_v32 = vld [vmem:[#allocation16_spill] sm:$0xff] }
 0x258   :  { %v3418_v58 = vadd.f32 %v6712_v40, %v3365_v43  ;;  %v3369_v38 = vadd.f32 %v6715_v53, %v3316_v37  ;;  %v3420_v2 = vadd.f32 %v6717_v54, %v3367_v25  ;;  %v3522_v7 = vadd.f32 %v3521_v63, %v3469_v26  ;;  %v6725_v34 = vld [vmem:[#allocation24_spill] sm:$0xff] }
 0x259   :  { %v3514_v6 = vadd.f32 %v6566_v29, %v3461_v33  ;;  %v3465_v39 = vadd.f32 %v6713_v31, %v3412_v3  ;;  %v3516_v44 = vadd.f32 %v6578_v41, %v3463_v36  ;;  %v6718_v29 = vld [vmem:[#allocation19_spill] sm:$0xff] }
 0x25a   :  { %v3471_v13 = vadd.f32 %v6719_v8, %v3418_v58  ;;  %v3422_v60 = vadd.f32 %v6720_v15, %v3369_v38  ;;  %v3473_v19 = vadd.f32 %v6722_v9, %v3420_v2  ;;  %v3575_v3 = vadd.f32 %v6725_v34, %v3522_v7 }
 0x25b   :  { %v3567_v57 = vadd.f32 %v6718_v29, %v3514_v6  ;;  %v3518_v56 = vadd.f32 %v3517_v47, %v3465_v39  ;;  %v3569_v41 = vadd.f32 %v6721_v50, %v3516_v44 }
 0x25c   :  { %v3524_v0 = vadd.f32 %v3523_v16, %v3471_v13  ;;  %v3475_v33 = vadd.f32 %v6724_v32, %v3422_v60  ;;  %v3526_v24 = vadd.f32 %v3525_v11, %v3473_v19 }
 0x25d   :  { %v3571_v21 = vadd.f32 %v6723_v27, %v3518_v56 }
 0x25e   :  { %v3577_v43 = vadd.f32 %v6580_v59, %v3524_v0  ;;  %v3528_v23 = vadd.f32 %v3527_v61, %v3475_v33  ;;  %v3579_v6 = vadd.f32 %v6591_v49, %v3526_v24 }
 0x260   :  { %v3581_v58 = vadd.f32 %v6602_v5, %v3528_v23 }
 0x264   :  { %v3670_v4 = vpop.f32.mrf.mxu1 }
 0x266   :  { %v3672_v18 = vpop.f32.mrf.mxu1 }
 0x268   :  { %v3674_v35 = vpop.f32.mrf.mxu1 }
 0x26a   :  { %v3676_v42 = vpop.f32.mrf.mxu1 }
 0x26c   :  { %v3680_v12 = vpop.f32.mrf.mxu1 }
 0x26e   :  { %v3682_v14 = vpop.f32.mrf.mxu1 }
 0x270   :  { %v3684_v25 = vpop.f32.mrf.mxu1 }
 0x272   :  { %v3686_v53 = vpop.f32.mrf.mxu1 }
 0x282   :  { %v3617_v46 = vpop.f32.mrf.mxu0 }
 0x283   :  { %v3618_v48 = vadd.f32 %v3617_v46, %v3565_v22 }
 0x284   :  { %v3619_v17 = vpop.f32.mrf.mxu0 }
 0x285   :  { %v3671_v62 = vadd.f32 %v3670_v4, %v3618_v48  ;;  %v3620_v10 = vadd.f32 %v3619_v17, %v3567_v57 }
 0x286   :  { %v3621_v20 = vpop.f32.mrf.mxu0 }
 0x287   :  { %v3689_v28 = vmax.f32 %v3671_v62, 0.0  ;;  %v3673_v47 = vadd.f32 %v3672_v18, %v3620_v10  ;;  %v3622_v30 = vadd.f32 %v3621_v20, %v3569_v41 }
 0x288   :  { %v3623_v63 = vpop.f32.mrf.mxu0 }
 0x289   :  { %3697 = vst [vmem:[%s6679_s3] sm:$0xff] %v3689_v28  ;;  %v3690_v4 = vmax.f32 %v3673_v47, 0.0  ;;  %v3675_v51 = vadd.f32 %v3674_v35, %v3622_v30  ;;  %v3624_v16 = vadd.f32 %v3623_v63, %v3571_v21 }
 0x28a   :  { %v3627_v37 = vpop.f32.mrf.mxu0 }
 0x28b   :  { %3698 = vst [vmem:[%s6679_s3 + $0x8] sm:$0xff] %v3690_v4  ;;  %v3691_v18 = vmax.f32 %v3675_v51, 0.0  ;;  %v3677_v1 = vadd.f32 %v3676_v42, %v3624_v16  ;;  %v3628_v36 = vadd.f32 %v3627_v37, %v3575_v3 }
 0x28c   :  { %v3629_v11 = vpop.f32.mrf.mxu0 }
 0x28d   :  { %3699 = vst [vmem:[%s6679_s3 + $0x10] sm:$0xff] %v3691_v18  ;;  %v3692_v35 = vmax.f32 %v3677_v1, 0.0  ;;  %v3681_v45 = vadd.f32 %v3680_v12, %v3628_v36  ;;  %v3630_v59 = vadd.f32 %v3629_v11, %v3577_v43 }
 0x28e   :  { %v3631_v40 = vpop.f32.mrf.mxu0 }
 0x28f   :  { %3700 = vst [vmem:[%s6679_s3 + $0x18] sm:$0xff] %v3692_v35  ;;  %v3693_v61 = vmax.f32 %v3681_v45, 0.0  ;;  %v3683_v31 = vadd.f32 %v3682_v14, %v3630_v59  ;;  %v3632_v39 = vadd.f32 %v3631_v40, %v3579_v6 }
 0x290   :  { %v3633_v52 = vpop.f32.mrf.mxu0 }
 0x291   :  { %3701 = vst [vmem:[%s6679_s3 + $0x20] sm:$0xff] %v3693_v61  ;;  %v3694_v49 = vmax.f32 %v3683_v31, 0.0  ;;  %v3685_v22 = vadd.f32 %v3684_v25, %v3632_v39  ;;  %v3634_v44 = vadd.f32 %v3633_v52, %v3581_v58 }
 0x293   :  { %3702 = vst [vmem:[%s6679_s3 + $0x28] sm:$0xff] %v3694_v49  ;;  %v3695_v5 = vmax.f32 %v3685_v22, 0.0  ;;  %v3687_v38 = vadd.f32 %v3686_v53, %v3634_v44 }
 0x295   :  { %3703 = vst [vmem:[%s6679_s3 + $0x30] sm:$0xff] %v3695_v5  ;;  %v3696_v55 = vmax.f32 %v3687_v38, 0.0 }
 0x297   :  { %3704 = vst [vmem:[%s6679_s3 + $0x38] sm:$0xff] %v3696_v55 }

</bundles_post_ra>
